<compile_context>
chip_gen: v5e
topology: v5e:2x2
jax: 0.10.0
libtpu: 0.0.40
codegen_flags: <defaults>
</compile_context>

<pallas_src>
import jax
import jax.numpy as jnp
from jax.experimental import pallas as pl
from jax.experimental.pallas import tpu as pltpu


# ---------------------------------------------------------------------------
# helpers
# ---------------------------------------------------------------------------
_QRANGES = {
    # name     : ((qmin, qmax), int8-storage shift)
    "quint8": ((0.0, 255.0), 128.0),
    "qint8": ((-128.0, 127.0), 0.0),
}


def _round_up(x, m):
    return ((x + m - 1) // m) * m


def _choose_tile(dim, target, align=256):
    """Pick an MXU-friendly tile (multiple of `align`) <= `target` that divides
    the `align`-rounded-up dim.  Returns (tile, padded_dim)."""
    padded = _round_up(max(int(dim), 1), align)
    tile = min(_round_up(int(target), align), padded)
    while padded % tile:
        tile -= align
    return tile, padded


def _chip_caps():
    """Per-generation capabilities: int8 MXU availability + VMEM ceiling."""
    kind = jax.devices()[0].device_kind.lower()
    is_v7 = "7" in kind                       # v7x: no integer MXU, 64 MiB VMEM
    has_int8_mxu = (not is_v7) and (("v5" in kind) or ("v6" in kind))
    # v5e/v6e (and v5p) have 128 MiB VMEM per core -> allow ~100 MiB;
    # anything else (v7x / unknown) gets the v7x-safe 48 MiB cap.
    vmem_limit = (100 << 20) if (("v5" in kind) or ("v6" in kind)) else (48 << 20)
    return has_int8_mxu, vmem_limit


# ---------------------------------------------------------------------------
# pass 1: fake-quant -> int8 code (q - shift), elementwise
# ---------------------------------------------------------------------------
def _make_quant_kernel(scale, zp, shift, qmin, qmax):
    scale = float(scale)
    zp = float(zp)
    shift = float(shift)
    qmin = float(qmin)
    qmax = float(qmax)

    def kernel(x_ref, q_ref):
        x = x_ref[...].astype(jnp.float32)
        # Exact divide (matches torch's x / scale); jnp.round == torch.round
        # (round-half-to-even).
        q = jnp.clip(jnp.round(x / scale) + zp, qmin, qmax)
        # (q - shift) is guaranteed in [-128, 127]; go via int32 for a safe
        # f32 -> i8 lowering.
        q_ref[...] = (q - shift).astype(jnp.int32).astype(jnp.int8)

    return kernel


def _fake_quant_to_int8(x, scale, zp, shift, qmin, qmax,
                        *, row_tile=256, col_tile=2048):
    """Fake-quant a (pre-padded) 2-D array once; emit int8 codes (q - shift)."""
    R, C = x.shape
    tr, _ = _choose_tile(R, row_tile)
    tc, _ = _choose_tile(C, col_tile)
    return pl.pallas_call(
        _make_quant_kernel(scale, zp, shift, qmin, qmax),
        out_shape=jax.ShapeDtypeStruct((R, C), jnp.int8),
        grid=(R // tr, C // tc),
        in_specs=[pl.BlockSpec((tr, tc), lambda i, j: (i, j))],
        out_specs=pl.BlockSpec((tr, tc), lambda i, j: (i, j)),
        compiler_params=pltpu.CompilerParams(
            dimension_semantics=("parallel", "parallel"),
            vmem_limit_bytes=32 * 1024 * 1024,
        ),
    )(x)


# ---------------------------------------------------------------------------
# pass 2: tiled matmul (reduction-innermost grid, VMEM accumulator)
# ---------------------------------------------------------------------------
def _make_int8_matmul_kernel(out_scale):
    """Exact int8 x int8 -> int32 MXU matmul; scale by s1*s2 at finalize."""
    out_scale = float(out_scale)

    def kernel(a_ref, b_ref, o_ref, acc_ref):
        @pl.when(pl.program_id(2) == 0)
        def _init():
            acc_ref[...] = jnp.zeros_like(acc_ref)

        acc_ref[...] += jnp.dot(a_ref[...], b_ref[...],
                                preferred_element_type=jnp.int32)

        @pl.when(pl.program_id(2) == pl.num_programs(2) - 1)
        def _finalize():
            # Round through fp16 to mimic torch.matmul(.half(), .half()).
            o_ref[...] = (acc_ref[...].astype(jnp.float32) * out_scale
                          ).astype(jnp.float16).astype(o_ref.dtype)

    return kernel


def _make_bf16_matmul_kernel(s1, off1, s2, off2):
    """Upcast int8 codes on the VPU, dequantize, feed the bf16 MXU."""
    s1 = float(s1)
    off1 = float(off1)
    s2 = float(s2)
    off2 = float(off2)

    def kernel(a_ref, b_ref, o_ref, acc_ref):
        @pl.when(pl.program_id(2) == 0)
        def _init():
            acc_ref[...] = jnp.zeros_like(acc_ref)

        a = a_ref[...].astype(jnp.int32).astype(jnp.float32)
        b = b_ref[...].astype(jnp.int32).astype(jnp.float32)
        if off1 != 0.0:
            a = a + off1
        if off2 != 0.0:
            b = b + off2
        a = (a * s1).astype(jnp.bfloat16)
        b = (b * s2).astype(jnp.bfloat16)
        acc_ref[...] += jnp.dot(a, b, preferred_element_type=jnp.float32)

        @pl.when(pl.program_id(2) == pl.num_programs(2) - 1)
        def _finalize():
            o_ref[...] = acc_ref[...].astype(jnp.float16).astype(o_ref.dtype)

    return kernel


def _matmul_pass(a8, b8, out_dtype, tm, tk, tn, kernel, acc_dtype, vmem_limit):
    Mp, Np = a8.shape
    Np2, Kp = b8.shape
    assert Np == Np2
    out_bytes = jnp.dtype(out_dtype).itemsize
    cost = pl.CostEstimate(
        flops=2 * Mp * Np * Kp,
        transcendentals=0,
        bytes_accessed=(Mp * Np) * (Kp // tk)      # a8 re-read once per K tile
                       + (Np * Kp) * (Mp // tm)    # b8 re-read once per M tile
                       + Mp * Kp * out_bytes,
    )
    return pl.pallas_call(
        kernel,
        out_shape=jax.ShapeDtypeStruct((Mp, Kp), out_dtype),
        grid_spec=pltpu.PrefetchScalarGridSpec(
            num_scalar_prefetch=0,
            grid=(Mp // tm, Kp // tk, Np // tn),           # reduction innermost
            in_specs=[
                pl.BlockSpec((tm, tn), lambda i, j, k: (i, k)),   # m1 codes
                pl.BlockSpec((tn, tk), lambda i, j, k: (k, j)),   # m2 codes
            ],
            out_specs=pl.BlockSpec((tm, tk), lambda i, j, k: (i, j)),
            scratch_shapes=[pltpu.VMEM((tm, tk), acc_dtype)],
        ),
        compiler_params=pltpu.CompilerParams(
            dimension_semantics=("parallel", "parallel", "arbitrary"),
            vmem_limit_bytes=vmem_limit,
        ),
        cost_estimate=cost,
    )(a8, b8)


# ---------------------------------------------------------------------------
# public wrapper (QMatmulDebug.forward)
# ---------------------------------------------------------------------------
def qmatmul_debug(m1, m2, scale_m1, zp_m1, scale_m2, zp_m2, *,
                  dtype_m1="quint8", dtype_m2="qint8",
                  tm=512, tk=512, tn=1024, mxu="auto"):
    """m1: [M, N], m2: [N, K] -> [M, K] in m1.dtype.

    mxu: "auto" (int8 MXU on v5e/v6e when exactly representable, else bf16),
         "int8" (force), or "bf16" (force the universal path).
    Quant params must be host scalars (module buffers) -- they are baked into
    the kernels as compile-time constants.
    """
    M, N = m1.shape
    N2, K = m2.shape
    assert N == N2, "inner dims must match"
    out_dtype = m1.dtype

    (q1min, q1max), shift1 = _QRANGES[dtype_m1]
    (q2min, q2max), shift2 = _QRANGES[dtype_m2]
    off1 = float(shift1) - float(zp_m1)   # dq1 = (code1 + off1) * scale_m1
    off2 = float(shift2) - float(zp_m2)   # dq2 = (code2 + off2) * scale_m2

    # 256-aligned tiles (native MXU width); pad awkward dims instead of
    # falling back to one huge full-extent block.
    tm, Mp = _choose_tile(M, tm)
    tk, Kp = _choose_tile(K, tk)
    tn, Np = _choose_tile(N, tn)
    if (Mp, Np) != (M, N):
        m1 = jnp.pad(m1, ((0, Mp - M), (0, Np - N)))
    if (Np, Kp) != (N, K):
        m2 = jnp.pad(m2, ((0, Np - N), (0, Kp - K)))

    # Pass 1: fake-quant each operand exactly once -> int8 codes.
    a8 = _fake_quant_to_int8(m1, scale_m1, zp_m1, shift1, q1min, q1max)
    b8 = _fake_quant_to_int8(m2, scale_m2, zp_m2, shift2, q2min, q2max)

    has_int8_mxu, vmem_limit = _chip_caps()
    out_scale = float(scale_m1) * float(scale_m2)
    use_int8 = (mxu == "int8") or (
        mxu == "auto"
        and has_int8_mxu
        and off1 == 0.0 and off2 == 0.0          # (q - zp) fits int8 exactly
        and Np * (128 * 128) < 2 ** 31           # no int32 accumulator overflow
    )

    def _run(int8_path):
        if int8_path:
            kern, acc_dt = _make_int8_matmul_kernel(out_scale), jnp.int32
        else:
            kern, acc_dt = (_make_bf16_matmul_kernel(scale_m1, off1,
                                                     scale_m2, off2),
                            jnp.float32)
        return _matmul_pass(a8, b8, out_dtype, tm, tk, tn, kern, acc_dt,
                            vmem_limit)

    if use_int8:
        try:
            out = jax.block_until_ready(_run(True))
        except Exception:                         # pragma: no cover
            if mxu == "int8":
                raise
            # int8 MXU lowering unavailable on this chip -> bf16 fallback.
            out = _run(False)
    else:
        out = _run(False)

    if (Mp, Kp) != (M, K):
        out = out[:M, :K]
    return out


# ---------------------------------------------------------------------------
# pure-JAX reference (mirrors the PyTorch forward)
# ---------------------------------------------------------------------------
def _reference(m1, m2, scale_m1, zp_m1, scale_m2, zp_m2,
               operand_dtype=jnp.float32):
    in_dtype = m1.dtype
    q1 = jnp.clip(jnp.round(m1 / scale_m1) + zp_m1, 0.0, 255.0)
    dq1 = ((q1 - zp_m1) * scale_m1).astype(operand_dtype)
    q2 = jnp.clip(jnp.round(m2 / scale_m2) + zp_m2, -128.0, 127.0)
    dq2 = ((q2 - zp_m2) * scale_m2).astype(operand_dtype)
    out = jnp.dot(dq1.astype(jnp.float32), dq2.astype(jnp.float32))
    return out.astype(jnp.float16).astype(in_dtype)


if __name__ == "__main__":
    key = jax.random.PRNGKey(0)
    k1, k2 = jax.random.split(key)

    # Small, 256-aligned shapes; explicit 256^3 tiles -> grid (2, 2, 3), so the
    # accumulator init/finalize path and the reduction loop are exercised with
    # MXU-native 256-wide tiles.
    M, N, K = 512, 768, 512
    m1 = jax.random.normal(k1, (M, N), dtype=jnp.float32)   # activation (asym/quint8)
    m2 = jax.random.normal(k2, (N, K), dtype=jnp.float32)   # weight     (sym /qint8)

    # deterministic quantization parameters (module buffers)
    scale_m1, zp_m1 = 0.05, 128.0
    scale_m2, zp_m2 = 0.02, 0.0

    # Auto path: int8 MXU on v5e/v6e (exact), bf16 MXU elsewhere.
    out = qmatmul_debug(m1, m2, scale_m1, zp_m1, scale_m2, zp_m2,
                        tm=256, tk=256, tn=256)
    out = jax.block_until_ready(out)
    assert out.shape == (M, K) and out.dtype == m1.dtype

    # Check against the exact-math (f32 dequantized operand) reference; the
    # tolerance covers the bf16-operand MXU path as well.
    ref_exact = _reference(m1, m2, scale_m1, zp_m1, scale_m2, zp_m2,
                           operand_dtype=jnp.float32)
    assert jnp.allclose(out, ref_exact, atol=0.5, rtol=0.05), \
        "mismatch vs exact reference"

    # Force the universal bf16-MXU path (runs on every generation) and compare
    # tightly against a bf16-operand reference -- validates the in-kernel
    # int8 -> dequant -> bf16 upcast and the tiled accumulation.
    out_bf16 = qmatmul_debug(m1, m2, scale_m1, zp_m1, scale_m2, zp_m2,
                             tm=256, tk=256, tn=256, mxu="bf16")
    out_bf16 = jax.block_until_ready(out_bf16)
    ref_bf16 = _reference(m1, m2, scale_m1, zp_m1, scale_m2, zp_m2,
                          operand_dtype=jnp.bfloat16)
    assert jnp.allclose(out_bf16, ref_bf16, atol=0.05, rtol=5e-3), \
        "mismatch vs bf16 reference"

    print("KERNEL_OK")
</pallas_src>

<mosaic_0001>
module attributes {stable_mosaic.version = 11 : i64} {
  func.func @kernel(%arg0: i32, %arg1: i32, %arg2: memref<256x768xf32, #tpu.memory_space<vmem>>, %arg3: memref<256x768xi8, #tpu.memory_space<vmem>>) attributes {dimension_semantics = [#tpu.dimension_semantics<parallel>, #tpu.dimension_semantics<parallel>], iteration_bounds = array<i64: 2, 1>, scalar_prefetch = 0 : i64, scratch_operands = 0 : i64, tpu.core_type = #tpu.core_type<tc>, window_params = [{transform_indices = @transform_0, window_bounds = array<i64: 256, 768>}, {transform_indices = @transform_1, window_bounds = array<i64: 256, 768>}]} {
    %c0 = arith.constant 0 : index
    %c0_0 = arith.constant 0 : index
    %0 = vector.load %arg2[%c0, %c0_0] : memref<256x768xf32, #tpu.memory_space<vmem>>, vector<256x768xf32>
    %cst = arith.constant 5.000000e-02 : f32
    %1 = vector.broadcast %cst : f32 to vector<256x768xf32>
    %2 = arith.divf %0, %1 : vector<256x768xf32>
    %3 = math.roundeven %2 : vector<256x768xf32>
    %cst_1 = arith.constant 1.280000e+02 : f32
    %4 = vector.broadcast %cst_1 : f32 to vector<256x768xf32>
    %5 = arith.addf %3, %4 : vector<256x768xf32>
    %cst_2 = arith.constant 0.000000e+00 : f32
    %cst_3 = arith.constant 2.550000e+02 : f32
    %6 = vector.broadcast %cst_2 : f32 to vector<256x768xf32>
    %7 = arith.maximumf %6, %5 : vector<256x768xf32>
    %8 = vector.broadcast %cst_3 : f32 to vector<256x768xf32>
    %9 = arith.minimumf %8, %7 : vector<256x768xf32>
    %cst_4 = arith.constant 1.280000e+02 : f32
    %10 = vector.broadcast %cst_4 : f32 to vector<256x768xf32>
    %11 = arith.subf %9, %10 : vector<256x768xf32>
    %12 = arith.fptosi %11 : vector<256x768xf32> to vector<256x768xi32>
    %13 = arith.trunci %12 : vector<256x768xi32> to vector<256x768xi8>
    %c0_5 = arith.constant 0 : index
    %c0_6 = arith.constant 0 : index
    %14 = vector.load %arg3[%c0_5, %c0_6] : memref<256x768xi8, #tpu.memory_space<vmem>>, vector<256x768xi8>
    tpu.vector_store %arg3[%c0_5, %c0_6], %13 {strides = array<i32>} : memref<256x768xi8, #tpu.memory_space<vmem>>, vector<256x768xi8>,
    return
  }
  func.func @transform_0(%arg0: i32, %arg1: i32) -> (i32, i32) {
    %c0_i32 = arith.constant 0 : i32
    return %arg0, %arg1 : i32, i32
  }
  func.func @transform_1(%arg0: i32, %arg1: i32) -> (i32, i32) {
    %c0_i32 = arith.constant 0 : i32
    return %arg0, %arg1 : i32, i32
  }
}

</mosaic_0001>

<bundles_post_ra>
// kernel: tpu_custom_call.1
= control target key start
LH: loop header
LB: loop body
LE: loop exit
PB: predicated region body
PF: predicated region fallthrough
CT: control target
= control target key end

     0   :  { %6 = vsyncpa [#allocation3], 0  ;;  %s12940_s0 = inlined_call_operand.hbm [shape: f32[512,768], index: 0, kind: input, shape index: {}]   ;;  %s12941_s1 = inlined_call_operand.hbm [shape: s8[512,768], index: 1, kind: output, shape index: {}]  }
   0x1   :  { %8 = vsyncpa [#allocation3 + $0x1], 0 }
   0x2   :  { %9 = vsyncpa [#allocation4], 0 }
   0x3   :  { %11 = vsyncpa [#allocation4 + $0x1], 0  ;;  %s4905_s6 = smov 0   ;;  %s4907_s7 = smov 0  }
   0x4   :  { %s4909_s8 = smov 0   ;;  %s4911_s9 = smov 0  }
   0x5   :  { %s4913_s10 = smov 0   ;;  %s4915_s11 = smov 0  }
   0x6 LB: > { %s2001_s12 = sadd.s32 4294967295, %s4888_s11   ;;  %s2002_s13 = sadd.s32 4294967294, %s4888_s11   ;;  %s4888_s11 = sphi %s4915_s11, %s17_s11   ;;  %s4884_s10 = sphi %s4913_s10, %s17951_s10   ;;  %s4880_s9 = sphi %s4911_s9, %s17950_s9   ;;  %s4876_s8 = sphi %s4909_s8, %s17949_s8   ;;  %s4872_s7 = sphi %s4907_s7, %s17948_s7   ;;  %s4868_s6 = sphi %s4905_s6, %s17947_s6  }
   0x7   : > { %s29_s14 = sadd.s32 1, %s4884_s10  ;;  %s38_s15 = sadd.s32 1, %s4876_s8 }
   0x8   : > { %p31_p0 = scmp.ge.s32.totalorder %s29_s14, 2  ;;  %p45_p1 = scmp.ne.s32.totalorder %s4876_s8, %s4872_s7 }
   0x9   : > { %p46_p2 = scmp.eq.s32.totalorder %s4888_s11, 0  ;;  %p51_p3 = scmp.ne.s32.totalorder %s4872_s7, %s4868_s6 }
   0xa   : > { %s17953_s14 = smov (%p31_p0, %s29_s14), 0  ;;  %p52_p5 = scmp.eq.s32.totalorder %s2001_s12, 0 }
   0xb   : > { %p4946_p4 = por %p46_p2, %p45_p1  ;;  %s33_s17 = ssub.s32 %s4884_s10, %s17953_s14 }
   0xc   : > { %p77_p6 = scmp.eq.s32.totalorder %s2001_s12, 1  ;;  %p36_p7 = scmp.eq.s32.totalorder %s33_s17, 0 }
   0xd   : > { %p4952_p8 = por %p52_p5, %p51_p3  ;;  %p83_p10 = scmp.eq.s32.totalorder %s2002_s13, 1 }
   0xe   : > { %p4956_p9 = por %p77_p6, %p45_p1  ;;  %p2004_p12 = scmp.ge.s32.totalorder %s4888_s11, 2 }
   0xf   : > { %s4961_s20 = scalar_select %p36_p7, %s4876_s8, %s38_s15  }
  0x10   : > { %p4963_p11 = por %p83_p10, %p51_p3  ;;  %p4719_p13 = scmp.lt.s32.totalorder %s4888_s11, 2 }
  0x11   : > { %s103_s22 = sand.u32 1, %s4876_s8   ;;  %s2207_s24 = smul.u32 1536, %s4884_s10 }
  0x12   : > { %s2206_s23 = smul.u32 1536, %s103_s22  ;;  %p4712_p0 = pnand %p4719_p13, %p4946_p4 }
  0x13   : > { %s115_s27 = scalar_lea.hbm %s12940_s0, %s2207_s24  ;;  %p2008_p1 = scmp.ge.s32.totalorder %s4888_s11, 1 }
  0x14   : > { %s107_s28 = scalar_lea.vmem [#allocation2], %s2206_s23  ;;  %s116_s30 = sshll.u32 %s115_s27, 4  ;;  %s117_s30 = int_to_ptr.hbm [resolvable:$true] %s116_s30 }
  0x15   : > { %s118_s29 = sshll.u32 %s107_s28, 4  ;;  %s104_s2 = scalar_lea.sflag [#allocation3], %s103_s22  ;;  %s119_s29 = int_to_ptr.vmem [resolvable:$true] %s118_s29 }
  0x16   : > { %s4890_s3 = smov 768   ;;  %s4891_s4 = smov 48  }
  0x17   : > { %4714 = dma.hbm_to_vmem [thread:$0]  (!%p4712_p0), %s117_s30, 24576, %s119_s29, %s104_s2, %s4890_s3, %s4890_s3, %s4891_s4  }
  0x18   : > { %p126_p2 = scmp.lt.s32.totalorder %s4888_s11, 3 }
  0x1a   : > { %p127_p3 = pnand %p2008_p1, %p126_p2 }
  0x1c   : > { %130 = sbr.rel (%p127_p3) target bundleno = 1422 (0x58e), region = 24 }
  0x21   : > { %s4979_s5 = sand.u32 1, %s4872_s7  }
  0x22   : > { %s2208_s12 = smul.u32 1536, %s4979_s5  ;;  %s133_s13 = scalar_lea.sflag [#allocation3], %s4979_s5 }
  0x24   : > { %s4983_s15 = scalar_lea.vmem [#allocation2], %s2208_s12 }
  0x25   : > { %4859 = dma.done.wait (%p4952_p8), %s133_s13, 24576  }
  0x26   : > { %4861 = vsyncadd (%p4952_p8), %s133_s13, 4294942720  ;;  %v4892_v0 = vmov 0.05   ;;  %v160_v6 = vld [vmem:[%s4983_s15] sm:$0xff]  ;;  %v161_v7 = vld [vmem:[%s4983_s15 + $0x8] sm:$0xff]  ;;  %s2209_s16 = smul.u32 384, %s4979_s5 }
  0x27   : > { %4774 = vrcp.f32 %v4892_v0  ;;  %v162_v8 = vld [vmem:[%s4983_s15 + $0x10] sm:$0xff]  ;;  %v163_v9 = vld [vmem:[%s4983_s15 + $0x18] sm:$0xff]  ;;  %v164_v10 = vld [vmem:[%s4983_s15 + $0x20] sm:$0xff]  ;;  %s4706_s18 = smul.u32 384, %s4880_s9  ;;  %s1896_s26 = scalar_lea.sflag [#allocation4], %s4979_s5 }
  0x28   : > { %v165_v11 = vld [vmem:[%s4983_s15 + $0x28] sm:$0xff]  ;;  %v166_v12 = vld [vmem:[%s4983_s15 + $0x30] sm:$0xff]  ;;  %v167_v13 = vld [vmem:[%s4983_s15 + $0x38] sm:$0xff]  ;;  %s12477_s17 = scalar_lea.vmem [#allocation5], %s2209_s16  ;;  %s4826_s2 = scalar_lea.hbm %s12941_s1, 768 }
  0x29   : > { %v168_v14 = vld [vmem:[%s4983_s15 + $0x40] sm:$0xff]  ;;  %v169_v15 = vld [vmem:[%s4983_s15 + $0x48] sm:$0xff]  ;;  %v170_v17 = vld [vmem:[%s4983_s15 + $0x50] sm:$0xff]  ;;  %s1910_s23 = scalar_lea.hbm %s12941_s1, %s4706_s18  ;;  %s1911_s24 = sshll.u32 %s12477_s17, 4  ;;  %s1912_s24 = int_to_ptr.vmem [resolvable:$true] %s1911_s24 }
  0x2a   : > { %v171_v18 = vld [vmem:[%s4983_s15 + $0x58] sm:$0xff]  ;;  %v172_v19 = vld [vmem:[%s4983_s15 + $0x60] sm:$0xff]  ;;  %v173_v20 = vld [vmem:[%s4983_s15 + $0x68] sm:$0xff]  ;;  %s1913_s25 = sshll.u32 %s1910_s23, 4  ;;  %s1914_s25 = int_to_ptr.hbm [resolvable:$true] %s1913_s25 }
  0x2b   : > { %v174_v21 = vld [vmem:[%s4983_s15 + $0x70] sm:$0xff]  ;;  %v175_v22 = vld [vmem:[%s4983_s15 + $0x78] sm:$0xff]  ;;  %v176_v23 = vld [vmem:[%s4983_s15 + $0x80] sm:$0xff]  ;;  %s4820_s27 = sshra.s32 %s1914_s25, 4  ;;  %s4821_s27 = int_to_ptr.hbm [resolvable:$true] %s4820_s27 }
  0x2c   : > { %v177_v24 = vld [vmem:[%s4983_s15 + $0x88] sm:$0xff]  ;;  %v178_v25 = vld [vmem:[%s4983_s15 + $0x90] sm:$0xff]  ;;  %v179_v26 = vld [vmem:[%s4983_s15 + $0x98] sm:$0xff]  ;;  %s4822_s28 = scalar_lea.hbm %s4821_s27, 384  ;;  %p4827_p7 = scmp.lt.s32.totalorder %s4821_s27, %s12941_s1 }
  0x2d   : > { %v4775_v1 = vpop.eup %4774  ;;  %v180_v27 = vld [vmem:[%s4983_s15 + $0xa0] sm:$0xff]  ;;  %v181_v28 = vld [vmem:[%s4983_s15 + $0xa8] sm:$0xff]  ;;  %v182_v31 = vld [vmem:[%s4983_s15 + $0xb0] sm:$0xff]  ;;  %p4823_p4 = scmp.ne.s32.totalorder %s4821_s27, %s4822_s28  ;;  %p4828_p8 = scmp.lt.s32.totalorder %s4826_s2, %s4822_s28 }
  0x2e   : > { %v353_v2 = vmul.f32 0.05, %v4775_v1  ;;  %vm357_vm0 = vweird.f32 %v4775_v1  ;;  %v183_v32 = vld [vmem:[%s4983_s15 + $0xb8] sm:$0xff]  ;;  %v184_v33 = vld [vmem:[%s4983_s15 + $0xc0] sm:$0xff]  ;;  %v185_v34 = vld [vmem:[%s4983_s15 + $0xc8] sm:$0xff] }
  0x2f   : > { %v186_v39 = vld [vmem:[%s4983_s15 + $0xd0] sm:$0xff]  ;;  %v187_v40 = vld [vmem:[%s4983_s15 + $0xd8] sm:$0xff]  ;;  %v188_v41 = vld [vmem:[%s4983_s15 + $0xe0] sm:$0xff]  ;;  %p4824_p5 = pnand %p4823_p4, %p4956_p9  ;;  %p4829_p10 = por %p4828_p8, %p4827_p7 }
  0x30   : > { %v354_v3 = vsub.f32 1.0, %v353_v2  ;;  %v189_v42 = vld [vmem:[%s4983_s15 + $0xe8] sm:$0xff]  ;;  %v190_v47 = vld [vmem:[%s4983_s15 + $0xf0] sm:$0xff]  ;;  %v191_v48 = vld [vmem:[%s4983_s15 + $0xf8] sm:$0xff] }
  0x31   : > { %v192_v49 = vld [vmem:[%s4983_s15 + $0x100] sm:$0xff]  ;;  %v193_v50 = vld [vmem:[%s4983_s15 + $0x108] sm:$0xff]  ;;  %v194_v55 = vld [vmem:[%s4983_s15 + $0x110] sm:$0xff]  ;;  %p4825_p6 = pneg %p4824_p5 }
  0x32   : > { %v355_v4 = vmul.f32 %v4775_v1, %v354_v3  ;;  %v195_v56 = vld [vmem:[%s4983_s15 + $0x118] sm:$0xff]  ;;  %v196_v57 = vld [vmem:[%s4983_s15 + $0x120] sm:$0xff]  ;;  %v197_v58 = vld [vmem:[%s4983_s15 + $0x128] sm:$0xff] }
  0x33   : > { %v198_v63 = vld [vmem:[%s4983_s15 + $0x130] sm:$0xff]  ;;  %v199_v0 = vld [vmem:[%s4983_s15 + $0x138] sm:$0xff]  ;;  %v201_v2 = vld [vmem:[%s4983_s15 + $0x148] sm:$0xff]  ;;  %p4830_p13 = pnand %p4829_p10, %p4825_p6 }
  0x34   : > { %v356_v5 = vadd.f32 %v4775_v1, %v355_v4 }
  0x36   : > { %v4999_v16 = vsel %vm357_vm0, %v4775_v1, %v356_v5  ;;  %v200_v1 = vld [vmem:[%s4983_s15 + $0x140] sm:$0xff] }
  0x37   : > { %v5014_v29 = vmul.f32 %v4999_v16, %v160_v6  ;;  %v5017_v30 = vmul.f32 %v4999_v16, %v161_v7  ;;  %v5024_v35 = vmul.f32 %v4999_v16, %v162_v8  ;;  %v5027_v36 = vmul.f32 %v4999_v16, %v163_v9  ;;  %v202_v7 = vld [vmem:[%s4983_s15 + $0x150] sm:$0xff]  ;;  %v203_v8 = vld [vmem:[%s4983_s15 + $0x158] sm:$0xff]  ;;  %v204_v9 = vld [vmem:[%s4983_s15 + $0x160] sm:$0xff] }
  0x38   : > { %v5030_v37 = vmul.f32 %v4999_v16, %v164_v10  ;;  %v5033_v38 = vmul.f32 %v4999_v16, %v165_v11  ;;  %v5040_v43 = vmul.f32 %v4999_v16, %v166_v12  ;;  %v5043_v44 = vmul.f32 %v4999_v16, %v167_v13  ;;  %v205_v10 = vld [vmem:[%s4983_s15 + $0x168] sm:$0xff] }
  0x39   : > { %14262 = vst [vmem:[#allocation8_spill] sm:$0xff] %v5014_v29  ;;  %v5046_v45 = vmul.f32 %v4999_v16, %v168_v14  ;;  %v5049_v46 = vmul.f32 %v4999_v16, %v169_v15  ;;  %v5056_v51 = vmul.f32 %v4999_v16, %v170_v17  ;;  %v5059_v52 = vmul.f32 %v4999_v16, %v171_v18  ;;  %v206_v15 = vld [vmem:[%s4983_s15 + $0x170] sm:$0xff]  ;;  %v207_v17 = vld [vmem:[%s4983_s15 + $0x178] sm:$0xff]  ;;  %v208_v18 = vld [vmem:[%s4983_s15 + $0x180] sm:$0xff] }
  0x3a   : > { %14263 = vst [vmem:[#allocation9_spill] sm:$0xff] %v5017_v30  ;;  %v5062_v53 = vmul.f32 %v4999_v16, %v172_v19  ;;  %v5065_v54 = vmul.f32 %v4999_v16, %v173_v20  ;;  %v5072_v59 = vmul.f32 %v4999_v16, %v174_v21  ;;  %v5075_v60 = vmul.f32 %v4999_v16, %v175_v22  ;;  %v209_v19 = vld [vmem:[%s4983_s15 + $0x188] sm:$0xff] }
  0x3b   : > { %14264 = vst [vmem:[#allocation10_spill] sm:$0xff] %v5024_v35  ;;  %v5078_v61 = vmul.f32 %v4999_v16, %v176_v23  ;;  %v5081_v62 = vmul.f32 %v4999_v16, %v177_v24  ;;  %v5088_v3 = vmul.f32 %v4999_v16, %v178_v25  ;;  %v5091_v4 = vmul.f32 %v4999_v16, %v179_v26  ;;  %v210_v24 = vld [vmem:[%s4983_s15 + $0x190] sm:$0xff]  ;;  %v211_v25 = vld [vmem:[%s4983_s15 + $0x198] sm:$0xff]  ;;  %v212_v26 = vld [vmem:[%s4983_s15 + $0x1a0] sm:$0xff] }
  0x3c   : > { %14265 = vst [vmem:[#allocation11_spill] sm:$0xff] %v5027_v36  ;;  %v5094_v5 = vmul.f32 %v4999_v16, %v180_v27  ;;  %v5097_v6 = vmul.f32 %v4999_v16, %v181_v28  ;;  %v5104_v11 = vmul.f32 %v4999_v16, %v182_v31  ;;  %v5107_v12 = vmul.f32 %v4999_v16, %v183_v32  ;;  %v213_v27 = vld [vmem:[%s4983_s15 + $0x1a8] sm:$0xff] }
  0x3d   : > { %14266 = vst [vmem:[#allocation12_spill] sm:$0xff] %v5033_v38  ;;  %v5110_v13 = vmul.f32 %v4999_v16, %v184_v33  ;;  %v5113_v14 = vmul.f32 %v4999_v16, %v185_v34  ;;  %v5120_v20 = vmul.f32 %v4999_v16, %v186_v39  ;;  %v5123_v21 = vmul.f32 %v4999_v16, %v187_v40  ;;  %v214_v34 = vld [vmem:[%s4983_s15 + $0x1b0] sm:$0xff]  ;;  %v215_v39 = vld [vmem:[%s4983_s15 + $0x1b8] sm:$0xff]  ;;  %v216_v40 = vld [vmem:[%s4983_s15 + $0x1c0] sm:$0xff] }
  0x3e   : > { %14267 = vst [vmem:[#allocation13_spill] sm:$0xff] %v5040_v43  ;;  %v5126_v22 = vmul.f32 %v4999_v16, %v188_v41  ;;  %v5129_v23 = vmul.f32 %v4999_v16, %v189_v42  ;;  %v5136_v28 = vmul.f32 %v4999_v16, %v190_v47  ;;  %v5139_v31 = vmul.f32 %v4999_v16, %v191_v48  ;;  %v217_v41 = vld [vmem:[%s4983_s15 + $0x1c8] sm:$0xff] }
  0x3f   : > { %14268 = vst [vmem:[#allocation14_spill] sm:$0xff] %v5043_v44  ;;  %v5142_v32 = vmul.f32 %v4999_v16, %v192_v49  ;;  %v5145_v33 = vmul.f32 %v4999_v16, %v193_v50  ;;  %v5152_v42 = vmul.f32 %v4999_v16, %v194_v55  ;;  %v5155_v47 = vmul.f32 %v4999_v16, %v195_v56  ;;  %v218_v50 = vld [vmem:[%s4983_s15 + $0x1d0] sm:$0xff] }
  0x40   : > { %14269 = vst [vmem:[#allocation15_spill] sm:$0xff] %v5046_v45  ;;  %v5158_v48 = vmul.f32 %v4999_v16, %v196_v57  ;;  %v5161_v49 = vmul.f32 %v4999_v16, %v197_v58  ;;  %v5168_v55 = vmul.f32 %v4999_v16, %v198_v63  ;;  %v5171_v56 = vmul.f32 %v4999_v16, %v199_v0 }
  0x41   : > { %14270 = vst [vmem:[#allocation16_spill] sm:$0xff] %v5059_v52  ;;  %v5174_v57 = vmul.f32 %v4999_v16, %v200_v1  ;;  %v5177_v58 = vmul.f32 %v4999_v16, %v201_v2  ;;  %v5184_v63 = vmul.f32 %v4999_v16, %v202_v7  ;;  %v5187_v0 = vmul.f32 %v4999_v16, %v203_v8 }
  0x42   : > { %14271 = vst [vmem:[#allocation17_spill] sm:$0xff] %v5062_v53  ;;  %v5190_v1 = vmul.f32 %v4999_v16, %v204_v9  ;;  %v5193_v2 = vmul.f32 %v4999_v16, %v205_v10  ;;  %v5200_v7 = vmul.f32 %v4999_v16, %v206_v15  ;;  %v5203_v8 = vmul.f32 %v4999_v16, %v207_v17 }
  0x43   : > { %14272 = vst [vmem:[#allocation18_spill] sm:$0xff] %v5065_v54  ;;  %v5206_v9 = vmul.f32 %v4999_v16, %v208_v18  ;;  %v5209_v10 = vmul.f32 %v4999_v16, %v209_v19  ;;  %v5216_v15 = vmul.f32 %v4999_v16, %v210_v24  ;;  %v5219_v17 = vmul.f32 %v4999_v16, %v211_v25 }
  0x44   : > { %14273 = vst [vmem:[#allocation19_spill] sm:$0xff] %v5072_v59  ;;  %v5222_v18 = vmul.f32 %v4999_v16, %v212_v26  ;;  %v5225_v19 = vmul.f32 %v4999_v16, %v213_v27  ;;  %v5232_v24 = vmul.f32 %v4999_v16, %v214_v34  ;;  %v5235_v25 = vmul.f32 %v4999_v16, %v215_v39 }
  0x45   : > { %14274 = vst [vmem:[#allocation20_spill] sm:$0xff] %v5075_v60  ;;  %v5238_v26 = vmul.f32 %v4999_v16, %v216_v40  ;;  %v5241_v27 = vmul.f32 %v4999_v16, %v217_v41  ;;  %v5248_v34 = vmul.f32 %v4999_v16, %v218_v50 }
  0x46   : > { %14275 = vst [vmem:[#allocation21_spill] sm:$0xff] %v5078_v61 }
  0x47   : > { %14276 = vst [vmem:[#allocation22_spill] sm:$0xff] %v5081_v62 }
  0x48   : > { %14277 = vst [vmem:[#allocation23_spill] sm:$0xff] %v5088_v3 }
  0x49   : > { %14278 = vst [vmem:[#allocation24_spill] sm:$0xff] %v5091_v4 }
  0x4a   : > { %14279 = vst [vmem:[#allocation25_spill] sm:$0xff] %v5094_v5 }
  0x4b   : > { %14280 = vst [vmem:[#allocation26_spill] sm:$0xff] %v5097_v6 }
  0x4c   : > { %14281 = vst [vmem:[#allocation27_spill] sm:$0xff] %v5104_v11 }
  0x4d   : > { %14282 = vst [vmem:[#allocation28_spill] sm:$0xff] %v5107_v12 }
  0x4e   : > { %14283 = vst [vmem:[#allocation29_spill] sm:$0xff] %v5110_v13 }
  0x4f   : > { %14284 = vst [vmem:[#allocation30_spill] sm:$0xff] %v5113_v14 }
  0x50   : > { %14285 = vst [vmem:[#allocation31_spill] sm:$0xff] %v5120_v20 }
  0x51   : > { %14286 = vst [vmem:[#allocation32_spill] sm:$0xff] %v5123_v21 }
  0x52   : > { %14287 = vst [vmem:[#allocation33_spill] sm:$0xff] %v5126_v22 }
  0x53   : > { %14288 = vst [vmem:[#allocation34_spill] sm:$0xff] %v5129_v23 }
  0x54   : > { %14289 = vst [vmem:[#allocation35_spill] sm:$0xff] %v5136_v28 }
  0x55   : > { %14290 = vst [vmem:[#allocation36_spill] sm:$0xff] %v5139_v31  ;;  %v221_v31 = vld [vmem:[%s4983_s15 + $0x1e8] sm:$0xff] }
  0x56   : > { %14291 = vst [vmem:[#allocation37_spill] sm:$0xff] %v5142_v32  ;;  %v220_v32 = vld [vmem:[%s4983_s15 + $0x1e0] sm:$0xff]  ;;  %v5257_v41 = vmul.f32 %v4999_v16, %v221_v31 }
  0x57   : > { %14292 = vst [vmem:[#allocation38_spill] sm:$0xff] %v5145_v33  ;;  %v219_v33 = vld [vmem:[%s4983_s15 + $0x1d8] sm:$0xff]  ;;  %v5254_v40 = vmul.f32 %v4999_v16, %v220_v32 }
  0x58   : > { %14293 = vst [vmem:[#allocation39_spill] sm:$0xff] %v5152_v42  ;;  %v225_v42 = vld [vmem:[%s4983_s15 + $0x208] sm:$0xff]  ;;  %v5251_v39 = vmul.f32 %v4999_v16, %v219_v33 }
  0x59   : > { %14294 = vst [vmem:[#allocation40_spill] sm:$0xff] %v5155_v47  ;;  %v224_v47 = vld [vmem:[%s4983_s15 + $0x200] sm:$0xff]  ;;  %v5273_v31 = vmul.f32 %v4999_v16, %v225_v42 }
  0x5a   : > { %14295 = vst [vmem:[#allocation41_spill] sm:$0xff] %v5158_v48  ;;  %v223_v48 = vld [vmem:[%s4983_s15 + $0x1f8] sm:$0xff]  ;;  %v5270_v32 = vmul.f32 %v4999_v16, %v224_v47 }
  0x5b   : > { %14296 = vst [vmem:[#allocation42_spill] sm:$0xff] %v5161_v49  ;;  %v222_v49 = vld [vmem:[%s4983_s15 + $0x1f0] sm:$0xff]  ;;  %v5267_v33 = vmul.f32 %v4999_v16, %v223_v48 }
  0x5c   : > { %14297 = vst [vmem:[#allocation43_spill] sm:$0xff] %v5168_v55  ;;  %v229_v55 = vld [vmem:[%s4983_s15 + $0x228] sm:$0xff]  ;;  %v5264_v50 = vmul.f32 %v4999_v16, %v222_v49 }
  0x5d   : > { %14298 = vst [vmem:[#allocation44_spill] sm:$0xff] %v5171_v56  ;;  %v228_v56 = vld [vmem:[%s4983_s15 + $0x220] sm:$0xff]  ;;  %v5289_v42 = vmul.f32 %v4999_v16, %v229_v55 }
  0x5e   : > { %14299 = vst [vmem:[#allocation45_spill] sm:$0xff] %v5174_v57  ;;  %v227_v57 = vld [vmem:[%s4983_s15 + $0x218] sm:$0xff]  ;;  %v5286_v47 = vmul.f32 %v4999_v16, %v228_v56 }
  0x5f   : > { %14300 = vst [vmem:[#allocation46_spill] sm:$0xff] %v5177_v58  ;;  %v226_v58 = vld [vmem:[%s4983_s15 + $0x210] sm:$0xff]  ;;  %v5283_v48 = vmul.f32 %v4999_v16, %v227_v57 }
  0x60   : > { %14301 = vst [vmem:[#allocation47_spill] sm:$0xff] %v5184_v63  ;;  %v233_v63 = vld [vmem:[%s4983_s15 + $0x248] sm:$0xff]  ;;  %v5280_v49 = vmul.f32 %v4999_v16, %v226_v58 }
  0x61   : > { %14302 = vst [vmem:[#allocation48_spill] sm:$0xff] %v5187_v0  ;;  %v232_v0 = vld [vmem:[%s4983_s15 + $0x240] sm:$0xff]  ;;  %v5305_v55 = vmul.f32 %v4999_v16, %v233_v63 }
  0x62   : > { %14303 = vst [vmem:[#allocation49_spill] sm:$0xff] %v5190_v1  ;;  %v231_v1 = vld [vmem:[%s4983_s15 + $0x238] sm:$0xff]  ;;  %v5302_v56 = vmul.f32 %v4999_v16, %v232_v0 }
  0x63   : > { %14304 = vst [vmem:[#allocation50_spill] sm:$0xff] %v5193_v2  ;;  %v230_v2 = vld [vmem:[%s4983_s15 + $0x230] sm:$0xff]  ;;  %v5299_v57 = vmul.f32 %v4999_v16, %v231_v1 }
  0x64   : > { %14305 = vst [vmem:[#allocation51_spill] sm:$0xff] %v5200_v7  ;;  %v237_v7 = vld [vmem:[%s4983_s15 + $0x268] sm:$0xff]  ;;  %v5296_v58 = vmul.f32 %v4999_v16, %v230_v2 }
  0x65   : > { %14306 = vst [vmem:[#allocation52_spill] sm:$0xff] %v5203_v8  ;;  %v236_v8 = vld [vmem:[%s4983_s15 + $0x260] sm:$0xff]  ;;  %v5321_v63 = vmul.f32 %v4999_v16, %v237_v7 }
  0x66   : > { %14307 = vst [vmem:[#allocation53_spill] sm:$0xff] %v5206_v9  ;;  %v235_v9 = vld [vmem:[%s4983_s15 + $0x258] sm:$0xff]  ;;  %v5318_v0 = vmul.f32 %v4999_v16, %v236_v8 }
  0x67   : > { %14308 = vst [vmem:[#allocation54_spill] sm:$0xff] %v5209_v10  ;;  %v234_v10 = vld [vmem:[%s4983_s15 + $0x250] sm:$0xff]  ;;  %v5315_v1 = vmul.f32 %v4999_v16, %v235_v9 }
  0x68   : > { %14309 = vst [vmem:[#allocation55_spill] sm:$0xff] %v5216_v15  ;;  %v241_v15 = vld [vmem:[%s4983_s15 + $0x288] sm:$0xff]  ;;  %v5312_v2 = vmul.f32 %v4999_v16, %v234_v10 }
  0x69   : > { %14310 = vst [vmem:[#allocation56_spill] sm:$0xff] %v5219_v17  ;;  %v240_v17 = vld [vmem:[%s4983_s15 + $0x280] sm:$0xff]  ;;  %v5337_v7 = vmul.f32 %v4999_v16, %v241_v15 }
  0x6a   : > { %14311 = vst [vmem:[#allocation57_spill] sm:$0xff] %v5222_v18  ;;  %v239_v18 = vld [vmem:[%s4983_s15 + $0x278] sm:$0xff]  ;;  %v5334_v8 = vmul.f32 %v4999_v16, %v240_v17 }
  0x6b   : > { %14312 = vst [vmem:[#allocation58_spill] sm:$0xff] %v5225_v19  ;;  %v238_v19 = vld [vmem:[%s4983_s15 + $0x270] sm:$0xff]  ;;  %v5331_v9 = vmul.f32 %v4999_v16, %v239_v18 }
  0x6c   : > { %14313 = vst [vmem:[#allocation59_spill] sm:$0xff] %v5232_v24  ;;  %v245_v24 = vld [vmem:[%s4983_s15 + $0x2a8] sm:$0xff]  ;;  %v5328_v10 = vmul.f32 %v4999_v16, %v238_v19 }
  0x6d   : > { %14314 = vst [vmem:[#allocation60_spill] sm:$0xff] %v5235_v25  ;;  %v244_v25 = vld [vmem:[%s4983_s15 + $0x2a0] sm:$0xff]  ;;  %v5353_v15 = vmul.f32 %v4999_v16, %v245_v24 }
  0x6e   : > { %14315 = vst [vmem:[#allocation61_spill] sm:$0xff] %v5238_v26  ;;  %v243_v26 = vld [vmem:[%s4983_s15 + $0x298] sm:$0xff]  ;;  %v5350_v17 = vmul.f32 %v4999_v16, %v244_v25 }
  0x6f   : > { %14316 = vst [vmem:[#allocation62_spill] sm:$0xff] %v5241_v27  ;;  %v242_v27 = vld [vmem:[%s4983_s15 + $0x290] sm:$0xff]  ;;  %v5347_v18 = vmul.f32 %v4999_v16, %v243_v26 }
  0x70   : > { %14317 = vst [vmem:[#allocation63_spill] sm:$0xff] %v5248_v34  ;;  %v249_v34 = vld [vmem:[%s4983_s15 + $0x2c8] sm:$0xff]  ;;  %v5344_v19 = vmul.f32 %v4999_v16, %v242_v27 }
  0x71   : > { %14318 = vst [vmem:[#allocation64_spill] sm:$0xff] %v5251_v39  ;;  %v248_v39 = vld [vmem:[%s4983_s15 + $0x2c0] sm:$0xff]  ;;  %v5369_v24 = vmul.f32 %v4999_v16, %v249_v34 }
  0x72   : > { %14319 = vst [vmem:[#allocation65_spill] sm:$0xff] %v5254_v40  ;;  %v247_v40 = vld [vmem:[%s4983_s15 + $0x2b8] sm:$0xff]  ;;  %v5366_v25 = vmul.f32 %v4999_v16, %v248_v39 }
  0x73   : > { %14320 = vst [vmem:[#allocation66_spill] sm:$0xff] %v5257_v41  ;;  %v246_v41 = vld [vmem:[%s4983_s15 + $0x2b0] sm:$0xff]  ;;  %v5363_v26 = vmul.f32 %v4999_v16, %v247_v40 }
  0x74   : > { %14321 = vst [vmem:[#allocation67_spill] sm:$0xff] %v5264_v50  ;;  %v253_v50 = vld [vmem:[%s4983_s15 + $0x2e8] sm:$0xff]  ;;  %v5360_v27 = vmul.f32 %v4999_v16, %v246_v41 }
  0x75   : > { %14322 = vst [vmem:[#allocation68_spill] sm:$0xff] %v5267_v33  ;;  %v252_v33 = vld [vmem:[%s4983_s15 + $0x2e0] sm:$0xff]  ;;  %v5385_v34 = vmul.f32 %v4999_v16, %v253_v50 }
  0x76   : > { %14323 = vst [vmem:[#allocation69_spill] sm:$0xff] %v5270_v32  ;;  %v251_v32 = vld [vmem:[%s4983_s15 + $0x2d8] sm:$0xff]  ;;  %v5382_v39 = vmul.f32 %v4999_v16, %v252_v33 }
  0x77   : > { %14324 = vst [vmem:[#allocation70_spill] sm:$0xff] %v5273_v31  ;;  %v250_v31 = vld [vmem:[%s4983_s15 + $0x2d0] sm:$0xff]  ;;  %v5379_v40 = vmul.f32 %v4999_v16, %v251_v32 }
  0x78   : > { %14325 = vst [vmem:[#allocation71_spill] sm:$0xff] %v5280_v49  ;;  %v257_v49 = vld [vmem:[%s4983_s15 + $0x308] sm:$0xff]  ;;  %v5376_v41 = vmul.f32 %v4999_v16, %v250_v31 }
  0x79   : > { %14326 = vst [vmem:[#allocation72_spill] sm:$0xff] %v5283_v48  ;;  %v256_v48 = vld [vmem:[%s4983_s15 + $0x300] sm:$0xff]  ;;  %v5401_v50 = vmul.f32 %v4999_v16, %v257_v49 }
  0x7a   : > { %14327 = vst [vmem:[#allocation73_spill] sm:$0xff] %v5286_v47  ;;  %v255_v47 = vld [vmem:[%s4983_s15 + $0x2f8] sm:$0xff]  ;;  %v5398_v33 = vmul.f32 %v4999_v16, %v256_v48 }
  0x7b   : > { %14328 = vst [vmem:[#allocation74_spill] sm:$0xff] %v5289_v42  ;;  %v254_v42 = vld [vmem:[%s4983_s15 + $0x2f0] sm:$0xff]  ;;  %v5395_v32 = vmul.f32 %v4999_v16, %v255_v47 }
  0x7c   : > { %14329 = vst [vmem:[#allocation75_spill] sm:$0xff] %v5296_v58  ;;  %v261_v58 = vld [vmem:[%s4983_s15 + $0x328] sm:$0xff]  ;;  %v5392_v31 = vmul.f32 %v4999_v16, %v254_v42 }
  0x7d   : > { %14330 = vst [vmem:[#allocation76_spill] sm:$0xff] %v5299_v57  ;;  %v260_v57 = vld [vmem:[%s4983_s15 + $0x320] sm:$0xff]  ;;  %v5417_v49 = vmul.f32 %v4999_v16, %v261_v58 }
  0x7e   : > { %14331 = vst [vmem:[#allocation77_spill] sm:$0xff] %v5302_v56  ;;  %v259_v56 = vld [vmem:[%s4983_s15 + $0x318] sm:$0xff]  ;;  %v5414_v48 = vmul.f32 %v4999_v16, %v260_v57 }
  0x7f   : > { %14332 = vst [vmem:[#allocation78_spill] sm:$0xff] %v5305_v55  ;;  %v258_v55 = vld [vmem:[%s4983_s15 + $0x310] sm:$0xff]  ;;  %v5411_v47 = vmul.f32 %v4999_v16, %v259_v56 }
  0x80   : > { %14333 = vst [vmem:[#allocation79_spill] sm:$0xff] %v5312_v2  ;;  %v265_v2 = vld [vmem:[%s4983_s15 + $0x348] sm:$0xff]  ;;  %v5408_v42 = vmul.f32 %v4999_v16, %v258_v55 }
  0x81   : > { %14334 = vst [vmem:[#allocation80_spill] sm:$0xff] %v5315_v1  ;;  %v264_v1 = vld [vmem:[%s4983_s15 + $0x340] sm:$0xff]  ;;  %v5433_v58 = vmul.f32 %v4999_v16, %v265_v2 }
  0x82   : > { %14335 = vst [vmem:[#allocation81_spill] sm:$0xff] %v5318_v0  ;;  %v263_v0 = vld [vmem:[%s4983_s15 + $0x338] sm:$0xff]  ;;  %v5430_v57 = vmul.f32 %v4999_v16, %v264_v1 }
  0x83   : > { %14336 = vst [vmem:[#allocation82_spill] sm:$0xff] %v5321_v63  ;;  %v262_v63 = vld [vmem:[%s4983_s15 + $0x330] sm:$0xff]  ;;  %v5427_v56 = vmul.f32 %v4999_v16, %v263_v0 }
  0x84   : > { %14337 = vst [vmem:[#allocation83_spill] sm:$0xff] %v5328_v10  ;;  %v269_v10 = vld [vmem:[%s4983_s15 + $0x368] sm:$0xff]  ;;  %v5424_v55 = vmul.f32 %v4999_v16, %v262_v63 }
  0x85   : > { %14338 = vst [vmem:[#allocation84_spill] sm:$0xff] %v5331_v9  ;;  %v268_v9 = vld [vmem:[%s4983_s15 + $0x360] sm:$0xff]  ;;  %v5449_v2 = vmul.f32 %v4999_v16, %v269_v10 }
  0x86   : > { %14339 = vst [vmem:[#allocation85_spill] sm:$0xff] %v5334_v8  ;;  %v267_v8 = vld [vmem:[%s4983_s15 + $0x358] sm:$0xff]  ;;  %v5446_v1 = vmul.f32 %v4999_v16, %v268_v9 }
  0x87   : > { %14340 = vst [vmem:[#allocation86_spill] sm:$0xff] %v5337_v7  ;;  %v266_v7 = vld [vmem:[%s4983_s15 + $0x350] sm:$0xff]  ;;  %v5443_v0 = vmul.f32 %v4999_v16, %v267_v8 }
  0x88   : > { %14341 = vst [vmem:[#allocation87_spill] sm:$0xff] %v5344_v19  ;;  %v273_v19 = vld [vmem:[%s4983_s15 + $0x388] sm:$0xff]  ;;  %v5440_v63 = vmul.f32 %v4999_v16, %v266_v7 }
  0x89   : > { %14342 = vst [vmem:[#allocation88_spill] sm:$0xff] %v5347_v18  ;;  %v272_v18 = vld [vmem:[%s4983_s15 + $0x380] sm:$0xff]  ;;  %v5465_v10 = vmul.f32 %v4999_v16, %v273_v19 }
  0x8a   : > { %14343 = vst [vmem:[#allocation89_spill] sm:$0xff] %v5350_v17  ;;  %v271_v17 = vld [vmem:[%s4983_s15 + $0x378] sm:$0xff]  ;;  %v5462_v9 = vmul.f32 %v4999_v16, %v272_v18 }
  0x8b   : > { %14344 = vst [vmem:[#allocation90_spill] sm:$0xff] %v5353_v15  ;;  %v270_v15 = vld [vmem:[%s4983_s15 + $0x370] sm:$0xff]  ;;  %v5459_v8 = vmul.f32 %v4999_v16, %v271_v17 }
  0x8c   : > { %14345 = vst [vmem:[#allocation91_spill] sm:$0xff] %v5360_v27  ;;  %v277_v27 = vld [vmem:[%s4983_s15 + $0x3a8] sm:$0xff]  ;;  %v5456_v7 = vmul.f32 %v4999_v16, %v270_v15 }
  0x8d   : > { %14346 = vst [vmem:[#allocation92_spill] sm:$0xff] %v5363_v26  ;;  %v276_v26 = vld [vmem:[%s4983_s15 + $0x3a0] sm:$0xff]  ;;  %v5481_v19 = vmul.f32 %v4999_v16, %v277_v27  ;;  %v302_v27 = vld [vmem:[%s4983_s15 + $0x470] sm:$0xff] }
  0x8e   : > { %14347 = vst [vmem:[#allocation93_spill] sm:$0xff] %v5366_v25  ;;  %v275_v25 = vld [vmem:[%s4983_s15 + $0x398] sm:$0xff]  ;;  %v5478_v18 = vmul.f32 %v4999_v16, %v276_v26 }
  0x8f   : > { %14348 = vst [vmem:[#allocation94_spill] sm:$0xff] %v5369_v24  ;;  %v274_v24 = vld [vmem:[%s4983_s15 + $0x390] sm:$0xff]  ;;  %v5475_v17 = vmul.f32 %v4999_v16, %v275_v25 }
  0x90   : > { %14349 = vst [vmem:[#allocation95_spill] sm:$0xff] %v5376_v41  ;;  %v281_v41 = vld [vmem:[%s4983_s15 + $0x3c8] sm:$0xff]  ;;  %v5472_v15 = vmul.f32 %v4999_v16, %v274_v24 }
  0x91   : > { %14350 = vst [vmem:[#allocation96_spill] sm:$0xff] %v5379_v40  ;;  %v280_v40 = vld [vmem:[%s4983_s15 + $0x3c0] sm:$0xff]  ;;  %v5497_v26 = vmul.f32 %v4999_v16, %v281_v41 }
  0x92   : > { %14351 = vst [vmem:[#allocation97_spill] sm:$0xff] %v5382_v39  ;;  %v279_v39 = vld [vmem:[%s4983_s15 + $0x3b8] sm:$0xff]  ;;  %v5494_v25 = vmul.f32 %v4999_v16, %v280_v40  ;;  %v306_v40 = vld [vmem:[%s4983_s15 + $0x490] sm:$0xff] }
  0x93   : > { %14352 = vst [vmem:[#allocation98_spill] sm:$0xff] %v5385_v34  ;;  %v278_v34 = vld [vmem:[%s4983_s15 + $0x3b0] sm:$0xff]  ;;  %v5491_v24 = vmul.f32 %v4999_v16, %v279_v39 }
  0x94   : > { %14353 = vst [vmem:[#allocation99_spill] sm:$0xff] %v5392_v31  ;;  %v285_v31 = vld [vmem:[%s4983_s15 + $0x3e8] sm:$0xff]  ;;  %v5488_v28 = vmul.f32 %v4999_v16, %v278_v34 }
  0x95   : > { %14354 = vst [vmem:[#allocation100_spill] sm:$0xff] %v5395_v32  ;;  %v284_v32 = vld [vmem:[%s4983_s15 + $0x3e0] sm:$0xff]  ;;  %v5513_v41 = vmul.f32 %v4999_v16, %v285_v31  ;;  %v309_v31 = vld [vmem:[%s4983_s15 + $0x4a8] sm:$0xff] }
  0x96   : > { %14355 = vst [vmem:[#allocation101_spill] sm:$0xff] %v5398_v33  ;;  %v283_v33 = vld [vmem:[%s4983_s15 + $0x3d8] sm:$0xff]  ;;  %v5510_v39 = vmul.f32 %v4999_v16, %v284_v32 }
  0x97   : > { %14356 = vst [vmem:[#allocation102_spill] sm:$0xff] %v5401_v50  ;;  %v282_v50 = vld [vmem:[%s4983_s15 + $0x3d0] sm:$0xff]  ;;  %v5507_v34 = vmul.f32 %v4999_v16, %v283_v33 }
  0x98   : > { %14357 = vst [vmem:[#allocation103_spill] sm:$0xff] %v5408_v42  ;;  %v289_v42 = vld [vmem:[%s4983_s15 + $0x408] sm:$0xff] }
  0x99   : > { %14358 = vst [vmem:[#allocation104_spill] sm:$0xff] %v5411_v47  ;;  %v288_v47 = vld [vmem:[%s4983_s15 + $0x400] sm:$0xff]  ;;  %v5528_v32 = vmul.f32 %v4999_v16, %v289_v42 }
  0x9a   : > { %14359 = vst [vmem:[#allocation105_spill] sm:$0xff] %v5414_v48  ;;  %v287_v48 = vld [vmem:[%s4983_s15 + $0x3f8] sm:$0xff]  ;;  %v5525_v33 = vmul.f32 %v4999_v16, %v288_v47  ;;  %v312_v42 = vld [vmem:[%s4983_s15 + $0x4c0] sm:$0xff] }
  0x9b   : > { %14360 = vst [vmem:[#allocation106_spill] sm:$0xff] %v5417_v49  ;;  %v286_v49 = vld [vmem:[%s4983_s15 + $0x3f0] sm:$0xff] }
  0x9c   : > { %14361 = vst [vmem:[#allocation107_spill] sm:$0xff] %v5424_v55  ;;  %v293_v55 = vld [vmem:[%s4983_s15 + $0x428] sm:$0xff] }
  0x9d   : > { %14362 = vst [vmem:[#allocation108_spill] sm:$0xff] %v5427_v56  ;;  %v292_v56 = vld [vmem:[%s4983_s15 + $0x420] sm:$0xff]  ;;  %v5543_v47 = vmul.f32 %v4999_v16, %v293_v55  ;;  %v315_v55 = vld [vmem:[%s4983_s15 + $0x4d8] sm:$0xff] }
  0x9e   : > { %14363 = vst [vmem:[#allocation109_spill] sm:$0xff] %v5430_v57  ;;  %v291_v57 = vld [vmem:[%s4983_s15 + $0x418] sm:$0xff] }
  0x9f   : > { %14364 = vst [vmem:[#allocation110_spill] sm:$0xff] %v5433_v58  ;;  %v290_v58 = vld [vmem:[%s4983_s15 + $0x410] sm:$0xff] }
  0xa0   : > { %14365 = vst [vmem:[#allocation111_spill] sm:$0xff] %v5440_v63  ;;  %v297_v63 = vld [vmem:[%s4983_s15 + $0x448] sm:$0xff] }
  0xa1   : > { %14366 = vst [vmem:[#allocation112_spill] sm:$0xff] %v5443_v0  ;;  %v296_v0 = vld [vmem:[%s4983_s15 + $0x440] sm:$0xff] }
  0xa2   : > { %14367 = vst [vmem:[#allocation113_spill] sm:$0xff] %v5446_v1  ;;  %v295_v1 = vld [vmem:[%s4983_s15 + $0x438] sm:$0xff] }
  0xa3   : > { %14368 = vst [vmem:[#allocation114_spill] sm:$0xff] %v5449_v2  ;;  %v294_v2 = vld [vmem:[%s4983_s15 + $0x430] sm:$0xff] }
  0xa4   : > { %14369 = vst [vmem:[#allocation115_spill] sm:$0xff] %v5456_v7  ;;  %v301_v7 = vld [vmem:[%s4983_s15 + $0x468] sm:$0xff] }
  0xa5   : > { %14370 = vst [vmem:[#allocation116_spill] sm:$0xff] %v5459_v8  ;;  %v300_v8 = vld [vmem:[%s4983_s15 + $0x460] sm:$0xff] }
  0xa6   : > { %14371 = vst [vmem:[#allocation117_spill] sm:$0xff] %v5462_v9  ;;  %v299_v9 = vld [vmem:[%s4983_s15 + $0x458] sm:$0xff] }
  0xa7   : > { %14372 = vst [vmem:[#allocation118_spill] sm:$0xff] %v5465_v10  ;;  %v298_v10 = vld [vmem:[%s4983_s15 + $0x450] sm:$0xff] }
  0xa8   : > { %14373 = vst [vmem:[#allocation119_spill] sm:$0xff] %v5472_v15  ;;  %v5504_v15 = vmul.f32 %v4999_v16, %v282_v50  ;;  %v5522_v50 = vmul.f32 %v4999_v16, %v287_v48  ;;  %v5540_v48 = vmul.f32 %v4999_v16, %v292_v56  ;;  %v5558_v56 = vmul.f32 %v4999_v16, %v297_v63  ;;  %v318_v63 = vld [vmem:[%s4983_s15 + $0x4f0] sm:$0xff] }
  0xa9   : > { %14374 = vst [vmem:[#allocation120_spill] sm:$0xff] %v5475_v17  ;;  %v305_v17 = vld [vmem:[%s4983_s15 + $0x488] sm:$0xff] }
  0xaa   : > { %14375 = vst [vmem:[#allocation121_spill] sm:$0xff] %v5478_v18  ;;  %v304_v18 = vld [vmem:[%s4983_s15 + $0x480] sm:$0xff] }
  0xab   : > { %14376 = vst [vmem:[#allocation122_spill] sm:$0xff] %v5481_v19  ;;  %v303_v19 = vld [vmem:[%s4983_s15 + $0x478] sm:$0xff] }
  0xac   : > { %14377 = vst [vmem:[#allocation123_spill] sm:$0xff] %v5488_v28 }
  0xad   : > { %14378 = vst [vmem:[#allocation124_spill] sm:$0xff] %v5491_v24  ;;  %v5519_v24 = vmul.f32 %v4999_v16, %v286_v49  ;;  %v5537_v49 = vmul.f32 %v4999_v16, %v291_v57  ;;  %v5555_v57 = vmul.f32 %v4999_v16, %v296_v0  ;;  %v5573_v0 = vmul.f32 %v4999_v16, %v301_v7  ;;  %v321_v7 = vld [vmem:[%s4983_s15 + $0x508] sm:$0xff] }
  0xae   : > { %14379 = vst [vmem:[#allocation125_spill] sm:$0xff] %v5494_v25  ;;  %v308_v25 = vld [vmem:[%s4983_s15 + $0x4a0] sm:$0xff] }
  0xaf   : > { %14380 = vst [vmem:[#allocation126_spill] sm:$0xff] %v5497_v26  ;;  %v307_v26 = vld [vmem:[%s4983_s15 + $0x498] sm:$0xff] }
  0xb0   : > { %14381 = vst [vmem:[#allocation127_spill] sm:$0xff] %v5504_v15 }
  0xb1   : > { %14382 = vst [vmem:[#allocation128_spill] sm:$0xff] %v5507_v34  ;;  %v5534_v34 = vmul.f32 %v4999_v16, %v290_v58  ;;  %v5552_v58 = vmul.f32 %v4999_v16, %v295_v1  ;;  %v5570_v1 = vmul.f32 %v4999_v16, %v300_v8  ;;  %v5588_v8 = vmul.f32 %v4999_v16, %v305_v17  ;;  %v324_v17 = vld [vmem:[%s4983_s15 + $0x520] sm:$0xff] }
  0xb2   : > { %14383 = vst [vmem:[#allocation129_spill] sm:$0xff] %v5510_v39  ;;  %v311_v39 = vld [vmem:[%s4983_s15 + $0x4b8] sm:$0xff] }
  0xb3   : > { %14384 = vst [vmem:[#allocation130_spill] sm:$0xff] %v5513_v41  ;;  %v310_v41 = vld [vmem:[%s4983_s15 + $0x4b0] sm:$0xff] }
  0xb4   : > { %14385 = vst [vmem:[#allocation131_spill] sm:$0xff] %v5519_v24 }
  0xb5   : > { %14386 = vst [vmem:[#allocation132_spill] sm:$0xff] %v5522_v50  ;;  %v5549_v50 = vmul.f32 %v4999_v16, %v294_v2  ;;  %v5567_v2 = vmul.f32 %v4999_v16, %v299_v9  ;;  %v5585_v9 = vmul.f32 %v4999_v16, %v304_v18  ;;  %v5603_v18 = vmul.f32 %v4999_v16, %v309_v31  ;;  %v327_v31 = vld [vmem:[%s4983_s15 + $0x538] sm:$0xff] }
  0xb6   : > { %14387 = vst [vmem:[#allocation133_spill] sm:$0xff] %v5525_v33  ;;  %v314_v33 = vld [vmem:[%s4983_s15 + $0x4d0] sm:$0xff] }
  0xb7   : > { %14388 = vst [vmem:[#allocation134_spill] sm:$0xff] %v5528_v32  ;;  %v313_v32 = vld [vmem:[%s4983_s15 + $0x4c8] sm:$0xff] }
  0xb8   : > { %14389 = vst [vmem:[#allocation135_spill] sm:$0xff] %v5534_v34 }
  0xb9   : > { %14390 = vst [vmem:[#allocation136_spill] sm:$0xff] %v5537_v49  ;;  %v5564_v49 = vmul.f32 %v4999_v16, %v298_v10  ;;  %v5582_v10 = vmul.f32 %v4999_v16, %v303_v19  ;;  %v5600_v19 = vmul.f32 %v4999_v16, %v308_v25  ;;  %v5618_v25 = vmul.f32 %v4999_v16, %v313_v32  ;;  %v330_v32 = vld [vmem:[%s4983_s15 + $0x550] sm:$0xff] }
  0xba   : > { %14391 = vst [vmem:[#allocation137_spill] sm:$0xff] %v5540_v48  ;;  %v317_v48 = vld [vmem:[%s4983_s15 + $0x4e8] sm:$0xff] }
  0xbb   : > { %14392 = vst [vmem:[#allocation138_spill] sm:$0xff] %v5543_v47  ;;  %v316_v47 = vld [vmem:[%s4983_s15 + $0x4e0] sm:$0xff] }
  0xbc   : > { %14393 = vst [vmem:[#allocation139_spill] sm:$0xff] %v5549_v50 }
  0xbd   : > { %14394 = vst [vmem:[#allocation140_spill] sm:$0xff] %v5552_v58  ;;  %v5579_v58 = vmul.f32 %v4999_v16, %v302_v27  ;;  %v5597_v27 = vmul.f32 %v4999_v16, %v307_v26  ;;  %v5615_v26 = vmul.f32 %v4999_v16, %v312_v42  ;;  %v5633_v42 = vmul.f32 %v4999_v16, %v317_v48  ;;  %v333_v48 = vld [vmem:[%s4983_s15 + $0x568] sm:$0xff] }
  0xbe   : > { %14395 = vst [vmem:[#allocation141_spill] sm:$0xff] %v5555_v57  ;;  %v320_v57 = vld [vmem:[%s4983_s15 + $0x500] sm:$0xff] }
  0xbf   : > { %14396 = vst [vmem:[#allocation142_spill] sm:$0xff] %v5558_v56  ;;  %v319_v56 = vld [vmem:[%s4983_s15 + $0x4f8] sm:$0xff] }
  0xc0   : > { %14397 = vst [vmem:[#allocation143_spill] sm:$0xff] %v5564_v49 }
  0xc1   : > { %14398 = vst [vmem:[#allocation144_spill] sm:$0xff] %v5567_v2  ;;  %v5594_v2 = vmul.f32 %v4999_v16, %v306_v40  ;;  %v5612_v40 = vmul.f32 %v4999_v16, %v311_v39  ;;  %v5630_v39 = vmul.f32 %v4999_v16, %v316_v47  ;;  %v5648_v47 = vmul.f32 %v4999_v16, %v321_v7  ;;  %v336_v7 = vld [vmem:[%s4983_s15 + $0x580] sm:$0xff] }
  0xc2   : > { %14399 = vst [vmem:[#allocation145_spill] sm:$0xff] %v5570_v1  ;;  %v323_v1 = vld [vmem:[%s4983_s15 + $0x518] sm:$0xff] }
  0xc3   : > { %14400 = vst [vmem:[#allocation146_spill] sm:$0xff] %v5573_v0  ;;  %v322_v0 = vld [vmem:[%s4983_s15 + $0x510] sm:$0xff] }
  0xc4   : > { %14401 = vst [vmem:[#allocation147_spill] sm:$0xff] %v5579_v58 }
  0xc5   : > { %14402 = vst [vmem:[#allocation148_spill] sm:$0xff] %v5582_v10  ;;  %v5609_v10 = vmul.f32 %v4999_v16, %v310_v41  ;;  %v5627_v41 = vmul.f32 %v4999_v16, %v315_v55  ;;  %v5645_v55 = vmul.f32 %v4999_v16, %v320_v57 }
  0xc6   : > { %14403 = vst [vmem:[#allocation149_spill] sm:$0xff] %v5585_v9  ;;  %v326_v9 = vld [vmem:[%s4983_s15 + $0x530] sm:$0xff] }
  0xc7   : > { %14404 = vst [vmem:[#allocation150_spill] sm:$0xff] %v5588_v8  ;;  %v325_v8 = vld [vmem:[%s4983_s15 + $0x528] sm:$0xff] }
  0xc8   : > { %14405 = vst [vmem:[#allocation151_spill] sm:$0xff] %v5594_v2  ;;  %v5663_v57 = vmul.f32 %v4999_v16, %v325_v8  ;;  %v339_v8 = vld [vmem:[%s4983_s15 + $0x598] sm:$0xff] }
  0xc9   : > { %14406 = vst [vmem:[#allocation152_spill] sm:$0xff] %v5597_v27  ;;  %v5624_v27 = vmul.f32 %v4999_v16, %v314_v33  ;;  %v5642_v33 = vmul.f32 %v4999_v16, %v319_v56  ;;  %v5660_v56 = vmul.f32 %v4999_v16, %v324_v17  ;;  %v2212_v17 = vcvt.f32.s32 %v5014_v29 }
  0xca   : > { %14407 = vst [vmem:[#allocation153_spill] sm:$0xff] %v5600_v19  ;;  %v329_v19 = vld [vmem:[%s4983_s15 + $0x548] sm:$0xff] }
  0xcb   : > { %14408 = vst [vmem:[#allocation154_spill] sm:$0xff] %v5603_v18  ;;  %v328_v18 = vld [vmem:[%s4983_s15 + $0x540] sm:$0xff] }
  0xcc   : > { %14409 = vst [vmem:[#allocation155_spill] sm:$0xff] %v5609_v10 }
  0xcd   : > { %14410 = vst [vmem:[#allocation156_spill] sm:$0xff] %v5612_v40  ;;  %v5639_v40 = vmul.f32 %v4999_v16, %v318_v63  ;;  %v5657_v63 = vmul.f32 %v4999_v16, %v323_v1  ;;  %v5675_v1 = vmul.f32 %v4999_v16, %v328_v18 }
  0xce   : > { %14411 = vst [vmem:[#allocation157_spill] sm:$0xff] %v5615_v26  ;;  %v332_v26 = vld [vmem:[%s4983_s15 + $0x560] sm:$0xff] }
  0xcf   : > { %14412 = vst [vmem:[#allocation158_spill] sm:$0xff] %v5618_v25  ;;  %v331_v25 = vld [vmem:[%s4983_s15 + $0x558] sm:$0xff]  ;;  %v5691_v18 = vmul.f32 %v4999_v16, %v332_v26  ;;  %v5710_v26 = vmul.f32 %v4999_v16, %v336_v7  ;;  %v2213_v7 = vcvt.s32.f32 %v2212_v17  ;;  %v350_v17 = vld [vmem:[%s4983_s15 + $0x5f0] sm:$0xff] }
  0xd0   : > { %14413 = vst [vmem:[#allocation159_spill] sm:$0xff] %v5624_v27 }
  0xd1   : > { %14414 = vst [vmem:[#allocation160_spill] sm:$0xff] %v5627_v41  ;;  %v5654_v41 = vmul.f32 %v4999_v16, %v322_v0  ;;  %v5672_v0 = vmul.f32 %v4999_v16, %v327_v31  ;;  %v342_v31 = vld [vmem:[%s4983_s15 + $0x5b0] sm:$0xff] }
  0xd2   : > { %14415 = vst [vmem:[#allocation161_spill] sm:$0xff] %v5630_v39  ;;  %v335_v39 = vld [vmem:[%s4983_s15 + $0x578] sm:$0xff] }
  0xd3   : > { %14416 = vst [vmem:[#allocation162_spill] sm:$0xff] %v5633_v42  ;;  %v334_v42 = vld [vmem:[%s4983_s15 + $0x570] sm:$0xff] }
  0xd4   : > { %14417 = vst [vmem:[#allocation163_spill] sm:$0xff] %v5639_v40  ;;  %v5722_v40 = vmul.f32 %v4999_v16, %v339_v8  ;;  %v2236_v8 = vcvt.f32.s32 %v5027_v36 }
  0xd5   : > { %14418 = vst [vmem:[#allocation164_spill] sm:$0xff] %v5642_v33  ;;  %v5669_v33 = vmul.f32 %v4999_v16, %v326_v9  ;;  %v5688_v9 = vmul.f32 %v4999_v16, %v331_v25  ;;  %v345_v25 = vld [vmem:[%s4983_s15 + $0x5c8] sm:$0xff] }
  0xd6   : > { %14419 = vst [vmem:[#allocation165_spill] sm:$0xff] %v5645_v55  ;;  %v338_v55 = vld [vmem:[%s4983_s15 + $0x590] sm:$0xff] }
  0xd7   : > { %14420 = vst [vmem:[#allocation166_spill] sm:$0xff] %v5648_v47  ;;  %v337_v47 = vld [vmem:[%s4983_s15 + $0x588] sm:$0xff] }
  0xd8   : > { %14421 = vst [vmem:[#allocation167_spill] sm:$0xff] %v5654_v41  ;;  %v5685_v41 = vmul.f32 %v4999_v16, %v330_v32  ;;  %v2220_v32 = vcvt.f32.s32 %v5017_v30 }
  0xd9   : > { %14422 = vst [vmem:[#allocation168_spill] sm:$0xff] %v5657_v63  ;;  %v5682_v63 = vmul.f32 %v4999_v16, %v329_v19  ;;  %v5700_v19 = vmul.f32 %v4999_v16, %v334_v42  ;;  %v347_v42 = vld [vmem:[%s4983_s15 + $0x5d8] sm:$0xff] }
  0xda   : > { %14423 = vst [vmem:[#allocation169_spill] sm:$0xff] %v5660_v56  ;;  %v341_v56 = vld [vmem:[%s4983_s15 + $0x5a8] sm:$0xff] }
  0xdb   : > { %14424 = vst [vmem:[#allocation170_spill] sm:$0xff] %v5663_v57  ;;  %v340_v57 = vld [vmem:[%s4983_s15 + $0x5a0] sm:$0xff] }
  0xdc   : > { %14425 = vst [vmem:[#allocation171_spill] sm:$0xff] %v5669_v33  ;;  %v5697_v33 = vmul.f32 %v4999_v16, %v333_v48  ;;  %v5716_v48 = vmul.f32 %v4999_v16, %v338_v55  ;;  %v5725_v27 = vmul.f32 %v4999_v16, %v340_v57 }
  0xdd   : > { %14426 = vst [vmem:[#allocation172_spill] sm:$0xff] %v5672_v0  ;;  %v344_v0 = vld [vmem:[%s4983_s15 + $0x5c0] sm:$0xff] }
  0xde   : > { %14427 = vst [vmem:[#allocation173_spill] sm:$0xff] %v5675_v1  ;;  %v343_v1 = vld [vmem:[%s4983_s15 + $0x5b8] sm:$0xff] }
  0xdf   : > { %14428 = vst [vmem:[#allocation174_spill] sm:$0xff] %v5682_v63  ;;  %v5707_v63 = vmul.f32 %v4999_v16, %v335_v39  ;;  %v5728_v39 = vmul.f32 %v4999_v16, %v341_v56  ;;  %v5734_v55 = vmul.f32 %v4999_v16, %v343_v1  ;;  %v2221_v56 = vcvt.s32.f32 %v2220_v32 }
  0xe0   : > { %14429 = vst [vmem:[#allocation175_spill] sm:$0xff] %v5685_v41  ;;  %v2228_v41 = vcvt.f32.s32 %v5024_v35  ;;  %v2223_v32 = vand.u32 2147483648, %v5017_v30 }
  0xe1   : > { %14430 = vst [vmem:[#allocation176_spill] sm:$0xff] %v5688_v9  ;;  %v346_v9 = vld [vmem:[%s4983_s15 + $0x5d0] sm:$0xff] }
  0xe2   : > { %14431 = vst [vmem:[#allocation177_spill] sm:$0xff] %v5691_v18  ;;  %v5713_v18 = vmul.f32 %v4999_v16, %v337_v47  ;;  %v5731_v47 = vmul.f32 %v4999_v16, %v342_v31  ;;  %v5744_v57 = vmul.f32 %v4999_v16, %v346_v9  ;;  %v5748_v31 = vmul.f32 %v4999_v16, %v347_v42 }
  0xe3   : > { %14432 = vst [vmem:[#allocation178_spill] sm:$0xff] %v5697_v33  ;;  %v349_v33 = vld [vmem:[%s4983_s15 + $0x5e8] sm:$0xff]  ;;  %v2218_v9 = vand.u32 2147483647, %v5017_v30  ;;  %v2226_v42 = vand.u32 2147483647, %v5024_v35  ;;  %v2292_v30 = vcvt.f32.s32 %v5056_v51 }
  0xe4   : > { %14433 = vst [vmem:[#allocation179_spill] sm:$0xff] %v5700_v19  ;;  %v348_v19 = vld [vmem:[%s4983_s15 + $0x5e0] sm:$0xff] }
  0xe5   : > { %14434 = vst [vmem:[#allocation180_spill] sm:$0xff] %v5707_v63  ;;  %v5751_v1 = vmul.f32 %v4999_v16, %v348_v19  ;;  %v2231_v19 = vand.u32 2147483648, %v5024_v35  ;;  %vm5781_vm2 = vcmp.lt.f32.partialorder %v2218_v9, 8388608.0  ;;  %v14455_v63 = vmov 0 }
  0xe6   : > { %14435 = vst [vmem:[#allocation181_spill] sm:$0xff] %v5710_v26  ;;  %v14451_v26 = vmov 0  ;;  %v14456_v63 = vsel %vm5781_vm2, 4294967295, %v14455_v63  ;;  %vm5785_vm3 = vcmp.lt.f32.partialorder %v2226_v42, 8388608.0  ;;  %v14464_v9 = vmov 0 }
  0xe7   : > { %14436 = vst [vmem:[#allocation182_spill] sm:$0xff] %v5713_v18  ;;  %v2260_v18 = vcvt.f32.s32 %v5040_v43 }
  0xe8   : > { %14437 = vst [vmem:[#allocation183_spill] sm:$0xff] %v5716_v48  ;;  %v5737_v48 = vmul.f32 %v4999_v16, %v344_v0  ;;  %v5754_v0 = vmul.f32 %v4999_v16, %v349_v33 }
  0xe9   : > { %14438 = vst [vmem:[#allocation184_spill] sm:$0xff] %v5722_v40  ;;  %v5741_v40 = vmul.f32 %v4999_v16, %v345_v25  ;;  %v2214_v25 = vand.u32 2147483647, %v2213_v7  ;;  %v5767_v7 = vmul.f32 %v4999_v16, %v350_v17  ;;  %v2239_v17 = vand.u32 2147483648, %v5027_v36 }
  0xea   : > { %14439 = vst [vmem:[#allocation185_spill] sm:$0xff] %v5725_v27  ;;  %v2242_v27 = vand.u32 2147483647, %v5030_v37  ;;  %v2261_v42 = vcvt.s32.f32 %v2260_v18  ;;  %v2271_v18 = vand.u32 2147483648, %v5043_v44 }
  0xeb   : > { %14440 = vst [vmem:[#allocation186_spill] sm:$0xff] %v5728_v39  ;;  %v2229_v39 = vcvt.s32.f32 %v2228_v41  ;;  %v2244_v41 = vcvt.f32.s32 %v5030_v37 }
  0xec   : > { %14441 = vst [vmem:[#allocation187_spill] sm:$0xff] %v5731_v47  ;;  %vm5798_vm5 = vcmp.lt.f32.partialorder %v2242_v27, 8388608.0  ;;  %v2258_v27 = vand.u32 2147483647, %v5040_v43 }
  0xed   : > { %14442 = vst [vmem:[#allocation188_spill] sm:$0xff] %v5734_v55  ;;  %v351_v55 = vld [vmem:[%s4983_s15 + $0x5f8] sm:$0xff]  ;;  %v2230_v33 = vand.u32 2147483647, %v2229_v39  ;;  %v2245_v39 = vcvt.s32.f32 %v2244_v41  ;;  %v14465_v9 = vsel %vm5798_vm5, 4294967295, %v14464_v9 }
  0xee   : > { %14443 = vst [vmem:[#allocation189_spill] sm:$0xff] %v5737_v48  ;;  %v2210_v48 = vand.u32 2147483647, %v5014_v29  ;;  %v5770_v47 = vmul.f32 %v4999_v16, %v351_v55  ;;  %v2250_v41 = vand.u32 2147483647, %v5033_v38  ;;  %vm5836_vm7 = vcmp.lt.f32.partialorder %v2258_v27, 8388608.0 }
  0xef   : > { %14444 = vst [vmem:[#allocation190_spill] sm:$0xff] %v5741_v40  ;;  %v2215_v40 = vand.u32 2147483648, %v5014_v29  ;;  %v2263_v29 = vand.u32 2147483648, %v5040_v43  ;;  %v2282_v27 = vand.u32 2147483647, %v5049_v46  ;;  %v2327_v43 = vand.u32 2147483648, %v5072_v59 }
  0xf0   : > { %14445 = vst [vmem:[#allocation191_spill] sm:$0xff] %v5744_v57  ;;  %v2252_v57 = vcvt.f32.s32 %v5033_v38  ;;  %vm5774_vm1 = vcmp.lt.f32.partialorder %v2210_v48, 8388608.0  ;;  %vm5823_vm6 = vcmp.lt.f32.partialorder %v2250_v41, 8388608.0 }
  0xf1   : > { %14446 = vst [vmem:[#allocation192_spill] sm:$0xff] %v5748_v31  ;;  %v2222_v31 = vand.u32 2147483647, %v2221_v56  ;;  %v14452_v26 = vsel %vm5774_vm1, 4294967295, %v14451_v26  ;;  %v2268_v56 = vcvt.f32.s32 %v5043_v44  ;;  %vm5878_vm10 = vcmp.lt.f32.partialorder %v2282_v27, 8388608.0 }
  0xf2   : > { %14447 = vst [vmem:[#allocation193_spill] sm:$0xff] %v5751_v1  ;;  %v2237_v1 = vcvt.s32.f32 %v2236_v8  ;;  %v5778_v8 = vor.u32 %v2215_v40, %v2214_v25  ;;  %v14461_v40 = vmov 0  ;;  %v2253_v25 = vcvt.s32.f32 %v2252_v57 }
  0xf3   : > { %14448 = vst [vmem:[#allocation194_spill] sm:$0xff] %v5754_v0  ;;  %v2234_v0 = vand.u32 2147483647, %v5027_v36  ;;  %v5790_v48 = vor.u32 %v2223_v32, %v2222_v31  ;;  %v2246_v32 = vand.u32 2147483647, %v2245_v39  ;;  %v2300_v39 = vcvt.f32.s32 %v5059_v52 }
  0xf4   : > { %14449 = vst [vmem:[#allocation195_spill] sm:$0xff] %v5767_v7  ;;  %v2238_v55 = vand.u32 2147483647, %v2237_v1  ;;  %v2276_v1 = vcvt.f32.s32 %v5046_v45  ;;  %v2266_v57 = vand.u32 2147483647, %v5043_v44  ;;  %v2284_v7 = vcvt.f32.s32 %v5049_v46 }
  0xf5   : > { %14450 = vst [vmem:[#allocation196_spill] sm:$0xff] %v5770_v47  ;;  %v5792_v47 = vor.u32 %v2231_v19, %v2230_v33  ;;  %vm5794_vm4 = vcmp.lt.f32.partialorder %v2234_v0, 8388608.0  ;;  %v2247_v0 = vand.u32 2147483648, %v5030_v37  ;;  %v2269_v19 = vcvt.s32.f32 %v2268_v56 }
  0xf6   : > { %14453 = vst [vmem:[#allocation197_spill] sm:$0xff] %v14452_v26  ;;  %v14462_v40 = vsel %vm5794_vm4, 4294967295, %v14461_v40  ;;  %v5809_v33 = vor.u32 %v2239_v17, %v2238_v55  ;;  %v2254_v31 = vand.u32 2147483647, %v2253_v25  ;;  %v2255_v56 = vand.u32 2147483648, %v5033_v38 }
  0xf7   : > { %14454 = vst [vmem:[#allocation198_spill] sm:$0xff] %v5778_v8  ;;  %v2262_v17 = vand.u32 2147483647, %v2261_v42  ;;  %v2277_v8 = vcvt.s32.f32 %v2276_v1  ;;  %v5828_v26 = vor.u32 %v2247_v0, %v2246_v32  ;;  %vm5840_vm8 = vcmp.lt.f32.partialorder %v2266_v57, 8388608.0 }
  0xf8   : > { %14457 = vst [vmem:[#allocation199_spill] sm:$0xff] %v14456_v63  ;;  %v2270_v63 = vand.u32 2147483647, %v2269_v19  ;;  %v14472_v42 = vmov 0  ;;  %v2285_v1 = vcvt.s32.f32 %v2284_v7  ;;  %v5844_v32 = vor.u32 %v2255_v56, %v2254_v31 }
  0xf9   : > { %14460 = vst [vmem:[#allocation200_spill] sm:$0xff] %v5792_v47  ;;  %v14473_v42 = vsel %vm5840_vm8, 4294967295, %v14472_v42  ;;  %v2274_v0 = vand.u32 2147483647, %v5046_v45  ;;  %v2279_v19 = vand.u32 2147483648, %v5046_v45  ;;  %v5849_v35 = vor.u32 %v2263_v29, %v2262_v17 }
  0xfa   : > { %14463 = vst [vmem:[#allocation201_spill] sm:$0xff] %v14462_v40  ;;  %v2278_v25 = vand.u32 2147483647, %v2277_v8  ;;  %v2308_v36 = vcvt.f32.s32 %v5062_v53  ;;  %v5853_v57 = vor.u32 %v2271_v18, %v2270_v63  ;;  %v2293_v7 = vcvt.s32.f32 %v2292_v30 }
  0xfb   : > { %14466 = vst [vmem:[#allocation202_spill] sm:$0xff] %v14465_v9  ;;  %v2316_v31 = vcvt.f32.s32 %v5065_v54  ;;  %v2286_v56 = vand.u32 2147483647, %v2285_v1  ;;  %v2290_v40 = vand.u32 2147483647, %v5056_v51  ;;  %v2324_v29 = vcvt.f32.s32 %v5072_v59 }
  0xfc   : > { %14467 = vst [vmem:[#allocation203_spill] sm:$0xff] %v5809_v33  ;;  %v2287_v33 = vand.u32 2147483648, %v5049_v46  ;;  %v2298_v47 = vand.u32 2147483647, %v5059_v52  ;;  %vm5868_vm9 = vcmp.lt.f32.partialorder %v2274_v0, 8388608.0  ;;  %v14477_v30 = vmov 0 }
  0xfd   : > { %14474 = vst [vmem:[#allocation204_spill] sm:$0xff] %v14473_v42  ;;  %v14478_v30 = vsel %vm5868_vm9, 4294967295, %v14477_v30  ;;  %v2301_v18 = vcvt.s32.f32 %v2300_v39  ;;  %v5876_v1 = vor.u32 %v2279_v19, %v2278_v25  ;;  %v14481_v9 = vmov 0 }
  0xfe   : > { %14475 = vst [vmem:[#allocation205_spill] sm:$0xff] %v5844_v32  ;;  %v14482_v9 = vsel %vm5878_vm10, 4294967295, %v14481_v9  ;;  %v2309_v8 = vcvt.s32.f32 %v2308_v36  ;;  %v2294_v63 = vand.u32 2147483647, %v2293_v7  ;;  %v2295_v39 = vand.u32 2147483648, %v5056_v51 }
  0xff   : > { %14476 = vst [vmem:[#allocation206_spill] sm:$0xff] %v5853_v57  ;;  %v2317_v38 = vcvt.s32.f32 %v2316_v31  ;;  %v5887_v32 = vor.u32 %v2287_v33, %v2286_v56  ;;  %vm5889_vm11 = vcmp.lt.f32.partialorder %v2290_v40, 8388608.0  ;;  %v14484_v17 = vmov 0 }
 0x100   : > { %14479 = vst [vmem:[#allocation207_spill] sm:$0xff] %v14478_v30  ;;  %v14485_v17 = vsel %vm5889_vm11, 4294967295, %v14484_v17  ;;  %vm5893_vm12 = vcmp.lt.f32.partialorder %v2298_v47, 8388608.0  ;;  %v14486_v25 = vmov 0  ;;  %v2325_v36 = vcvt.s32.f32 %v2324_v29 }
 0x101   : > { %14480 = vst [vmem:[#allocation208_spill] sm:$0xff] %v5876_v1  ;;  %v14487_v25 = vsel %vm5893_vm12, 4294967295, %v14486_v25  ;;  %v2302_v19 = vand.u32 2147483647, %v2301_v18  ;;  %v2303_v27 = vand.u32 2147483648, %v5059_v52  ;;  %v2332_v7 = vcvt.f32.s32 %v5075_v60 }
 0x102   : > { %14483 = vst [vmem:[#allocation209_spill] sm:$0xff] %v14482_v9  ;;  %v2306_v0 = vand.u32 2147483647, %v5062_v53  ;;  %v2310_v33 = vand.u32 2147483647, %v2309_v8  ;;  %v2311_v31 = vand.u32 2147483648, %v5062_v53  ;;  %v2340_v47 = vcvt.f32.s32 %v5078_v61 }
 0x103   : > { %v5906_v56 = vor.u32 %v2295_v39, %v2294_v63  ;;  %v2314_v29 = vand.u32 2147483647, %v5065_v54  ;;  %v2318_v18 = vand.u32 2147483647, %v2317_v38  ;;  %v2319_v44 = vand.u32 2147483648, %v5065_v54 }
 0x104   : > { %v2322_v57 = vand.u32 2147483647, %v5072_v59  ;;  %v2326_v42 = vand.u32 2147483647, %v2325_v36  ;;  %v2348_v30 = vcvt.f32.s32 %v5081_v62  ;;  %v5917_v40 = vor.u32 %v2303_v27, %v2302_v19 }
 0x105   : > { %v2330_v63 = vand.u32 2147483647, %v5075_v60  ;;  %v2333_v39 = vcvt.s32.f32 %v2332_v7  ;;  %vm5920_vm13 = vcmp.lt.f32.partialorder %v2306_v0, 8388608.0  ;;  %v14488_v38 = vmov 0  ;;  %v15352_v16 = vld [vmem:[#allocation205_spill] sm:$0xff] }
 0x106   : > { %v14489_v38 = vsel %vm5920_vm13, 4294967295, %v14488_v38  ;;  %v5924_v45 = vor.u32 %v2311_v31, %v2310_v33  ;;  %v2341_v36 = vcvt.s32.f32 %v2340_v47  ;;  %v2356_v1 = vcvt.f32.s32 %v5088_v3 }
 0x107   : > { %14490 = vst [vmem:[#allocation210_spill] sm:$0xff] %v14489_v38  ;;  %vm5931_vm14 = vcmp.lt.f32.partialorder %v2314_v29, 8388608.0  ;;  %v14492_v19 = vmov 0  ;;  %v5935_v27 = vor.u32 %v2319_v44, %v2318_v18  ;;  %v2338_v0 = vand.u32 2147483647, %v5078_v61  ;;  %v15361_v55 = vld [vmem:[#allocation207_spill] sm:$0xff] }
 0x108   : > { %14491 = vst [vmem:[#allocation211_spill] sm:$0xff] %v5924_v45  ;;  %v14493_v19 = vsel %vm5931_vm14, 4294967295, %v14492_v19  ;;  %vm5938_vm15 = vcmp.lt.f32.partialorder %v2322_v57, 8388608.0  ;;  %v14496_v7 = vmov 0  ;;  %v5942_v33 = vor.u32 %v2327_v43, %v2326_v42 }
 0x109   : > { %14494 = vst [vmem:[#allocation212_spill] sm:$0xff] %v14493_v19  ;;  %v14497_v7 = vsel %vm5938_vm15, 4294967295, %v14496_v7  ;;  %v2349_v31 = vcvt.s32.f32 %v2348_v30  ;;  %v2364_v47 = vcvt.f32.s32 %v5091_v4  ;;  %vm5949_vm0 = vcmp.lt.f32.partialorder %v2330_v63, 8388608.0  ;;  %v15366_v41 = vld [vmem:[#allocation209_spill] sm:$0xff] }
 0x10a   : > { %14495 = vst [vmem:[#allocation213_spill] sm:$0xff] %v5935_v27  ;;  %v14500_v9 = vmov 0  ;;  %v2334_v44 = vand.u32 2147483647, %v2333_v39  ;;  %v2335_v57 = vand.u32 2147483648, %v5075_v60  ;;  %v2343_v30 = vand.u32 2147483648, %v5078_v61 }
 0x10b   : > { %14498 = vst [vmem:[#allocation214_spill] sm:$0xff] %v14497_v7  ;;  %v14501_v9 = vsel %vm5949_vm0, 4294967295, %v14500_v9  ;;  %v2342_v42 = vand.u32 2147483647, %v2341_v36  ;;  %v2357_v18 = vcvt.s32.f32 %v2356_v1  ;;  %vm5963_vm12 = vcmp.lt.f32.partialorder %v2338_v0, 8388608.0 }
 0x10c   : > { %14499 = vst [vmem:[#allocation215_spill] sm:$0xff] %v5942_v33  ;;  %v14502_v29 = vmov 0  ;;  %v2346_v39 = vand.u32 2147483647, %v5081_v62  ;;  %v2372_v8 = vcvt.f32.s32 %v5094_v5  ;;  %v2350_v43 = vand.u32 2147483647, %v2349_v31 }
 0x10d   : > { %v14503_v29 = vsel %vm5963_vm12, 4294967295, %v14502_v29  ;;  %v2351_v1 = vand.u32 2147483648, %v5081_v62  ;;  %v2365_v53 = vcvt.s32.f32 %v2364_v47  ;;  %v5974_v45 = vor.u32 %v2335_v57, %v2334_v44 }
 0x10e   : > { %v2354_v0 = vand.u32 2147483647, %v5088_v3  ;;  %v2359_v63 = vand.u32 2147483648, %v5088_v3  ;;  %v2380_v54 = vcvt.f32.s32 %v5097_v6  ;;  %v5979_v27 = vor.u32 %v2343_v30, %v2342_v42 }
 0x10f   : > { %v2358_v19 = vand.u32 2147483647, %v2357_v18  ;;  %v2362_v38 = vand.u32 2147483647, %v5091_v4  ;;  %v2388_v7 = vcvt.f32.s32 %v5104_v11  ;;  %v2367_v31 = vand.u32 2147483648, %v5091_v4 }
 0x110   : > { %14504 = vst [vmem:[#allocation216_spill] sm:$0xff] %v5979_v27  ;;  %v2370_v36 = vand.u32 2147483647, %v5094_v5  ;;  %v2373_v47 = vcvt.s32.f32 %v2372_v8  ;;  %v2396_v44 = vcvt.f32.s32 %v5107_v12  ;;  %v5986_v57 = vor.u32 %v2351_v1, %v2350_v43 }
 0x111   : > { %v2366_v59 = vand.u32 2147483647, %v2365_v53  ;;  %v2378_v33 = vand.u32 2147483647, %v5097_v6  ;;  %v2404_v42 = vcvt.f32.s32 %v5110_v13  ;;  %vm5994_vm15 = vcmp.lt.f32.partialorder %v2346_v39, 8388608.0 }
 0x112   : > { %14505 = vst [vmem:[#allocation217_spill] sm:$0xff] %v5986_v57  ;;  %v14506_v18 = vmov 0  ;;  %vm5998_vm14 = vcmp.lt.f32.partialorder %v2354_v0, 8388608.0  ;;  %v14509_v8 = vmov 0  ;;  %v2381_v43 = vcvt.s32.f32 %v2380_v54 }
 0x113   : > { %v14507_v18 = vsel %vm5994_vm15, 4294967295, %v14506_v18  ;;  %v14510_v8 = vsel %vm5998_vm14, 4294967295, %v14509_v8  ;;  %v6006_v1 = vor.u32 %v2359_v63, %v2358_v19  ;;  %vm6008_vm13 = vcmp.lt.f32.partialorder %v2362_v38, 8388608.0 }
 0x114   : > { %14508 = vst [vmem:[#allocation218_spill] sm:$0xff] %v14507_v18  ;;  %v14513_v52 = vmov 0  ;;  %v2389_v39 = vcvt.s32.f32 %v2388_v7  ;;  %vm6012_vm0 = vcmp.lt.f32.partialorder %v2370_v36, 8388608.0  ;;  %v14516_v30 = vmov 0 }
 0x115   : > { %14511 = vst [vmem:[#allocation219_spill] sm:$0xff] %v14510_v8  ;;  %v14514_v52 = vsel %vm6008_vm13, 4294967295, %v14513_v52  ;;  %v14517_v30 = vsel %vm6012_vm0, 4294967295, %v14516_v30  ;;  %v2374_v0 = vand.u32 2147483647, %v2373_v47  ;;  %v2375_v60 = vand.u32 2147483648, %v5094_v5 }
 0x116   : > { %14512 = vst [vmem:[#allocation220_spill] sm:$0xff] %v6006_v1  ;;  %v2397_v54 = vcvt.s32.f32 %v2396_v44  ;;  %v6021_v19 = vor.u32 %v2367_v31, %v2366_v59  ;;  %vm6023_vm12 = vcmp.lt.f32.partialorder %v2378_v33, 8388608.0  ;;  %v14519_v38 = vmov 0 }
 0x117   : > { %14515 = vst [vmem:[#allocation221_spill] sm:$0xff] %v14514_v52  ;;  %v14520_v38 = vsel %vm6023_vm12, 4294967295, %v14519_v38  ;;  %v2405_v7 = vcvt.s32.f32 %v2404_v42  ;;  %v2382_v63 = vand.u32 2147483647, %v2381_v43  ;;  %v2383_v36 = vand.u32 2147483648, %v5097_v6 }
 0x118   : > { %14518 = vst [vmem:[#allocation222_spill] sm:$0xff] %v14517_v30  ;;  %v2386_v47 = vand.u32 2147483647, %v5104_v11  ;;  %v2412_v61 = vcvt.f32.s32 %v5113_v14  ;;  %v2390_v53 = vand.u32 2147483647, %v2389_v39  ;;  %v2391_v59 = vand.u32 2147483648, %v5104_v11 }
 0x119   : > { %14521 = vst [vmem:[#allocation223_spill] sm:$0xff] %v14520_v38  ;;  %v2420_v33 = vcvt.f32.s32 %v5120_v20  ;;  %v6036_v31 = vor.u32 %v2375_v60, %v2374_v0  ;;  %v2394_v42 = vand.u32 2147483647, %v5107_v12  ;;  %v2398_v43 = vand.u32 2147483647, %v2397_v54  ;;  %v14542_v39 = vld [vmem:[#allocation35_spill] sm:$0xff] }
 0x11a   : > { %v2399_v62 = vand.u32 2147483648, %v5107_v12  ;;  %v2402_v57 = vand.u32 2147483647, %v5110_v13  ;;  %v2406_v18 = vand.u32 2147483647, %v2405_v7  ;;  %v2407_v27 = vand.u32 2147483648, %v5110_v13 }
 0x11b   : > { %14522 = vst [vmem:[#allocation224_spill] sm:$0xff] %v6036_v31  ;;  %v2428_v8 = vcvt.f32.s32 %v5123_v21  ;;  %v6047_v44 = vor.u32 %v2383_v36, %v2382_v63  ;;  %v2410_v60 = vand.u32 2147483647, %v5113_v14  ;;  %v2413_v0 = vcvt.s32.f32 %v2412_v61  ;;  %v14544_v12 = vld [vmem:[#allocation36_spill] sm:$0xff]  ;;  %v14546_v38 = vld [vmem:[#allocation37_spill] sm:$0xff]  ;;  %v14549_v31 = vld [vmem:[#allocation39_spill] sm:$0xff] }
 0x11c   : > { %vm6050_vm14 = vcmp.lt.f32.partialorder %v2386_v47, 8388608.0  ;;  %v14524_v54 = vmov 0  ;;  %v6054_v3 = vor.u32 %v2391_v59, %v2390_v53  ;;  %v2421_v7 = vcvt.s32.f32 %v2420_v33 }
 0x11d   : > { %14523 = vst [vmem:[#allocation225_spill] sm:$0xff] %v6047_v44  ;;  %v14525_v54 = vsel %vm6050_vm14, 4294967295, %v14524_v54  ;;  %v2436_v1 = vcvt.f32.s32 %v5126_v22  ;;  %vm6061_vm13 = vcmp.lt.f32.partialorder %v2394_v42, 8388608.0  ;;  %v14528_v63 = vmov 0 }
 0x11e   : > { %14526 = vst [vmem:[#allocation226_spill] sm:$0xff] %v14525_v54  ;;  %v14529_v63 = vsel %vm6061_vm13, 4294967295, %v14528_v63  ;;  %v6065_v36 = vor.u32 %v2399_v62, %v2398_v43  ;;  %v2418_v61 = vand.u32 2147483647, %v5120_v20  ;;  %vm6068_vm15 = vcmp.lt.f32.partialorder %v2402_v57, 8388608.0 }
 0x11f   : > { %14527 = vst [vmem:[#allocation227_spill] sm:$0xff] %v6054_v3  ;;  %v14532_v47 = vmov 0  ;;  %v6072_v53 = vor.u32 %v2407_v27, %v2406_v18  ;;  %v2429_v59 = vcvt.s32.f32 %v2428_v8  ;;  %v2444_v33 = vcvt.f32.s32 %v5129_v23 }
 0x120   : > { %14530 = vst [vmem:[#allocation228_spill] sm:$0xff] %v14529_v63  ;;  %v14533_v47 = vsel %vm6068_vm15, 4294967295, %v14532_v47  ;;  %vm6079_vm0 = vcmp.lt.f32.partialorder %v2410_v60, 8388608.0  ;;  %v14536_v52 = vmov 0  ;;  %v2414_v62 = vand.u32 2147483647, %v2413_v0 }
 0x121   : > { %14531 = vst [vmem:[#allocation229_spill] sm:$0xff] %v6065_v36  ;;  %v14537_v52 = vsel %vm6079_vm0, 4294967295, %v14536_v52  ;;  %v2415_v57 = vand.u32 2147483648, %v5113_v14  ;;  %v2422_v18 = vand.u32 2147483647, %v2421_v7  ;;  %v2423_v8 = vand.u32 2147483648, %v5120_v20 }
 0x122   : > { %14534 = vst [vmem:[#allocation230_spill] sm:$0xff] %v14533_v47  ;;  %v2437_v43 = vcvt.s32.f32 %v2436_v1  ;;  %vm6093_vm12 = vcmp.lt.f32.partialorder %v2418_v61, 8388608.0  ;;  %v14539_v42 = vmov 0  ;;  %v2426_v0 = vand.u32 2147483647, %v5123_v21  ;;  %v14567_v20 = vld [vmem:[#allocation40_spill] sm:$0xff] }
 0x123   : > { %14535 = vst [vmem:[#allocation231_spill] sm:$0xff] %v6072_v53  ;;  %v14540_v42 = vsel %vm6093_vm12, 4294967295, %v14539_v42  ;;  %v2452_v6 = vcvt.f32.s32 %v14542_v39  ;;  %v2430_v27 = vand.u32 2147483647, %v2429_v59  ;;  %v2431_v1 = vand.u32 2147483648, %v5123_v21 }
 0x124   : > { %14538 = vst [vmem:[#allocation232_spill] sm:$0xff] %v14537_v52  ;;  %v2445_v11 = vcvt.s32.f32 %v2444_v33  ;;  %v6104_v3 = vor.u32 %v2415_v57, %v2414_v62  ;;  %v2434_v61 = vand.u32 2147483647, %v5126_v22  ;;  %v2439_v60 = vand.u32 2147483648, %v5126_v22  ;;  %v14547_v62 = vld [vmem:[#allocation38_spill] sm:$0xff] }
 0x125   : > { %14541 = vst [vmem:[#allocation233_spill] sm:$0xff] %v14540_v42  ;;  %v2460_v36 = vcvt.f32.s32 %v14544_v12  ;;  %v6109_v63 = vor.u32 %v2423_v8, %v2422_v18  ;;  %v2438_v54 = vand.u32 2147483647, %v2437_v43  ;;  %v2442_v44 = vand.u32 2147483647, %v5129_v23  ;;  %v14570_v52 = vld [vmem:[#allocation42_spill] sm:$0xff] }
 0x126   : > { %14543 = vst [vmem:[#allocation234_spill] sm:$0xff] %v6104_v3  ;;  %v2468_v47 = vcvt.f32.s32 %v14546_v38  ;;  %v2447_v59 = vand.u32 2147483648, %v5129_v23  ;;  %v2450_v7 = vand.u32 2147483647, %v14542_v39  ;;  %v2453_v33 = vcvt.s32.f32 %v2452_v6 }
 0x127   : > { %14545 = vst [vmem:[#allocation235_spill] sm:$0xff] %v6109_v63  ;;  %v2476_v57 = vcvt.f32.s32 %v14547_v62  ;;  %v6116_v13 = vor.u32 %v2431_v1, %v2430_v27  ;;  %v2446_v53 = vand.u32 2147483647, %v2445_v11  ;;  %v2458_v5 = vand.u32 2147483647, %v14544_v12 }
 0x128   : > { %v2484_v18 = vcvt.f32.s32 %v14549_v31  ;;  %vm6124_vm15 = vcmp.lt.f32.partialorder %v2426_v0, 8388608.0  ;;  %v14550_v43 = vmov 0  ;;  %vm6128_vm13 = vcmp.lt.f32.partialorder %v2434_v61, 8388608.0 }
 0x129   : > { %14548 = vst [vmem:[#allocation236_spill] sm:$0xff] %v6116_v13  ;;  %v14551_v43 = vsel %vm6124_vm15, 4294967295, %v14550_v43  ;;  %v14553_v6 = vmov 0  ;;  %v2461_v27 = vcvt.s32.f32 %v2460_v36  ;;  %v6136_v1 = vor.u32 %v2439_v60, %v2438_v54 }
 0x12a   : > { %14552 = vst [vmem:[#allocation237_spill] sm:$0xff] %v14551_v43  ;;  %v14554_v6 = vsel %vm6128_vm13, 4294967295, %v14553_v6  ;;  %vm6138_vm14 = vcmp.lt.f32.partialorder %v2442_v44, 8388608.0  ;;  %v14557_v30 = vmov 0  ;;  %v2469_v0 = vcvt.s32.f32 %v2468_v47 }
 0x12b   : > { %14555 = vst [vmem:[#allocation238_spill] sm:$0xff] %v14554_v6  ;;  %v14558_v30 = vsel %vm6138_vm14, 4294967295, %v14557_v30  ;;  %vm6142_vm0 = vcmp.lt.f32.partialorder %v2450_v7, 8388608.0  ;;  %v14560_v8 = vmov 0  ;;  %v2454_v61 = vand.u32 2147483647, %v2453_v33 }
 0x12c   : > { %14556 = vst [vmem:[#allocation239_spill] sm:$0xff] %v6136_v1  ;;  %v14561_v8 = vsel %vm6142_vm0, 4294967295, %v14560_v8  ;;  %v2455_v14 = vand.u32 2147483648, %v14542_v39  ;;  %v2477_v36 = vcvt.s32.f32 %v2476_v57  ;;  %v6151_v54 = vor.u32 %v2447_v59, %v2446_v53  ;;  %v14576_v1 = vld [vmem:[#allocation43_spill] sm:$0xff] }
 0x12d   : > { %14559 = vst [vmem:[#allocation240_spill] sm:$0xff] %v14558_v30  ;;  %vm6153_vm12 = vcmp.lt.f32.partialorder %v2458_v5, 8388608.0  ;;  %v14564_v44 = vmov 0  ;;  %v2485_v47 = vcvt.s32.f32 %v2484_v18  ;;  %v2462_v60 = vand.u32 2147483647, %v2461_v27  ;;  %v14568_v5 = vld [vmem:[#allocation41_spill] sm:$0xff] }
 0x12e   : > { %14562 = vst [vmem:[#allocation241_spill] sm:$0xff] %v14561_v8  ;;  %v14565_v44 = vsel %vm6153_vm12, 4294967295, %v14564_v44  ;;  %v2463_v7 = vand.u32 2147483648, %v14544_v12  ;;  %v2466_v33 = vand.u32 2147483647, %v14546_v38  ;;  %v2492_v63 = vcvt.f32.s32 %v14567_v20  ;;  %v14592_v12 = vld [vmem:[#allocation45_spill] sm:$0xff] }
 0x12f   : > { %14563 = vst [vmem:[#allocation242_spill] sm:$0xff] %v6151_v54  ;;  %v2470_v11 = vand.u32 2147483647, %v2469_v0  ;;  %v2471_v53 = vand.u32 2147483648, %v14546_v38  ;;  %v2500_v59 = vcvt.f32.s32 %v14568_v5  ;;  %v6166_v21 = vor.u32 %v2455_v14, %v2454_v61  ;;  %v14596_v39 = vld [vmem:[#allocation47_spill] sm:$0xff]  ;;  %v14599_v8 = vld [vmem:[#allocation49_spill] sm:$0xff] }
 0x130   : > { %14566 = vst [vmem:[#allocation243_spill] sm:$0xff] %v14565_v44  ;;  %v2474_v18 = vand.u32 2147483647, %v14547_v62  ;;  %v2478_v27 = vand.u32 2147483647, %v2477_v36  ;;  %v2479_v13 = vand.u32 2147483648, %v14547_v62  ;;  %v2508_v6 = vcvt.f32.s32 %v14570_v52 }
 0x131   : > { %14569 = vst [vmem:[#allocation244_spill] sm:$0xff] %v6166_v21  ;;  %v2482_v43 = vand.u32 2147483647, %v14549_v31  ;;  %v2486_v42 = vand.u32 2147483647, %v2485_v47  ;;  %v2487_v3 = vand.u32 2147483648, %v14549_v31  ;;  %v6177_v57 = vor.u32 %v2463_v7, %v2462_v60 }
 0x132   : > { %v2490_v14 = vand.u32 2147483647, %v14567_v20  ;;  %v2493_v61 = vcvt.s32.f32 %v2492_v63  ;;  %vm6180_vm13 = vcmp.lt.f32.partialorder %v2466_v33, 8388608.0  ;;  %v14572_v36 = vmov 0  ;;  %v14594_v62 = vld [vmem:[#allocation46_spill] sm:$0xff] }
 0x133   : > { %14571 = vst [vmem:[#allocation245_spill] sm:$0xff] %v6177_v57  ;;  %v14573_v36 = vsel %vm6180_vm13, 4294967295, %v14572_v36  ;;  %v6184_v22 = vor.u32 %v2471_v53, %v2470_v11  ;;  %v2501_v47 = vcvt.s32.f32 %v2500_v59  ;;  %v2516_v4 = vcvt.f32.s32 %v14576_v1  ;;  %v14585_v59 = vld [vmem:[#allocation44_spill] sm:$0xff] }
 0x134   : > { %14574 = vst [vmem:[#allocation246_spill] sm:$0xff] %v14573_v36  ;;  %vm6191_vm14 = vcmp.lt.f32.partialorder %v2474_v18, 8388608.0  ;;  %v14577_v60 = vmov 0  ;;  %v6195_v7 = vor.u32 %v2479_v13, %v2478_v27  ;;  %v2498_v63 = vand.u32 2147483647, %v14568_v5 }
 0x135   : > { %14575 = vst [vmem:[#allocation247_spill] sm:$0xff] %v6184_v22  ;;  %v14578_v60 = vsel %vm6191_vm14, 4294967295, %v14577_v60  ;;  %vm6198_vm15 = vcmp.lt.f32.partialorder %v2482_v43, 8388608.0  ;;  %v14581_v33 = vmov 0  ;;  %v6202_v11 = vor.u32 %v2487_v3, %v2486_v42 }
 0x136   : > { %14579 = vst [vmem:[#allocation248_spill] sm:$0xff] %v14578_v60  ;;  %v14582_v33 = vsel %vm6198_vm15, 4294967295, %v14581_v33  ;;  %v2509_v53 = vcvt.s32.f32 %v2508_v6  ;;  %v2524_v0 = vcvt.f32.s32 %v14585_v59  ;;  %vm6209_vm0 = vcmp.lt.f32.partialorder %v2490_v14, 8388608.0 }
 0x137   : > { %14580 = vst [vmem:[#allocation249_spill] sm:$0xff] %v6195_v7  ;;  %v14586_v30 = vmov 0  ;;  %v2494_v13 = vand.u32 2147483647, %v2493_v61  ;;  %v2495_v43 = vand.u32 2147483648, %v14567_v20  ;;  %v2503_v6 = vand.u32 2147483648, %v14568_v5 }
 0x138   : > { %14583 = vst [vmem:[#allocation250_spill] sm:$0xff] %v14582_v33  ;;  %v14587_v30 = vsel %vm6209_vm0, 4294967295, %v14586_v30  ;;  %v2502_v42 = vand.u32 2147483647, %v2501_v47  ;;  %v2517_v27 = vcvt.s32.f32 %v2516_v4  ;;  %vm6223_vm12 = vcmp.lt.f32.partialorder %v2498_v63, 8388608.0  ;;  %v14617_v5 = vld [vmem:[#allocation50_spill] sm:$0xff] }
 0x139   : > { %14584 = vst [vmem:[#allocation251_spill] sm:$0xff] %v6202_v11  ;;  %v14589_v18 = vmov 0  ;;  %v2506_v61 = vand.u32 2147483647, %v14570_v52  ;;  %v2532_v57 = vcvt.f32.s32 %v14592_v12  ;;  %v2510_v3 = vand.u32 2147483647, %v2509_v53 }
 0x13a   : > { %14588 = vst [vmem:[#allocation252_spill] sm:$0xff] %v14587_v30  ;;  %v14590_v18 = vsel %vm6223_vm12, 4294967295, %v14589_v18  ;;  %v2511_v4 = vand.u32 2147483648, %v14570_v52  ;;  %v2525_v38 = vcvt.s32.f32 %v2524_v0  ;;  %v6234_v22 = vor.u32 %v2495_v43, %v2494_v13  ;;  %v14597_v13 = vld [vmem:[#allocation48_spill] sm:$0xff] }
 0x13b   : > { %14591 = vst [vmem:[#allocation253_spill] sm:$0xff] %v14590_v18  ;;  %v2514_v63 = vand.u32 2147483647, %v14576_v1  ;;  %v2519_v14 = vand.u32 2147483648, %v14576_v1  ;;  %v2540_v7 = vcvt.f32.s32 %v14594_v62  ;;  %v6239_v60 = vor.u32 %v2503_v6, %v2502_v42  ;;  %v14620_v30 = vld [vmem:[#allocation52_spill] sm:$0xff] }
 0x13c   : > { %14593 = vst [vmem:[#allocation254_spill] sm:$0xff] %v6234_v22  ;;  %v2518_v36 = vand.u32 2147483647, %v2517_v27  ;;  %v2522_v44 = vand.u32 2147483647, %v14585_v59  ;;  %v2548_v33 = vcvt.f32.s32 %v14596_v39  ;;  %v2527_v53 = vand.u32 2147483648, %v14585_v59 }
 0x13d   : > { %14595 = vst [vmem:[#allocation255_spill] sm:$0xff] %v6239_v60  ;;  %v2530_v47 = vand.u32 2147483647, %v14592_v12  ;;  %v2533_v0 = vcvt.s32.f32 %v2532_v57  ;;  %v2556_v43 = vcvt.f32.s32 %v14597_v13  ;;  %v6246_v31 = vor.u32 %v2511_v4, %v2510_v3 }
 0x13e   : > { %v2526_v11 = vand.u32 2147483647, %v2525_v38  ;;  %v2538_v21 = vand.u32 2147483647, %v14594_v62  ;;  %v2564_v42 = vcvt.f32.s32 %v14599_v8  ;;  %vm6254_vm15 = vcmp.lt.f32.partialorder %v2506_v61, 8388608.0 }
 0x13f   : > { %14598 = vst [vmem:[#allocation256_spill] sm:$0xff] %v6246_v31  ;;  %v14600_v27 = vmov 0  ;;  %vm6258_vm14 = vcmp.lt.f32.partialorder %v2514_v63, 8388608.0  ;;  %v14603_v57 = vmov 0  ;;  %v2541_v3 = vcvt.s32.f32 %v2540_v7 }
 0x140   : > { %v14601_v27 = vsel %vm6254_vm15, 4294967295, %v14600_v27  ;;  %v14604_v57 = vsel %vm6258_vm14, 4294967295, %v14603_v57  ;;  %v6266_v4 = vor.u32 %v2519_v14, %v2518_v36  ;;  %vm6268_vm13 = vcmp.lt.f32.partialorder %v2522_v44, 8388608.0 }
 0x141   : > { %14602 = vst [vmem:[#allocation257_spill] sm:$0xff] %v14601_v27  ;;  %v14607_v23 = vmov 0  ;;  %v2549_v61 = vcvt.s32.f32 %v2548_v33  ;;  %vm6272_vm0 = vcmp.lt.f32.partialorder %v2530_v47, 8388608.0  ;;  %v14610_v6 = vmov 0 }
 0x142   : > { %14605 = vst [vmem:[#allocation258_spill] sm:$0xff] %v14604_v57  ;;  %v14608_v23 = vsel %vm6268_vm13, 4294967295, %v14607_v23  ;;  %v14611_v6 = vsel %vm6272_vm0, 4294967295, %v14610_v6  ;;  %v2534_v63 = vand.u32 2147483647, %v2533_v0  ;;  %v2535_v20 = vand.u32 2147483648, %v14592_v12 }
 0x143   : > { %14606 = vst [vmem:[#allocation259_spill] sm:$0xff] %v6266_v4  ;;  %v2557_v7 = vcvt.s32.f32 %v2556_v43  ;;  %v6281_v36 = vor.u32 %v2527_v53, %v2526_v11  ;;  %vm6283_vm12 = vcmp.lt.f32.partialorder %v2538_v21, 8388608.0  ;;  %v14614_v44 = vmov 0  ;;  %v14618_v21 = vld [vmem:[#allocation51_spill] sm:$0xff]  ;;  %v14626_v4 = vld [vmem:[#allocation53_spill] sm:$0xff] }
 0x144   : > { %14609 = vst [vmem:[#allocation260_spill] sm:$0xff] %v14608_v23  ;;  %v14615_v44 = vsel %vm6283_vm12, 4294967295, %v14614_v44  ;;  %v2565_v33 = vcvt.s32.f32 %v2564_v42  ;;  %v2542_v14 = vand.u32 2147483647, %v2541_v3  ;;  %v2543_v47 = vand.u32 2147483648, %v14594_v62  ;;  %v14642_v62 = vld [vmem:[#allocation55_spill] sm:$0xff] }
 0x145   : > { %14612 = vst [vmem:[#allocation261_spill] sm:$0xff] %v14611_v6  ;;  %v2546_v0 = vand.u32 2147483647, %v14596_v39  ;;  %v2572_v60 = vcvt.f32.s32 %v14617_v5  ;;  %v2550_v38 = vand.u32 2147483647, %v2549_v61  ;;  %v2551_v11 = vand.u32 2147483648, %v14596_v39 }
 0x146   : > { %14613 = vst [vmem:[#allocation262_spill] sm:$0xff] %v6281_v36  ;;  %v2580_v53 = vcvt.f32.s32 %v14618_v21  ;;  %v6296_v52 = vor.u32 %v2535_v20, %v2534_v63  ;;  %v2554_v42 = vand.u32 2147483647, %v14597_v13  ;;  %v2558_v3 = vand.u32 2147483647, %v2557_v7  ;;  %v14646_v12 = vld [vmem:[#allocation57_spill] sm:$0xff] }
 0x147   : > { %14616 = vst [vmem:[#allocation263_spill] sm:$0xff] %v14615_v44  ;;  %v2559_v31 = vand.u32 2147483648, %v14597_v13  ;;  %v2562_v27 = vand.u32 2147483647, %v14599_v8  ;;  %v2566_v18 = vand.u32 2147483647, %v2565_v33  ;;  %v2588_v57 = vcvt.f32.s32 %v14620_v30 }
 0x148   : > { %14619 = vst [vmem:[#allocation264_spill] sm:$0xff] %v6296_v52  ;;  %v2567_v22 = vand.u32 2147483648, %v14599_v8  ;;  %v6307_v43 = vor.u32 %v2543_v47, %v2542_v14  ;;  %v2570_v20 = vand.u32 2147483647, %v14617_v5  ;;  %v2573_v63 = vcvt.s32.f32 %v2572_v60  ;;  %v14644_v13 = vld [vmem:[#allocation56_spill] sm:$0xff]  ;;  %v14649_v6 = vld [vmem:[#allocation59_spill] sm:$0xff] }
 0x149   : > { %vm6310_vm14 = vcmp.lt.f32.partialorder %v2546_v0, 8388608.0  ;;  %v14622_v7 = vmov 0  ;;  %v6314_v1 = vor.u32 %v2551_v11, %v2550_v38  ;;  %v2581_v33 = vcvt.s32.f32 %v2580_v53  ;;  %v14635_v53 = vld [vmem:[#allocation54_spill] sm:$0xff] }
 0x14a   : > { %14621 = vst [vmem:[#allocation265_spill] sm:$0xff] %v6307_v43  ;;  %v14623_v7 = vsel %vm6310_vm14, 4294967295, %v14622_v7  ;;  %v2596_v54 = vcvt.f32.s32 %v14626_v4  ;;  %vm6321_vm13 = vcmp.lt.f32.partialorder %v2554_v42, 8388608.0  ;;  %v14627_v14 = vmov 0 }
 0x14b   : > { %14624 = vst [vmem:[#allocation266_spill] sm:$0xff] %v14623_v7  ;;  %v14628_v14 = vsel %vm6321_vm13, 4294967295, %v14627_v14  ;;  %v6325_v47 = vor.u32 %v2559_v31, %v2558_v3  ;;  %v2578_v60 = vand.u32 2147483647, %v14618_v21  ;;  %vm6328_vm15 = vcmp.lt.f32.partialorder %v2562_v27, 8388608.0 }
 0x14c   : > { %14625 = vst [vmem:[#allocation267_spill] sm:$0xff] %v6314_v1  ;;  %v14631_v0 = vmov 0  ;;  %v6332_v38 = vor.u32 %v2567_v22, %v2566_v18  ;;  %v2589_v11 = vcvt.s32.f32 %v2588_v57  ;;  %v2604_v61 = vcvt.f32.s32 %v14635_v53 }
 0x14d   : > { %14629 = vst [vmem:[#allocation268_spill] sm:$0xff] %v14628_v14  ;;  %v14632_v0 = vsel %vm6328_vm15, 4294967295, %v14631_v0  ;;  %vm6339_vm0 = vcmp.lt.f32.partialorder %v2570_v20, 8388608.0  ;;  %v14636_v23 = vmov 0  ;;  %v2574_v31 = vand.u32 2147483647, %v2573_v63 }
 0x14e   : > { %14630 = vst [vmem:[#allocation269_spill] sm:$0xff] %v6325_v47  ;;  %v14637_v23 = vsel %vm6339_vm0, 4294967295, %v14636_v23  ;;  %v2575_v27 = vand.u32 2147483648, %v14617_v5  ;;  %v2582_v18 = vand.u32 2147483647, %v2581_v33  ;;  %v2583_v57 = vand.u32 2147483648, %v14618_v21 }
 0x14f   : > { %14633 = vst [vmem:[#allocation270_spill] sm:$0xff] %v14632_v0  ;;  %v2597_v3 = vcvt.s32.f32 %v2596_v54  ;;  %vm6353_vm12 = vcmp.lt.f32.partialorder %v2578_v60, 8388608.0  ;;  %v14639_v42 = vmov 0  ;;  %v2586_v63 = vand.u32 2147483647, %v14620_v30  ;;  %v14667_v21 = vld [vmem:[#allocation60_spill] sm:$0xff] }
 0x150   : > { %14634 = vst [vmem:[#allocation271_spill] sm:$0xff] %v6332_v38  ;;  %v14640_v42 = vsel %vm6353_vm12, 4294967295, %v14639_v42  ;;  %v2612_v43 = vcvt.f32.s32 %v14642_v62  ;;  %v2590_v22 = vand.u32 2147483647, %v2589_v11  ;;  %v2591_v54 = vand.u32 2147483648, %v14620_v30 }
 0x151   : > { %14638 = vst [vmem:[#allocation272_spill] sm:$0xff] %v14637_v23  ;;  %v2605_v39 = vcvt.s32.f32 %v2604_v61  ;;  %v6364_v1 = vor.u32 %v2575_v27, %v2574_v31  ;;  %v2594_v60 = vand.u32 2147483647, %v14626_v4  ;;  %v2599_v20 = vand.u32 2147483648, %v14626_v4  ;;  %v14647_v31 = vld [vmem:[#allocation58_spill] sm:$0xff] }
 0x152   : > { %14641 = vst [vmem:[#allocation273_spill] sm:$0xff] %v14640_v42  ;;  %v2620_v47 = vcvt.f32.s32 %v14644_v13  ;;  %v6369_v14 = vor.u32 %v2583_v57, %v2582_v18  ;;  %v2598_v7 = vand.u32 2147483647, %v2597_v3  ;;  %v2602_v44 = vand.u32 2147483647, %v14635_v53  ;;  %v14670_v23 = vld [vmem:[#allocation62_spill] sm:$0xff] }
 0x153   : > { %14643 = vst [vmem:[#allocation274_spill] sm:$0xff] %v6364_v1  ;;  %v2628_v0 = vcvt.f32.s32 %v14646_v12  ;;  %v2607_v11 = vand.u32 2147483648, %v14635_v53  ;;  %v2610_v33 = vand.u32 2147483647, %v14642_v62  ;;  %v2613_v61 = vcvt.s32.f32 %v2612_v43 }
 0x154   : > { %14645 = vst [vmem:[#allocation275_spill] sm:$0xff] %v6369_v14  ;;  %v2636_v27 = vcvt.f32.s32 %v14647_v31  ;;  %v6376_v8 = vor.u32 %v2591_v54, %v2590_v22  ;;  %v2606_v38 = vand.u32 2147483647, %v2605_v39  ;;  %v2618_v52 = vand.u32 2147483647, %v14644_v13 }
 0x155   : > { %v2644_v18 = vcvt.f32.s32 %v14649_v6  ;;  %vm6384_vm15 = vcmp.lt.f32.partialorder %v2586_v63, 8388608.0  ;;  %v14650_v3 = vmov 0  ;;  %vm6388_vm13 = vcmp.lt.f32.partialorder %v2594_v60, 8388608.0 }
 0x156   : > { %14648 = vst [vmem:[#allocation276_spill] sm:$0xff] %v6376_v8  ;;  %v14651_v3 = vsel %vm6384_vm15, 4294967295, %v14650_v3  ;;  %v14653_v43 = vmov 0  ;;  %v2621_v22 = vcvt.s32.f32 %v2620_v47  ;;  %v6396_v54 = vor.u32 %v2599_v20, %v2598_v7 }
 0x157   : > { %14652 = vst [vmem:[#allocation277_spill] sm:$0xff] %v14651_v3  ;;  %v14654_v43 = vsel %vm6388_vm13, 4294967295, %v14653_v43  ;;  %vm6398_vm14 = vcmp.lt.f32.partialorder %v2602_v44, 8388608.0  ;;  %v14657_v59 = vmov 0  ;;  %v2629_v63 = vcvt.s32.f32 %v2628_v0 }
 0x158   : > { %14655 = vst [vmem:[#allocation278_spill] sm:$0xff] %v14654_v43  ;;  %v14658_v59 = vsel %vm6398_vm14, 4294967295, %v14657_v59  ;;  %vm6402_vm0 = vcmp.lt.f32.partialorder %v2610_v33, 8388608.0  ;;  %v14660_v57 = vmov 0  ;;  %v2614_v60 = vand.u32 2147483647, %v2613_v61 }
 0x159   : > { %14656 = vst [vmem:[#allocation279_spill] sm:$0xff] %v6396_v54  ;;  %v14661_v57 = vsel %vm6402_vm0, 4294967295, %v14660_v57  ;;  %v2615_v5 = vand.u32 2147483648, %v14642_v62  ;;  %v2637_v47 = vcvt.s32.f32 %v2636_v27  ;;  %v6411_v7 = vor.u32 %v2607_v11, %v2606_v38  ;;  %v14676_v54 = vld [vmem:[#allocation63_spill] sm:$0xff] }
 0x15a   : > { %14659 = vst [vmem:[#allocation280_spill] sm:$0xff] %v14658_v59  ;;  %vm6413_vm12 = vcmp.lt.f32.partialorder %v2618_v52, 8388608.0  ;;  %v14664_v44 = vmov 0  ;;  %v2645_v0 = vcvt.s32.f32 %v2644_v18  ;;  %v2622_v20 = vand.u32 2147483647, %v2621_v22  ;;  %v14668_v52 = vld [vmem:[#allocation61_spill] sm:$0xff] }
 0x15b   : > { %14662 = vst [vmem:[#allocation281_spill] sm:$0xff] %v14661_v57  ;;  %v14665_v44 = vsel %vm6413_vm12, 4294967295, %v14664_v44  ;;  %v2623_v33 = vand.u32 2147483648, %v14644_v13  ;;  %v2626_v61 = vand.u32 2147483647, %v14646_v12  ;;  %v2652_v14 = vcvt.f32.s32 %v14667_v21  ;;  %v14692_v13 = vld [vmem:[#allocation65_spill] sm:$0xff] }
 0x15c   : > { %14663 = vst [vmem:[#allocation282_spill] sm:$0xff] %v6411_v7  ;;  %v2630_v39 = vand.u32 2147483647, %v2629_v63  ;;  %v2631_v38 = vand.u32 2147483648, %v14646_v12  ;;  %v2660_v11 = vcvt.f32.s32 %v14668_v52  ;;  %v6426_v30 = vor.u32 %v2615_v5, %v2614_v60  ;;  %v14696_v62 = vld [vmem:[#allocation67_spill] sm:$0xff]  ;;  %v14699_v57 = vld [vmem:[#allocation69_spill] sm:$0xff] }
 0x15d   : > { %14666 = vst [vmem:[#allocation283_spill] sm:$0xff] %v14665_v44  ;;  %v2634_v18 = vand.u32 2147483647, %v14647_v31  ;;  %v2638_v22 = vand.u32 2147483647, %v2637_v47  ;;  %v2639_v8 = vand.u32 2147483648, %v14647_v31  ;;  %v2668_v43 = vcvt.f32.s32 %v14670_v23 }
 0x15e   : > { %14669 = vst [vmem:[#allocation284_spill] sm:$0xff] %v6426_v30  ;;  %v2642_v3 = vand.u32 2147483647, %v14649_v6  ;;  %v2646_v42 = vand.u32 2147483647, %v2645_v0  ;;  %v2647_v1 = vand.u32 2147483648, %v14649_v6  ;;  %v6437_v27 = vor.u32 %v2623_v33, %v2622_v20 }
 0x15f   : > { %v2650_v5 = vand.u32 2147483647, %v14667_v21  ;;  %v2653_v60 = vcvt.s32.f32 %v2652_v14  ;;  %vm6440_vm13 = vcmp.lt.f32.partialorder %v2626_v61, 8388608.0  ;;  %v14672_v47 = vmov 0  ;;  %v14694_v31 = vld [vmem:[#allocation66_spill] sm:$0xff] }
 0x160   : > { %14671 = vst [vmem:[#allocation285_spill] sm:$0xff] %v6437_v27  ;;  %v14673_v47 = vsel %vm6440_vm13, 4294967295, %v14672_v47  ;;  %v6444_v4 = vor.u32 %v2631_v38, %v2630_v39  ;;  %v2661_v0 = vcvt.s32.f32 %v2660_v11  ;;  %v2676_v36 = vcvt.f32.s32 %v14676_v54  ;;  %v14685_v11 = vld [vmem:[#allocation64_spill] sm:$0xff] }
 0x161   : > { %14674 = vst [vmem:[#allocation286_spill] sm:$0xff] %v14673_v47  ;;  %vm6451_vm14 = vcmp.lt.f32.partialorder %v2634_v18, 8388608.0  ;;  %v14677_v20 = vmov 0  ;;  %v6455_v33 = vor.u32 %v2639_v8, %v2638_v22  ;;  %v2658_v14 = vand.u32 2147483647, %v14668_v52 }
 0x162   : > { %14675 = vst [vmem:[#allocation287_spill] sm:$0xff] %v6444_v4  ;;  %v14678_v20 = vsel %vm6451_vm14, 4294967295, %v14677_v20  ;;  %vm6458_vm15 = vcmp.lt.f32.partialorder %v2642_v3, 8388608.0  ;;  %v14681_v61 = vmov 0  ;;  %v6462_v39 = vor.u32 %v2647_v1, %v2646_v42 }
 0x163   : > { %14679 = vst [vmem:[#allocation288_spill] sm:$0xff] %v14678_v20  ;;  %v14682_v61 = vsel %vm6458_vm15, 4294967295, %v14681_v61  ;;  %v2669_v38 = vcvt.s32.f32 %v2668_v43  ;;  %v2684_v63 = vcvt.f32.s32 %v14685_v11  ;;  %vm6469_vm0 = vcmp.lt.f32.partialorder %v2650_v5, 8388608.0 }
 0x164   : > { %14680 = vst [vmem:[#allocation289_spill] sm:$0xff] %v6455_v33  ;;  %v14686_v59 = vmov 0  ;;  %v2654_v8 = vand.u32 2147483647, %v2653_v60  ;;  %v2655_v3 = vand.u32 2147483648, %v14667_v21  ;;  %v2663_v43 = vand.u32 2147483648, %v14668_v52 }
 0x165   : > { %14683 = vst [vmem:[#allocation290_spill] sm:$0xff] %v14682_v61  ;;  %v14687_v59 = vsel %vm6469_vm0, 4294967295, %v14686_v59  ;;  %v2662_v42 = vand.u32 2147483647, %v2661_v0  ;;  %v2677_v22 = vcvt.s32.f32 %v2676_v36  ;;  %vm6483_vm12 = vcmp.lt.f32.partialorder %v2658_v14, 8388608.0  ;;  %v14717_v52 = vld [vmem:[#allocation70_spill] sm:$0xff] }
 0x166   : > { %14684 = vst [vmem:[#allocation291_spill] sm:$0xff] %v6462_v39  ;;  %v14689_v18 = vmov 0  ;;  %v2666_v60 = vand.u32 2147483647, %v14670_v23  ;;  %v2692_v27 = vcvt.f32.s32 %v14692_v13  ;;  %v2670_v1 = vand.u32 2147483647, %v2669_v38 }
 0x167   : > { %14688 = vst [vmem:[#allocation292_spill] sm:$0xff] %v14687_v59  ;;  %v14690_v18 = vsel %vm6483_vm12, 4294967295, %v14689_v18  ;;  %v2671_v36 = vand.u32 2147483648, %v14670_v23  ;;  %v2685_v12 = vcvt.s32.f32 %v2684_v63  ;;  %v6494_v4 = vor.u32 %v2655_v3, %v2654_v8  ;;  %v14697_v8 = vld [vmem:[#allocation68_spill] sm:$0xff] }
 0x168   : > { %14691 = vst [vmem:[#allocation293_spill] sm:$0xff] %v14690_v18  ;;  %v2674_v14 = vand.u32 2147483647, %v14676_v54  ;;  %v2679_v5 = vand.u32 2147483648, %v14676_v54  ;;  %v2700_v33 = vcvt.f32.s32 %v14694_v31  ;;  %v6499_v20 = vor.u32 %v2663_v43, %v2662_v42  ;;  %v14720_v59 = vld [vmem:[#allocation72_spill] sm:$0xff] }
 0x169   : > { %14693 = vst [vmem:[#allocation294_spill] sm:$0xff] %v6494_v4  ;;  %v2678_v47 = vand.u32 2147483647, %v2677_v22  ;;  %v2682_v44 = vand.u32 2147483647, %v14685_v11  ;;  %v2708_v61 = vcvt.f32.s32 %v14696_v62  ;;  %v2687_v38 = vand.u32 2147483648, %v14685_v11 }
 0x16a   : > { %14695 = vst [vmem:[#allocation295_spill] sm:$0xff] %v6499_v20  ;;  %v2690_v0 = vand.u32 2147483647, %v14692_v13  ;;  %v2693_v63 = vcvt.s32.f32 %v2692_v27  ;;  %v2716_v3 = vcvt.f32.s32 %v14697_v8  ;;  %v6506_v6 = vor.u32 %v2671_v36, %v2670_v1 }
 0x16b   : > { %v2686_v39 = vand.u32 2147483647, %v2685_v12  ;;  %v2698_v30 = vand.u32 2147483647, %v14694_v31  ;;  %v2724_v42 = vcvt.f32.s32 %v14699_v57  ;;  %vm6514_vm15 = vcmp.lt.f32.partialorder %v2666_v60, 8388608.0 }
 0x16c   : > { %14698 = vst [vmem:[#allocation296_spill] sm:$0xff] %v6506_v6  ;;  %v14700_v22 = vmov 0  ;;  %vm6518_vm14 = vcmp.lt.f32.partialorder %v2674_v14, 8388608.0  ;;  %v14703_v27 = vmov 0  ;;  %v2701_v1 = vcvt.s32.f32 %v2700_v33 }
 0x16d   : > { %v14701_v22 = vsel %vm6514_vm15, 4294967295, %v14700_v22  ;;  %v14704_v27 = vsel %vm6518_vm14, 4294967295, %v14703_v27  ;;  %v6526_v36 = vor.u32 %v2679_v5, %v2678_v47  ;;  %vm6528_vm13 = vcmp.lt.f32.partialorder %v2682_v44, 8388608.0 }
 0x16e   : > { %14702 = vst [vmem:[#allocation297_spill] sm:$0xff] %v14701_v22  ;;  %v14707_v53 = vmov 0  ;;  %v2709_v60 = vcvt.s32.f32 %v2708_v61  ;;  %vm6532_vm0 = vcmp.lt.f32.partialorder %v2690_v0, 8388608.0  ;;  %v14710_v43 = vmov 0 }
 0x16f   : > { %14705 = vst [vmem:[#allocation298_spill] sm:$0xff] %v14704_v27  ;;  %v14708_v53 = vsel %vm6528_vm13, 4294967295, %v14707_v53  ;;  %v14711_v43 = vsel %vm6532_vm0, 4294967295, %v14710_v43  ;;  %v2694_v14 = vand.u32 2147483647, %v2693_v63  ;;  %v2695_v21 = vand.u32 2147483648, %v14692_v13 }
 0x170   : > { %14706 = vst [vmem:[#allocation299_spill] sm:$0xff] %v6526_v36  ;;  %v2717_v33 = vcvt.s32.f32 %v2716_v3  ;;  %v6541_v47 = vor.u32 %v2687_v38, %v2686_v39  ;;  %vm6543_vm12 = vcmp.lt.f32.partialorder %v2698_v30, 8388608.0  ;;  %v14714_v44 = vmov 0  ;;  %v14718_v30 = vld [vmem:[#allocation71_spill] sm:$0xff]  ;;  %v14726_v36 = vld [vmem:[#allocation73_spill] sm:$0xff] }
 0x171   : > { %14709 = vst [vmem:[#allocation300_spill] sm:$0xff] %v14708_v53  ;;  %v14715_v44 = vsel %vm6543_vm12, 4294967295, %v14714_v44  ;;  %v2725_v61 = vcvt.s32.f32 %v2724_v42  ;;  %v2702_v5 = vand.u32 2147483647, %v2701_v1  ;;  %v2703_v0 = vand.u32 2147483648, %v14694_v31  ;;  %v14742_v31 = vld [vmem:[#allocation75_spill] sm:$0xff] }
 0x172   : > { %14712 = vst [vmem:[#allocation301_spill] sm:$0xff] %v14711_v43  ;;  %v2706_v63 = vand.u32 2147483647, %v14696_v62  ;;  %v2732_v20 = vcvt.f32.s32 %v14717_v52  ;;  %v2710_v12 = vand.u32 2147483647, %v2709_v60  ;;  %v2711_v39 = vand.u32 2147483648, %v14696_v62 }
 0x173   : > { %14713 = vst [vmem:[#allocation302_spill] sm:$0xff] %v6541_v47  ;;  %v2740_v38 = vcvt.f32.s32 %v14718_v30  ;;  %v6556_v23 = vor.u32 %v2695_v21, %v2694_v14  ;;  %v2714_v42 = vand.u32 2147483647, %v14697_v8  ;;  %v2718_v1 = vand.u32 2147483647, %v2717_v33  ;;  %v14746_v13 = vld [vmem:[#allocation77_spill] sm:$0xff] }
 0x174   : > { %14716 = vst [vmem:[#allocation303_spill] sm:$0xff] %v14715_v44  ;;  %v2719_v6 = vand.u32 2147483648, %v14697_v8  ;;  %v2722_v22 = vand.u32 2147483647, %v14699_v57  ;;  %v2726_v18 = vand.u32 2147483647, %v2725_v61  ;;  %v2748_v27 = vcvt.f32.s32 %v14720_v59 }
 0x175   : > { %14719 = vst [vmem:[#allocation304_spill] sm:$0xff] %v6556_v23  ;;  %v2727_v4 = vand.u32 2147483648, %v14699_v57  ;;  %v6567_v3 = vor.u32 %v2703_v0, %v2702_v5  ;;  %v2730_v21 = vand.u32 2147483647, %v14717_v52  ;;  %v2733_v14 = vcvt.s32.f32 %v2732_v20  ;;  %v14744_v8 = vld [vmem:[#allocation76_spill] sm:$0xff]  ;;  %v14749_v43 = vld [vmem:[#allocation79_spill] sm:$0xff] }
 0x176   : > { %vm6570_vm14 = vcmp.lt.f32.partialorder %v2706_v63, 8388608.0  ;;  %v14722_v33 = vmov 0  ;;  %v6574_v54 = vor.u32 %v2711_v39, %v2710_v12  ;;  %v2741_v61 = vcvt.s32.f32 %v2740_v38  ;;  %v14735_v38 = vld [vmem:[#allocation74_spill] sm:$0xff] }
 0x177   : > { %14721 = vst [vmem:[#allocation305_spill] sm:$0xff] %v6567_v3  ;;  %v14723_v33 = vsel %vm6570_vm14, 4294967295, %v14722_v33  ;;  %v2756_v7 = vcvt.f32.s32 %v14726_v36  ;;  %vm6581_vm13 = vcmp.lt.f32.partialorder %v2714_v42, 8388608.0  ;;  %v14727_v5 = vmov 0 }
 0x178   : > { %14724 = vst [vmem:[#allocation306_spill] sm:$0xff] %v14723_v33  ;;  %v14728_v5 = vsel %vm6581_vm13, 4294967295, %v14727_v5  ;;  %v6585_v0 = vor.u32 %v2719_v6, %v2718_v1  ;;  %v2738_v20 = vand.u32 2147483647, %v14718_v30  ;;  %vm6588_vm15 = vcmp.lt.f32.partialorder %v2722_v22, 8388608.0 }
 0x179   : > { %14725 = vst [vmem:[#allocation307_spill] sm:$0xff] %v6574_v54  ;;  %v14731_v63 = vmov 0  ;;  %v6592_v12 = vor.u32 %v2727_v4, %v2726_v18  ;;  %v2749_v39 = vcvt.s32.f32 %v2748_v27  ;;  %v2764_v60 = vcvt.f32.s32 %v14735_v38 }
 0x17a   : > { %14729 = vst [vmem:[#allocation308_spill] sm:$0xff] %v14728_v5  ;;  %v14732_v63 = vsel %vm6588_vm15, 4294967295, %v14731_v63  ;;  %vm6599_vm0 = vcmp.lt.f32.partialorder %v2730_v21, 8388608.0  ;;  %v14736_v53 = vmov 0  ;;  %v2734_v6 = vand.u32 2147483647, %v2733_v14 }
 0x17b   : > { %14730 = vst [vmem:[#allocation309_spill] sm:$0xff] %v6585_v0  ;;  %v14737_v53 = vsel %vm6599_vm0, 4294967295, %v14736_v53  ;;  %v2735_v22 = vand.u32 2147483648, %v14717_v52  ;;  %v2742_v18 = vand.u32 2147483647, %v2741_v61  ;;  %v2743_v27 = vand.u32 2147483648, %v14718_v30 }
 0x17c   : > { %14733 = vst [vmem:[#allocation310_spill] sm:$0xff] %v14732_v63  ;;  %v2757_v1 = vcvt.s32.f32 %v2756_v7  ;;  %vm6613_vm12 = vcmp.lt.f32.partialorder %v2738_v20, 8388608.0  ;;  %v14739_v42 = vmov 0  ;;  %v2746_v14 = vand.u32 2147483647, %v14720_v59  ;;  %v14767_v30 = vld [vmem:[#allocation80_spill] sm:$0xff] }
 0x17d   : > { %14734 = vst [vmem:[#allocation311_spill] sm:$0xff] %v6592_v12  ;;  %v14740_v42 = vsel %vm6613_vm12, 4294967295, %v14739_v42  ;;  %v2772_v3 = vcvt.f32.s32 %v14742_v31  ;;  %v2750_v4 = vand.u32 2147483647, %v2749_v39  ;;  %v2751_v7 = vand.u32 2147483648, %v14720_v59 }
 0x17e   : > { %14738 = vst [vmem:[#allocation312_spill] sm:$0xff] %v14737_v53  ;;  %v2765_v62 = vcvt.s32.f32 %v2764_v60  ;;  %v6624_v54 = vor.u32 %v2735_v22, %v2734_v6  ;;  %v2754_v20 = vand.u32 2147483647, %v14726_v36  ;;  %v2759_v21 = vand.u32 2147483648, %v14726_v36  ;;  %v14747_v6 = vld [vmem:[#allocation78_spill] sm:$0xff] }
 0x17f   : > { %14741 = vst [vmem:[#allocation313_spill] sm:$0xff] %v14740_v42  ;;  %v2780_v0 = vcvt.f32.s32 %v14744_v8  ;;  %v6629_v5 = vor.u32 %v2743_v27, %v2742_v18  ;;  %v2758_v33 = vand.u32 2147483647, %v2757_v1  ;;  %v2762_v44 = vand.u32 2147483647, %v14735_v38  ;;  %v14770_v53 = vld [vmem:[#allocation82_spill] sm:$0xff] }
 0x180   : > { %14743 = vst [vmem:[#allocation314_spill] sm:$0xff] %v6624_v54  ;;  %v2788_v63 = vcvt.f32.s32 %v14746_v13  ;;  %v2767_v39 = vand.u32 2147483648, %v14735_v38  ;;  %v2770_v61 = vand.u32 2147483647, %v14742_v31  ;;  %v2773_v60 = vcvt.s32.f32 %v2772_v3 }
 0x181   : > { %14745 = vst [vmem:[#allocation315_spill] sm:$0xff] %v6629_v5  ;;  %v2796_v22 = vcvt.f32.s32 %v14747_v6  ;;  %v6636_v57 = vor.u32 %v2751_v7, %v2750_v4  ;;  %v2766_v12 = vand.u32 2147483647, %v2765_v62  ;;  %v2778_v23 = vand.u32 2147483647, %v14744_v8 }
 0x182   : > { %v2804_v18 = vcvt.f32.s32 %v14749_v43  ;;  %vm6644_vm15 = vcmp.lt.f32.partialorder %v2746_v14, 8388608.0  ;;  %v14750_v1 = vmov 0  ;;  %vm6648_vm13 = vcmp.lt.f32.partialorder %v2754_v20, 8388608.0 }
 0x183   : > { %14748 = vst [vmem:[#allocation316_spill] sm:$0xff] %v6636_v57  ;;  %v14751_v1 = vsel %vm6644_vm15, 4294967295, %v14750_v1  ;;  %v14753_v3 = vmov 0  ;;  %v2781_v4 = vcvt.s32.f32 %v2780_v0  ;;  %v6656_v7 = vor.u32 %v2759_v21, %v2758_v33 }
 0x184   : > { %14752 = vst [vmem:[#allocation317_spill] sm:$0xff] %v14751_v1  ;;  %v14754_v3 = vsel %vm6648_vm13, 4294967295, %v14753_v3  ;;  %vm6658_vm14 = vcmp.lt.f32.partialorder %v2762_v44, 8388608.0  ;;  %v14757_v11 = vmov 0  ;;  %v2789_v14 = vcvt.s32.f32 %v2788_v63 }
 0x185   : > { %14755 = vst [vmem:[#allocation318_spill] sm:$0xff] %v14754_v3  ;;  %v14758_v11 = vsel %vm6658_vm14, 4294967295, %v14757_v11  ;;  %vm6662_vm0 = vcmp.lt.f32.partialorder %v2770_v61, 8388608.0  ;;  %v14760_v27 = vmov 0  ;;  %v2774_v20 = vand.u32 2147483647, %v2773_v60 }
 0x186   : > { %14756 = vst [vmem:[#allocation319_spill] sm:$0xff] %v6656_v7  ;;  %v14761_v27 = vsel %vm6662_vm0, 4294967295, %v14760_v27  ;;  %v2775_v52 = vand.u32 2147483648, %v14742_v31  ;;  %v2797_v0 = vcvt.s32.f32 %v2796_v22  ;;  %v6671_v33 = vor.u32 %v2767_v39, %v2766_v12  ;;  %v14776_v7 = vld [vmem:[#allocation83_spill] sm:$0xff] }
 0x187   : > { %14759 = vst [vmem:[#allocation320_spill] sm:$0xff] %v14758_v11  ;;  %vm6673_vm12 = vcmp.lt.f32.partialorder %v2778_v23, 8388608.0  ;;  %v14764_v44 = vmov 0  ;;  %v2805_v63 = vcvt.s32.f32 %v2804_v18  ;;  %v2782_v21 = vand.u32 2147483647, %v2781_v4  ;;  %v14768_v23 = vld [vmem:[#allocation81_spill] sm:$0xff] }
 0x188   : > { %14762 = vst [vmem:[#allocation321_spill] sm:$0xff] %v14761_v27  ;;  %v14765_v44 = vsel %vm6673_vm12, 4294967295, %v14764_v44  ;;  %v2783_v61 = vand.u32 2147483648, %v14744_v8  ;;  %v2786_v60 = vand.u32 2147483647, %v14746_v13  ;;  %v2812_v5 = vcvt.f32.s32 %v14767_v30  ;;  %v14792_v8 = vld [vmem:[#allocation85_spill] sm:$0xff] }
 0x189   : > { %14763 = vst [vmem:[#allocation322_spill] sm:$0xff] %v6671_v33  ;;  %v2790_v62 = vand.u32 2147483647, %v2789_v14  ;;  %v2791_v12 = vand.u32 2147483648, %v14746_v13  ;;  %v2820_v39 = vcvt.f32.s32 %v14768_v23  ;;  %v6686_v59 = vor.u32 %v2775_v52, %v2774_v20  ;;  %v14796_v31 = vld [vmem:[#allocation87_spill] sm:$0xff]  ;;  %v14799_v27 = vld [vmem:[#allocation89_spill] sm:$0xff] }
 0x18a   : > { %14766 = vst [vmem:[#allocation323_spill] sm:$0xff] %v14765_v44  ;;  %v2794_v18 = vand.u32 2147483647, %v14747_v6  ;;  %v2798_v4 = vand.u32 2147483647, %v2797_v0  ;;  %v2799_v57 = vand.u32 2147483648, %v14747_v6  ;;  %v2828_v3 = vcvt.f32.s32 %v14770_v53 }
 0x18b   : > { %14769 = vst [vmem:[#allocation324_spill] sm:$0xff] %v6686_v59  ;;  %v2802_v1 = vand.u32 2147483647, %v14749_v43  ;;  %v2806_v42 = vand.u32 2147483647, %v2805_v63  ;;  %v2807_v54 = vand.u32 2147483648, %v14749_v43  ;;  %v6697_v22 = vor.u32 %v2783_v61, %v2782_v21 }
 0x18c   : > { %v2810_v52 = vand.u32 2147483647, %v14767_v30  ;;  %v2813_v20 = vcvt.s32.f32 %v2812_v5  ;;  %vm6700_vm13 = vcmp.lt.f32.partialorder %v2786_v60, 8388608.0  ;;  %v14772_v0 = vmov 0  ;;  %v14794_v6 = vld [vmem:[#allocation86_spill] sm:$0xff] }
 0x18d   : > { %14771 = vst [vmem:[#allocation325_spill] sm:$0xff] %v6697_v22  ;;  %v14773_v0 = vsel %vm6700_vm13, 4294967295, %v14772_v0  ;;  %v6704_v36 = vor.u32 %v2791_v12, %v2790_v62  ;;  %v2821_v63 = vcvt.s32.f32 %v2820_v39  ;;  %v2836_v47 = vcvt.f32.s32 %v14776_v7  ;;  %v14785_v39 = vld [vmem:[#allocation84_spill] sm:$0xff] }
 0x18e   : > { %14774 = vst [vmem:[#allocation326_spill] sm:$0xff] %v14773_v0  ;;  %vm6711_vm14 = vcmp.lt.f32.partialorder %v2794_v18, 8388608.0  ;;  %v14777_v21 = vmov 0  ;;  %v6715_v61 = vor.u32 %v2799_v57, %v2798_v4  ;;  %v2818_v5 = vand.u32 2147483647, %v14768_v23 }
 0x18f   : > { %14775 = vst [vmem:[#allocation327_spill] sm:$0xff] %v6704_v36  ;;  %v14778_v21 = vsel %vm6711_vm14, 4294967295, %v14777_v21  ;;  %vm6718_vm15 = vcmp.lt.f32.partialorder %v2802_v1, 8388608.0  ;;  %v14781_v60 = vmov 0  ;;  %v6722_v62 = vor.u32 %v2807_v54, %v2806_v42 }
 0x190   : > { %14779 = vst [vmem:[#allocation328_spill] sm:$0xff] %v14778_v21  ;;  %v14782_v60 = vsel %vm6718_vm15, 4294967295, %v14781_v60  ;;  %v2829_v12 = vcvt.s32.f32 %v2828_v3  ;;  %v2844_v14 = vcvt.f32.s32 %v14785_v39  ;;  %vm6729_vm0 = vcmp.lt.f32.partialorder %v2810_v52, 8388608.0 }
 0x191   : > { %14780 = vst [vmem:[#allocation329_spill] sm:$0xff] %v6715_v61  ;;  %v14786_v11 = vmov 0  ;;  %v2814_v57 = vand.u32 2147483647, %v2813_v20  ;;  %v2815_v1 = vand.u32 2147483648, %v14767_v30  ;;  %v2823_v3 = vand.u32 2147483648, %v14768_v23 }
 0x192   : > { %14783 = vst [vmem:[#allocation330_spill] sm:$0xff] %v14782_v60  ;;  %v14787_v11 = vsel %vm6729_vm0, 4294967295, %v14786_v11  ;;  %v2822_v42 = vand.u32 2147483647, %v2821_v63  ;;  %v2837_v4 = vcvt.s32.f32 %v2836_v47  ;;  %vm6743_vm12 = vcmp.lt.f32.partialorder %v2818_v5, 8388608.0  ;;  %v14817_v23 = vld [vmem:[#allocation90_spill] sm:$0xff] }
 0x193   : > { %14784 = vst [vmem:[#allocation331_spill] sm:$0xff] %v6722_v62  ;;  %v14789_v18 = vmov 0  ;;  %v2826_v20 = vand.u32 2147483647, %v14770_v53  ;;  %v2852_v22 = vcvt.f32.s32 %v14792_v8  ;;  %v2830_v54 = vand.u32 2147483647, %v2829_v12 }
 0x194   : > { %14788 = vst [vmem:[#allocation332_spill] sm:$0xff] %v14787_v11  ;;  %v14790_v18 = vsel %vm6743_vm12, 4294967295, %v14789_v18  ;;  %v2831_v47 = vand.u32 2147483648, %v14770_v53  ;;  %v2845_v13 = vcvt.s32.f32 %v2844_v14  ;;  %v6754_v36 = vor.u32 %v2815_v1, %v2814_v57  ;;  %v14797_v57 = vld [vmem:[#allocation88_spill] sm:$0xff] }
 0x195   : > { %14791 = vst [vmem:[#allocation333_spill] sm:$0xff] %v14790_v18  ;;  %v2834_v5 = vand.u32 2147483647, %v14776_v7  ;;  %v2839_v52 = vand.u32 2147483648, %v14776_v7  ;;  %v2860_v61 = vcvt.f32.s32 %v14794_v6  ;;  %v6759_v21 = vor.u32 %v2823_v3, %v2822_v42  ;;  %v14820_v11 = vld [vmem:[#allocation92_spill] sm:$0xff] }
 0x196   : > { %14793 = vst [vmem:[#allocation334_spill] sm:$0xff] %v6754_v36  ;;  %v2838_v0 = vand.u32 2147483647, %v2837_v4  ;;  %v2842_v44 = vand.u32 2147483647, %v14785_v39  ;;  %v2868_v60 = vcvt.f32.s32 %v14796_v31  ;;  %v2847_v12 = vand.u32 2147483648, %v14785_v39 }
 0x197   : > { %14795 = vst [vmem:[#allocation335_spill] sm:$0xff] %v6759_v21  ;;  %v2850_v63 = vand.u32 2147483647, %v14792_v8  ;;  %v2853_v14 = vcvt.s32.f32 %v2852_v22  ;;  %v2876_v1 = vcvt.f32.s32 %v14797_v57  ;;  %v6766_v43 = vor.u32 %v2831_v47, %v2830_v54 }
 0x198   : > { %v2846_v62 = vand.u32 2147483647, %v2845_v13  ;;  %v2858_v59 = vand.u32 2147483647, %v14794_v6  ;;  %v2884_v42 = vcvt.f32.s32 %v14799_v27  ;;  %vm6774_vm15 = vcmp.lt.f32.partialorder %v2826_v20, 8388608.0 }
 0x199   : > { %14798 = vst [vmem:[#allocation336_spill] sm:$0xff] %v6766_v43  ;;  %v14800_v4 = vmov 0  ;;  %vm6778_vm14 = vcmp.lt.f32.partialorder %v2834_v5, 8388608.0  ;;  %v14803_v22 = vmov 0  ;;  %v2861_v54 = vcvt.s32.f32 %v2860_v61 }
 0x19a   : > { %v14801_v4 = vsel %vm6774_vm15, 4294967295, %v14800_v4  ;;  %v14804_v22 = vsel %vm6778_vm14, 4294967295, %v14803_v22  ;;  %v6786_v47 = vor.u32 %v2839_v52, %v2838_v0  ;;  %vm6788_vm13 = vcmp.lt.f32.partialorder %v2842_v44, 8388608.0 }
 0x19b   : > { %14802 = vst [vmem:[#allocation337_spill] sm:$0xff] %v14801_v4  ;;  %v14807_v38 = vmov 0  ;;  %v2869_v20 = vcvt.s32.f32 %v2868_v60  ;;  %vm6792_vm0 = vcmp.lt.f32.partialorder %v2850_v63, 8388608.0  ;;  %v14810_v3 = vmov 0 }
 0x19c   : > { %14805 = vst [vmem:[#allocation338_spill] sm:$0xff] %v14804_v22  ;;  %v14808_v38 = vsel %vm6788_vm13, 4294967295, %v14807_v38  ;;  %v14811_v3 = vsel %vm6792_vm0, 4294967295, %v14810_v3  ;;  %v2854_v5 = vand.u32 2147483647, %v2853_v14  ;;  %v2855_v30 = vand.u32 2147483648, %v14792_v8 }
 0x19d   : > { %14806 = vst [vmem:[#allocation339_spill] sm:$0xff] %v6786_v47  ;;  %v2877_v61 = vcvt.s32.f32 %v2876_v1  ;;  %v6801_v0 = vor.u32 %v2847_v12, %v2846_v62  ;;  %vm6803_vm12 = vcmp.lt.f32.partialorder %v2858_v59, 8388608.0  ;;  %v14814_v44 = vmov 0  ;;  %v14818_v59 = vld [vmem:[#allocation91_spill] sm:$0xff]  ;;  %v14826_v47 = vld [vmem:[#allocation93_spill] sm:$0xff] }
 0x19e   : > { %14809 = vst [vmem:[#allocation340_spill] sm:$0xff] %v14808_v38  ;;  %v14815_v44 = vsel %vm6803_vm12, 4294967295, %v14814_v44  ;;  %v2885_v60 = vcvt.s32.f32 %v2884_v42  ;;  %v2862_v52 = vand.u32 2147483647, %v2861_v54  ;;  %v2863_v63 = vand.u32 2147483648, %v14794_v6  ;;  %v14842_v6 = vld [vmem:[#allocation95_spill] sm:$0xff] }
 0x19f   : > { %14812 = vst [vmem:[#allocation341_spill] sm:$0xff] %v14811_v3  ;;  %v2866_v14 = vand.u32 2147483647, %v14796_v31  ;;  %v2892_v21 = vcvt.f32.s32 %v14817_v23  ;;  %v2870_v13 = vand.u32 2147483647, %v2869_v20  ;;  %v2871_v62 = vand.u32 2147483648, %v14796_v31 }
 0x1a0   : > { %14813 = vst [vmem:[#allocation342_spill] sm:$0xff] %v6801_v0  ;;  %v2900_v12 = vcvt.f32.s32 %v14818_v59  ;;  %v6816_v53 = vor.u32 %v2855_v30, %v2854_v5  ;;  %v2874_v42 = vand.u32 2147483647, %v14797_v57  ;;  %v2878_v54 = vand.u32 2147483647, %v2877_v61  ;;  %v14846_v8 = vld [vmem:[#allocation97_spill] sm:$0xff] }
 0x1a1   : > { %14816 = vst [vmem:[#allocation343_spill] sm:$0xff] %v14815_v44  ;;  %v2879_v43 = vand.u32 2147483648, %v14797_v57  ;;  %v2882_v4 = vand.u32 2147483647, %v14799_v27  ;;  %v2886_v18 = vand.u32 2147483647, %v2885_v60  ;;  %v2908_v22 = vcvt.f32.s32 %v14820_v11 }
 0x1a2   : > { %14819 = vst [vmem:[#allocation344_spill] sm:$0xff] %v6816_v53  ;;  %v2887_v36 = vand.u32 2147483648, %v14799_v27  ;;  %v6827_v1 = vor.u32 %v2863_v63, %v2862_v52  ;;  %v2890_v30 = vand.u32 2147483647, %v14817_v23  ;;  %v2893_v5 = vcvt.s32.f32 %v2892_v21  ;;  %v14844_v57 = vld [vmem:[#allocation96_spill] sm:$0xff]  ;;  %v14849_v3 = vld [vmem:[#allocation99_spill] sm:$0xff] }
 0x1a3   : > { %vm6830_vm14 = vcmp.lt.f32.partialorder %v2866_v14, 8388608.0  ;;  %v14822_v61 = vmov 0  ;;  %v6834_v7 = vor.u32 %v2871_v62, %v2870_v13  ;;  %v2901_v60 = vcvt.s32.f32 %v2900_v12  ;;  %v14835_v12 = vld [vmem:[#allocation94_spill] sm:$0xff] }
 0x1a4   : > { %14821 = vst [vmem:[#allocation345_spill] sm:$0xff] %v6827_v1  ;;  %v14823_v61 = vsel %vm6830_vm14, 4294967295, %v14822_v61  ;;  %v2916_v33 = vcvt.f32.s32 %v14826_v47  ;;  %vm6841_vm13 = vcmp.lt.f32.partialorder %v2874_v42, 8388608.0  ;;  %v14827_v52 = vmov 0 }
 0x1a5   : > { %14824 = vst [vmem:[#allocation346_spill] sm:$0xff] %v14823_v61  ;;  %v14828_v52 = vsel %vm6841_vm13, 4294967295, %v14827_v52  ;;  %v6845_v63 = vor.u32 %v2879_v43, %v2878_v54  ;;  %v2898_v21 = vand.u32 2147483647, %v14818_v59  ;;  %vm6848_vm15 = vcmp.lt.f32.partialorder %v2882_v4, 8388608.0 }
 0x1a6   : > { %14825 = vst [vmem:[#allocation347_spill] sm:$0xff] %v6834_v7  ;;  %v14831_v14 = vmov 0  ;;  %v6852_v13 = vor.u32 %v2887_v36, %v2886_v18  ;;  %v2909_v62 = vcvt.s32.f32 %v2908_v22  ;;  %v2924_v20 = vcvt.f32.s32 %v14835_v12 }
 0x1a7   : > { %14829 = vst [vmem:[#allocation348_spill] sm:$0xff] %v14828_v52  ;;  %v14832_v14 = vsel %vm6848_vm15, 4294967295, %v14831_v14  ;;  %vm6859_vm0 = vcmp.lt.f32.partialorder %v2890_v30, 8388608.0  ;;  %v14836_v38 = vmov 0  ;;  %v2894_v43 = vand.u32 2147483647, %v2893_v5 }
 0x1a8   : > { %14830 = vst [vmem:[#allocation349_spill] sm:$0xff] %v6845_v63  ;;  %v14837_v38 = vsel %vm6859_vm0, 4294967295, %v14836_v38  ;;  %v2895_v4 = vand.u32 2147483648, %v14817_v23  ;;  %v2902_v18 = vand.u32 2147483647, %v2901_v60  ;;  %v2903_v22 = vand.u32 2147483648, %v14818_v59 }
 0x1a9   : > { %14833 = vst [vmem:[#allocation350_spill] sm:$0xff] %v14832_v14  ;;  %v2917_v54 = vcvt.s32.f32 %v2916_v33  ;;  %vm6873_vm12 = vcmp.lt.f32.partialorder %v2898_v21, 8388608.0  ;;  %v14839_v42 = vmov 0  ;;  %v2906_v5 = vand.u32 2147483647, %v14820_v11  ;;  %v14867_v59 = vld [vmem:[#allocation100_spill] sm:$0xff] }
 0x1aa   : > { %14834 = vst [vmem:[#allocation351_spill] sm:$0xff] %v6852_v13  ;;  %v14840_v42 = vsel %vm6873_vm12, 4294967295, %v14839_v42  ;;  %v2932_v1 = vcvt.f32.s32 %v14842_v6  ;;  %v2910_v36 = vand.u32 2147483647, %v2909_v62  ;;  %v2911_v33 = vand.u32 2147483648, %v14820_v11 }
 0x1ab   : > { %14838 = vst [vmem:[#allocation352_spill] sm:$0xff] %v14837_v38  ;;  %v2925_v31 = vcvt.s32.f32 %v2924_v20  ;;  %v6884_v7 = vor.u32 %v2895_v4, %v2894_v43  ;;  %v2914_v21 = vand.u32 2147483647, %v14826_v47  ;;  %v2919_v30 = vand.u32 2147483648, %v14826_v47  ;;  %v14847_v43 = vld [vmem:[#allocation98_spill] sm:$0xff] }
 0x1ac   : > { %14841 = vst [vmem:[#allocation353_spill] sm:$0xff] %v14840_v42  ;;  %v2940_v63 = vcvt.f32.s32 %v14844_v57  ;;  %v6889_v52 = vor.u32 %v2903_v22, %v2902_v18  ;;  %v2918_v61 = vand.u32 2147483647, %v2917_v54  ;;  %v2922_v44 = vand.u32 2147483647, %v14835_v12  ;;  %v14870_v38 = vld [vmem:[#allocation102_spill] sm:$0xff] }
 0x1ad   : > { %14843 = vst [vmem:[#allocation354_spill] sm:$0xff] %v6884_v7  ;;  %v2948_v14 = vcvt.f32.s32 %v14846_v8  ;;  %v2927_v62 = vand.u32 2147483648, %v14835_v12  ;;  %v2930_v60 = vand.u32 2147483647, %v14842_v6  ;;  %v2933_v20 = vcvt.s32.f32 %v2932_v1 }
 0x1ae   : > { %14845 = vst [vmem:[#allocation355_spill] sm:$0xff] %v6889_v52  ;;  %v2956_v4 = vcvt.f32.s32 %v14847_v43  ;;  %v6896_v27 = vor.u32 %v2911_v33, %v2910_v36  ;;  %v2926_v13 = vand.u32 2147483647, %v2925_v31  ;;  %v2938_v53 = vand.u32 2147483647, %v14844_v57 }
 0x1af   : > { %v2964_v18 = vcvt.f32.s32 %v14849_v3  ;;  %vm6904_vm15 = vcmp.lt.f32.partialorder %v2906_v5, 8388608.0  ;;  %v14850_v54 = vmov 0  ;;  %vm6908_vm13 = vcmp.lt.f32.partialorder %v2914_v21, 8388608.0 }
 0x1b0   : > { %14848 = vst [vmem:[#allocation356_spill] sm:$0xff] %v6896_v27  ;;  %v14851_v54 = vsel %vm6904_vm15, 4294967295, %v14850_v54  ;;  %v14853_v1 = vmov 0  ;;  %v2941_v36 = vcvt.s32.f32 %v2940_v63  ;;  %v6916_v33 = vor.u32 %v2919_v30, %v2918_v61 }
 0x1b1   : > { %14852 = vst [vmem:[#allocation357_spill] sm:$0xff] %v14851_v54  ;;  %v14854_v1 = vsel %vm6908_vm13, 4294967295, %v14853_v1  ;;  %vm6918_vm14 = vcmp.lt.f32.partialorder %v2922_v44, 8388608.0  ;;  %v14857_v39 = vmov 0  ;;  %v2949_v5 = vcvt.s32.f32 %v2948_v14 }
 0x1b2   : > { %14855 = vst [vmem:[#allocation358_spill] sm:$0xff] %v14854_v1  ;;  %v14858_v39 = vsel %vm6918_vm14, 4294967295, %v14857_v39  ;;  %vm6922_vm0 = vcmp.lt.f32.partialorder %v2930_v60, 8388608.0  ;;  %v14860_v22 = vmov 0  ;;  %v2934_v21 = vand.u32 2147483647, %v2933_v20 }
 0x1b3   : > { %14856 = vst [vmem:[#allocation359_spill] sm:$0xff] %v6916_v33  ;;  %v14861_v22 = vsel %vm6922_vm0, 4294967295, %v14860_v22  ;;  %v2935_v23 = vand.u32 2147483648, %v14842_v6  ;;  %v2957_v63 = vcvt.s32.f32 %v2956_v4  ;;  %v6931_v61 = vor.u32 %v2927_v62, %v2926_v13  ;;  %v14876_v33 = vld [vmem:[#allocation103_spill] sm:$0xff] }
 0x1b4   : > { %14859 = vst [vmem:[#allocation360_spill] sm:$0xff] %v14858_v39  ;;  %vm6933_vm12 = vcmp.lt.f32.partialorder %v2938_v53, 8388608.0  ;;  %v14864_v44 = vmov 0  ;;  %v2965_v14 = vcvt.s32.f32 %v2964_v18  ;;  %v2942_v30 = vand.u32 2147483647, %v2941_v36  ;;  %v14868_v53 = vld [vmem:[#allocation101_spill] sm:$0xff] }
 0x1b5   : > { %14862 = vst [vmem:[#allocation361_spill] sm:$0xff] %v14861_v22  ;;  %v14865_v44 = vsel %vm6933_vm12, 4294967295, %v14864_v44  ;;  %v2943_v60 = vand.u32 2147483648, %v14844_v57  ;;  %v2946_v20 = vand.u32 2147483647, %v14846_v8  ;;  %v2972_v52 = vcvt.f32.s32 %v14867_v59  ;;  %v14892_v57 = vld [vmem:[#allocation105_spill] sm:$0xff] }
 0x1b6   : > { %14863 = vst [vmem:[#allocation362_spill] sm:$0xff] %v6931_v61  ;;  %v2950_v31 = vand.u32 2147483647, %v2949_v5  ;;  %v2951_v13 = vand.u32 2147483648, %v14846_v8  ;;  %v2980_v62 = vcvt.f32.s32 %v14868_v53  ;;  %v6946_v11 = vor.u32 %v2935_v23, %v2934_v21  ;;  %v14896_v6 = vld [vmem:[#allocation107_spill] sm:$0xff]  ;;  %v14899_v22 = vld [vmem:[#allocation109_spill] sm:$0xff] }
 0x1b7   : > { %14866 = vst [vmem:[#allocation363_spill] sm:$0xff] %v14865_v44  ;;  %v2954_v18 = vand.u32 2147483647, %v14847_v43  ;;  %v2958_v36 = vand.u32 2147483647, %v2957_v63  ;;  %v2959_v27 = vand.u32 2147483648, %v14847_v43  ;;  %v2988_v1 = vcvt.f32.s32 %v14870_v38 }
 0x1b8   : > { %14869 = vst [vmem:[#allocation364_spill] sm:$0xff] %v6946_v11  ;;  %v2962_v54 = vand.u32 2147483647, %v14849_v3  ;;  %v2966_v42 = vand.u32 2147483647, %v2965_v14  ;;  %v2967_v7 = vand.u32 2147483648, %v14849_v3  ;;  %v6957_v4 = vor.u32 %v2943_v60, %v2942_v30 }
 0x1b9   : > { %v2970_v23 = vand.u32 2147483647, %v14867_v59  ;;  %v2973_v21 = vcvt.s32.f32 %v2972_v52  ;;  %vm6960_vm13 = vcmp.lt.f32.partialorder %v2946_v20, 8388608.0  ;;  %v14872_v63 = vmov 0  ;;  %v14894_v43 = vld [vmem:[#allocation106_spill] sm:$0xff] }
 0x1ba   : > { %14871 = vst [vmem:[#allocation365_spill] sm:$0xff] %v6957_v4  ;;  %v14873_v63 = vsel %vm6960_vm13, 4294967295, %v14872_v63  ;;  %v6964_v47 = vor.u32 %v2951_v13, %v2950_v31  ;;  %v2981_v14 = vcvt.s32.f32 %v2980_v62  ;;  %v2996_v0 = vcvt.f32.s32 %v14876_v33  ;;  %v14885_v62 = vld [vmem:[#allocation104_spill] sm:$0xff] }
 0x1bb   : > { %14874 = vst [vmem:[#allocation366_spill] sm:$0xff] %v14873_v63  ;;  %vm6971_vm14 = vcmp.lt.f32.partialorder %v2954_v18, 8388608.0  ;;  %v14877_v30 = vmov 0  ;;  %v6975_v60 = vor.u32 %v2959_v27, %v2958_v36  ;;  %v2978_v52 = vand.u32 2147483647, %v14868_v53 }
 0x1bc   : > { %14875 = vst [vmem:[#allocation367_spill] sm:$0xff] %v6964_v47  ;;  %v14878_v30 = vsel %vm6971_vm14, 4294967295, %v14877_v30  ;;  %vm6978_vm15 = vcmp.lt.f32.partialorder %v2962_v54, 8388608.0  ;;  %v14881_v20 = vmov 0  ;;  %v6982_v31 = vor.u32 %v2967_v7, %v2966_v42 }
 0x1bd   : > { %14879 = vst [vmem:[#allocation368_spill] sm:$0xff] %v14878_v30  ;;  %v14882_v20 = vsel %vm6978_vm15, 4294967295, %v14881_v20  ;;  %v2989_v13 = vcvt.s32.f32 %v2988_v1  ;;  %v3004_v5 = vcvt.f32.s32 %v14885_v62  ;;  %vm6989_vm0 = vcmp.lt.f32.partialorder %v2970_v23, 8388608.0 }
 0x1be   : > { %14880 = vst [vmem:[#allocation369_spill] sm:$0xff] %v6975_v60  ;;  %v14886_v39 = vmov 0  ;;  %v2974_v27 = vand.u32 2147483647, %v2973_v21  ;;  %v2975_v54 = vand.u32 2147483648, %v14867_v59  ;;  %v2983_v1 = vand.u32 2147483648, %v14868_v53 }
 0x1bf   : > { %14883 = vst [vmem:[#allocation370_spill] sm:$0xff] %v14882_v20  ;;  %v14887_v39 = vsel %vm6989_vm0, 4294967295, %v14886_v39  ;;  %v2982_v42 = vand.u32 2147483647, %v2981_v14  ;;  %v2997_v36 = vcvt.s32.f32 %v2996_v0  ;;  %vm7003_vm12 = vcmp.lt.f32.partialorder %v2978_v52, 8388608.0  ;;  %v14916_v53 = vld [vmem:[#allocation110_spill] sm:$0xff] }
 0x1c0   : > { %14884 = vst [vmem:[#allocation371_spill] sm:$0xff] %v6982_v31  ;;  %v14889_v18 = vmov 0  ;;  %v2986_v21 = vand.u32 2147483647, %v14870_v38  ;;  %v3012_v4 = vcvt.f32.s32 %v14892_v57  ;;  %v2990_v7 = vand.u32 2147483647, %v2989_v13 }
 0x1c1   : > { %14888 = vst [vmem:[#allocation372_spill] sm:$0xff] %v14887_v39  ;;  %v14890_v18 = vsel %vm7003_vm12, 4294967295, %v14889_v18  ;;  %v2991_v0 = vand.u32 2147483648, %v14870_v38  ;;  %v3005_v8 = vcvt.s32.f32 %v3004_v5  ;;  %v7014_v47 = vor.u32 %v2975_v54, %v2974_v27  ;;  %v14897_v27 = vld [vmem:[#allocation108_spill] sm:$0xff] }
 0x1c2   : > { %14891 = vst [vmem:[#allocation373_spill] sm:$0xff] %v14890_v18  ;;  %v2994_v52 = vand.u32 2147483647, %v14876_v33  ;;  %v2999_v23 = vand.u32 2147483648, %v14876_v33  ;;  %v3020_v60 = vcvt.f32.s32 %v14894_v43  ;;  %v7019_v30 = vor.u32 %v2983_v1, %v2982_v42  ;;  %v14919_v39 = vld [vmem:[#allocation112_spill] sm:$0xff] }
 0x1c3   : > { %14893 = vst [vmem:[#allocation374_spill] sm:$0xff] %v7014_v47  ;;  %v2998_v63 = vand.u32 2147483647, %v2997_v36  ;;  %v3002_v44 = vand.u32 2147483647, %v14885_v62  ;;  %v3028_v20 = vcvt.f32.s32 %v14896_v6  ;;  %v3007_v13 = vand.u32 2147483648, %v14885_v62 }
 0x1c4   : > { %14895 = vst [vmem:[#allocation375_spill] sm:$0xff] %v7019_v30  ;;  %v3010_v14 = vand.u32 2147483647, %v14892_v57  ;;  %v3013_v5 = vcvt.s32.f32 %v3012_v4  ;;  %v3036_v54 = vcvt.f32.s32 %v14897_v27  ;;  %v7026_v3 = vor.u32 %v2991_v0, %v2990_v7 }
 0x1c5   : > { %v3006_v31 = vand.u32 2147483647, %v3005_v8  ;;  %v3018_v11 = vand.u32 2147483647, %v14894_v43  ;;  %v3044_v42 = vcvt.f32.s32 %v14899_v22  ;;  %vm7034_vm15 = vcmp.lt.f32.partialorder %v2986_v21, 8388608.0 }
 0x1c6   : > { %14898 = vst [vmem:[#allocation376_spill] sm:$0xff] %v7026_v3  ;;  %v14900_v36 = vmov 0  ;;  %vm7038_vm14 = vcmp.lt.f32.partialorder %v2994_v52, 8388608.0  ;;  %v14903_v4 = vmov 0  ;;  %v3021_v7 = vcvt.s32.f32 %v3020_v60 }
 0x1c7   : > { %v14901_v36 = vsel %vm7034_vm15, 4294967295, %v14900_v36  ;;  %v14904_v4 = vsel %vm7038_vm14, 4294967295, %v14903_v4  ;;  %v7046_v0 = vor.u32 %v2999_v23, %v2998_v63  ;;  %vm7048_vm13 = vcmp.lt.f32.partialorder %v3002_v44, 8388608.0 }
 0x1c8   : > { %14902 = vst [vmem:[#allocation377_spill] sm:$0xff] %v14901_v36  ;;  %v14907_v12 = vmov 0  ;;  %v3029_v21 = vcvt.s32.f32 %v3028_v20  ;;  %vm7052_vm0 = vcmp.lt.f32.partialorder %v3010_v14, 8388608.0  ;;  %v14910_v1 = vmov 0 }
 0x1c9   : > { %14905 = vst [vmem:[#allocation378_spill] sm:$0xff] %v14904_v4  ;;  %v14908_v12 = vsel %vm7048_vm13, 4294967295, %v14907_v12  ;;  %v14911_v1 = vsel %vm7052_vm0, 4294967295, %v14910_v1  ;;  %v3014_v52 = vand.u32 2147483647, %v3013_v5  ;;  %v3015_v59 = vand.u32 2147483648, %v14892_v57 }
 0x1ca   : > { %14906 = vst [vmem:[#allocation379_spill] sm:$0xff] %v7046_v0  ;;  %v3037_v60 = vcvt.s32.f32 %v3036_v54  ;;  %v7061_v63 = vor.u32 %v3007_v13, %v3006_v31  ;;  %vm7063_vm12 = vcmp.lt.f32.partialorder %v3018_v11, 8388608.0  ;;  %v14913_v44 = vmov 0  ;;  %v14917_v11 = vld [vmem:[#allocation111_spill] sm:$0xff]  ;;  %v14925_v0 = vld [vmem:[#allocation113_spill] sm:$0xff] }
 0x1cb   : > { %14909 = vst [vmem:[#allocation380_spill] sm:$0xff] %v14908_v12  ;;  %v14914_v44 = vsel %vm7063_vm12, 4294967295, %v14913_v44  ;;  %v3045_v20 = vcvt.s32.f32 %v3044_v42  ;;  %v3022_v23 = vand.u32 2147483647, %v3021_v7  ;;  %v3023_v14 = vand.u32 2147483648, %v14894_v43  ;;  %v14941_v43 = vld [vmem:[#allocation115_spill] sm:$0xff] }
 0x1cc   : > { %14912 = vst [vmem:[#allocation381_spill] sm:$0xff] %v14911_v1  ;;  %v3026_v5 = vand.u32 2147483647, %v14896_v6  ;;  %v3052_v30 = vcvt.f32.s32 %v14916_v53  ;;  %v3030_v8 = vand.u32 2147483647, %v3029_v21  ;;  %v3031_v31 = vand.u32 2147483648, %v14896_v6 }
 0x1cd   : > { %14915 = vst [vmem:[#allocation382_spill] sm:$0xff] %v14914_v44  ;;  %v3060_v13 = vcvt.f32.s32 %v14917_v11  ;;  %v7076_v38 = vor.u32 %v3015_v59, %v3014_v52  ;;  %v3034_v42 = vand.u32 2147483647, %v14897_v27  ;;  %v3038_v7 = vand.u32 2147483647, %v3037_v60  ;;  %v14945_v57 = vld [vmem:[#allocation117_spill] sm:$0xff] }
 0x1ce   : > { %v3039_v3 = vand.u32 2147483648, %v14897_v27  ;;  %v3042_v36 = vand.u32 2147483647, %v14899_v22  ;;  %v3046_v18 = vand.u32 2147483647, %v3045_v20  ;;  %v3047_v47 = vand.u32 2147483648, %v14899_v22 }
 0x1cf   : > { %14918 = vst [vmem:[#allocation383_spill] sm:$0xff] %v7076_v38  ;;  %v3068_v4 = vcvt.f32.s32 %v14919_v39  ;;  %v7087_v54 = vor.u32 %v3023_v14, %v3022_v23  ;;  %v3050_v59 = vand.u32 2147483647, %v14916_v53  ;;  %v3053_v52 = vcvt.s32.f32 %v3052_v30  ;;  %v14943_v27 = vld [vmem:[#allocation116_spill] sm:$0xff]  ;;  %v14948_v1 = vld [vmem:[#allocation119_spill] sm:$0xff] }
 0x1d0   : > { %vm7090_vm14 = vcmp.lt.f32.partialorder %v3026_v5, 8388608.0  ;;  %v14921_v60 = vmov 0  ;;  %v7094_v33 = vor.u32 %v3031_v31, %v3030_v8  ;;  %v3061_v20 = vcvt.s32.f32 %v3060_v13  ;;  %v14934_v13 = vld [vmem:[#allocation114_spill] sm:$0xff] }
 0x1d1   : > { %14920 = vst [vmem:[#allocation384_spill] sm:$0xff] %v7087_v54  ;;  %v14922_v60 = vsel %vm7090_vm14, 4294967295, %v14921_v60  ;;  %v3076_v61 = vcvt.f32.s32 %v14925_v0  ;;  %vm7101_vm13 = vcmp.lt.f32.partialorder %v3034_v42, 8388608.0  ;;  %v14926_v23 = vmov 0 }
 0x1d2   : > { %14923 = vst [vmem:[#allocation385_spill] sm:$0xff] %v14922_v60  ;;  %v14927_v23 = vsel %vm7101_vm13, 4294967295, %v14926_v23  ;;  %v7105_v14 = vor.u32 %v3039_v3, %v3038_v7  ;;  %v3058_v30 = vand.u32 2147483647, %v14917_v11  ;;  %vm7108_vm15 = vcmp.lt.f32.partialorder %v3042_v36, 8388608.0 }
 0x1d3   : > { %14924 = vst [vmem:[#allocation386_spill] sm:$0xff] %v7094_v33  ;;  %v14930_v5 = vmov 0  ;;  %v7112_v8 = vor.u32 %v3047_v47, %v3046_v18  ;;  %v3069_v31 = vcvt.s32.f32 %v3068_v4  ;;  %v3084_v21 = vcvt.f32.s32 %v14934_v13 }
 0x1d4   : > { %14928 = vst [vmem:[#allocation387_spill] sm:$0xff] %v14927_v23  ;;  %v14931_v5 = vsel %vm7108_vm15, 4294967295, %v14930_v5  ;;  %vm7119_vm0 = vcmp.lt.f32.partialorder %v3050_v59, 8388608.0  ;;  %v14935_v12 = vmov 0  ;;  %v3054_v3 = vand.u32 2147483647, %v3053_v52 }
 0x1d5   : > { %14929 = vst [vmem:[#allocation388_spill] sm:$0xff] %v7105_v14  ;;  %v14936_v12 = vsel %vm7119_vm0, 4294967295, %v14935_v12  ;;  %v3055_v36 = vand.u32 2147483648, %v14916_v53  ;;  %v3062_v18 = vand.u32 2147483647, %v3061_v20  ;;  %v3063_v4 = vand.u32 2147483648, %v14917_v11 }
 0x1d6   : > { %14932 = vst [vmem:[#allocation389_spill] sm:$0xff] %v14931_v5  ;;  %v3077_v7 = vcvt.s32.f32 %v3076_v61  ;;  %vm7133_vm12 = vcmp.lt.f32.partialorder %v3058_v30, 8388608.0  ;;  %v14938_v42 = vmov 0  ;;  %v3066_v52 = vand.u32 2147483647, %v14919_v39  ;;  %v14965_v11 = vld [vmem:[#allocation120_spill] sm:$0xff] }
 0x1d7   : > { %14933 = vst [vmem:[#allocation390_spill] sm:$0xff] %v7112_v8  ;;  %v14939_v42 = vsel %vm7133_vm12, 4294967295, %v14938_v42  ;;  %v3092_v54 = vcvt.f32.s32 %v14941_v43  ;;  %v3070_v47 = vand.u32 2147483647, %v3069_v31  ;;  %v3071_v61 = vand.u32 2147483648, %v14919_v39 }
 0x1d8   : > { %14937 = vst [vmem:[#allocation114_spill] sm:$0xff] %v14936_v12  ;;  %v3085_v6 = vcvt.s32.f32 %v3084_v21  ;;  %v7144_v33 = vor.u32 %v3055_v36, %v3054_v3  ;;  %v3074_v30 = vand.u32 2147483647, %v14925_v0  ;;  %v3079_v59 = vand.u32 2147483648, %v14925_v0  ;;  %v14946_v3 = vld [vmem:[#allocation118_spill] sm:$0xff] }
 0x1d9   : > { %14940 = vst [vmem:[#allocation391_spill] sm:$0xff] %v14939_v42  ;;  %v3100_v14 = vcvt.f32.s32 %v14943_v27  ;;  %v7149_v23 = vor.u32 %v3063_v4, %v3062_v18  ;;  %v3078_v60 = vand.u32 2147483647, %v3077_v7  ;;  %v3082_v44 = vand.u32 2147483647, %v14934_v13  ;;  %v14968_v12 = vld [vmem:[#allocation122_spill] sm:$0xff] }
 0x1da   : > { %14942 = vst [vmem:[#allocation392_spill] sm:$0xff] %v7144_v33  ;;  %v3108_v5 = vcvt.f32.s32 %v14945_v57  ;;  %v3087_v31 = vand.u32 2147483648, %v14934_v13  ;;  %v3090_v20 = vand.u32 2147483647, %v14941_v43  ;;  %v3093_v21 = vcvt.s32.f32 %v3092_v54 }
 0x1db   : > { %14944 = vst [vmem:[#allocation393_spill] sm:$0xff] %v7149_v23  ;;  %v3116_v36 = vcvt.f32.s32 %v14946_v3  ;;  %v7156_v22 = vor.u32 %v3071_v61, %v3070_v47  ;;  %v3086_v8 = vand.u32 2147483647, %v3085_v6  ;;  %v3098_v38 = vand.u32 2147483647, %v14943_v27 }
 0x1dc   : > { %v3124_v18 = vcvt.f32.s32 %v14948_v1  ;;  %vm7164_vm15 = vcmp.lt.f32.partialorder %v3066_v52, 8388608.0  ;;  %v14949_v7 = vmov 0  ;;  %vm7168_vm13 = vcmp.lt.f32.partialorder %v3074_v30, 8388608.0 }
 0x1dd   : > { %14947 = vst [vmem:[#allocation394_spill] sm:$0xff] %v7156_v22  ;;  %v14950_v7 = vsel %vm7164_vm15, 4294967295, %v14949_v7  ;;  %v14952_v54 = vmov 0  ;;  %v3101_v47 = vcvt.s32.f32 %v3100_v14  ;;  %v7176_v61 = vor.u32 %v3079_v59, %v3078_v60 }
 0x1de   : > { %14951 = vst [vmem:[#allocation395_spill] sm:$0xff] %v14950_v7  ;;  %v14953_v54 = vsel %vm7168_vm13, 4294967295, %v14952_v54  ;;  %vm7178_vm14 = vcmp.lt.f32.partialorder %v3082_v44, 8388608.0  ;;  %v14956_v62 = vmov 0  ;;  %v3109_v52 = vcvt.s32.f32 %v3108_v5 }
 0x1df   : > { %14954 = vst [vmem:[#allocation396_spill] sm:$0xff] %v14953_v54  ;;  %v14957_v62 = vsel %vm7178_vm14, 4294967295, %v14956_v62  ;;  %vm7182_vm0 = vcmp.lt.f32.partialorder %v3090_v20, 8388608.0  ;;  %v14959_v4 = vmov 0  ;;  %v3094_v30 = vand.u32 2147483647, %v3093_v21 }
 0x1e0   : > { %14955 = vst [vmem:[#allocation397_spill] sm:$0xff] %v7176_v61  ;;  %v14960_v4 = vsel %vm7182_vm0, 4294967295, %v14959_v4  ;;  %v3095_v53 = vand.u32 2147483648, %v14941_v43  ;;  %v3117_v14 = vcvt.s32.f32 %v3116_v36  ;;  %v7191_v60 = vor.u32 %v3087_v31, %v3086_v8 }
 0x1e1   : > { %14958 = vst [vmem:[#allocation398_spill] sm:$0xff] %v14957_v62  ;;  %vm7193_vm12 = vcmp.lt.f32.partialorder %v3098_v38, 8388608.0  ;;  %v14962_v44 = vmov 0  ;;  %v3125_v5 = vcvt.s32.f32 %v3124_v18  ;;  %v3102_v59 = vand.u32 2147483647, %v3101_v47  ;;  %v14966_v38 = vld [vmem:[#allocation121_spill] sm:$0xff] }
 0x1e2   : > { %14961 = vst [vmem:[#allocation399_spill] sm:$0xff] %v14960_v4  ;;  %v14963_v44 = vsel %vm7193_vm12, 4294967295, %v14962_v44  ;;  %v3103_v20 = vand.u32 2147483648, %v14943_v27  ;;  %v3106_v21 = vand.u32 2147483647, %v14945_v57  ;;  %v3132_v23 = vcvt.f32.s32 %v14965_v11  ;;  %v14989_v27 = vld [vmem:[#allocation125_spill] sm:$0xff] }
 0x1e3   : > { %14964 = vst [vmem:[#allocation400_spill] sm:$0xff] %v14963_v44  ;;  %v3110_v6 = vand.u32 2147483647, %v3109_v52  ;;  %v3111_v8 = vand.u32 2147483648, %v14945_v57  ;;  %v3140_v31 = vcvt.f32.s32 %v14966_v38  ;;  %v7206_v39 = vor.u32 %v3095_v53, %v3094_v30 }
 0x1e4   : > { %v3114_v18 = vand.u32 2147483647, %v14946_v3  ;;  %v3118_v47 = vand.u32 2147483647, %v3117_v14  ;;  %v3119_v22 = vand.u32 2147483648, %v14946_v3  ;;  %v3127_v33 = vand.u32 2147483648, %v14948_v1 }
 0x1e5   : > { %14967 = vst [vmem:[#allocation401_spill] sm:$0xff] %v7206_v39  ;;  %v3122_v7 = vand.u32 2147483647, %v14948_v1  ;;  %v3126_v42 = vand.u32 2147483647, %v3125_v5  ;;  %v3148_v54 = vcvt.f32.s32 %v14968_v12  ;;  %v7217_v36 = vor.u32 %v3103_v20, %v3102_v59  ;;  %v14991_v3 = vld [vmem:[#allocation126_spill] sm:$0xff] }
 0x1e6   : > { %v3130_v53 = vand.u32 2147483647, %v14965_v11  ;;  %v3133_v30 = vcvt.s32.f32 %v3132_v23  ;;  %vm7220_vm13 = vcmp.lt.f32.partialorder %v3106_v21, 8388608.0  ;;  %v14970_v14 = vmov 0  ;;  %v14995_v39 = vld [vmem:[#allocation129_spill] sm:$0xff] }
 0x1e7   : > { %14969 = vst [vmem:[#allocation402_spill] sm:$0xff] %v7217_v36  ;;  %v14971_v14 = vsel %vm7220_vm13, 4294967295, %v14970_v14  ;;  %v7224_v0 = vor.u32 %v3111_v8, %v3110_v6  ;;  %v3141_v5 = vcvt.s32.f32 %v3140_v31  ;;  %v3156_v61 = vcvt.f32.s32 %v5488_v28  ;;  %v14982_v31 = vld [vmem:[#allocation124_spill] sm:$0xff] }
 0x1e8   : > { %14972 = vst [vmem:[#allocation403_spill] sm:$0xff] %v14971_v14  ;;  %vm7231_vm14 = vcmp.lt.f32.partialorder %v3114_v18, 8388608.0  ;;  %v14974_v59 = vmov 0  ;;  %v7235_v20 = vor.u32 %v3119_v22, %v3118_v47  ;;  %v3138_v23 = vand.u32 2147483647, %v14966_v38 }
 0x1e9   : > { %14973 = vst [vmem:[#allocation404_spill] sm:$0xff] %v7224_v0  ;;  %v14975_v59 = vsel %vm7231_vm14, 4294967295, %v14974_v59  ;;  %vm7238_vm15 = vcmp.lt.f32.partialorder %v3122_v7, 8388608.0  ;;  %v14978_v21 = vmov 0  ;;  %v7242_v6 = vor.u32 %v3127_v33, %v3126_v42 }
 0x1ea   : > { %14976 = vst [vmem:[#allocation405_spill] sm:$0xff] %v14975_v59  ;;  %v14979_v21 = vsel %vm7238_vm15, 4294967295, %v14978_v21  ;;  %v3149_v8 = vcvt.s32.f32 %v3148_v54  ;;  %v3164_v52 = vcvt.f32.s32 %v14982_v31  ;;  %vm7249_vm0 = vcmp.lt.f32.partialorder %v3130_v53, 8388608.0 }
 0x1eb   : > { %14977 = vst [vmem:[#allocation406_spill] sm:$0xff] %v7235_v20  ;;  %v14983_v62 = vmov 0  ;;  %v3134_v22 = vand.u32 2147483647, %v3133_v30  ;;  %v3135_v7 = vand.u32 2147483648, %v14965_v11  ;;  %v3143_v54 = vand.u32 2147483648, %v14966_v38 }
 0x1ec   : > { %14980 = vst [vmem:[#allocation407_spill] sm:$0xff] %v14979_v21  ;;  %v14984_v62 = vsel %vm7249_vm0, 4294967295, %v14983_v62  ;;  %v3142_v42 = vand.u32 2147483647, %v3141_v5  ;;  %v3157_v47 = vcvt.s32.f32 %v3156_v61  ;;  %vm7263_vm12 = vcmp.lt.f32.partialorder %v3138_v23, 8388608.0  ;;  %v15013_v38 = vld [vmem:[#allocation130_spill] sm:$0xff] }
 0x1ed   : > { %14981 = vst [vmem:[#allocation408_spill] sm:$0xff] %v7242_v6  ;;  %v14986_v18 = vmov 0  ;;  %v3146_v30 = vand.u32 2147483647, %v14968_v12  ;;  %v3172_v36 = vcvt.f32.s32 %v14989_v27  ;;  %v3150_v33 = vand.u32 2147483647, %v3149_v8 }
 0x1ee   : > { %14985 = vst [vmem:[#allocation409_spill] sm:$0xff] %v14984_v62  ;;  %v14987_v18 = vsel %vm7263_vm12, 4294967295, %v14986_v18  ;;  %v3151_v61 = vand.u32 2147483648, %v14968_v12  ;;  %v3165_v57 = vcvt.s32.f32 %v3164_v52  ;;  %v7274_v0 = vor.u32 %v3135_v7, %v3134_v22  ;;  %v14993_v22 = vld [vmem:[#allocation128_spill] sm:$0xff] }
 0x1ef   : > { %14988 = vst [vmem:[#allocation410_spill] sm:$0xff] %v14987_v18  ;;  %v3154_v23 = vand.u32 2147483647, %v5488_v28  ;;  %v3159_v53 = vand.u32 2147483648, %v5488_v28  ;;  %v3180_v20 = vcvt.f32.s32 %v14991_v3  ;;  %v7279_v59 = vor.u32 %v3143_v54, %v3142_v42 }
 0x1f0   : > { %14990 = vst [vmem:[#allocation411_spill] sm:$0xff] %v7274_v0  ;;  %v3158_v14 = vand.u32 2147483647, %v3157_v47  ;;  %v3162_v44 = vand.u32 2147483647, %v14982_v31  ;;  %v3188_v21 = vcvt.f32.s32 %v5504_v15  ;;  %v3167_v8 = vand.u32 2147483648, %v14982_v31 }
 0x1f1   : > { %14992 = vst [vmem:[#allocation412_spill] sm:$0xff] %v7279_v59  ;;  %v3170_v5 = vand.u32 2147483647, %v14989_v27  ;;  %v3173_v52 = vcvt.s32.f32 %v3172_v36  ;;  %v3196_v7 = vcvt.f32.s32 %v14993_v22  ;;  %v7286_v1 = vor.u32 %v3151_v61, %v3150_v33  ;;  %v15015_v0 = vld [vmem:[#allocation132_spill] sm:$0xff] }
 0x1f2   : > { %v3166_v6 = vand.u32 2147483647, %v3165_v57  ;;  %v3178_v43 = vand.u32 2147483647, %v14991_v3  ;;  %v3204_v42 = vcvt.f32.s32 %v14995_v39  ;;  %vm7294_vm15 = vcmp.lt.f32.partialorder %v3146_v30, 8388608.0 }
 0x1f3   : > { %14994 = vst [vmem:[#allocation413_spill] sm:$0xff] %v7286_v1  ;;  %v14996_v47 = vmov 0  ;;  %vm7298_vm14 = vcmp.lt.f32.partialorder %v3154_v23, 8388608.0  ;;  %v14999_v36 = vmov 0  ;;  %v3181_v33 = vcvt.s32.f32 %v3180_v20 }
 0x1f4   : > { %v14997_v47 = vsel %vm7294_vm15, 4294967295, %v14996_v47  ;;  %v15000_v36 = vsel %vm7298_vm14, 4294967295, %v14999_v36  ;;  %v7306_v61 = vor.u32 %v3159_v53, %v3158_v14  ;;  %vm7308_vm13 = vcmp.lt.f32.partialorder %v3162_v44, 8388608.0 }
 0x1f5   : > { %14998 = vst [vmem:[#allocation414_spill] sm:$0xff] %v14997_v47  ;;  %v15003_v4 = vmov 0  ;;  %v3189_v30 = vcvt.s32.f32 %v3188_v21  ;;  %vm7312_vm0 = vcmp.lt.f32.partialorder %v3170_v5, 8388608.0  ;;  %v15006_v54 = vmov 0 }
 0x1f6   : > { %15001 = vst [vmem:[#allocation415_spill] sm:$0xff] %v15000_v36  ;;  %v15004_v4 = vsel %vm7308_vm13, 4294967295, %v15003_v4  ;;  %v15007_v54 = vsel %vm7312_vm0, 4294967295, %v15006_v54  ;;  %v3174_v23 = vand.u32 2147483647, %v3173_v52  ;;  %v3175_v11 = vand.u32 2147483648, %v14989_v27 }
 0x1f7   : > { %15002 = vst [vmem:[#allocation416_spill] sm:$0xff] %v7306_v61  ;;  %v3197_v20 = vcvt.s32.f32 %v3196_v7  ;;  %v7321_v14 = vor.u32 %v3167_v8, %v3166_v6  ;;  %vm7323_vm12 = vcmp.lt.f32.partialorder %v3178_v43, 8388608.0  ;;  %v15010_v44 = vmov 0  ;;  %v15021_v61 = vld [vmem:[#allocation133_spill] sm:$0xff] }
 0x1f8   : > { %15005 = vst [vmem:[#allocation417_spill] sm:$0xff] %v15004_v4  ;;  %v15011_v44 = vsel %vm7323_vm12, 4294967295, %v15010_v44  ;;  %v3205_v21 = vcvt.s32.f32 %v3204_v42  ;;  %v3182_v53 = vand.u32 2147483647, %v3181_v33  ;;  %v3183_v5 = vand.u32 2147483648, %v14991_v3 }
 0x1f9   : > { %15008 = vst [vmem:[#allocation418_spill] sm:$0xff] %v15007_v54  ;;  %v3186_v52 = vand.u32 2147483647, %v5504_v15  ;;  %v3212_v59 = vcvt.f32.s32 %v15013_v38  ;;  %v3190_v57 = vand.u32 2147483647, %v3189_v30  ;;  %v3191_v6 = vand.u32 2147483648, %v5504_v15 }
 0x1fa   : > { %15009 = vst [vmem:[#allocation419_spill] sm:$0xff] %v7321_v14  ;;  %v3220_v43 = vcvt.f32.s32 %v5519_v24  ;;  %v7336_v8 = vor.u32 %v3175_v11, %v3174_v23  ;;  %v3194_v42 = vand.u32 2147483647, %v14993_v22  ;;  %v3198_v33 = vand.u32 2147483647, %v3197_v20 }
 0x1fb   : > { %15012 = vst [vmem:[#allocation420_spill] sm:$0xff] %v15011_v44  ;;  %v3199_v12 = vand.u32 2147483648, %v14993_v22  ;;  %v3202_v1 = vand.u32 2147483647, %v14995_v39  ;;  %v3206_v47 = vand.u32 2147483647, %v3205_v21  ;;  %v3228_v36 = vcvt.f32.s32 %v15015_v0 }
 0x1fc   : > { %15014 = vst [vmem:[#allocation421_spill] sm:$0xff] %v7336_v8  ;;  %v3207_v18 = vand.u32 2147483648, %v14995_v39  ;;  %v7347_v7 = vor.u32 %v3183_v5, %v3182_v53  ;;  %v3210_v11 = vand.u32 2147483647, %v15013_v38  ;;  %v3213_v23 = vcvt.s32.f32 %v3212_v59  ;;  %v15038_v22 = vld [vmem:[#allocation136_spill] sm:$0xff]  ;;  %v15040_v44 = vld [vmem:[#allocation137_spill] sm:$0xff] }
 0x1fd   : > { %vm7350_vm14 = vcmp.lt.f32.partialorder %v3186_v52, 8388608.0  ;;  %v15017_v20 = vmov 0  ;;  %v7354_v28 = vor.u32 %v3191_v6, %v3190_v57  ;;  %v3221_v21 = vcvt.s32.f32 %v3220_v43  ;;  %v15030_v43 = vld [vmem:[#allocation134_spill] sm:$0xff] }
 0x1fe   : > { %15016 = vst [vmem:[#allocation422_spill] sm:$0xff] %v7347_v7  ;;  %v15018_v20 = vsel %vm7350_vm14, 4294967295, %v15017_v20  ;;  %v3236_v62 = vcvt.f32.s32 %v15021_v61  ;;  %vm7361_vm13 = vcmp.lt.f32.partialorder %v3194_v42, 8388608.0  ;;  %v15022_v53 = vmov 0 }
 0x1ff   : > { %15019 = vst [vmem:[#allocation423_spill] sm:$0xff] %v15018_v20  ;;  %v15023_v53 = vsel %vm7361_vm13, 4294967295, %v15022_v53  ;;  %v7365_v5 = vor.u32 %v3199_v12, %v3198_v33  ;;  %v3218_v59 = vand.u32 2147483647, %v5519_v24  ;;  %vm7368_vm15 = vcmp.lt.f32.partialorder %v3202_v1, 8388608.0 }
 0x200   : > { %15020 = vst [vmem:[#allocation424_spill] sm:$0xff] %v7354_v28  ;;  %v15026_v52 = vmov 0  ;;  %v7372_v57 = vor.u32 %v3207_v18, %v3206_v47  ;;  %v3229_v6 = vcvt.s32.f32 %v3228_v36  ;;  %v3244_v30 = vcvt.f32.s32 %v15030_v43 }
 0x201   : > { %15024 = vst [vmem:[#allocation425_spill] sm:$0xff] %v15023_v53  ;;  %v15027_v52 = vsel %vm7368_vm15, 4294967295, %v15026_v52  ;;  %vm7379_vm0 = vcmp.lt.f32.partialorder %v3210_v11, 8388608.0  ;;  %v15031_v4 = vmov 0  ;;  %v3214_v12 = vand.u32 2147483647, %v3213_v23 }
 0x202   : > { %15025 = vst [vmem:[#allocation426_spill] sm:$0xff] %v7365_v5  ;;  %v15032_v4 = vsel %vm7379_vm0, 4294967295, %v15031_v4  ;;  %v3215_v1 = vand.u32 2147483648, %v15013_v38  ;;  %v3222_v47 = vand.u32 2147483647, %v3221_v21  ;;  %v3223_v36 = vand.u32 2147483648, %v5519_v24 }
 0x203   : > { %15028 = vst [vmem:[#allocation427_spill] sm:$0xff] %v15027_v52  ;;  %v3237_v33 = vcvt.s32.f32 %v3236_v62  ;;  %vm7393_vm12 = vcmp.lt.f32.partialorder %v3218_v59, 8388608.0  ;;  %v15034_v42 = vmov 0  ;;  %v3226_v23 = vand.u32 2147483647, %v15015_v0  ;;  %v15060_v24 = vld [vmem:[#allocation140_spill] sm:$0xff] }
 0x204   : > { %15029 = vst [vmem:[#allocation428_spill] sm:$0xff] %v7372_v57  ;;  %v15035_v42 = vsel %vm7393_vm12, 4294967295, %v15034_v42  ;;  %v3252_v3 = vcvt.f32.s32 %v5534_v34  ;;  %v3230_v18 = vand.u32 2147483647, %v3229_v6  ;;  %v3231_v62 = vand.u32 2147483648, %v15015_v0 }
 0x205   : > { %15033 = vst [vmem:[#allocation429_spill] sm:$0xff] %v15032_v4  ;;  %v3245_v15 = vcvt.s32.f32 %v3244_v30  ;;  %v7404_v28 = vor.u32 %v3215_v1, %v3214_v12  ;;  %v3234_v59 = vand.u32 2147483647, %v15021_v61  ;;  %v3239_v11 = vand.u32 2147483648, %v15021_v61  ;;  %v15041_v12 = vld [vmem:[#allocation138_spill] sm:$0xff] }
 0x206   : > { %15036 = vst [vmem:[#allocation430_spill] sm:$0xff] %v15035_v42  ;;  %v3260_v5 = vcvt.f32.s32 %v15038_v22  ;;  %v7409_v53 = vor.u32 %v3223_v36, %v3222_v47  ;;  %v3238_v20 = vand.u32 2147483647, %v3237_v33  ;;  %v3242_v7 = vand.u32 2147483647, %v15030_v43  ;;  %v15063_v4 = vld [vmem:[#allocation142_spill] sm:$0xff] }
 0x207   : > { %15037 = vst [vmem:[#allocation431_spill] sm:$0xff] %v7404_v28  ;;  %v3268_v52 = vcvt.f32.s32 %v15040_v44  ;;  %v3247_v6 = vand.u32 2147483648, %v15030_v43  ;;  %v3250_v21 = vand.u32 2147483647, %v5534_v34  ;;  %v3253_v30 = vcvt.s32.f32 %v3252_v3 }
 0x208   : > { %15039 = vst [vmem:[#allocation432_spill] sm:$0xff] %v7409_v53  ;;  %v3276_v1 = vcvt.f32.s32 %v15041_v12  ;;  %v7416_v39 = vor.u32 %v3231_v62, %v3230_v18  ;;  %v3246_v57 = vand.u32 2147483647, %v3245_v15  ;;  %v3258_v27 = vand.u32 2147483647, %v15038_v22 }
 0x209   : > { %v3284_v47 = vcvt.f32.s32 %v5549_v50  ;;  %vm7424_vm15 = vcmp.lt.f32.partialorder %v3226_v23, 8388608.0  ;;  %v15043_v33 = vmov 0  ;;  %vm7428_vm13 = vcmp.lt.f32.partialorder %v3234_v59, 8388608.0 }
 0x20a   : > { %15042 = vst [vmem:[#allocation433_spill] sm:$0xff] %v7416_v39  ;;  %v15044_v33 = vsel %vm7424_vm15, 4294967295, %v15043_v33  ;;  %v15046_v3 = vmov 0  ;;  %v3261_v18 = vcvt.s32.f32 %v3260_v5  ;;  %v7436_v62 = vor.u32 %v3239_v11, %v3238_v20 }
 0x20b   : > { %15045 = vst [vmem:[#allocation434_spill] sm:$0xff] %v15044_v33  ;;  %v15047_v3 = vsel %vm7428_vm13, 4294967295, %v15046_v3  ;;  %vm7438_vm14 = vcmp.lt.f32.partialorder %v3242_v7, 8388608.0  ;;  %v15050_v8 = vmov 0  ;;  %v3269_v23 = vcvt.s32.f32 %v3268_v52 }
 0x20c   : > { %15048 = vst [vmem:[#allocation435_spill] sm:$0xff] %v15047_v3  ;;  %v15051_v8 = vsel %vm7438_vm14, 4294967295, %v15050_v8  ;;  %vm7442_vm0 = vcmp.lt.f32.partialorder %v3250_v21, 8388608.0  ;;  %v15053_v36 = vmov 0  ;;  %v3254_v59 = vand.u32 2147483647, %v3253_v30 }
 0x20d   : > { %15049 = vst [vmem:[#allocation436_spill] sm:$0xff] %v7436_v62  ;;  %v15054_v36 = vsel %vm7442_vm0, 4294967295, %v15053_v36  ;;  %v3255_v38 = vand.u32 2147483648, %v5534_v34  ;;  %v3277_v5 = vcvt.s32.f32 %v3276_v1  ;;  %v7451_v20 = vor.u32 %v3247_v6, %v3246_v57 }
 0x20e   : > { %15052 = vst [vmem:[#allocation437_spill] sm:$0xff] %v15051_v8  ;;  %vm7453_vm12 = vcmp.lt.f32.partialorder %v3258_v27, 8388608.0  ;;  %v15057_v7 = vmov 0  ;;  %v3285_v52 = vcvt.s32.f32 %v3284_v47  ;;  %v3262_v11 = vand.u32 2147483647, %v3261_v18  ;;  %v15061_v27 = vld [vmem:[#allocation141_spill] sm:$0xff] }
 0x20f   : > { %15055 = vst [vmem:[#allocation438_spill] sm:$0xff] %v15054_v36  ;;  %v15058_v7 = vsel %vm7453_vm12, 4294967295, %v15057_v7  ;;  %v3263_v21 = vand.u32 2147483648, %v15038_v22  ;;  %v3266_v30 = vand.u32 2147483647, %v15040_v44  ;;  %v3292_v53 = vcvt.f32.s32 %v15060_v24  ;;  %v15084_v22 = vld [vmem:[#allocation145_spill] sm:$0xff] }
 0x210   : > { %15056 = vst [vmem:[#allocation439_spill] sm:$0xff] %v7451_v20  ;;  %v3270_v15 = vand.u32 2147483647, %v3269_v23  ;;  %v3271_v57 = vand.u32 2147483648, %v15040_v44  ;;  %v3300_v6 = vcvt.f32.s32 %v15061_v27  ;;  %v7466_v0 = vor.u32 %v3255_v38, %v3254_v59 }
 0x211   : > { %15059 = vst [vmem:[#allocation440_spill] sm:$0xff] %v15058_v7  ;;  %v3274_v47 = vand.u32 2147483647, %v15041_v12  ;;  %v3278_v18 = vand.u32 2147483647, %v3277_v5  ;;  %v3279_v39 = vand.u32 2147483648, %v15041_v12  ;;  %v3308_v3 = vcvt.f32.s32 %v15063_v4 }
 0x212   : > { %15062 = vst [vmem:[#allocation441_spill] sm:$0xff] %v7466_v0  ;;  %v3282_v33 = vand.u32 2147483647, %v5549_v50  ;;  %v3286_v42 = vand.u32 2147483647, %v3285_v52  ;;  %v3287_v28 = vand.u32 2147483648, %v5549_v50  ;;  %v7477_v1 = vor.u32 %v3263_v21, %v3262_v11 }
 0x213   : > { %v3290_v38 = vand.u32 2147483647, %v15060_v24  ;;  %v3293_v59 = vcvt.s32.f32 %v3292_v53  ;;  %vm7480_vm13 = vcmp.lt.f32.partialorder %v3266_v30, 8388608.0  ;;  %v15065_v5 = vmov 0  ;;  %v15086_v12 = vld [vmem:[#allocation146_spill] sm:$0xff]  ;;  %v15090_v0 = vld [vmem:[#allocation149_spill] sm:$0xff] }
 0x214   : > { %15064 = vst [vmem:[#allocation442_spill] sm:$0xff] %v7477_v1  ;;  %v15066_v5 = vsel %vm7480_vm13, 4294967295, %v15065_v5  ;;  %v7484_v61 = vor.u32 %v3271_v57, %v3270_v15  ;;  %v3301_v52 = vcvt.s32.f32 %v3300_v6  ;;  %v3316_v62 = vcvt.f32.s32 %v5564_v49  ;;  %v15077_v6 = vld [vmem:[#allocation144_spill] sm:$0xff] }
 0x215   : > { %15067 = vst [vmem:[#allocation443_spill] sm:$0xff] %v15066_v5  ;;  %vm7491_vm14 = vcmp.lt.f32.partialorder %v3274_v47, 8388608.0  ;;  %v15069_v11 = vmov 0  ;;  %v7495_v21 = vor.u32 %v3279_v39, %v3278_v18  ;;  %v3298_v53 = vand.u32 2147483647, %v15061_v27 }
 0x216   : > { %15068 = vst [vmem:[#allocation444_spill] sm:$0xff] %v7484_v61  ;;  %v15070_v11 = vsel %vm7491_vm14, 4294967295, %v15069_v11  ;;  %vm7498_vm15 = vcmp.lt.f32.partialorder %v3282_v33, 8388608.0  ;;  %v15073_v30 = vmov 0  ;;  %v7502_v15 = vor.u32 %v3287_v28, %v3286_v42 }
 0x217   : > { %15071 = vst [vmem:[#allocation445_spill] sm:$0xff] %v15070_v11  ;;  %v15074_v30 = vsel %vm7498_vm15, 4294967295, %v15073_v30  ;;  %v3309_v57 = vcvt.s32.f32 %v3308_v3  ;;  %v3324_v23 = vcvt.f32.s32 %v15077_v6  ;;  %vm7509_vm0 = vcmp.lt.f32.partialorder %v3290_v38, 8388608.0 }
 0x218   : > { %15072 = vst [vmem:[#allocation446_spill] sm:$0xff] %v7495_v21  ;;  %v15078_v8 = vmov 0  ;;  %v3294_v39 = vand.u32 2147483647, %v3293_v59  ;;  %v3295_v33 = vand.u32 2147483648, %v15060_v24  ;;  %v3303_v3 = vand.u32 2147483648, %v15061_v27 }
 0x219   : > { %15075 = vst [vmem:[#allocation447_spill] sm:$0xff] %v15074_v30  ;;  %v15079_v8 = vsel %vm7509_vm0, 4294967295, %v15078_v8  ;;  %v3302_v42 = vand.u32 2147483647, %v3301_v52  ;;  %v3317_v18 = vcvt.s32.f32 %v3316_v62  ;;  %vm7523_vm12 = vcmp.lt.f32.partialorder %v3298_v53, 8388608.0 }
 0x21a   : > { %15076 = vst [vmem:[#allocation448_spill] sm:$0xff] %v7502_v15  ;;  %v15081_v47 = vmov 0  ;;  %v3306_v59 = vand.u32 2147483647, %v15063_v4  ;;  %v3332_v1 = vcvt.f32.s32 %v15084_v22  ;;  %v3310_v28 = vand.u32 2147483647, %v3309_v57 }
 0x21b   : > { %15080 = vst [vmem:[#allocation449_spill] sm:$0xff] %v15079_v8  ;;  %v15082_v47 = vsel %vm7523_vm12, 4294967295, %v15081_v47  ;;  %v3311_v62 = vand.u32 2147483648, %v15063_v4  ;;  %v3325_v44 = vcvt.s32.f32 %v3324_v23  ;;  %v7534_v61 = vor.u32 %v3295_v33, %v3294_v39  ;;  %v15088_v39 = vld [vmem:[#allocation148_spill] sm:$0xff] }
 0x21c   : > { %15083 = vst [vmem:[#allocation450_spill] sm:$0xff] %v15082_v47  ;;  %v3314_v53 = vand.u32 2147483647, %v5564_v49  ;;  %v3319_v38 = vand.u32 2147483648, %v5564_v49  ;;  %v3340_v21 = vcvt.f32.s32 %v15086_v12  ;;  %v7539_v11 = vor.u32 %v3303_v3, %v3302_v42 }
 0x21d   : > { %15085 = vst [vmem:[#allocation451_spill] sm:$0xff] %v7534_v61  ;;  %v3318_v5 = vand.u32 2147483647, %v3317_v18  ;;  %v3322_v7 = vand.u32 2147483647, %v15077_v6  ;;  %v3327_v57 = vand.u32 2147483648, %v15077_v6  ;;  %v3333_v52 = vcvt.s32.f32 %v3332_v1 }
 0x21e   : > { %15087 = vst [vmem:[#allocation452_spill] sm:$0xff] %v7539_v11  ;;  %v3330_v30 = vand.u32 2147483647, %v15084_v22  ;;  %v3348_v23 = vcvt.f32.s32 %v5579_v58  ;;  %v3356_v33 = vcvt.f32.s32 %v15088_v39  ;;  %v7546_v50 = vor.u32 %v3311_v62, %v3310_v28  ;;  %v15108_v11 = vld [vmem:[#allocation150_spill] sm:$0xff]  ;;  %v15110_v61 = vld [vmem:[#allocation152_spill] sm:$0xff] }
 0x21f   : > { %v3326_v15 = vand.u32 2147483647, %v3325_v44  ;;  %v3338_v34 = vand.u32 2147483647, %v15086_v12  ;;  %v3364_v42 = vcvt.f32.s32 %v15090_v0  ;;  %vm7554_vm15 = vcmp.lt.f32.partialorder %v3306_v59, 8388608.0  ;;  %v15125_v6 = vld [vmem:[#allocation154_spill] sm:$0xff] }
 0x220   : > { %15089 = vst [vmem:[#allocation453_spill] sm:$0xff] %v7546_v50  ;;  %v15091_v18 = vmov 0  ;;  %vm7558_vm14 = vcmp.lt.f32.partialorder %v3314_v53, 8388608.0  ;;  %v15094_v1 = vmov 0  ;;  %v3341_v28 = vcvt.s32.f32 %v3340_v21 }
 0x221   : > { %v15092_v18 = vsel %vm7554_vm15, 4294967295, %v15091_v18  ;;  %v15095_v1 = vsel %vm7558_vm14, 4294967295, %v15094_v1  ;;  %v7566_v62 = vor.u32 %v3319_v38, %v3318_v5  ;;  %vm7568_vm13 = vcmp.lt.f32.partialorder %v3322_v7, 8388608.0 }
 0x222   : > { %15093 = vst [vmem:[#allocation454_spill] sm:$0xff] %v15092_v18  ;;  %v15098_v36 = vmov 0  ;;  %vm7572_vm0 = vcmp.lt.f32.partialorder %v3330_v30, 8388608.0  ;;  %v15101_v59 = vmov 0  ;;  %v3334_v53 = vand.u32 2147483647, %v3333_v52 }
 0x223   : > { %15096 = vst [vmem:[#allocation455_spill] sm:$0xff] %v15095_v1  ;;  %v15099_v36 = vsel %vm7568_vm13, 4294967295, %v15098_v36  ;;  %v15102_v59 = vsel %vm7572_vm0, 4294967295, %v15101_v59  ;;  %v3335_v3 = vand.u32 2147483648, %v15084_v22  ;;  %v3349_v24 = vcvt.s32.f32 %v3348_v23  ;;  %v15138_v22 = vld [vmem:[#allocation159_spill] sm:$0xff] }
 0x224   : > { %15097 = vst [vmem:[#allocation456_spill] sm:$0xff] %v7566_v62  ;;  %v3357_v21 = vcvt.s32.f32 %v3356_v33  ;;  %v7581_v5 = vor.u32 %v3327_v57, %v3326_v15  ;;  %vm7583_vm12 = vcmp.lt.f32.partialorder %v3338_v34, 8388608.0  ;;  %v15105_v7 = vmov 0  ;;  %v15118_v62 = vld [vmem:[#allocation153_spill] sm:$0xff] }
 0x225   : > { %15100 = vst [vmem:[#allocation457_spill] sm:$0xff] %v15099_v36  ;;  %v15106_v7 = vsel %vm7583_vm12, 4294967295, %v15105_v7  ;;  %v3365_v30 = vcvt.s32.f32 %v3364_v42  ;;  %v3342_v38 = vand.u32 2147483647, %v3341_v28  ;;  %v3343_v27 = vand.u32 2147483648, %v15086_v12  ;;  %v15210_v36 = vld [vmem:[#allocation172_spill] sm:$0xff] }
 0x226   : > { %15103 = vst [vmem:[#allocation458_spill] sm:$0xff] %v15102_v59  ;;  %v3346_v52 = vand.u32 2147483647, %v5579_v58  ;;  %v3372_v23 = vcvt.f32.s32 %v15108_v11  ;;  %v3351_v15 = vand.u32 2147483648, %v5579_v58  ;;  %v3354_v34 = vand.u32 2147483647, %v15088_v39 }
 0x227   : > { %15104 = vst [vmem:[#allocation459_spill] sm:$0xff] %v7581_v5  ;;  %v3380_v57 = vcvt.f32.s32 %v5594_v2  ;;  %v7597_v44 = vor.u32 %v3335_v3, %v3334_v53  ;;  %v3350_v42 = vand.u32 2147483647, %v3349_v24  ;;  %v3358_v28 = vand.u32 2147483647, %v3357_v21 }
 0x228   : > { %15107 = vst [vmem:[#allocation460_spill] sm:$0xff] %v15106_v7  ;;  %v3359_v4 = vand.u32 2147483648, %v15088_v39  ;;  %v3362_v50 = vand.u32 2147483647, %v15090_v0  ;;  %v3366_v18 = vand.u32 2147483647, %v3365_v30  ;;  %v3388_v1 = vcvt.f32.s32 %v15110_v61 }
 0x229   : > { %15109 = vst [vmem:[#allocation461_spill] sm:$0xff] %v7597_v44  ;;  %v3367_v47 = vand.u32 2147483648, %v15090_v0  ;;  %v7607_v49 = vor.u32 %v3343_v27, %v3342_v38  ;;  %v3370_v3 = vand.u32 2147483647, %v15108_v11  ;;  %v3373_v24 = vcvt.s32.f32 %v3372_v23  ;;  %v15135_v0 = vld [vmem:[#allocation157_spill] sm:$0xff] }
 0x22a   : > { %vm7610_vm14 = vcmp.lt.f32.partialorder %v3346_v52, 8388608.0  ;;  %v15112_v53 = vmov 0  ;;  %vm7614_vm15 = vcmp.lt.f32.partialorder %v3354_v34, 8388608.0  ;;  %v15115_v21 = vmov 0 }
 0x22b   : > { %15111 = vst [vmem:[#allocation462_spill] sm:$0xff] %v7607_v49  ;;  %v15113_v53 = vsel %vm7610_vm14, 4294967295, %v15112_v53  ;;  %v15116_v21 = vsel %vm7614_vm15, 4294967295, %v15115_v21  ;;  %v3381_v30 = vcvt.s32.f32 %v3380_v57  ;;  %v3396_v8 = vcvt.f32.s32 %v15118_v62 }
 0x22c   : > { %15114 = vst [vmem:[#allocation463_spill] sm:$0xff] %v15113_v53  ;;  %v7623_v38 = vor.u32 %v3351_v15, %v3350_v42  ;;  %v7625_v33 = vor.u32 %v3359_v4, %v3358_v28  ;;  %v3378_v52 = vand.u32 2147483647, %v5594_v2  ;;  %vm7628_vm13 = vcmp.lt.f32.partialorder %v3362_v50, 8388608.0 }
 0x22d   : > { %15117 = vst [vmem:[#allocation464_spill] sm:$0xff] %v15116_v21  ;;  %v15121_v23 = vmov 0  ;;  %v7632_v34 = vor.u32 %v3367_v47, %v3366_v18  ;;  %v3389_v57 = vcvt.s32.f32 %v3388_v1  ;;  %v3404_v5 = vcvt.f32.s32 %v15125_v6 }
 0x22e   : > { %15119 = vst [vmem:[#allocation465_spill] sm:$0xff] %v7623_v38  ;;  %v15122_v23 = vsel %vm7628_vm13, 4294967295, %v15121_v23  ;;  %vm7639_vm0 = vcmp.lt.f32.partialorder %v3370_v3, 8388608.0  ;;  %v15126_v15 = vmov 0  ;;  %v3374_v4 = vand.u32 2147483647, %v3373_v24 }
 0x22f   : > { %15120 = vst [vmem:[#allocation466_spill] sm:$0xff] %v7625_v33  ;;  %v15127_v15 = vsel %vm7639_vm0, 4294967295, %v15126_v15  ;;  %v3375_v50 = vand.u32 2147483648, %v15108_v11  ;;  %v3382_v42 = vand.u32 2147483647, %v3381_v30  ;;  %v3383_v28 = vand.u32 2147483648, %v5594_v2 }
 0x230   : > { %15123 = vst [vmem:[#allocation467_spill] sm:$0xff] %v15122_v23  ;;  %v3397_v47 = vcvt.s32.f32 %v3396_v8  ;;  %v3412_v18 = vcvt.f32.s32 %v5609_v10  ;;  %vm7654_vm12 = vcmp.lt.f32.partialorder %v3378_v52, 8388608.0  ;;  %v15129_v24 = vmov 0  ;;  %v15133_v3 = vld [vmem:[#allocation156_spill] sm:$0xff] }
 0x231   : > { %15124 = vst [vmem:[#allocation468_spill] sm:$0xff] %v7632_v34  ;;  %v15130_v24 = vsel %vm7654_vm12, 4294967295, %v15129_v24  ;;  %v3386_v30 = vand.u32 2147483647, %v15110_v61  ;;  %v3390_v27 = vand.u32 2147483647, %v3389_v57  ;;  %v3405_v1 = vcvt.s32.f32 %v3404_v5 }
 0x232   : > { %15128 = vst [vmem:[#allocation469_spill] sm:$0xff] %v15127_v15  ;;  %v3391_v53 = vand.u32 2147483648, %v15110_v61  ;;  %v7664_v58 = vor.u32 %v3375_v50, %v3374_v4  ;;  %v3394_v21 = vand.u32 2147483647, %v15118_v62  ;;  %v3399_v52 = vand.u32 2147483648, %v15118_v62  ;;  %v15136_v4 = vld [vmem:[#allocation158_spill] sm:$0xff] }
 0x233   : > { %15131 = vst [vmem:[#allocation470_spill] sm:$0xff] %v15130_v24  ;;  %v3420_v39 = vcvt.f32.s32 %v15133_v3  ;;  %v7669_v33 = vor.u32 %v3383_v28, %v3382_v42  ;;  %v3398_v38 = vand.u32 2147483647, %v3397_v47  ;;  %v3402_v12 = vand.u32 2147483647, %v15125_v6  ;;  %v15156_v2 = vld [vmem:[#allocation160_spill] sm:$0xff] }
 0x234   : > { %15132 = vst [vmem:[#allocation471_spill] sm:$0xff] %v7664_v58  ;;  %v3413_v49 = vcvt.s32.f32 %v3412_v18  ;;  %v3407_v8 = vand.u32 2147483648, %v15125_v6  ;;  %v3410_v57 = vand.u32 2147483647, %v5609_v10  ;;  %v3428_v5 = vcvt.f32.s32 %v15135_v0  ;;  %v15166_v6 = vld [vmem:[#allocation162_spill] sm:$0xff] }
 0x235   : > { %15134 = vst [vmem:[#allocation472_spill] sm:$0xff] %v7669_v33  ;;  %v3436_v50 = vcvt.f32.s32 %v15136_v4  ;;  %v7676_v34 = vor.u32 %v3391_v53, %v3390_v27  ;;  %v3406_v23 = vand.u32 2147483647, %v3405_v1  ;;  %v3418_v7 = vand.u32 2147483647, %v15133_v3 }
 0x236   : > { %v3444_v42 = vcvt.f32.s32 %v15138_v22  ;;  %vm7684_vm13 = vcmp.lt.f32.partialorder %v3386_v30, 8388608.0  ;;  %v15139_v47 = vmov 0  ;;  %vm7688_vm15 = vcmp.lt.f32.partialorder %v3394_v21, 8388608.0 }
 0x237   : > { %15137 = vst [vmem:[#allocation473_spill] sm:$0xff] %v7676_v34  ;;  %v15140_v47 = vsel %vm7684_vm13, 4294967295, %v15139_v47  ;;  %v15142_v18 = vmov 0  ;;  %v3421_v53 = vcvt.s32.f32 %v3420_v39  ;;  %v7692_v27 = vor.u32 %v3399_v52, %v3398_v38 }
 0x238   : > { %15141 = vst [vmem:[#allocation474_spill] sm:$0xff] %v15140_v47  ;;  %v15143_v18 = vsel %vm7688_vm15, 4294967295, %v15142_v18  ;;  %vm7694_vm14 = vcmp.lt.f32.partialorder %v3402_v12, 8388608.0  ;;  %v15146_v1 = vmov 0  ;;  %v3414_v44 = vand.u32 2147483647, %v3413_v49 }
 0x239   : > { %15144 = vst [vmem:[#allocation475_spill] sm:$0xff] %v15143_v18  ;;  %v15147_v1 = vsel %vm7694_vm14, 4294967295, %v15146_v1  ;;  %v3415_v59 = vand.u32 2147483648, %v5609_v10  ;;  %vm7703_vm0 = vcmp.lt.f32.partialorder %v3410_v57, 8388608.0  ;;  %v15149_v21 = vmov 0  ;;  %v15174_v10 = vld [vmem:[#allocation164_spill] sm:$0xff] }
 0x23a   : > { %15145 = vst [vmem:[#allocation476_spill] sm:$0xff] %v7692_v27  ;;  %v15150_v21 = vsel %vm7703_vm0, 4294967295, %v15149_v21  ;;  %v3429_v28 = vcvt.s32.f32 %v3428_v5  ;;  %v3437_v39 = vcvt.s32.f32 %v3436_v50  ;;  %v7711_v38 = vor.u32 %v3407_v8, %v3406_v23  ;;  %v15158_v23 = vld [vmem:[#allocation161_spill] sm:$0xff]  ;;  %v15169_v27 = vld [vmem:[#allocation163_spill] sm:$0xff] }
 0x23b   : > { %15148 = vst [vmem:[#allocation477_spill] sm:$0xff] %v15147_v1  ;;  %vm7713_vm11 = vcmp.lt.f32.partialorder %v3418_v7, 8388608.0  ;;  %v15153_v49 = vmov 0  ;;  %v3445_v52 = vcvt.s32.f32 %v3444_v42  ;;  %v3422_v24 = vand.u32 2147483647, %v3421_v53 }
 0x23c   : > { %15151 = vst [vmem:[#allocation478_spill] sm:$0xff] %v15150_v21  ;;  %v15154_v49 = vsel %vm7713_vm11, 4294967295, %v15153_v49  ;;  %v3423_v57 = vand.u32 2147483648, %v15133_v3  ;;  %v3426_v30 = vand.u32 2147483647, %v15135_v0  ;;  %v3452_v5 = vcvt.f32.s32 %v15156_v2 }
 0x23d   : > { %15152 = vst [vmem:[#allocation479_spill] sm:$0xff] %v7711_v38  ;;  %v7724_v12 = vor.u32 %v3415_v59, %v3414_v44  ;;  %v3434_v7 = vand.u32 2147483647, %v15136_v4  ;;  %v3460_v8 = vcvt.f32.s32 %v15158_v23  ;;  %v3430_v61 = vand.u32 2147483647, %v3429_v28 }
 0x23e   : > { %15155 = vst [vmem:[#allocation480_spill] sm:$0xff] %v15154_v49  ;;  %v3431_v42 = vand.u32 2147483648, %v15135_v0  ;;  %v3438_v53 = vand.u32 2147483647, %v3437_v39  ;;  %v3439_v34 = vand.u32 2147483648, %v15136_v4  ;;  %v3447_v44 = vand.u32 2147483648, %v15138_v22 }
 0x23f   : > { %15157 = vst [vmem:[#allocation481_spill] sm:$0xff] %v7724_v12  ;;  %v3442_v18 = vand.u32 2147483647, %v15138_v22  ;;  %v3446_v50 = vand.u32 2147483647, %v3445_v52  ;;  %v7736_v59 = vor.u32 %v3423_v57, %v3422_v24  ;;  %vm7738_vm15 = vcmp.lt.f32.partialorder %v3426_v30, 8388608.0 }
 0x240   : > { %v15160_v62 = vmov 0  ;;  %v3450_v28 = vand.u32 2147483647, %v15156_v2  ;;  %v3453_v39 = vcvt.s32.f32 %v3452_v5  ;;  %vm7747_vm14 = vcmp.lt.f32.partialorder %v3434_v7, 8388608.0  ;;  %v15178_v12 = vld [vmem:[#allocation165_spill] sm:$0xff]  ;;  %v15185_v0 = vld [vmem:[#allocation166_spill] sm:$0xff] }
 0x241   : > { %15159 = vst [vmem:[#allocation482_spill] sm:$0xff] %v7736_v59  ;;  %v15161_v62 = vsel %vm7738_vm15, 4294967295, %v15160_v62  ;;  %v15163_v47 = vmov 0  ;;  %v3461_v52 = vcvt.s32.f32 %v3460_v8  ;;  %v3468_v24 = vcvt.f32.s32 %v15166_v6 }
 0x242   : > { %15162 = vst [vmem:[#allocation483_spill] sm:$0xff] %v15161_v62  ;;  %v15164_v47 = vsel %vm7747_vm14, 4294967295, %v15163_v47  ;;  %v7752_v57 = vor.u32 %v3431_v42, %v3430_v61  ;;  %v7754_v30 = vor.u32 %v3439_v34, %v3438_v53  ;;  %v3458_v38 = vand.u32 2147483647, %v15158_v23 }
 0x243   : > { %15165 = vst [vmem:[#allocation484_spill] sm:$0xff] %v15164_v47  ;;  %v3476_v5 = vcvt.f32.s32 %v15169_v27  ;;  %vm7758_vm13 = vcmp.lt.f32.partialorder %v3442_v18, 8388608.0  ;;  %v15170_v33 = vmov 0  ;;  %v7762_v1 = vor.u32 %v3447_v44, %v3446_v50  ;;  %v15189_v47 = vld [vmem:[#allocation168_spill] sm:$0xff] }
 0x244   : > { %15167 = vst [vmem:[#allocation485_spill] sm:$0xff] %v7752_v57  ;;  %v15171_v33 = vsel %vm7758_vm13, 4294967295, %v15170_v33  ;;  %v3466_v7 = vand.u32 2147483647, %v15166_v6  ;;  %v3484_v8 = vcvt.f32.s32 %v15174_v10  ;;  %vm7770_vm0 = vcmp.lt.f32.partialorder %v3450_v28, 8388608.0 }
 0x245   : > { %15168 = vst [vmem:[#allocation486_spill] sm:$0xff] %v7754_v30  ;;  %v15175_v34 = vmov 0  ;;  %v3454_v42 = vand.u32 2147483647, %v3453_v39  ;;  %v3455_v18 = vand.u32 2147483648, %v15156_v2  ;;  %v3463_v50 = vand.u32 2147483648, %v15158_v23 }
 0x246   : > { %15172 = vst [vmem:[#allocation487_spill] sm:$0xff] %v15171_v33  ;;  %v15176_v34 = vsel %vm7770_vm0, 4294967295, %v15175_v34  ;;  %v3462_v53 = vand.u32 2147483647, %v3461_v52  ;;  %v3469_v44 = vcvt.s32.f32 %v3468_v24  ;;  %v3492_v21 = vcvt.f32.s32 %v15178_v12 }
 0x247   : > { %15173 = vst [vmem:[#allocation488_spill] sm:$0xff] %v7762_v1  ;;  %vm7785_vm11 = vcmp.lt.f32.partialorder %v3458_v38, 8388608.0  ;;  %v15179_v39 = vmov 0  ;;  %v3477_v52 = vcvt.s32.f32 %v3476_v5  ;;  %vm7793_vm12 = vcmp.lt.f32.partialorder %v3466_v7, 8388608.0 }
 0x248   : > { %15177 = vst [vmem:[#allocation489_spill] sm:$0xff] %v15176_v34  ;;  %v15180_v39 = vsel %vm7785_vm11, 4294967295, %v15179_v39  ;;  %v15182_v61 = vmov 0  ;;  %v3485_v11 = vcvt.s32.f32 %v3484_v8  ;;  %v3500_v57 = vcvt.f32.s32 %v15185_v0  ;;  %v15188_v8 = vld [vmem:[#allocation167_spill] sm:$0xff] }
 0x249   : > { %15181 = vst [vmem:[#allocation490_spill] sm:$0xff] %v15180_v39  ;;  %v15183_v61 = vsel %vm7793_vm12, 4294967295, %v15182_v61  ;;  %v7798_v62 = vor.u32 %v3455_v18, %v3454_v42  ;;  %v3471_v38 = vand.u32 2147483648, %v15166_v6  ;;  %v3474_v28 = vand.u32 2147483647, %v15169_v27 }
 0x24a   : > { %15184 = vst [vmem:[#allocation491_spill] sm:$0xff] %v15183_v61  ;;  %v3482_v5 = vand.u32 2147483647, %v15174_v10  ;;  %v7803_v4 = vor.u32 %v3463_v50, %v3462_v53  ;;  %v3470_v30 = vand.u32 2147483647, %v3469_v44  ;;  %v3479_v24 = vand.u32 2147483648, %v15169_v27 }
 0x24b   : > { %15186 = vst [vmem:[#allocation492_spill] sm:$0xff] %v7798_v62  ;;  %v3493_v7 = vcvt.s32.f32 %v3492_v21  ;;  %v3478_v22 = vand.u32 2147483647, %v3477_v52  ;;  %v3490_v1 = vand.u32 2147483647, %v15178_v12  ;;  %v3508_v33 = vcvt.f32.s32 %v15188_v8  ;;  %v15196_v44 = vld [vmem:[#allocation169_spill] sm:$0xff] }
 0x24c   : > { %15187 = vst [vmem:[#allocation493_spill] sm:$0xff] %v7803_v4  ;;  %v3516_v42 = vcvt.f32.s32 %v15189_v47  ;;  %v3486_v18 = vand.u32 2147483647, %v3485_v11  ;;  %v3487_v3 = vand.u32 2147483648, %v15174_v10  ;;  %v3498_v59 = vand.u32 2147483647, %v15185_v0 }
 0x24d   : > { %v3501_v49 = vcvt.s32.f32 %v3500_v57  ;;  %vm7815_vm13 = vcmp.lt.f32.partialorder %v3474_v28, 8388608.0  ;;  %v15190_v21 = vmov 0  ;;  %vm7819_vm14 = vcmp.lt.f32.partialorder %v3482_v5, 8388608.0 }
 0x24e   : > { %v15191_v21 = vsel %vm7815_vm13, 4294967295, %v15190_v21  ;;  %v15193_v50 = vmov 0  ;;  %v3524_v11 = vcvt.f32.s32 %v15196_v44  ;;  %v7828_v52 = vor.u32 %v3471_v38, %v3470_v30 }
 0x24f   : > { %15192 = vst [vmem:[#allocation494_spill] sm:$0xff] %v15191_v21  ;;  %v15194_v50 = vsel %vm7819_vm14, 4294967295, %v15193_v50  ;;  %v3494_v58 = vand.u32 2147483647, %v3493_v7  ;;  %v3495_v53 = vand.u32 2147483648, %v15178_v12  ;;  %v7831_v28 = vor.u32 %v3479_v24, %v3478_v22  ;;  %v15222_v12 = vld [vmem:[#allocation173_spill] sm:$0xff] }
 0x250   : > { %15195 = vst [vmem:[#allocation495_spill] sm:$0xff] %v15194_v50  ;;  %vm7833_vm0 = vcmp.lt.f32.partialorder %v3490_v1, 8388608.0  ;;  %v15199_v2 = vmov 0  ;;  %v3509_v5 = vcvt.s32.f32 %v3508_v33  ;;  %v3517_v62 = vcvt.s32.f32 %v3516_v42  ;;  %v15206_v1 = vld [vmem:[#allocation170_spill] sm:$0xff] }
 0x251   : > { %15197 = vst [vmem:[#allocation496_spill] sm:$0xff] %v7828_v52  ;;  %v15200_v2 = vsel %vm7833_vm0, 4294967295, %v15199_v2  ;;  %v7837_v34 = vor.u32 %v3487_v3, %v3486_v18  ;;  %vm7839_vm15 = vcmp.lt.f32.partialorder %v3498_v59, 8388608.0  ;;  %v15203_v15 = vmov 0  ;;  %v15208_v59 = vld [vmem:[#allocation171_spill] sm:$0xff] }
 0x252   : > { %15198 = vst [vmem:[#allocation497_spill] sm:$0xff] %v7831_v28  ;;  %v15204_v15 = vsel %vm7839_vm15, 4294967295, %v15203_v15  ;;  %v3502_v57 = vand.u32 2147483647, %v3501_v49  ;;  %v3503_v30 = vand.u32 2147483648, %v15185_v0  ;;  %v3511_v22 = vand.u32 2147483648, %v15188_v8 }
 0x253   : > { %15201 = vst [vmem:[#allocation498_spill] sm:$0xff] %v15200_v2  ;;  %v3506_v38 = vand.u32 2147483647, %v15188_v8  ;;  %v3525_v24 = vcvt.s32.f32 %v3524_v11  ;;  %v3532_v7 = vcvt.f32.s32 %v15206_v1  ;;  %v7847_v23 = vor.u32 %v3495_v53, %v3494_v58  ;;  %v15223_v2 = vld [vmem:[#allocation174_spill] sm:$0xff] }
 0x254   : > { %15202 = vst [vmem:[#allocation499_spill] sm:$0xff] %v7837_v34  ;;  %v3514_v33 = vand.u32 2147483647, %v15189_v47  ;;  %v3519_v3 = vand.u32 2147483648, %v15189_v47  ;;  %v3540_v42 = vcvt.f32.s32 %v15208_v59  ;;  %v3510_v18 = vand.u32 2147483647, %v3509_v5 }
 0x255   : > { %15205 = vst [vmem:[#allocation500_spill] sm:$0xff] %v15204_v15  ;;  %v3518_v4 = vand.u32 2147483647, %v3517_v62  ;;  %v3522_v39 = vand.u32 2147483647, %v15196_v44  ;;  %v7865_v11 = vor.u32 %v3503_v30, %v3502_v57  ;;  %v3548_v43 = vcvt.f32.s32 %v15210_v36 }
 0x256   : > { %15207 = vst [vmem:[#allocation501_spill] sm:$0xff] %v7847_v23  ;;  %vm7868_vm11 = vcmp.lt.f32.partialorder %v3506_v38, 8388608.0  ;;  %v15211_v49 = vmov 0  ;;  %v3526_v62 = vand.u32 2147483647, %v3525_v24  ;;  %v3527_v5 = vand.u32 2147483648, %v15196_v44 }
 0x257   : > { %15209 = vst [vmem:[#allocation502_spill] sm:$0xff] %v7865_v11  ;;  %v15212_v49 = vsel %vm7868_vm11, 4294967295, %v15211_v49  ;;  %v3533_v6 = vcvt.s32.f32 %v3532_v7  ;;  %vm7877_vm13 = vcmp.lt.f32.partialorder %v3514_v33, 8388608.0  ;;  %v15214_v50 = vmov 0 }
 0x258   : > { %15213 = vst [vmem:[#allocation503_spill] sm:$0xff] %v15212_v49  ;;  %v15215_v50 = vsel %vm7877_vm13, 4294967295, %v15214_v50  ;;  %v3530_v57 = vand.u32 2147483647, %v15206_v1  ;;  %v3541_v30 = vcvt.s32.f32 %v3540_v42  ;;  %v7882_v38 = vor.u32 %v3511_v22, %v3510_v18 }
 0x259   : > { %15216 = vst [vmem:[#allocation504_spill] sm:$0xff] %v15215_v50  ;;  %v7884_v53 = vor.u32 %v3519_v3, %v3518_v4  ;;  %vm7886_vm14 = vcmp.lt.f32.partialorder %v3522_v39, 8388608.0  ;;  %v15219_v24 = vmov 0  ;;  %v3538_v7 = vand.u32 2147483647, %v15208_v59  ;;  %v15225_v3 = vld [vmem:[#allocation175_spill] sm:$0xff] }
 0x25a   : > { %15217 = vst [vmem:[#allocation505_spill] sm:$0xff] %v7882_v38  ;;  %v15220_v24 = vsel %vm7886_vm14, 4294967295, %v15219_v24  ;;  %v3549_v58 = vcvt.s32.f32 %v3548_v43  ;;  %v3556_v23 = vcvt.f32.s32 %v15222_v12  ;;  %v3564_v42 = vcvt.f32.s32 %v15223_v2 }
 0x25b   : > { %15218 = vst [vmem:[#allocation506_spill] sm:$0xff] %v7884_v53  ;;  %v7897_v22 = vor.u32 %v3527_v5, %v3526_v62  ;;  %v3534_v4 = vand.u32 2147483647, %v3533_v6  ;;  %v3535_v39 = vand.u32 2147483648, %v15206_v1  ;;  %v3572_v18 = vcvt.f32.s32 %v15225_v3  ;;  %v15250_v1 = vld [vmem:[#allocation179_spill] sm:$0xff] }
 0x25c   : > { %15221 = vst [vmem:[#allocation507_spill] sm:$0xff] %v15220_v24  ;;  %vm7901_vm0 = vcmp.lt.f32.partialorder %v3530_v57, 8388608.0  ;;  %v15226_v10 = vmov 0  ;;  %v3542_v34 = vand.u32 2147483647, %v3541_v30  ;;  %v3543_v15 = vand.u32 2147483648, %v15208_v59 }
 0x25d   : > { %15224 = vst [vmem:[#allocation508_spill] sm:$0xff] %v7897_v22  ;;  %v15227_v10 = vsel %vm7901_vm0, 4294967295, %v15226_v10  ;;  %v3546_v43 = vand.u32 2147483647, %v15210_v36  ;;  %vm7915_vm15 = vcmp.lt.f32.partialorder %v3538_v7, 8388608.0  ;;  %v15229_v5 = vmov 0 }
 0x25e   : > { %15228 = vst [vmem:[#allocation509_spill] sm:$0xff] %v15227_v10  ;;  %v15230_v5 = vsel %vm7915_vm15, 4294967295, %v15229_v5  ;;  %v15232_v57 = vld [vmem:[#allocation176_spill] sm:$0xff]  ;;  %v3550_v33 = vand.u32 2147483647, %v3549_v58  ;;  %v3551_v0 = vand.u32 2147483648, %v15210_v36  ;;  %v3557_v11 = vcvt.s32.f32 %v3556_v23 }
 0x25f   : > { %15231 = vst [vmem:[#allocation510_spill] sm:$0xff] %v15230_v5  ;;  %v3580_v30 = vcvt.f32.s32 %v15232_v57  ;;  %v3565_v27 = vcvt.s32.f32 %v3564_v42  ;;  %v7925_v8 = vor.u32 %v3535_v39, %v3534_v4  ;;  %v3554_v6 = vand.u32 2147483647, %v15222_v12  ;;  %v15238_v4 = vld [vmem:[#allocation177_spill] sm:$0xff]  ;;  %v15254_v10 = vld [vmem:[#allocation180_spill] sm:$0xff] }
 0x260   : > { %v3573_v7 = vcvt.s32.f32 %v3572_v18  ;;  %v7928_v47 = vor.u32 %v3543_v15, %v3542_v34  ;;  %vm7930_vm13 = vcmp.lt.f32.partialorder %v3546_v43, 8388608.0  ;;  %v15235_v53 = vmov 0  ;;  %v15240_v34 = vld [vmem:[#allocation178_spill] sm:$0xff] }
 0x261   : > { %15233 = vst [vmem:[#allocation511_spill] sm:$0xff] %v7925_v8  ;;  %v15236_v53 = vsel %vm7930_vm13, 4294967295, %v15235_v53  ;;  %v3562_v58 = vand.u32 2147483647, %v15223_v2  ;;  %v3570_v23 = vand.u32 2147483647, %v15225_v3  ;;  %v3581_v62 = vcvt.s32.f32 %v3580_v30 }
 0x262   : > { %15234 = vst [vmem:[#allocation512_spill] sm:$0xff] %v7928_v47  ;;  %v3559_v42 = vand.u32 2147483648, %v15222_v12  ;;  %v3567_v24 = vand.u32 2147483648, %v15223_v2  ;;  %v3588_v39 = vcvt.f32.s32 %v15238_v4  ;;  %v7939_v44 = vor.u32 %v3551_v0, %v3550_v33 }
 0x263   : > { %15237 = vst [vmem:[#allocation513_spill] sm:$0xff] %v15236_v53  ;;  %v3558_v18 = vand.u32 2147483647, %v3557_v11  ;;  %v3566_v15 = vand.u32 2147483647, %v3565_v27  ;;  %v3596_v43 = vcvt.f32.s32 %v15240_v34  ;;  %vm7946_vm14 = vcmp.lt.f32.partialorder %v3554_v6, 8388608.0 }
 0x264   : > { %15239 = vst [vmem:[#allocation514_spill] sm:$0xff] %v7939_v44  ;;  %v15241_v50 = vmov 0  ;;  %v3574_v38 = vand.u32 2147483647, %v3573_v7  ;;  %v3575_v30 = vand.u32 2147483648, %v15225_v3  ;;  %vm7955_vm11 = vcmp.lt.f32.partialorder %v3562_v58, 8388608.0 }
 0x265   : > { %v15242_v50 = vsel %vm7946_vm14, 4294967295, %v15241_v50  ;;  %v15244_v27 = vmov 0  ;;  %vm7959_vm12 = vcmp.lt.f32.partialorder %v3570_v23, 8388608.0  ;;  %v15247_v11 = vmov 0 }
 0x266   : > { %15243 = vst [vmem:[#allocation515_spill] sm:$0xff] %v15242_v50  ;;  %v15245_v27 = vsel %vm7955_vm11, 4294967295, %v15244_v27  ;;  %v15248_v11 = vsel %vm7959_vm12, 4294967295, %v15247_v11  ;;  %v3578_v33 = vand.u32 2147483647, %v15232_v57  ;;  %v3583_v7 = vand.u32 2147483648, %v15232_v57 }
 0x267   : > { %15246 = vst [vmem:[#allocation516_spill] sm:$0xff] %v15245_v27  ;;  %v3582_v6 = vand.u32 2147483647, %v3581_v62  ;;  %v3589_v22 = vcvt.s32.f32 %v3588_v39  ;;  %v3604_v8 = vcvt.f32.s32 %v15250_v1  ;;  %v7970_v0 = vor.u32 %v3559_v42, %v3558_v18  ;;  %v15258_v18 = vld [vmem:[#allocation181_spill] sm:$0xff] }
 0x268   : > { %15249 = vst [vmem:[#allocation517_spill] sm:$0xff] %v15248_v11  ;;  %v7972_v59 = vor.u32 %v3567_v24, %v3566_v15  ;;  %v3597_v23 = vcvt.s32.f32 %v3596_v43  ;;  %v7974_v47 = vor.u32 %v3575_v30, %v3574_v38  ;;  %v3586_v5 = vand.u32 2147483647, %v15238_v4  ;;  %v15260_v30 = vld [vmem:[#allocation182_spill] sm:$0xff]  ;;  %v15274_v50 = vld [vmem:[#allocation185_spill] sm:$0xff] }
 0x269   : > { %15251 = vst [vmem:[#allocation518_spill] sm:$0xff] %v7970_v0  ;;  %v3594_v62 = vand.u32 2147483647, %v15240_v34  ;;  %v3612_v39 = vcvt.f32.s32 %v15254_v10  ;;  %vm7979_vm15 = vcmp.lt.f32.partialorder %v3578_v33, 8388608.0  ;;  %v15255_v49 = vmov 0 }
 0x26a   : > { %15252 = vst [vmem:[#allocation519_spill] sm:$0xff] %v7972_v59  ;;  %v15256_v49 = vsel %vm7979_vm15, 4294967295, %v15255_v49  ;;  %v3591_v53 = vand.u32 2147483648, %v15238_v4  ;;  %v3602_v42 = vand.u32 2147483647, %v15250_v1  ;;  %v3620_v24 = vcvt.f32.s32 %v15258_v18  ;;  %v15273_v59 = vld [vmem:[#allocation184_spill] sm:$0xff] }
 0x26b   : > { %15253 = vst [vmem:[#allocation520_spill] sm:$0xff] %v7974_v47  ;;  %v7986_v15 = vor.u32 %v3583_v7, %v3582_v6  ;;  %v3590_v38 = vand.u32 2147483647, %v3589_v22  ;;  %v3605_v43 = vcvt.s32.f32 %v3604_v8  ;;  %v3628_v58 = vcvt.f32.s32 %v15260_v30 }
 0x26c   : > { %15257 = vst [vmem:[#allocation521_spill] sm:$0xff] %v15256_v49  ;;  %v3598_v44 = vand.u32 2147483647, %v3597_v23  ;;  %v3599_v28 = vand.u32 2147483648, %v15240_v34  ;;  %vm8002_vm13 = vcmp.lt.f32.partialorder %v3586_v5, 8388608.0  ;;  %v15261_v22 = vmov 0 }
 0x26d   : > { %15259 = vst [vmem:[#allocation522_spill] sm:$0xff] %v7986_v15  ;;  %v15262_v22 = vsel %vm8002_vm13, 4294967295, %v15261_v22  ;;  %vm8006_vm0 = vcmp.lt.f32.partialorder %v3594_v62, 8388608.0  ;;  %v15264_v6 = vmov 0  ;;  %v3613_v7 = vcvt.s32.f32 %v3612_v39 }
 0x26e   : > { %15263 = vst [vmem:[#allocation523_spill] sm:$0xff] %v15262_v22  ;;  %v15265_v6 = vsel %vm8006_vm0, 4294967295, %v15264_v6  ;;  %vm8010_vm14 = vcmp.lt.f32.partialorder %v3602_v42, 8388608.0  ;;  %v15267_v33 = vmov 0  ;;  %v3607_v23 = vand.u32 2147483648, %v15250_v1  ;;  %v15272_v42 = vld [vmem:[#allocation183_spill] sm:$0xff] }
 0x26f   : > { %15266 = vst [vmem:[#allocation524_spill] sm:$0xff] %v15265_v6  ;;  %v15268_v33 = vsel %vm8010_vm14, 4294967295, %v15267_v33  ;;  %v3610_v36 = vand.u32 2147483647, %v15254_v10  ;;  %v3621_v2 = vcvt.s32.f32 %v3620_v24  ;;  %v8020_v8 = vor.u32 %v3591_v53, %v3590_v38 }
 0x270   : > { %15269 = vst [vmem:[#allocation525_spill] sm:$0xff] %v15268_v33  ;;  %v3606_v62 = vand.u32 2147483647, %v3605_v43  ;;  %v3629_v3 = vcvt.s32.f32 %v3628_v58  ;;  %v8022_v47 = vor.u32 %v3599_v28, %v3598_v44  ;;  %v3618_v39 = vand.u32 2147483647, %v15258_v18  ;;  %v15278_v28 = vld [vmem:[#allocation186_spill] sm:$0xff] }
 0x271   : > { %15270 = vst [vmem:[#allocation526_spill] sm:$0xff] %v8020_v8  ;;  %v3636_v11 = vcvt.f32.s32 %v15272_v42  ;;  %v3644_v27 = vcvt.f32.s32 %v15273_v59  ;;  %v3614_v12 = vand.u32 2147483647, %v3613_v7  ;;  %v3615_v24 = vand.u32 2147483648, %v15254_v10  ;;  %v15299_v10 = vld [vmem:[#allocation188_spill] sm:$0xff] }
 0x272   : > { %15271 = vst [vmem:[#allocation527_spill] sm:$0xff] %v8022_v47  ;;  %v3626_v0 = vand.u32 2147483647, %v15260_v30  ;;  %v3652_v49 = vcvt.f32.s32 %v15274_v50  ;;  %vm8030_vm15 = vcmp.lt.f32.partialorder %v3610_v36, 8388608.0  ;;  %v15275_v53 = vmov 0 }
 0x273   : > { %v15276_v53 = vsel %vm8030_vm15, 4294967295, %v15275_v53  ;;  %v3622_v58 = vand.u32 2147483647, %v3621_v2  ;;  %v3623_v44 = vand.u32 2147483648, %v15258_v18  ;;  %v3660_v38 = vcvt.f32.s32 %v15278_v28  ;;  %v15305_v18 = vld [vmem:[#allocation189_spill] sm:$0xff] }
 0x274   : > { %15277 = vst [vmem:[#allocation528_spill] sm:$0xff] %v15276_v53  ;;  %v8040_v7 = vor.u32 %v3607_v23, %v3606_v62  ;;  %v3630_v5 = vand.u32 2147483647, %v3629_v3  ;;  %v3631_v57 = vand.u32 2147483648, %v15260_v30  ;;  %vm8047_vm12 = vcmp.lt.f32.partialorder %v3618_v39, 8388608.0  ;;  %v15307_v30 = vld [vmem:[#allocation190_spill] sm:$0xff] }
 0x275   : > { %v15280_v2 = vmov 0  ;;  %v3637_v15 = vcvt.s32.f32 %v3636_v11  ;;  %v3645_v21 = vcvt.s32.f32 %v3644_v27  ;;  %v8051_v52 = vor.u32 %v3615_v24, %v3614_v12 }
 0x276   : > { %15279 = vst [vmem:[#allocation529_spill] sm:$0xff] %v8040_v7  ;;  %v15281_v2 = vsel %vm8047_vm12, 4294967295, %v15280_v2  ;;  %vm8053_vm11 = vcmp.lt.f32.partialorder %v3626_v0, 8388608.0  ;;  %v15284_v43 = vmov 0  ;;  %v3634_v3 = vand.u32 2147483647, %v15272_v42 }
 0x277   : > { %15282 = vst [vmem:[#allocation530_spill] sm:$0xff] %v15281_v2  ;;  %v15285_v43 = vsel %vm8053_vm11, 4294967295, %v15284_v43  ;;  %v3653_v23 = vcvt.s32.f32 %v3652_v49  ;;  %v8058_v62 = vor.u32 %v3623_v44, %v3622_v58  ;;  %v3639_v6 = vand.u32 2147483648, %v15272_v42  ;;  %v15289_v0 = vld [vmem:[#allocation187_spill] sm:$0xff] }
 0x278   : > { %15283 = vst [vmem:[#allocation531_spill] sm:$0xff] %v8051_v52  ;;  %v3642_v39 = vand.u32 2147483647, %v15273_v59  ;;  %v3661_v36 = vcvt.s32.f32 %v3660_v38  ;;  %v8062_v34 = vor.u32 %v3631_v57, %v3630_v5  ;;  %v3647_v27 = vand.u32 2147483648, %v15273_v59 }
 0x279   : > { %15286 = vst [vmem:[#allocation532_spill] sm:$0xff] %v15285_v43  ;;  %v3650_v12 = vand.u32 2147483647, %v15274_v50  ;;  %v3668_v11 = vcvt.f32.s32 %v15289_v0  ;;  %v3638_v24 = vand.u32 2147483647, %v3637_v15  ;;  %vm8076_vm0 = vcmp.lt.f32.partialorder %v3634_v3, 8388608.0 }
 0x27a   : > { %15287 = vst [vmem:[#allocation533_spill] sm:$0xff] %v8058_v62  ;;  %v3646_v58 = vand.u32 2147483647, %v3645_v21  ;;  %v3658_v44 = vand.u32 2147483647, %v15278_v28  ;;  %v15290_v5 = vmov 0  ;;  %v3676_v2 = vcvt.f32.s32 %v15299_v10 }
 0x27b   : > { %15288 = vst [vmem:[#allocation534_spill] sm:$0xff] %v8062_v34  ;;  %v15291_v5 = vsel %vm8076_vm0, 4294967295, %v15290_v5  ;;  %v3654_v38 = vand.u32 2147483647, %v3653_v23  ;;  %v3655_v47 = vand.u32 2147483648, %v15274_v50  ;;  %vm8085_vm14 = vcmp.lt.f32.partialorder %v3642_v39, 8388608.0 }
 0x27c   : > { %15292 = vst [vmem:[#allocation187_spill] sm:$0xff] %v15291_v5  ;;  %v15293_v21 = vmov 0  ;;  %v3662_v49 = vand.u32 2147483647, %v3661_v36  ;;  %v3663_v53 = vand.u32 2147483648, %v15278_v28  ;;  %vm8094_vm15 = vcmp.lt.f32.partialorder %v3650_v12, 8388608.0 }
 0x27d   : > { %v15294_v21 = vsel %vm8085_vm14, 4294967295, %v15293_v21  ;;  %v15296_v23 = vmov 0  ;;  %v3669_v57 = vcvt.s32.f32 %v3668_v11  ;;  %v8099_v15 = vor.u32 %v3639_v6, %v3638_v24 }
 0x27e   : > { %15295 = vst [vmem:[#allocation535_spill] sm:$0xff] %v15294_v21  ;;  %v15297_v23 = vsel %vm8094_vm15, 4294967295, %v15296_v23  ;;  %v8101_v39 = vor.u32 %v3647_v27, %v3646_v58  ;;  %vm8103_vm12 = vcmp.lt.f32.partialorder %v3658_v44, 8388608.0  ;;  %v15302_v36 = vmov 0  ;;  %v15309_v27 = vld [vmem:[#allocation191_spill] sm:$0xff]  ;;  %v15310_v58 = vld [vmem:[#allocation192_spill] sm:$0xff] }
 0x27f   : > { %15298 = vst [vmem:[#allocation536_spill] sm:$0xff] %v15297_v23  ;;  %v15303_v36 = vsel %vm8103_vm12, 4294967295, %v15302_v36  ;;  %v3684_v62 = vcvt.f32.s32 %v15305_v18  ;;  %v8108_v52 = vor.u32 %v3655_v47, %v3654_v38  ;;  %v3666_v12 = vand.u32 2147483647, %v15289_v0  ;;  %v15311_v47 = vld [vmem:[#allocation193_spill] sm:$0xff] }
 0x280   : > { %15300 = vst [vmem:[#allocation188_spill] sm:$0xff] %v8099_v15  ;;  %v3674_v3 = vand.u32 2147483647, %v15299_v10  ;;  %v3692_v11 = vcvt.f32.s32 %v15307_v30  ;;  %v8113_v34 = vor.u32 %v3663_v53, %v3662_v49  ;;  %v3682_v6 = vand.u32 2147483647, %v15305_v18  ;;  %v15312_v49 = vld [vmem:[#allocation194_spill] sm:$0xff] }
 0x281   : > { %15301 = vst [vmem:[#allocation537_spill] sm:$0xff] %v8101_v39  ;;  %v3700_v24 = vcvt.f32.s32 %v15309_v27  ;;  %v3708_v44 = vcvt.f32.s32 %v15310_v58  ;;  %v3670_v43 = vand.u32 2147483647, %v3669_v57  ;;  %v3671_v1 = vand.u32 2147483648, %v15289_v0 }
 0x282   : > { %15304 = vst [vmem:[#allocation538_spill] sm:$0xff] %v15303_v36  ;;  %v3677_v7 = vcvt.s32.f32 %v3676_v2  ;;  %v3716_v38 = vcvt.f32.s32 %v15311_v47  ;;  %v3685_v4 = vcvt.s32.f32 %v3684_v62  ;;  %v3690_v53 = vand.u32 2147483647, %v15307_v30 }
 0x283   : > { %15306 = vst [vmem:[#allocation189_spill] sm:$0xff] %v8108_v52  ;;  %v3724_v8 = vcvt.f32.s32 %v15312_v49  ;;  %v3679_v22 = vand.u32 2147483648, %v15299_v10  ;;  %v3693_v61 = vcvt.s32.f32 %v3692_v11  ;;  %vm8139_vm0 = vcmp.lt.f32.partialorder %v3666_v12, 8388608.0  ;;  %v15319_v12 = vld [vmem:[#allocation195_spill] sm:$0xff] }
 0x284   : > { %15308 = vst [vmem:[#allocation190_spill] sm:$0xff] %v8113_v34  ;;  %vm8143_vm11 = vcmp.lt.f32.partialorder %v3674_v3, 8388608.0  ;;  %vm8147_vm14 = vcmp.lt.f32.partialorder %v3682_v6, 8388608.0  ;;  %v15317_v57 = vmov 0  ;;  %v3687_v2 = vand.u32 2147483648, %v15305_v18 }
 0x285   : > { %v15318_v57 = vsel %vm8147_vm14, 4294967295, %v15317_v57  ;;  %v3701_v11 = vcvt.s32.f32 %v3700_v24  ;;  %v3709_v50 = vcvt.s32.f32 %v3708_v44  ;;  %v8152_v52 = vor.u32 %v3671_v1, %v3670_v43  ;;  %v15322_v44 = vld [vmem:[#allocation196_spill] sm:$0xff] }
 0x286   : > { %v3678_v36 = vand.u32 2147483647, %v3677_v7  ;;  %v3717_v62 = vcvt.s32.f32 %v3716_v38  ;;  %v3732_v28 = vcvt.f32.s32 %v15319_v12  ;;  %v3686_v34 = vand.u32 2147483647, %v3685_v4 }
 0x287   : > { %vm8155_vm12 = vcmp.lt.f32.partialorder %v3690_v53, 8388608.0  ;;  %v15320_v3 = vmov 0  ;;  %v3695_v6 = vand.u32 2147483648, %v15307_v30  ;;  %v3725_v23 = vcvt.s32.f32 %v3724_v8 }
 0x288   : > { %v15321_v3 = vsel %vm8155_vm12, 4294967295, %v15320_v3  ;;  %v3694_v59 = vand.u32 2147483647, %v3693_v61  ;;  %v3698_v39 = vand.u32 2147483647, %v15309_v27  ;;  %v3740_v1 = vcvt.f32.s32 %v15322_v44 }
 0x289   : > { %v3706_v24 = vand.u32 2147483647, %v15310_v58  ;;  %v3702_v43 = vand.u32 2147483647, %v3701_v11  ;;  %v3703_v7 = vand.u32 2147483648, %v15309_v27  ;;  %v3711_v4 = vand.u32 2147483648, %v15310_v58 }
 0x28a   : > { %v3710_v38 = vand.u32 2147483647, %v3709_v50  ;;  %v8165_v53 = vor.u32 %v3679_v22, %v3678_v36  ;;  %v3718_v42 = vand.u32 2147483647, %v3717_v62  ;;  %v3719_v15 = vand.u32 2147483648, %v15311_v47 }
 0x28b   : > { %v3733_v5 = vcvt.s32.f32 %v3732_v28  ;;  %v3714_v61 = vand.u32 2147483647, %v15311_v47  ;;  %v3726_v8 = vand.u32 2147483647, %v3725_v23  ;;  %v3727_v20 = vand.u32 2147483648, %v15312_v49 }
 0x28c   : > { %v3741_v54 = vcvt.s32.f32 %v3740_v1  ;;  %v8170_v31 = vor.u32 %v3687_v2, %v3686_v34  ;;  %vm8172_vm15 = vcmp.lt.f32.partialorder %v3698_v39, 8388608.0  ;;  %vm8176_vm13 = vcmp.lt.f32.partialorder %v3706_v24, 8388608.0 }
 0x28d   : > { %v3722_v22 = vand.u32 2147483647, %v15312_v49  ;;  %v8181_v36 = vor.u32 %v3695_v6, %v3694_v59  ;;  %v8183_v28 = vor.u32 %v3703_v7, %v3702_v43  ;;  %v8185_v23 = vor.u32 %v3711_v4, %v3710_v38  ;;  %v15336_v43 = vld [vmem:[#allocation198_spill] sm:$0xff] }
 0x28e   : > { %v3730_v62 = vand.u32 2147483647, %v15319_v12  ;;  %v8188_v34 = vor.u32 %v3719_v15, %v3718_v42  ;;  %v3734_v39 = vand.u32 2147483647, %v3733_v5  ;;  %v3735_v2 = vand.u32 2147483648, %v15319_v12  ;;  %v15348_v15 = vld [vmem:[#allocation11_spill] sm:$0xff] }
 0x28f   : > { %v3738_v24 = vand.u32 2147483647, %v15322_v44  ;;  %vm8192_vm10 = vcmp.lt.f32.partialorder %v3714_v61, 8388608.0  ;;  %v8196_v14 = vor.u32 %v3727_v20, %v3726_v8  ;;  %v3742_v59 = vand.u32 2147483647, %v3741_v54  ;;  %v15337_v54 = vld [vmem:[#allocation8_spill] sm:$0xff] }
 0x290   : > { %v3743_v6 = vand.u32 2147483648, %v15322_v44  ;;  %vm8211_vm9 = vcmp.lt.f32.partialorder %v3722_v22, 8388608.0  ;;  %vm8227_vm14 = vcmp.lt.f32.partialorder %v3730_v62, 8388608.0  ;;  %v8235_v61 = vor.u32 %v3735_v2, %v3734_v39  ;;  %v15341_v2 = vld [vmem:[#allocation9_spill] sm:$0xff]  ;;  %v15343_v22 = vld [vmem:[#allocation200_spill] sm:$0xff] }
 0x291   : > { %vm8237_vm12 = vcmp.lt.f32.partialorder %v3738_v24, 8388608.0  ;;  %v15338_v7 = vsel %vm5774_vm1, %v15336_v43, %v15337_v54  ;;  %v15342_v24 = vsel %vm5781_vm2, %v5790_v48, %v15341_v2  ;;  %v15344_v54 = vld [vmem:[#allocation10_spill] sm:$0xff]  ;;  %v15351_v48 = vsel %vm5798_vm5, %v5828_v26, %v5030_v37  ;;  %v15355_v42 = vld [vmem:[#allocation13_spill] sm:$0xff] }
 0x292   : > { %v8246_v62 = vadd.f32 128.0, %v15338_v7  ;;  %v8252_v5 = vor.u32 %v3743_v6, %v3742_v59  ;;  %v8259_v4 = vadd.f32 128.0, %v15342_v24  ;;  %v15345_v43 = vsel %vm5785_vm3, %v15343_v22, %v15344_v54  ;;  %v15353_v24 = vld [vmem:[#allocation12_spill] sm:$0xff]  ;;  %v15359_v37 = vld [vmem:[#allocation14_spill] sm:$0xff] }
 0x293   : > { %v8266_v7 = vadd.f32 128.0, %v15345_v43  ;;  %v8280_v2 = vadd.f32 128.0, %v15351_v48  ;;  %v15354_v22 = vsel %vm5823_vm6, %v15352_v16, %v15353_v24  ;;  %vm15362_vm1 = vnez %v15361_v55  ;;  %v15363_v48 = vld [vmem:[#allocation208_spill] sm:$0xff]  ;;  %v15364_v16 = vld [vmem:[#allocation15_spill] sm:$0xff]  ;;  %v15377_v55 = vld [vmem:[#allocation17_spill] sm:$0xff] }
 0x294   : > { %15339 = vst [vmem:[#allocation191_spill] sm:$0xff] %v8246_v62  ;;  %v15347_v62 = vld [vmem:[#allocation203_spill] sm:$0xff]  ;;  %v8287_v54 = vadd.f32 128.0, %v15354_v22  ;;  %v15365_v24 = vsel %vm15362_vm1, %v15363_v48, %v15364_v16  ;;  %vm15367_vm2 = vnez %v15366_v41  ;;  %vm15369_vm3 = vnez %v14485_v17  ;;  %v15381_v16 = vld [vmem:[#allocation213_spill] sm:$0xff] }
 0x295   : > { %v15349_v59 = vsel %vm5794_vm4, %v15347_v62, %v15348_v15  ;;  %v15356_v15 = vsel %vm5836_vm7, %v5849_v35, %v15355_v42  ;;  %v8308_v22 = vadd.f32 128.0, %v15365_v24  ;;  %v15368_v35 = vsel %vm15367_vm2, %v5887_v32, %v5049_v46  ;;  %v15374_v32 = vld [vmem:[#allocation210_spill] sm:$0xff]  ;;  %v15376_v17 = vld [vmem:[#allocation211_spill] sm:$0xff] }
 0x296   : > { %v8273_v6 = vadd.f32 128.0, %v15349_v59  ;;  %v8294_v62 = vadd.f32 128.0, %v15356_v15  ;;  %v15358_v59 = vld [vmem:[#allocation206_spill] sm:$0xff]  ;;  %v8315_v42 = vadd.f32 128.0, %v15368_v35  ;;  %v15370_v15 = vsel %vm15369_vm3, %v5906_v56, %v5056_v51  ;;  %v15379_v56 = vld [vmem:[#allocation212_spill] sm:$0xff] }
 0x297   : > { %v15360_v26 = vsel %vm5840_vm8, %v15358_v59, %v15359_v37  ;;  %v8322_v43 = vadd.f32 128.0, %v15370_v15  ;;  %vm15371_vm4 = vnez %v14487_v25  ;;  %v15372_v37 = vld [vmem:[#allocation16_spill] sm:$0xff]  ;;  %vm15375_vm5 = vnez %v15374_v32  ;;  %v15382_v24 = vld [vmem:[#allocation18_spill] sm:$0xff]  ;;  %v15386_v15 = vld [vmem:[#allocation215_spill] sm:$0xff] }
 0x298   : > { %v8301_v39 = vadd.f32 128.0, %v15360_v26  ;;  %v15373_v26 = vsel %vm15371_vm4, %v5917_v40, %v15372_v37  ;;  %v15378_v48 = vsel %vm15375_vm5, %v15376_v17, %v15377_v55  ;;  %vm15380_vm6 = vnez %v15379_v56  ;;  %v15384_v40 = vld [vmem:[#allocation214_spill] sm:$0xff]  ;;  %v15387_v37 = vld [vmem:[#allocation19_spill] sm:$0xff]  ;;  %v15390_v17 = vld [vmem:[#allocation20_spill] sm:$0xff] }
 0x299   : > { %v8333_v46 = vadd.f32 128.0, %v15373_v26  ;;  %v8340_v51 = vadd.f32 128.0, %v15378_v48  ;;  %v15383_v41 = vsel %vm15380_vm6, %v15381_v16, %v15382_v24  ;;  %vm15385_vm7 = vnez %v15384_v40  ;;  %v15393_v56 = vld [vmem:[#allocation216_spill] sm:$0xff]  ;;  %v15394_v16 = vld [vmem:[#allocation21_spill] sm:$0xff]  ;;  %v15397_v40 = vld [vmem:[#allocation218_spill] sm:$0xff] }
 0x29a   : > { %v8347_v35 = vadd.f32 128.0, %v15383_v41  ;;  %v15388_v26 = vsel %vm15385_vm7, %v15386_v15, %v15387_v37  ;;  %vm15389_vm8 = vnez %v14501_v9  ;;  %vm15392_vm1 = vnez %v14503_v29  ;;  %v15399_v25 = vld [vmem:[#allocation217_spill] sm:$0xff]  ;;  %v15400_v15 = vld [vmem:[#allocation22_spill] sm:$0xff]  ;;  %v15403_v9 = vld [vmem:[#allocation219_spill] sm:$0xff] }
 0x29b   : > { %v8358_v32 = vadd.f32 128.0, %v15388_v26  ;;  %v15391_v55 = vsel %vm15389_vm8, %v5974_v45, %v15390_v17  ;;  %v15395_v24 = vsel %vm15392_vm1, %v15393_v56, %v15394_v16  ;;  %vm15398_vm2 = vnez %v15397_v40  ;;  %v15405_v59 = vld [vmem:[#allocation220_spill] sm:$0xff]  ;;  %v15406_v45 = vld [vmem:[#allocation23_spill] sm:$0xff]  ;;  %v15409_v29 = vld [vmem:[#allocation221_spill] sm:$0xff] }
 0x29c   : > { %v8365_v48 = vadd.f32 128.0, %v15391_v55  ;;  %v8372_v41 = vadd.f32 128.0, %v15395_v24  ;;  %v15401_v37 = vsel %vm15398_vm2, %v15399_v25, %v15400_v15  ;;  %vm15404_vm3 = vnez %v15403_v9  ;;  %v15411_v56 = vld [vmem:[#allocation24_spill] sm:$0xff]  ;;  %v15414_v40 = vld [vmem:[#allocation222_spill] sm:$0xff]  ;;  %v15417_v25 = vld [vmem:[#allocation25_spill] sm:$0xff] }
 0x29d   : > { %v8379_v26 = vadd.f32 128.0, %v15401_v37  ;;  %v15407_v17 = vsel %vm15404_vm3, %v15405_v59, %v15406_v45  ;;  %vm15410_vm4 = vnez %v15409_v29  ;;  %vm15415_vm5 = vnez %v15414_v40  ;;  %v15420_v9 = vld [vmem:[#allocation223_spill] sm:$0xff]  ;;  %v15423_v59 = vld [vmem:[#allocation26_spill] sm:$0xff]  ;;  %v15432_v40 = vld [vmem:[#allocation228_spill] sm:$0xff] }
 0x29e   : > { %15396 = vst [vmem:[#allocation192_spill] sm:$0xff] %v8372_v41  ;;  %v8386_v55 = vadd.f32 128.0, %v15407_v17  ;;  %v15412_v16 = vsel %vm15410_vm4, %v6021_v19, %v15411_v56  ;;  %v15416_v41 = vld [vmem:[#allocation224_spill] sm:$0xff]  ;;  %vm15421_vm6 = vnez %v15420_v9  ;;  %v15426_v29 = vld [vmem:[#allocation226_spill] sm:$0xff]  ;;  %v15429_v19 = vld [vmem:[#allocation27_spill] sm:$0xff]  ;;  %vm15433_vm8 = vnez %v15432_v40 }
 0x29f   : > { %15402 = vst [vmem:[#allocation193_spill] sm:$0xff] %v8379_v26  ;;  %v8393_v24 = vadd.f32 128.0, %v15412_v16  ;;  %v15418_v15 = vsel %vm15415_vm5, %v15416_v41, %v15417_v25  ;;  %v15422_v26 = vld [vmem:[#allocation225_spill] sm:$0xff]  ;;  %vm15427_vm7 = vnez %v15426_v29  ;;  %v15435_v41 = vld [vmem:[#allocation28_spill] sm:$0xff]  ;;  %v15438_v9 = vld [vmem:[#allocation230_spill] sm:$0xff]  ;;  %v16552_v8 = vmax.f32 %v8259_v4, 0.0 }
 0x2a0   : > { %15408 = vst [vmem:[#allocation194_spill] sm:$0xff] %v8386_v55  ;;  %v8400_v37 = vadd.f32 128.0, %v15418_v15  ;;  %v15424_v45 = vsel %vm15421_vm6, %v15422_v26, %v15423_v59  ;;  %v15428_v55 = vld [vmem:[#allocation227_spill] sm:$0xff]  ;;  %vm15439_vm1 = vnez %v15438_v9  ;;  %v15441_v26 = vld [vmem:[#allocation29_spill] sm:$0xff]  ;;  %v15444_v29 = vld [vmem:[#allocation232_spill] sm:$0xff]  ;;  %v16557_v4 = vmax.f32 %v8294_v62, 0.0 }
 0x2a1   : > { %15413 = vst [vmem:[#allocation195_spill] sm:$0xff] %v8393_v24  ;;  %v8407_v17 = vadd.f32 128.0, %v15424_v45  ;;  %v15430_v56 = vsel %vm15427_vm7, %v15428_v55, %v15429_v19  ;;  %v15434_v24 = vld [vmem:[#allocation229_spill] sm:$0xff]  ;;  %vm15445_vm2 = vnez %v15444_v29  ;;  %v15447_v55 = vld [vmem:[#allocation30_spill] sm:$0xff]  ;;  %v16391_v11 = vld [vmem:[#allocation191_spill] sm:$0xff]  ;;  %v16562_v62 = vmax.f32 %v8333_v46, 0.0 }
 0x2a2   : > { %15419 = vst [vmem:[#allocation196_spill] sm:$0xff] %v8400_v37  ;;  %v8414_v16 = vadd.f32 128.0, %v15430_v56  ;;  %v15436_v25 = vsel %vm15433_vm8, %v15434_v24, %v15435_v41  ;;  %v15440_v37 = vld [vmem:[#allocation231_spill] sm:$0xff]  ;;  %v15450_v40 = vld [vmem:[#allocation233_spill] sm:$0xff]  ;;  %v15462_v29 = vld [vmem:[#allocation238_spill] sm:$0xff] }
 0x2a3   : > { %15425 = vst [vmem:[#allocation197_spill] sm:$0xff] %v8407_v17  ;;  %v8421_v15 = vadd.f32 128.0, %v15436_v25  ;;  %v15442_v59 = vsel %vm15439_vm1, %v15440_v37, %v15441_v26  ;;  %v15446_v17 = vld [vmem:[#allocation234_spill] sm:$0xff]  ;;  %vm15451_vm3 = vnez %v15450_v40  ;;  %v15453_v24 = vld [vmem:[#allocation31_spill] sm:$0xff]  ;;  %v15456_v9 = vld [vmem:[#allocation237_spill] sm:$0xff]  ;;  %vm15463_vm5 = vnez %v15462_v29 }
 0x2a4   : > { %15431 = vst [vmem:[#allocation198_spill] sm:$0xff] %v8414_v16  ;;  %v8428_v45 = vadd.f32 128.0, %v15442_v59  ;;  %v15448_v19 = vsel %vm15445_vm2, %v15446_v17, %v15447_v55  ;;  %v15452_v16 = vld [vmem:[#allocation235_spill] sm:$0xff]  ;;  %vm15457_vm4 = vnez %v15456_v9  ;;  %v15459_v37 = vld [vmem:[#allocation32_spill] sm:$0xff]  ;;  %v15465_v17 = vld [vmem:[#allocation33_spill] sm:$0xff] }
 0x2a5   : > { %15437 = vst [vmem:[#allocation8_spill] sm:$0xff] %v8421_v15  ;;  %v8435_v56 = vadd.f32 128.0, %v15448_v19  ;;  %v15454_v41 = vsel %vm15451_vm3, %v15452_v16, %v15453_v24  ;;  %v15458_v15 = vld [vmem:[#allocation236_spill] sm:$0xff]  ;;  %v15471_v16 = vld [vmem:[#allocation34_spill] sm:$0xff]  ;;  %v15474_v9 = vld [vmem:[#allocation241_spill] sm:$0xff] }
 0x2a6   : > { %15443 = vst [vmem:[#allocation199_spill] sm:$0xff] %v8428_v45  ;;  %v8442_v25 = vadd.f32 128.0, %v15454_v41  ;;  %v15460_v26 = vsel %vm15457_vm4, %v15458_v15, %v15459_v37  ;;  %v15464_v45 = vld [vmem:[#allocation239_spill] sm:$0xff]  ;;  %v15468_v40 = vld [vmem:[#allocation240_spill] sm:$0xff]  ;;  %vm15475_vm7 = vnez %v15474_v9 }
 0x2a7   : > { %15449 = vst [vmem:[#allocation9_spill] sm:$0xff] %v8435_v56  ;;  %v8449_v59 = vadd.f32 128.0, %v15460_v26  ;;  %v15466_v55 = vsel %vm15463_vm5, %v15464_v45, %v15465_v17  ;;  %vm15469_vm6 = vnez %v15468_v40  ;;  %v15470_v56 = vld [vmem:[#allocation242_spill] sm:$0xff]  ;;  %v15477_v15 = vld [vmem:[#allocation35_spill] sm:$0xff]  ;;  %v15483_v45 = vld [vmem:[#allocation36_spill] sm:$0xff] }
 0x2a8   : > { %15455 = vst [vmem:[#allocation200_spill] sm:$0xff] %v8442_v25  ;;  %v8456_v19 = vadd.f32 128.0, %v15466_v55  ;;  %v15472_v24 = vsel %vm15469_vm6, %v15470_v56, %v15471_v16  ;;  %v15476_v25 = vld [vmem:[#allocation244_spill] sm:$0xff]  ;;  %v15480_v29 = vld [vmem:[#allocation243_spill] sm:$0xff]  ;;  %v15486_v40 = vld [vmem:[#allocation246_spill] sm:$0xff] }
 0x2a9   : > { %15461 = vst [vmem:[#allocation10_spill] sm:$0xff] %v8449_v59  ;;  %v8463_v41 = vadd.f32 128.0, %v15472_v24  ;;  %v15478_v37 = vsel %vm15475_vm7, %v15476_v25, %v15477_v15  ;;  %vm15481_vm8 = vnez %v15480_v29  ;;  %v15482_v59 = vld [vmem:[#allocation245_spill] sm:$0xff]  ;;  %vm15487_vm1 = vnez %v15486_v40  ;;  %v15492_v9 = vld [vmem:[#allocation248_spill] sm:$0xff]  ;;  %v15495_v25 = vld [vmem:[#allocation38_spill] sm:$0xff] }
 0x2aa   : > { %15467 = vst [vmem:[#allocation201_spill] sm:$0xff] %v8456_v19  ;;  %v8470_v26 = vadd.f32 128.0, %v15478_v37  ;;  %v15484_v17 = vsel %vm15481_vm8, %v15482_v59, %v15483_v45  ;;  %v15488_v19 = vld [vmem:[#allocation247_spill] sm:$0xff]  ;;  %v15489_v56 = vld [vmem:[#allocation37_spill] sm:$0xff]  ;;  %vm15493_vm2 = vnez %v15492_v9  ;;  %v15498_v29 = vld [vmem:[#allocation250_spill] sm:$0xff] }
 0x2ab   : > { %15473 = vst [vmem:[#allocation203_spill] sm:$0xff] %v8463_v41  ;;  %v8477_v55 = vadd.f32 128.0, %v15484_v17  ;;  %v15490_v16 = vsel %vm15487_vm1, %v15488_v19, %v15489_v56  ;;  %v15494_v41 = vld [vmem:[#allocation249_spill] sm:$0xff]  ;;  %vm15499_vm3 = vnez %v15498_v29  ;;  %v15501_v59 = vld [vmem:[#allocation39_spill] sm:$0xff]  ;;  %v15504_v40 = vld [vmem:[#allocation252_spill] sm:$0xff] }
 0x2ac   : > { %15479 = vst [vmem:[#allocation11_spill] sm:$0xff] %v8470_v26  ;;  %v8484_v24 = vadd.f32 128.0, %v15490_v16  ;;  %v15496_v15 = vsel %vm15493_vm2, %v15494_v41, %v15495_v25  ;;  %v15500_v26 = vld [vmem:[#allocation251_spill] sm:$0xff]  ;;  %vm15505_vm4 = vnez %v15504_v40  ;;  %v15507_v19 = vld [vmem:[#allocation40_spill] sm:$0xff]  ;;  %v15510_v9 = vld [vmem:[#allocation253_spill] sm:$0xff] }
 0x2ad   : > { %15485 = vst [vmem:[#allocation202_spill] sm:$0xff] %v8477_v55  ;;  %v8491_v37 = vadd.f32 128.0, %v15496_v15  ;;  %v15502_v45 = vsel %vm15499_vm3, %v15500_v26, %v15501_v59  ;;  %v15506_v55 = vld [vmem:[#allocation254_spill] sm:$0xff]  ;;  %vm15511_vm5 = vnez %v15510_v9  ;;  %v15513_v41 = vld [vmem:[#allocation41_spill] sm:$0xff]  ;;  %v15528_v9 = vld [vmem:[#allocation260_spill] sm:$0xff] }
 0x2ae   : > { %15491 = vst [vmem:[#allocation205_spill] sm:$0xff] %v8484_v24  ;;  %v8498_v17 = vadd.f32 128.0, %v15502_v45  ;;  %v15508_v56 = vsel %vm15505_vm4, %v15506_v55, %v15507_v19  ;;  %v15512_v24 = vld [vmem:[#allocation255_spill] sm:$0xff]  ;;  %v15516_v29 = vld [vmem:[#allocation257_spill] sm:$0xff]  ;;  %v15519_v26 = vld [vmem:[#allocation42_spill] sm:$0xff]  ;;  %vm15529_vm8 = vnez %v15528_v9 }
 0x2af   : > { %15497 = vst [vmem:[#allocation12_spill] sm:$0xff] %v8491_v37  ;;  %v8505_v16 = vadd.f32 128.0, %v15508_v56  ;;  %v15514_v25 = vsel %vm15511_vm5, %v15512_v24, %v15513_v41  ;;  %vm15517_vm6 = vnez %v15516_v29  ;;  %v15518_v37 = vld [vmem:[#allocation256_spill] sm:$0xff]  ;;  %v15522_v40 = vld [vmem:[#allocation258_spill] sm:$0xff]  ;;  %v15525_v55 = vld [vmem:[#allocation43_spill] sm:$0xff] }
 0x2b0   : > { %15503 = vst [vmem:[#allocation13_spill] sm:$0xff] %v8498_v17  ;;  %v8512_v15 = vadd.f32 128.0, %v15514_v25  ;;  %v15520_v59 = vsel %vm15517_vm6, %v15518_v37, %v15519_v26  ;;  %vm15523_vm7 = vnez %v15522_v40  ;;  %v15524_v17 = vld [vmem:[#allocation259_spill] sm:$0xff]  ;;  %v15531_v24 = vld [vmem:[#allocation44_spill] sm:$0xff]  ;;  %v15534_v29 = vld [vmem:[#allocation261_spill] sm:$0xff] }
 0x2b1   : > { %15509 = vst [vmem:[#allocation204_spill] sm:$0xff] %v8505_v16  ;;  %v8519_v45 = vadd.f32 128.0, %v15520_v59  ;;  %v15526_v19 = vsel %vm15523_vm7, %v15524_v17, %v15525_v55  ;;  %v15530_v16 = vld [vmem:[#allocation262_spill] sm:$0xff]  ;;  %vm15535_vm1 = vnez %v15534_v29  ;;  %v15537_v37 = vld [vmem:[#allocation45_spill] sm:$0xff]  ;;  %v15540_v40 = vld [vmem:[#allocation263_spill] sm:$0xff] }
 0x2b2   : > { %15515 = vst [vmem:[#allocation206_spill] sm:$0xff] %v8512_v15  ;;  %v8526_v56 = vadd.f32 128.0, %v15526_v19  ;;  %v15532_v41 = vsel %vm15529_vm8, %v15530_v16, %v15531_v24  ;;  %v15536_v15 = vld [vmem:[#allocation264_spill] sm:$0xff]  ;;  %vm15541_vm2 = vnez %v15540_v40  ;;  %v15543_v17 = vld [vmem:[#allocation46_spill] sm:$0xff]  ;;  %v15549_v16 = vld [vmem:[#allocation47_spill] sm:$0xff] }
 0x2b3   : > { %15521 = vst [vmem:[#allocation14_spill] sm:$0xff] %v8519_v45  ;;  %v8533_v25 = vadd.f32 128.0, %v15532_v41  ;;  %v15538_v26 = vsel %vm15535_vm1, %v15536_v15, %v15537_v37  ;;  %v15542_v45 = vld [vmem:[#allocation265_spill] sm:$0xff]  ;;  %v15546_v9 = vld [vmem:[#allocation266_spill] sm:$0xff]  ;;  %v15552_v29 = vld [vmem:[#allocation268_spill] sm:$0xff] }
 0x2b4   : > { %15527 = vst [vmem:[#allocation207_spill] sm:$0xff] %v8526_v56  ;;  %v8540_v59 = vadd.f32 128.0, %v15538_v26  ;;  %v15544_v55 = vsel %vm15541_vm2, %v15542_v45, %v15543_v17  ;;  %vm15547_vm3 = vnez %v15546_v9  ;;  %v15548_v56 = vld [vmem:[#allocation267_spill] sm:$0xff]  ;;  %vm15553_vm4 = vnez %v15552_v29  ;;  %v15555_v15 = vld [vmem:[#allocation48_spill] sm:$0xff]  ;;  %v15558_v40 = vld [vmem:[#allocation270_spill] sm:$0xff] }
 0x2b5   : > { %15533 = vst [vmem:[#allocation208_spill] sm:$0xff] %v8533_v25  ;;  %v8547_v19 = vadd.f32 128.0, %v15544_v55  ;;  %v15550_v24 = vsel %vm15547_vm3, %v15548_v56, %v15549_v16  ;;  %v15554_v25 = vld [vmem:[#allocation269_spill] sm:$0xff]  ;;  %vm15559_vm5 = vnez %v15558_v40  ;;  %v15564_v9 = vld [vmem:[#allocation272_spill] sm:$0xff]  ;;  %v15567_v56 = vld [vmem:[#allocation50_spill] sm:$0xff] }
 0x2b6   : > { %15539 = vst [vmem:[#allocation15_spill] sm:$0xff] %v8540_v59  ;;  %v8554_v41 = vadd.f32 128.0, %v15550_v24  ;;  %v15556_v37 = vsel %vm15553_vm4, %v15554_v25, %v15555_v15  ;;  %v15560_v59 = vld [vmem:[#allocation271_spill] sm:$0xff]  ;;  %v15561_v45 = vld [vmem:[#allocation49_spill] sm:$0xff]  ;;  %vm15565_vm6 = vnez %v15564_v9  ;;  %v15582_v9 = vld [vmem:[#allocation278_spill] sm:$0xff] }
 0x2b7   : > { %15545 = vst [vmem:[#allocation209_spill] sm:$0xff] %v8547_v19  ;;  %v8561_v26 = vadd.f32 128.0, %v15556_v37  ;;  %v15562_v17 = vsel %vm15559_vm5, %v15560_v59, %v15561_v45  ;;  %v15566_v19 = vld [vmem:[#allocation274_spill] sm:$0xff]  ;;  %v15570_v29 = vld [vmem:[#allocation273_spill] sm:$0xff]  ;;  %v15573_v25 = vld [vmem:[#allocation51_spill] sm:$0xff]  ;;  %vm15583_vm1 = vnez %v15582_v9 }
 0x2b8   : > { %15551 = vst [vmem:[#allocation16_spill] sm:$0xff] %v8554_v41  ;;  %v8568_v55 = vadd.f32 128.0, %v15562_v17  ;;  %v15568_v16 = vsel %vm15565_vm6, %v15566_v19, %v15567_v56  ;;  %vm15571_vm7 = vnez %v15570_v29  ;;  %v15572_v41 = vld [vmem:[#allocation275_spill] sm:$0xff]  ;;  %v15576_v40 = vld [vmem:[#allocation277_spill] sm:$0xff]  ;;  %v15579_v59 = vld [vmem:[#allocation52_spill] sm:$0xff] }
 0x2b9   : > { %15557 = vst [vmem:[#allocation210_spill] sm:$0xff] %v8561_v26  ;;  %v8575_v24 = vadd.f32 128.0, %v15568_v16  ;;  %v15574_v15 = vsel %vm15571_vm7, %v15572_v41, %v15573_v25  ;;  %vm15577_vm8 = vnez %v15576_v40  ;;  %v15578_v26 = vld [vmem:[#allocation276_spill] sm:$0xff]  ;;  %v15585_v19 = vld [vmem:[#allocation53_spill] sm:$0xff]  ;;  %v15591_v41 = vld [vmem:[#allocation54_spill] sm:$0xff] }
 0x2ba   : > { %15563 = vst [vmem:[#allocation211_spill] sm:$0xff] %v8568_v55  ;;  %v8582_v37 = vadd.f32 128.0, %v15574_v15  ;;  %v15580_v45 = vsel %vm15577_vm8, %v15578_v26, %v15579_v59  ;;  %v15584_v55 = vld [vmem:[#allocation279_spill] sm:$0xff]  ;;  %v15588_v29 = vld [vmem:[#allocation280_spill] sm:$0xff]  ;;  %v15594_v40 = vld [vmem:[#allocation281_spill] sm:$0xff] }
 0x2bb   : > { %15569 = vst [vmem:[#allocation17_spill] sm:$0xff] %v8575_v24  ;;  %v8589_v17 = vadd.f32 128.0, %v15580_v45  ;;  %v15586_v56 = vsel %vm15583_vm1, %v15584_v55, %v15585_v19  ;;  %vm15589_vm2 = vnez %v15588_v29  ;;  %v15590_v24 = vld [vmem:[#allocation282_spill] sm:$0xff]  ;;  %vm15595_vm3 = vnez %v15594_v40  ;;  %v15597_v26 = vld [vmem:[#allocation55_spill] sm:$0xff]  ;;  %v15603_v55 = vld [vmem:[#allocation56_spill] sm:$0xff] }
 0x2bc   : > { %15575 = vst [vmem:[#allocation212_spill] sm:$0xff] %v8582_v37  ;;  %v8596_v16 = vadd.f32 128.0, %v15586_v56  ;;  %v15592_v25 = vsel %vm15589_vm2, %v15590_v24, %v15591_v41  ;;  %v15596_v37 = vld [vmem:[#allocation284_spill] sm:$0xff]  ;;  %v15600_v9 = vld [vmem:[#allocation283_spill] sm:$0xff]  ;;  %v15606_v29 = vld [vmem:[#allocation286_spill] sm:$0xff] }
 0x2bd   : > { %15581 = vst [vmem:[#allocation213_spill] sm:$0xff] %v8589_v17  ;;  %v8603_v15 = vadd.f32 128.0, %v15592_v25  ;;  %v15598_v59 = vsel %vm15595_vm3, %v15596_v37, %v15597_v26  ;;  %vm15601_vm4 = vnez %v15600_v9  ;;  %v15602_v17 = vld [vmem:[#allocation285_spill] sm:$0xff]  ;;  %vm15607_vm5 = vnez %v15606_v29  ;;  %v15612_v40 = vld [vmem:[#allocation288_spill] sm:$0xff]  ;;  %v15615_v37 = vld [vmem:[#allocation58_spill] sm:$0xff] }
 0x2be   : > { %15587 = vst [vmem:[#allocation18_spill] sm:$0xff] %v8596_v16  ;;  %v8610_v45 = vadd.f32 128.0, %v15598_v59  ;;  %v15604_v19 = vsel %vm15601_vm4, %v15602_v17, %v15603_v55  ;;  %v15608_v16 = vld [vmem:[#allocation287_spill] sm:$0xff]  ;;  %v15609_v24 = vld [vmem:[#allocation57_spill] sm:$0xff]  ;;  %vm15613_vm6 = vnez %v15612_v40  ;;  %v15618_v9 = vld [vmem:[#allocation290_spill] sm:$0xff] }
 0x2bf   : > { %15593 = vst [vmem:[#allocation214_spill] sm:$0xff] %v8603_v15  ;;  %v8617_v56 = vadd.f32 128.0, %v15604_v19  ;;  %v15610_v41 = vsel %vm15607_vm5, %v15608_v16, %v15609_v24  ;;  %v15614_v15 = vld [vmem:[#allocation289_spill] sm:$0xff]  ;;  %vm15619_vm7 = vnez %v15618_v9  ;;  %v15621_v17 = vld [vmem:[#allocation59_spill] sm:$0xff]  ;;  %v15624_v29 = vld [vmem:[#allocation292_spill] sm:$0xff] }
 0x2c0   : > { %15599 = vst [vmem:[#allocation215_spill] sm:$0xff] %v8610_v45  ;;  %v8624_v25 = vadd.f32 128.0, %v15610_v41  ;;  %v15616_v26 = vsel %vm15613_vm6, %v15614_v15, %v15615_v37  ;;  %v15620_v45 = vld [vmem:[#allocation291_spill] sm:$0xff]  ;;  %vm15625_vm8 = vnez %v15624_v29  ;;  %v15627_v16 = vld [vmem:[#allocation60_spill] sm:$0xff]  ;;  %v15630_v40 = vld [vmem:[#allocation293_spill] sm:$0xff] }
 0x2c1   : > { %15605 = vst [vmem:[#allocation19_spill] sm:$0xff] %v8617_v56  ;;  %v8631_v59 = vadd.f32 128.0, %v15616_v26  ;;  %v15622_v55 = vsel %vm15619_vm7, %v15620_v45, %v15621_v17  ;;  %v15626_v56 = vld [vmem:[#allocation294_spill] sm:$0xff]  ;;  %vm15631_vm1 = vnez %v15630_v40  ;;  %v15633_v15 = vld [vmem:[#allocation61_spill] sm:$0xff]  ;;  %v15648_v40 = vld [vmem:[#allocation300_spill] sm:$0xff] }
 0x2c2   : > { %15611 = vst [vmem:[#allocation20_spill] sm:$0xff] %v8624_v25  ;;  %v8638_v19 = vadd.f32 128.0, %v15622_v55  ;;  %v15628_v24 = vsel %vm15625_vm8, %v15626_v56, %v15627_v16  ;;  %v15632_v25 = vld [vmem:[#allocation295_spill] sm:$0xff]  ;;  %v15636_v9 = vld [vmem:[#allocation297_spill] sm:$0xff]  ;;  %v15639_v45 = vld [vmem:[#allocation62_spill] sm:$0xff]  ;;  %vm15649_vm4 = vnez %v15648_v40 }
 0x2c3   : > { %15617 = vst [vmem:[#allocation216_spill] sm:$0xff] %v8631_v59  ;;  %v8645_v41 = vadd.f32 128.0, %v15628_v24  ;;  %v15634_v37 = vsel %vm15631_vm1, %v15632_v25, %v15633_v15  ;;  %vm15637_vm2 = vnez %v15636_v9  ;;  %v15638_v59 = vld [vmem:[#allocation296_spill] sm:$0xff]  ;;  %v15642_v29 = vld [vmem:[#allocation298_spill] sm:$0xff]  ;;  %v15645_v56 = vld [vmem:[#allocation63_spill] sm:$0xff] }
 0x2c4   : > { %15623 = vst [vmem:[#allocation21_spill] sm:$0xff] %v8638_v19  ;;  %v8652_v26 = vadd.f32 128.0, %v15634_v37  ;;  %v15640_v17 = vsel %vm15637_vm2, %v15638_v59, %v15639_v45  ;;  %vm15643_vm3 = vnez %v15642_v29  ;;  %v15644_v19 = vld [vmem:[#allocation299_spill] sm:$0xff]  ;;  %v15651_v25 = vld [vmem:[#allocation64_spill] sm:$0xff]  ;;  %v15654_v9 = vld [vmem:[#allocation301_spill] sm:$0xff] }
 0x2c5   : > { %15629 = vst [vmem:[#allocation218_spill] sm:$0xff] %v8645_v41  ;;  %v8659_v55 = vadd.f32 128.0, %v15640_v17  ;;  %v15646_v16 = vsel %vm15643_vm3, %v15644_v19, %v15645_v56  ;;  %v15650_v41 = vld [vmem:[#allocation302_spill] sm:$0xff]  ;;  %vm15655_vm5 = vnez %v15654_v9  ;;  %v15657_v59 = vld [vmem:[#allocation65_spill] sm:$0xff]  ;;  %v15660_v29 = vld [vmem:[#allocation303_spill] sm:$0xff] }
 0x2c6   : > { %15635 = vst [vmem:[#allocation217_spill] sm:$0xff] %v8652_v26  ;;  %v8666_v24 = vadd.f32 128.0, %v15646_v16  ;;  %v15652_v15 = vsel %vm15649_vm4, %v15650_v41, %v15651_v25  ;;  %v15656_v26 = vld [vmem:[#allocation304_spill] sm:$0xff]  ;;  %vm15661_vm6 = vnez %v15660_v29  ;;  %v15663_v19 = vld [vmem:[#allocation66_spill] sm:$0xff]  ;;  %v15669_v41 = vld [vmem:[#allocation67_spill] sm:$0xff] }
 0x2c7   : > { %15641 = vst [vmem:[#allocation22_spill] sm:$0xff] %v8659_v55  ;;  %v8673_v37 = vadd.f32 128.0, %v15652_v15  ;;  %v15658_v45 = vsel %vm15655_vm5, %v15656_v26, %v15657_v59  ;;  %v15662_v55 = vld [vmem:[#allocation305_spill] sm:$0xff]  ;;  %v15666_v40 = vld [vmem:[#allocation306_spill] sm:$0xff]  ;;  %v15672_v9 = vld [vmem:[#allocation308_spill] sm:$0xff] }
 0x2c8   : > { %15647 = vst [vmem:[#allocation219_spill] sm:$0xff] %v8666_v24  ;;  %v8680_v17 = vadd.f32 128.0, %v15658_v45  ;;  %v15664_v56 = vsel %vm15661_vm6, %v15662_v55, %v15663_v19  ;;  %vm15667_vm7 = vnez %v15666_v40  ;;  %v15668_v24 = vld [vmem:[#allocation307_spill] sm:$0xff]  ;;  %vm15673_vm8 = vnez %v15672_v9  ;;  %v15675_v26 = vld [vmem:[#allocation68_spill] sm:$0xff]  ;;  %v15678_v29 = vld [vmem:[#allocation310_spill] sm:$0xff] }
 0x2c9   : > { %15653 = vst [vmem:[#allocation220_spill] sm:$0xff] %v8673_v37  ;;  %v8687_v16 = vadd.f32 128.0, %v15664_v56  ;;  %v15670_v25 = vsel %vm15667_vm7, %v15668_v24, %v15669_v41  ;;  %v15674_v37 = vld [vmem:[#allocation309_spill] sm:$0xff]  ;;  %vm15679_vm1 = vnez %v15678_v29  ;;  %v15684_v40 = vld [vmem:[#allocation312_spill] sm:$0xff]  ;;  %v15687_v24 = vld [vmem:[#allocation70_spill] sm:$0xff] }
 0x2ca   : > { %15659 = vst [vmem:[#allocation23_spill] sm:$0xff] %v8680_v17  ;;  %v8694_v15 = vadd.f32 128.0, %v15670_v25  ;;  %v15676_v59 = vsel %vm15673_vm8, %v15674_v37, %v15675_v26  ;;  %v15680_v17 = vld [vmem:[#allocation311_spill] sm:$0xff]  ;;  %v15681_v55 = vld [vmem:[#allocation69_spill] sm:$0xff]  ;;  %vm15685_vm2 = vnez %v15684_v40  ;;  %v15702_v40 = vld [vmem:[#allocation318_spill] sm:$0xff] }
 0x2cb   : > { %15665 = vst [vmem:[#allocation221_spill] sm:$0xff] %v8687_v16  ;;  %v8701_v45 = vadd.f32 128.0, %v15676_v59  ;;  %v15682_v19 = vsel %vm15679_vm1, %v15680_v17, %v15681_v55  ;;  %v15686_v16 = vld [vmem:[#allocation314_spill] sm:$0xff]  ;;  %v15690_v9 = vld [vmem:[#allocation313_spill] sm:$0xff]  ;;  %v15693_v37 = vld [vmem:[#allocation71_spill] sm:$0xff]  ;;  %vm15703_vm5 = vnez %v15702_v40 }
 0x2cc   : > { %15671 = vst [vmem:[#allocation24_spill] sm:$0xff] %v8694_v15  ;;  %v8708_v56 = vadd.f32 128.0, %v15682_v19  ;;  %v15688_v41 = vsel %vm15685_vm2, %v15686_v16, %v15687_v24  ;;  %vm15691_vm3 = vnez %v15690_v9  ;;  %v15692_v15 = vld [vmem:[#allocation315_spill] sm:$0xff]  ;;  %v15696_v29 = vld [vmem:[#allocation317_spill] sm:$0xff]  ;;  %v15699_v17 = vld [vmem:[#allocation72_spill] sm:$0xff] }
 0x2cd   : > { %15677 = vst [vmem:[#allocation222_spill] sm:$0xff] %v8701_v45  ;;  %v8715_v25 = vadd.f32 128.0, %v15688_v41  ;;  %v15694_v26 = vsel %vm15691_vm3, %v15692_v15, %v15693_v37  ;;  %vm15697_vm4 = vnez %v15696_v29  ;;  %v15698_v45 = vld [vmem:[#allocation316_spill] sm:$0xff]  ;;  %v15705_v16 = vld [vmem:[#allocation73_spill] sm:$0xff]  ;;  %v15711_v15 = vld [vmem:[#allocation74_spill] sm:$0xff] }
 0x2ce   : > { %15683 = vst [vmem:[#allocation224_spill] sm:$0xff] %v8708_v56  ;;  %v8722_v59 = vadd.f32 128.0, %v15694_v26  ;;  %v15700_v55 = vsel %vm15697_vm4, %v15698_v45, %v15699_v17  ;;  %v15704_v56 = vld [vmem:[#allocation319_spill] sm:$0xff]  ;;  %v15708_v9 = vld [vmem:[#allocation320_spill] sm:$0xff]  ;;  %v15714_v29 = vld [vmem:[#allocation321_spill] sm:$0xff] }
 0x2cf   : > { %15689 = vst [vmem:[#allocation25_spill] sm:$0xff] %v8715_v25  ;;  %v8729_v19 = vadd.f32 128.0, %v15700_v55  ;;  %v15706_v24 = vsel %vm15703_vm5, %v15704_v56, %v15705_v16  ;;  %vm15709_vm6 = vnez %v15708_v9  ;;  %v15710_v25 = vld [vmem:[#allocation322_spill] sm:$0xff]  ;;  %vm15715_vm7 = vnez %v15714_v29  ;;  %v15717_v45 = vld [vmem:[#allocation75_spill] sm:$0xff]  ;;  %v15723_v56 = vld [vmem:[#allocation76_spill] sm:$0xff] }
 0x2d0   : > { %15695 = vst [vmem:[#allocation223_spill] sm:$0xff] %v8722_v59  ;;  %v8736_v41 = vadd.f32 128.0, %v15706_v24  ;;  %v15712_v37 = vsel %vm15709_vm6, %v15710_v25, %v15711_v15  ;;  %v15716_v59 = vld [vmem:[#allocation324_spill] sm:$0xff]  ;;  %v15720_v40 = vld [vmem:[#allocation323_spill] sm:$0xff]  ;;  %v15726_v9 = vld [vmem:[#allocation326_spill] sm:$0xff] }
 0x2d1   : > { %15701 = vst [vmem:[#allocation225_spill] sm:$0xff] %v8729_v19  ;;  %v8743_v26 = vadd.f32 128.0, %v15712_v37  ;;  %v15718_v17 = vsel %vm15715_vm7, %v15716_v59, %v15717_v45  ;;  %vm15721_vm8 = vnez %v15720_v40  ;;  %v15722_v19 = vld [vmem:[#allocation325_spill] sm:$0xff]  ;;  %vm15727_vm1 = vnez %v15726_v9  ;;  %v15732_v29 = vld [vmem:[#allocation328_spill] sm:$0xff]  ;;  %v15735_v59 = vld [vmem:[#allocation78_spill] sm:$0xff] }
 0x2d2   : > { %15707 = vst [vmem:[#allocation26_spill] sm:$0xff] %v8736_v41  ;;  %v8750_v55 = vadd.f32 128.0, %v15718_v17  ;;  %v15724_v16 = vsel %vm15721_vm8, %v15722_v19, %v15723_v56  ;;  %v15728_v41 = vld [vmem:[#allocation327_spill] sm:$0xff]  ;;  %v15729_v25 = vld [vmem:[#allocation77_spill] sm:$0xff]  ;;  %vm15733_vm2 = vnez %v15732_v29  ;;  %v15738_v40 = vld [vmem:[#allocation330_spill] sm:$0xff] }
 0x2d3   : > { %15713 = vst [vmem:[#allocation226_spill] sm:$0xff] %v8743_v26  ;;  %v8757_v24 = vadd.f32 128.0, %v15724_v16  ;;  %v15730_v15 = vsel %vm15727_vm1, %v15728_v41, %v15729_v25  ;;  %v15734_v26 = vld [vmem:[#allocation329_spill] sm:$0xff]  ;;  %vm15739_vm3 = vnez %v15738_v40  ;;  %v15741_v19 = vld [vmem:[#allocation79_spill] sm:$0xff]  ;;  %v15744_v9 = vld [vmem:[#allocation332_spill] sm:$0xff] }
 0x2d4   : > { %15719 = vst [vmem:[#allocation227_spill] sm:$0xff] %v8750_v55  ;;  %v8764_v37 = vadd.f32 128.0, %v15730_v15  ;;  %v15736_v45 = vsel %vm15733_vm2, %v15734_v26, %v15735_v59  ;;  %v15740_v55 = vld [vmem:[#allocation331_spill] sm:$0xff]  ;;  %vm15745_vm4 = vnez %v15744_v9  ;;  %v15747_v41 = vld [vmem:[#allocation80_spill] sm:$0xff]  ;;  %v15750_v29 = vld [vmem:[#allocation333_spill] sm:$0xff] }
 0x2d5   : > { %15725 = vst [vmem:[#allocation27_spill] sm:$0xff] %v8757_v24  ;;  %v8771_v17 = vadd.f32 128.0, %v15736_v45  ;;  %v15742_v56 = vsel %vm15739_vm3, %v15740_v55, %v15741_v19  ;;  %v15746_v24 = vld [vmem:[#allocation334_spill] sm:$0xff]  ;;  %vm15751_vm5 = vnez %v15750_v29  ;;  %v15753_v26 = vld [vmem:[#allocation81_spill] sm:$0xff]  ;;  %v15768_v29 = vld [vmem:[#allocation340_spill] sm:$0xff] }
 0x2d6   : > { %15731 = vst [vmem:[#allocation228_spill] sm:$0xff] %v8764_v37  ;;  %v8778_v16 = vadd.f32 128.0, %v15742_v56  ;;  %v15748_v25 = vsel %vm15745_vm4, %v15746_v24, %v15747_v41  ;;  %v15752_v37 = vld [vmem:[#allocation335_spill] sm:$0xff]  ;;  %v15756_v40 = vld [vmem:[#allocation337_spill] sm:$0xff]  ;;  %v15759_v55 = vld [vmem:[#allocation82_spill] sm:$0xff]  ;;  %vm15769_vm8 = vnez %v15768_v29 }
 0x2d7   : > { %15737 = vst [vmem:[#allocation229_spill] sm:$0xff] %v8771_v17  ;;  %v8785_v15 = vadd.f32 128.0, %v15748_v25  ;;  %v15754_v59 = vsel %vm15751_vm5, %v15752_v37, %v15753_v26  ;;  %vm15757_vm6 = vnez %v15756_v40  ;;  %v15758_v17 = vld [vmem:[#allocation336_spill] sm:$0xff]  ;;  %v15762_v9 = vld [vmem:[#allocation338_spill] sm:$0xff]  ;;  %v15765_v24 = vld [vmem:[#allocation83_spill] sm:$0xff] }
 0x2d8   : > { %15743 = vst [vmem:[#allocation28_spill] sm:$0xff] %v8778_v16  ;;  %v8792_v45 = vadd.f32 128.0, %v15754_v59  ;;  %v15760_v19 = vsel %vm15757_vm6, %v15758_v17, %v15759_v55  ;;  %vm15763_vm7 = vnez %v15762_v9  ;;  %v15764_v16 = vld [vmem:[#allocation339_spill] sm:$0xff]  ;;  %v15771_v37 = vld [vmem:[#allocation84_spill] sm:$0xff]  ;;  %v15774_v40 = vld [vmem:[#allocation341_spill] sm:$0xff] }
 0x2d9   : > { %15749 = vst [vmem:[#allocation230_spill] sm:$0xff] %v8785_v15  ;;  %v8799_v56 = vadd.f32 128.0, %v15760_v19  ;;  %v15766_v41 = vsel %vm15763_vm7, %v15764_v16, %v15765_v24  ;;  %v15770_v15 = vld [vmem:[#allocation342_spill] sm:$0xff]  ;;  %vm15775_vm1 = vnez %v15774_v40  ;;  %v15777_v17 = vld [vmem:[#allocation85_spill] sm:$0xff]  ;;  %v15780_v9 = vld [vmem:[#allocation343_spill] sm:$0xff] }
 0x2da   : > { %15755 = vst [vmem:[#allocation231_spill] sm:$0xff] %v8792_v45  ;;  %v8806_v25 = vadd.f32 128.0, %v15766_v41  ;;  %v15772_v26 = vsel %vm15769_vm8, %v15770_v15, %v15771_v37  ;;  %v15776_v45 = vld [vmem:[#allocation344_spill] sm:$0xff]  ;;  %vm15781_vm2 = vnez %v15780_v9  ;;  %v15783_v16 = vld [vmem:[#allocation86_spill] sm:$0xff]  ;;  %v15789_v15 = vld [vmem:[#allocation87_spill] sm:$0xff] }
 0x2db   : > { %15761 = vst [vmem:[#allocation29_spill] sm:$0xff] %v8799_v56  ;;  %v8813_v59 = vadd.f32 128.0, %v15772_v26  ;;  %v15778_v55 = vsel %vm15775_vm1, %v15776_v45, %v15777_v17  ;;  %v15782_v56 = vld [vmem:[#allocation345_spill] sm:$0xff]  ;;  %v15786_v29 = vld [vmem:[#allocation346_spill] sm:$0xff]  ;;  %v15792_v40 = vld [vmem:[#allocation348_spill] sm:$0xff] }
 0x2dc   : > { %15767 = vst [vmem:[#allocation232_spill] sm:$0xff] %v8806_v25  ;;  %v8820_v19 = vadd.f32 128.0, %v15778_v55  ;;  %v15784_v24 = vsel %vm15781_vm2, %v15782_v56, %v15783_v16  ;;  %vm15787_vm3 = vnez %v15786_v29  ;;  %v15788_v25 = vld [vmem:[#allocation347_spill] sm:$0xff]  ;;  %vm15793_vm4 = vnez %v15792_v40  ;;  %v15795_v45 = vld [vmem:[#allocation88_spill] sm:$0xff]  ;;  %v15798_v9 = vld [vmem:[#allocation350_spill] sm:$0xff] }
 0x2dd   : > { %15773 = vst [vmem:[#allocation234_spill] sm:$0xff] %v8813_v59  ;;  %v8827_v41 = vadd.f32 128.0, %v15784_v24  ;;  %v15790_v37 = vsel %vm15787_vm3, %v15788_v25, %v15789_v15  ;;  %v15794_v59 = vld [vmem:[#allocation349_spill] sm:$0xff]  ;;  %vm15799_vm5 = vnez %v15798_v9  ;;  %v15804_v29 = vld [vmem:[#allocation352_spill] sm:$0xff]  ;;  %v15807_v25 = vld [vmem:[#allocation90_spill] sm:$0xff] }
 0x2de   : > { %15779 = vst [vmem:[#allocation30_spill] sm:$0xff] %v8820_v19  ;;  %v8834_v26 = vadd.f32 128.0, %v15790_v37  ;;  %v15796_v17 = vsel %vm15793_vm4, %v15794_v59, %v15795_v45  ;;  %v15800_v19 = vld [vmem:[#allocation351_spill] sm:$0xff]  ;;  %v15801_v56 = vld [vmem:[#allocation89_spill] sm:$0xff]  ;;  %vm15805_vm6 = vnez %v15804_v29  ;;  %v15822_v29 = vld [vmem:[#allocation358_spill] sm:$0xff] }
 0x2df   : > { %15785 = vst [vmem:[#allocation233_spill] sm:$0xff] %v8827_v41  ;;  %v8841_v55 = vadd.f32 128.0, %v15796_v17  ;;  %v15802_v16 = vsel %vm15799_vm5, %v15800_v19, %v15801_v56  ;;  %v15806_v41 = vld [vmem:[#allocation354_spill] sm:$0xff]  ;;  %v15810_v40 = vld [vmem:[#allocation353_spill] sm:$0xff]  ;;  %v15813_v59 = vld [vmem:[#allocation91_spill] sm:$0xff]  ;;  %vm15823_vm1 = vnez %v15822_v29 }
 0x2e0   : > { %15791 = vst [vmem:[#allocation235_spill] sm:$0xff] %v8834_v26  ;;  %v8848_v24 = vadd.f32 128.0, %v15802_v16  ;;  %v15808_v15 = vsel %vm15805_vm6, %v15806_v41, %v15807_v25  ;;  %vm15811_vm7 = vnez %v15810_v40  ;;  %v15812_v26 = vld [vmem:[#allocation355_spill] sm:$0xff]  ;;  %v15816_v9 = vld [vmem:[#allocation357_spill] sm:$0xff]  ;;  %v15819_v19 = vld [vmem:[#allocation92_spill] sm:$0xff] }
 0x2e1   : > { %15797 = vst [vmem:[#allocation31_spill] sm:$0xff] %v8841_v55  ;;  %v8855_v37 = vadd.f32 128.0, %v15808_v15  ;;  %v15814_v45 = vsel %vm15811_vm7, %v15812_v26, %v15813_v59  ;;  %vm15817_vm8 = vnez %v15816_v9  ;;  %v15818_v55 = vld [vmem:[#allocation356_spill] sm:$0xff]  ;;  %v15825_v41 = vld [vmem:[#allocation93_spill] sm:$0xff]  ;;  %v15831_v26 = vld [vmem:[#allocation94_spill] sm:$0xff] }
 0x2e2   : > { %15803 = vst [vmem:[#allocation237_spill] sm:$0xff] %v8848_v24  ;;  %v8862_v17 = vadd.f32 128.0, %v15814_v45  ;;  %v15820_v56 = vsel %vm15817_vm8, %v15818_v55, %v15819_v19  ;;  %v15824_v24 = vld [vmem:[#allocation359_spill] sm:$0xff]  ;;  %v15828_v40 = vld [vmem:[#allocation360_spill] sm:$0xff]  ;;  %v15834_v9 = vld [vmem:[#allocation361_spill] sm:$0xff] }
 0x2e3   : > { %15809 = vst [vmem:[#allocation236_spill] sm:$0xff] %v8855_v37  ;;  %v8869_v16 = vadd.f32 128.0, %v15820_v56  ;;  %v15826_v25 = vsel %vm15823_vm1, %v15824_v24, %v15825_v41  ;;  %vm15829_vm2 = vnez %v15828_v40  ;;  %v15830_v37 = vld [vmem:[#allocation362_spill] sm:$0xff]  ;;  %vm15835_vm3 = vnez %v15834_v9  ;;  %v15837_v55 = vld [vmem:[#allocation95_spill] sm:$0xff]  ;;  %v15843_v24 = vld [vmem:[#allocation96_spill] sm:$0xff] }
 0x2e4   : > { %15815 = vst [vmem:[#allocation32_spill] sm:$0xff] %v8862_v17  ;;  %v8876_v15 = vadd.f32 128.0, %v15826_v25  ;;  %v15832_v59 = vsel %vm15829_vm2, %v15830_v37, %v15831_v26  ;;  %v15836_v17 = vld [vmem:[#allocation364_spill] sm:$0xff]  ;;  %v15840_v29 = vld [vmem:[#allocation363_spill] sm:$0xff]  ;;  %v15846_v40 = vld [vmem:[#allocation366_spill] sm:$0xff] }
 0x2e5   : > { %15821 = vst [vmem:[#allocation238_spill] sm:$0xff] %v8869_v16  ;;  %v8883_v45 = vadd.f32 128.0, %v15832_v59  ;;  %v15838_v19 = vsel %vm15835_vm3, %v15836_v17, %v15837_v55  ;;  %vm15841_vm4 = vnez %v15840_v29  ;;  %v15842_v16 = vld [vmem:[#allocation365_spill] sm:$0xff]  ;;  %vm15847_vm5 = vnez %v15846_v40  ;;  %v15852_v9 = vld [vmem:[#allocation368_spill] sm:$0xff]  ;;  %v15855_v17 = vld [vmem:[#allocation98_spill] sm:$0xff] }
 0x2e6   : > { %15827 = vst [vmem:[#allocation239_spill] sm:$0xff] %v8876_v15  ;;  %v8890_v56 = vadd.f32 128.0, %v15838_v19  ;;  %v15844_v41 = vsel %vm15841_vm4, %v15842_v16, %v15843_v24  ;;  %v15848_v15 = vld [vmem:[#allocation367_spill] sm:$0xff]  ;;  %v15849_v37 = vld [vmem:[#allocation97_spill] sm:$0xff]  ;;  %vm15853_vm6 = vnez %v15852_v9  ;;  %v15858_v29 = vld [vmem:[#allocation370_spill] sm:$0xff] }
 0x2e7   : > { %15833 = vst [vmem:[#allocation33_spill] sm:$0xff] %v8883_v45  ;;  %v8897_v25 = vadd.f32 128.0, %v15844_v41  ;;  %v15850_v26 = vsel %vm15847_vm5, %v15848_v15, %v15849_v37  ;;  %v15854_v45 = vld [vmem:[#allocation369_spill] sm:$0xff]  ;;  %vm15859_vm7 = vnez %v15858_v29  ;;  %v15861_v16 = vld [vmem:[#allocation99_spill] sm:$0xff]  ;;  %v15864_v40 = vld [vmem:[#allocation372_spill] sm:$0xff] }
 0x2e8   : > { %15839 = vst [vmem:[#allocation240_spill] sm:$0xff] %v8890_v56  ;;  %v8904_v59 = vadd.f32 128.0, %v15850_v26  ;;  %v15856_v55 = vsel %vm15853_vm6, %v15854_v45, %v15855_v17  ;;  %v15860_v56 = vld [vmem:[#allocation371_spill] sm:$0xff]  ;;  %vm15865_vm8 = vnez %v15864_v40  ;;  %v15867_v15 = vld [vmem:[#allocation100_spill] sm:$0xff]  ;;  %v15869_v9 = vld [vmem:[#allocation373_spill] sm:$0xff] }
 0x2e9   : > { %15845 = vst [vmem:[#allocation242_spill] sm:$0xff] %v8897_v25  ;;  %v8911_v19 = vadd.f32 128.0, %v15856_v55  ;;  %v15862_v24 = vsel %vm15859_vm7, %v15860_v56, %v15861_v16  ;;  %v15866_v25 = vld [vmem:[#allocation374_spill] sm:$0xff]  ;;  %vm15870_vm1 = vnez %v15869_v9  ;;  %v15872_v45 = vld [vmem:[#allocation101_spill] sm:$0xff]  ;;  %v15887_v9 = vld [vmem:[#allocation380_spill] sm:$0xff] }
 0x2ea   : > { %15851 = vst [vmem:[#allocation34_spill] sm:$0xff] %v8904_v59  ;;  %v8918_v41 = vadd.f32 128.0, %v15862_v24  ;;  %v15868_v37 = vsel %vm15865_vm8, %v15866_v25, %v15867_v15  ;;  %v15871_v59 = vld [vmem:[#allocation375_spill] sm:$0xff]  ;;  %v15875_v29 = vld [vmem:[#allocation377_spill] sm:$0xff]  ;;  %v15878_v56 = vld [vmem:[#allocation102_spill] sm:$0xff]  ;;  %vm15888_vm4 = vnez %v15887_v9 }
 0x2eb   : > { %15857 = vst [vmem:[#allocation241_spill] sm:$0xff] %v8911_v19  ;;  %v8925_v26 = vadd.f32 128.0, %v15868_v37  ;;  %v15873_v17 = vsel %vm15870_vm1, %v15871_v59, %v15872_v45  ;;  %vm15876_vm2 = vnez %v15875_v29  ;;  %v15877_v19 = vld [vmem:[#allocation376_spill] sm:$0xff]  ;;  %v15881_v40 = vld [vmem:[#allocation378_spill] sm:$0xff]  ;;  %v15884_v25 = vld [vmem:[#allocation103_spill] sm:$0xff] }
 0x2ec   : > { %15863 = vst [vmem:[#allocation244_spill] sm:$0xff] %v8918_v41  ;;  %v8932_v55 = vadd.f32 128.0, %v15873_v17  ;;  %v15879_v16 = vsel %vm15876_vm2, %v15877_v19, %v15878_v56  ;;  %vm15882_vm3 = vnez %v15881_v40  ;;  %v15883_v41 = vld [vmem:[#allocation379_spill] sm:$0xff]  ;;  %v15889_v59 = vld [vmem:[#allocation104_spill] sm:$0xff]  ;;  %v15892_v29 = vld [vmem:[#allocation381_spill] sm:$0xff] }
 0x2ed   : > { %v8939_v24 = vadd.f32 128.0, %v15879_v16  ;;  %v15885_v15 = vsel %vm15882_vm3, %v15883_v41, %v15884_v25  ;;  %v15890_v45 = vsel %vm15888_vm4, %v7061_v63, %v15889_v59  ;;  %vm15893_vm5 = vnez %v15892_v29  ;;  %v15895_v19 = vld [vmem:[#allocation105_spill] sm:$0xff]  ;;  %v15898_v40 = vld [vmem:[#allocation382_spill] sm:$0xff]  ;;  %v15907_v63 = vld [vmem:[#allocation107_spill] sm:$0xff] }
 0x2ee   : > { %15874 = vst [vmem:[#allocation35_spill] sm:$0xff] %v8932_v55  ;;  %v8946_v37 = vadd.f32 128.0, %v15885_v15  ;;  %v8953_v17 = vadd.f32 128.0, %v15890_v45  ;;  %v15894_v55 = vld [vmem:[#allocation383_spill] sm:$0xff]  ;;  %vm15899_vm6 = vnez %v15898_v40  ;;  %v15901_v41 = vld [vmem:[#allocation106_spill] sm:$0xff]  ;;  %v15904_v9 = vld [vmem:[#allocation385_spill] sm:$0xff] }
 0x2ef   : > { %15880 = vst [vmem:[#allocation243_spill] sm:$0xff] %v8939_v24  ;;  %v15896_v56 = vsel %vm15893_vm5, %v15894_v55, %v15895_v19  ;;  %v15900_v24 = vld [vmem:[#allocation384_spill] sm:$0xff]  ;;  %vm15905_vm7 = vnez %v15904_v9  ;;  %v15910_v29 = vld [vmem:[#allocation387_spill] sm:$0xff]  ;;  %v15916_v40 = vld [vmem:[#allocation389_spill] sm:$0xff] }
 0x2f0   : > { %15886 = vst [vmem:[#allocation245_spill] sm:$0xff] %v8946_v37  ;;  %v8960_v16 = vadd.f32 128.0, %v15896_v56  ;;  %v15902_v25 = vsel %vm15899_vm6, %v15900_v24, %v15901_v41  ;;  %v15906_v37 = vld [vmem:[#allocation386_spill] sm:$0xff]  ;;  %vm15911_vm8 = vnez %v15910_v29  ;;  %v15913_v55 = vld [vmem:[#allocation108_spill] sm:$0xff]  ;;  %vm15917_vm1 = vnez %v15916_v40  ;;  %v15919_v24 = vld [vmem:[#allocation109_spill] sm:$0xff] }
 0x2f1   : > { %15891 = vst [vmem:[#allocation36_spill] sm:$0xff] %v8953_v17  ;;  %v8967_v15 = vadd.f32 128.0, %v15902_v25  ;;  %v15908_v59 = vsel %vm15905_vm7, %v15906_v37, %v15907_v63  ;;  %v15912_v17 = vld [vmem:[#allocation388_spill] sm:$0xff]  ;;  %v15922_v9 = vld [vmem:[#allocation114_spill] sm:$0xff]  ;;  %v15928_v29 = vld [vmem:[#allocation391_spill] sm:$0xff] }
 0x2f2   : > { %15897 = vst [vmem:[#allocation246_spill] sm:$0xff] %v8960_v16  ;;  %v8974_v45 = vadd.f32 128.0, %v15908_v59  ;;  %v15914_v19 = vsel %vm15911_vm8, %v15912_v17, %v15913_v55  ;;  %v15918_v16 = vld [vmem:[#allocation390_spill] sm:$0xff]  ;;  %vm15923_vm2 = vnez %v15922_v9  ;;  %vm15929_vm3 = vnez %v15928_v29  ;;  %v15931_v17 = vld [vmem:[#allocation111_spill] sm:$0xff]  ;;  %v15940_v9 = vld [vmem:[#allocation396_spill] sm:$0xff] }
 0x2f3   : > { %15903 = vst [vmem:[#allocation247_spill] sm:$0xff] %v8967_v15  ;;  %v8981_v56 = vadd.f32 128.0, %v15914_v19  ;;  %v15920_v41 = vsel %vm15917_vm1, %v15918_v16, %v15919_v24  ;;  %v15924_v15 = vld [vmem:[#allocation392_spill] sm:$0xff]  ;;  %v15925_v37 = vld [vmem:[#allocation110_spill] sm:$0xff]  ;;  %v15934_v40 = vld [vmem:[#allocation395_spill] sm:$0xff]  ;;  %vm15941_vm5 = vnez %v15940_v9 }
 0x2f4   : > { %15909 = vst [vmem:[#allocation37_spill] sm:$0xff] %v8974_v45  ;;  %v8988_v25 = vadd.f32 128.0, %v15920_v41  ;;  %v15926_v63 = vsel %vm15923_vm2, %v15924_v15, %v15925_v37  ;;  %v15930_v45 = vld [vmem:[#allocation393_spill] sm:$0xff]  ;;  %vm15935_vm4 = vnez %v15934_v40  ;;  %v15937_v16 = vld [vmem:[#allocation112_spill] sm:$0xff]  ;;  %v15946_v29 = vld [vmem:[#allocation398_spill] sm:$0xff] }
 0x2f5   : > { %15915 = vst [vmem:[#allocation248_spill] sm:$0xff] %v8981_v56  ;;  %v8995_v59 = vadd.f32 128.0, %v15926_v63  ;;  %v15932_v55 = vsel %vm15929_vm3, %v15930_v45, %v15931_v17  ;;  %v15936_v56 = vld [vmem:[#allocation394_spill] sm:$0xff]  ;;  %v15943_v15 = vld [vmem:[#allocation113_spill] sm:$0xff]  ;;  %vm15947_vm6 = vnez %v15946_v29  ;;  %v15956_v9 = vld [vmem:[#allocation400_spill] sm:$0xff] }
 0x2f6   : > { %15921 = vst [vmem:[#allocation249_spill] sm:$0xff] %v8988_v25  ;;  %v9002_v19 = vadd.f32 128.0, %v15932_v55  ;;  %v15938_v24 = vsel %vm15935_vm4, %v15936_v56, %v15937_v16  ;;  %v15942_v25 = vld [vmem:[#allocation397_spill] sm:$0xff]  ;;  %v15948_v45 = vsel %vm15947_vm6, %v7191_v60, %v14934_v13  ;;  %v15950_v55 = vld [vmem:[#allocation399_spill] sm:$0xff]  ;;  %vm15957_vm8 = vnez %v15956_v9 }
 0x2f7   : > { %15927 = vst [vmem:[#allocation38_spill] sm:$0xff] %v8995_v59  ;;  %v9009_v41 = vadd.f32 128.0, %v15938_v24  ;;  %v15944_v37 = vsel %vm15941_vm5, %v15942_v25, %v15943_v15  ;;  %v9023_v17 = vadd.f32 128.0, %v15948_v45  ;;  %vm15951_vm7 = vnez %v15950_v55  ;;  %v15952_v40 = vld [vmem:[#allocation401_spill] sm:$0xff]  ;;  %v15953_v56 = vld [vmem:[#allocation115_spill] sm:$0xff]  ;;  %v15959_v25 = vld [vmem:[#allocation116_spill] sm:$0xff] }
 0x2f8   : > { %15933 = vst [vmem:[#allocation250_spill] sm:$0xff] %v9002_v19  ;;  %v9016_v63 = vadd.f32 128.0, %v15944_v37  ;;  %v15954_v16 = vsel %vm15951_vm7, %v15952_v40, %v15953_v56  ;;  %v15962_v29 = vld [vmem:[#allocation403_spill] sm:$0xff]  ;;  %v15965_v13 = vld [vmem:[#allocation117_spill] sm:$0xff]  ;;  %v15971_v40 = vld [vmem:[#allocation118_spill] sm:$0xff] }
 0x2f9   : > { %15939 = vst [vmem:[#allocation251_spill] sm:$0xff] %v9009_v41  ;;  %v9030_v24 = vadd.f32 128.0, %v15954_v16  ;;  %v15958_v41 = vld [vmem:[#allocation402_spill] sm:$0xff]  ;;  %vm15963_vm1 = vnez %v15962_v29  ;;  %v15968_v55 = vld [vmem:[#allocation405_spill] sm:$0xff]  ;;  %v15974_v9 = vld [vmem:[#allocation407_spill] sm:$0xff] }
 0x2fa   : > { %15945 = vst [vmem:[#allocation39_spill] sm:$0xff] %v9016_v63  ;;  %v15960_v15 = vsel %vm15957_vm8, %v15958_v41, %v15959_v25  ;;  %v15964_v63 = vld [vmem:[#allocation404_spill] sm:$0xff]  ;;  %vm15969_vm2 = vnez %v15968_v55  ;;  %vm15975_vm3 = vnez %v15974_v9  ;;  %v15977_v41 = vld [vmem:[#allocation119_spill] sm:$0xff]  ;;  %v15980_v29 = vld [vmem:[#allocation409_spill] sm:$0xff] }
 0x2fb   : > { %15949 = vst [vmem:[#allocation252_spill] sm:$0xff] %v9023_v17  ;;  %v9037_v37 = vadd.f32 128.0, %v15960_v15  ;;  %v15966_v60 = vsel %vm15963_vm1, %v15964_v63, %v15965_v13  ;;  %v15970_v17 = vld [vmem:[#allocation406_spill] sm:$0xff]  ;;  %vm15981_vm4 = vnez %v15980_v29  ;;  %v15983_v63 = vld [vmem:[#allocation120_spill] sm:$0xff]  ;;  %v15998_v29 = vld [vmem:[#allocation415_spill] sm:$0xff] }
 0x2fc   : > { %15955 = vst [vmem:[#allocation254_spill] sm:$0xff] %v9030_v24  ;;  %v9044_v45 = vadd.f32 128.0, %v15966_v60  ;;  %v15972_v56 = vsel %vm15969_vm2, %v15970_v17, %v15971_v40  ;;  %v15976_v24 = vld [vmem:[#allocation408_spill] sm:$0xff]  ;;  %v15986_v55 = vld [vmem:[#allocation410_spill] sm:$0xff]  ;;  %v15989_v17 = vld [vmem:[#allocation121_spill] sm:$0xff]  ;;  %vm15999_vm7 = vnez %v15998_v29 }
 0x2fd   : > { %15961 = vst [vmem:[#allocation40_spill] sm:$0xff] %v9037_v37  ;;  %v9051_v16 = vadd.f32 128.0, %v15972_v56  ;;  %v15978_v25 = vsel %vm15975_vm3, %v15976_v24, %v15977_v41  ;;  %v15982_v37 = vld [vmem:[#allocation411_spill] sm:$0xff]  ;;  %vm15987_vm5 = vnez %v15986_v55  ;;  %v15992_v9 = vld [vmem:[#allocation414_spill] sm:$0xff]  ;;  %v16004_v55 = vld [vmem:[#allocation417_spill] sm:$0xff] }
 0x2fe   : > { %15967 = vst [vmem:[#allocation253_spill] sm:$0xff] %v9044_v45  ;;  %v9058_v15 = vadd.f32 128.0, %v15978_v25  ;;  %v15984_v13 = vsel %vm15981_vm4, %v15982_v37, %v15983_v63  ;;  %v15988_v45 = vld [vmem:[#allocation412_spill] sm:$0xff]  ;;  %vm15993_vm6 = vnez %v15992_v9  ;;  %v15995_v24 = vld [vmem:[#allocation122_spill] sm:$0xff]  ;;  %v16001_v37 = vld [vmem:[#allocation123_spill] sm:$0xff]  ;;  %vm16005_vm8 = vnez %v16004_v55 }
 0x2ff   : > { %15973 = vst [vmem:[#allocation255_spill] sm:$0xff] %v9051_v16  ;;  %v9065_v60 = vadd.f32 128.0, %v15984_v13  ;;  %v15990_v40 = vsel %vm15987_vm5, %v15988_v45, %v15989_v17  ;;  %v15994_v16 = vld [vmem:[#allocation413_spill] sm:$0xff]  ;;  %v16007_v45 = vld [vmem:[#allocation124_spill] sm:$0xff]  ;;  %v16010_v9 = vld [vmem:[#allocation418_spill] sm:$0xff] }
 0x300   : > { %15979 = vst [vmem:[#allocation41_spill] sm:$0xff] %v9058_v15  ;;  %v9072_v56 = vadd.f32 128.0, %v15990_v40  ;;  %v15996_v41 = vsel %vm15993_vm6, %v15994_v16, %v15995_v24  ;;  %v16000_v15 = vld [vmem:[#allocation416_spill] sm:$0xff]  ;;  %vm16011_vm1 = vnez %v16010_v9  ;;  %v16013_v16 = vld [vmem:[#allocation125_spill] sm:$0xff]  ;;  %v16022_v55 = vld [vmem:[#allocation423_spill] sm:$0xff] }
 0x301   : > { %15985 = vst [vmem:[#allocation257_spill] sm:$0xff] %v9065_v60  ;;  %v9079_v25 = vadd.f32 128.0, %v15996_v41  ;;  %v16002_v63 = vsel %vm15999_vm7, %v16000_v15, %v16001_v37  ;;  %v16006_v60 = vld [vmem:[#allocation419_spill] sm:$0xff]  ;;  %v16016_v29 = vld [vmem:[#allocation420_spill] sm:$0xff]  ;;  %v16019_v15 = vld [vmem:[#allocation126_spill] sm:$0xff]  ;;  %vm16023_vm3 = vnez %v16022_v55 }
 0x302   : > { %15991 = vst [vmem:[#allocation256_spill] sm:$0xff] %v9072_v56  ;;  %v9086_v13 = vadd.f32 128.0, %v16002_v63  ;;  %v16008_v17 = vsel %vm16005_vm8, %v16006_v60, %v16007_v45  ;;  %v16012_v56 = vld [vmem:[#allocation421_spill] sm:$0xff]  ;;  %vm16017_vm2 = vnez %v16016_v29  ;;  %v16025_v60 = vld [vmem:[#allocation127_spill] sm:$0xff] }
 0x303   : > { %15997 = vst [vmem:[#allocation42_spill] sm:$0xff] %v9079_v25  ;;  %v9093_v40 = vadd.f32 128.0, %v16008_v17  ;;  %v16014_v24 = vsel %vm16011_vm1, %v16012_v56, %v16013_v16  ;;  %v16018_v25 = vld [vmem:[#allocation422_spill] sm:$0xff]  ;;  %v16028_v9 = vld [vmem:[#allocation425_spill] sm:$0xff]  ;;  %v16031_v56 = vld [vmem:[#allocation128_spill] sm:$0xff] }
 0x304   : > { %16003 = vst [vmem:[#allocation258_spill] sm:$0xff] %v9086_v13  ;;  %v9100_v41 = vadd.f32 128.0, %v16014_v24  ;;  %v16020_v37 = vsel %vm16017_vm2, %v16018_v25, %v16019_v15  ;;  %v16024_v13 = vld [vmem:[#allocation424_spill] sm:$0xff]  ;;  %vm16029_vm4 = vnez %v16028_v9  ;;  %v16034_v29 = vld [vmem:[#allocation427_spill] sm:$0xff]  ;;  %v16037_v25 = vld [vmem:[#allocation129_spill] sm:$0xff] }
 0x305   : > { %16009 = vst [vmem:[#allocation259_spill] sm:$0xff] %v9093_v40  ;;  %v9107_v63 = vadd.f32 128.0, %v16020_v37  ;;  %v16026_v45 = vsel %vm16023_vm3, %v16024_v13, %v16025_v60  ;;  %v16030_v40 = vld [vmem:[#allocation426_spill] sm:$0xff]  ;;  %vm16035_vm5 = vnez %v16034_v29  ;;  %v16040_v55 = vld [vmem:[#allocation429_spill] sm:$0xff]  ;;  %v16400_v38 = vld [vmem:[#allocation199_spill] sm:$0xff] }
 0x306   : > { %16015 = vst [vmem:[#allocation43_spill] sm:$0xff] %v9100_v41  ;;  %v9114_v17 = vadd.f32 128.0, %v16026_v45  ;;  %v16032_v16 = vsel %vm16029_vm4, %v16030_v40, %v16031_v56  ;;  %v16036_v41 = vld [vmem:[#allocation428_spill] sm:$0xff]  ;;  %vm16041_vm6 = vnez %v16040_v55  ;;  %v16043_v13 = vld [vmem:[#allocation130_spill] sm:$0xff]  ;;  %v16049_v40 = vld [vmem:[#allocation131_spill] sm:$0xff] }
 0x307   : > { %16021 = vst [vmem:[#allocation260_spill] sm:$0xff] %v9107_v63  ;;  %v9121_v24 = vadd.f32 128.0, %v16032_v16  ;;  %v16038_v15 = vsel %vm16035_vm5, %v16036_v41, %v16037_v25  ;;  %v16042_v63 = vld [vmem:[#allocation431_spill] sm:$0xff]  ;;  %v16046_v9 = vld [vmem:[#allocation430_spill] sm:$0xff]  ;;  %v16055_v41 = vld [vmem:[#allocation132_spill] sm:$0xff] }
 0x308   : > { %16027 = vst [vmem:[#allocation262_spill] sm:$0xff] %v9114_v17  ;;  %v9128_v37 = vadd.f32 128.0, %v16038_v15  ;;  %v16044_v60 = vsel %vm16041_vm6, %v16042_v63, %v16043_v13  ;;  %vm16047_vm7 = vnez %v16046_v9  ;;  %v16048_v17 = vld [vmem:[#allocation432_spill] sm:$0xff]  ;;  %v16052_v29 = vld [vmem:[#allocation434_spill] sm:$0xff]  ;;  %v16058_v55 = vld [vmem:[#allocation435_spill] sm:$0xff] }
 0x309   : > { %16033 = vst [vmem:[#allocation44_spill] sm:$0xff] %v9121_v24  ;;  %v9135_v45 = vadd.f32 128.0, %v16044_v60  ;;  %v16050_v56 = vsel %vm16047_vm7, %v16048_v17, %v16049_v40  ;;  %vm16053_vm8 = vnez %v16052_v29  ;;  %v16054_v24 = vld [vmem:[#allocation433_spill] sm:$0xff]  ;;  %vm16059_vm1 = vnez %v16058_v55  ;;  %v16067_v17 = vld [vmem:[#allocation134_spill] sm:$0xff]  ;;  %v16076_v55 = vld [vmem:[#allocation440_spill] sm:$0xff] }
 0x30a   : > { %16039 = vst [vmem:[#allocation261_spill] sm:$0xff] %v9128_v37  ;;  %v9142_v16 = vadd.f32 128.0, %v16050_v56  ;;  %v16056_v25 = vsel %vm16053_vm8, %v16054_v24, %v16055_v41  ;;  %v16060_v37 = vld [vmem:[#allocation436_spill] sm:$0xff]  ;;  %v16061_v63 = vld [vmem:[#allocation133_spill] sm:$0xff]  ;;  %v16070_v29 = vld [vmem:[#allocation438_spill] sm:$0xff]  ;;  %vm16077_vm4 = vnez %v16076_v55 }
 0x30b   : > { %16045 = vst [vmem:[#allocation264_spill] sm:$0xff] %v9135_v45  ;;  %v9149_v15 = vadd.f32 128.0, %v16056_v25  ;;  %v16062_v13 = vsel %vm16059_vm1, %v16060_v37, %v16061_v63  ;;  %v16064_v9 = vld [vmem:[#allocation437_spill] sm:$0xff]  ;;  %v16066_v45 = vld [vmem:[#allocation439_spill] sm:$0xff]  ;;  %vm16071_vm3 = vnez %v16070_v29  ;;  %v16079_v37 = vld [vmem:[#allocation136_spill] sm:$0xff] }
 0x30c   : > { %16051 = vst [vmem:[#allocation45_spill] sm:$0xff] %v9142_v16  ;;  %v9156_v60 = vadd.f32 128.0, %v16062_v13  ;;  %vm16065_vm2 = vnez %v16064_v9  ;;  %v16072_v16 = vld [vmem:[#allocation441_spill] sm:$0xff]  ;;  %v16073_v24 = vld [vmem:[#allocation135_spill] sm:$0xff] }
 0x30d   : > { %16057 = vst [vmem:[#allocation263_spill] sm:$0xff] %v9149_v15  ;;  %v16068_v40 = vsel %vm16065_vm2, %v16066_v45, %v16067_v17  ;;  %v16074_v41 = vsel %vm16071_vm3, %v16072_v16, %v16073_v24  ;;  %v16078_v15 = vld [vmem:[#allocation442_spill] sm:$0xff]  ;;  %v16082_v9 = vld [vmem:[#allocation443_spill] sm:$0xff]  ;;  %v16085_v45 = vld [vmem:[#allocation137_spill] sm:$0xff] }
 0x30e   : > { %16063 = vst [vmem:[#allocation265_spill] sm:$0xff] %v9156_v60  ;;  %v9163_v56 = vadd.f32 128.0, %v16068_v40  ;;  %v9170_v25 = vadd.f32 128.0, %v16074_v41  ;;  %v16080_v63 = vsel %vm16077_vm4, %v16078_v15, %v16079_v37  ;;  %vm16083_vm5 = vnez %v16082_v9  ;;  %v16084_v60 = vld [vmem:[#allocation444_spill] sm:$0xff]  ;;  %v16088_v29 = vld [vmem:[#allocation445_spill] sm:$0xff]  ;;  %v16091_v16 = vld [vmem:[#allocation138_spill] sm:$0xff] }
 0x30f   : > { %v9177_v13 = vadd.f32 128.0, %v16080_v63  ;;  %v16086_v17 = vsel %vm16083_vm5, %v16084_v60, %v16085_v45  ;;  %vm16089_vm6 = vnez %v16088_v29  ;;  %v16094_v55 = vld [vmem:[#allocation447_spill] sm:$0xff]  ;;  %v16100_v9 = vld [vmem:[#allocation449_spill] sm:$0xff]  ;;  %v16103_v60 = vld [vmem:[#allocation140_spill] sm:$0xff] }
 0x310   : > { %16069 = vst [vmem:[#allocation46_spill] sm:$0xff] %v9163_v56  ;;  %v9184_v40 = vadd.f32 128.0, %v16086_v17  ;;  %v16090_v56 = vld [vmem:[#allocation446_spill] sm:$0xff]  ;;  %vm16095_vm7 = vnez %v16094_v55  ;;  %v16097_v15 = vld [vmem:[#allocation139_spill] sm:$0xff]  ;;  %vm16101_vm8 = vnez %v16100_v9  ;;  %v16401_v20 = vld [vmem:[#allocation9_spill] sm:$0xff] }
 0x311   : > { %16075 = vst [vmem:[#allocation266_spill] sm:$0xff] %v9170_v25  ;;  %v16092_v24 = vsel %vm16089_vm6, %v16090_v56, %v16091_v16  ;;  %v16096_v25 = vld [vmem:[#allocation448_spill] sm:$0xff]  ;;  %v16106_v29 = vld [vmem:[#allocation450_spill] sm:$0xff]  ;;  %v16109_v56 = vld [vmem:[#allocation141_spill] sm:$0xff] }
 0x312   : > { %16081 = vst [vmem:[#allocation267_spill] sm:$0xff] %v9177_v13  ;;  %v9191_v41 = vadd.f32 128.0, %v16092_v24  ;;  %v16098_v37 = vsel %vm16095_vm7, %v16096_v25, %v16097_v15  ;;  %v16102_v13 = vld [vmem:[#allocation451_spill] sm:$0xff]  ;;  %vm16107_vm1 = vnez %v16106_v29  ;;  %v16112_v55 = vld [vmem:[#allocation454_spill] sm:$0xff]  ;;  %v16124_v29 = vld [vmem:[#allocation457_spill] sm:$0xff] }
 0x313   : > { %16087 = vst [vmem:[#allocation47_spill] sm:$0xff] %v9184_v40  ;;  %v9198_v63 = vadd.f32 128.0, %v16098_v37  ;;  %v16104_v45 = vsel %vm16101_vm8, %v16102_v13, %v16103_v60  ;;  %v16108_v40 = vld [vmem:[#allocation452_spill] sm:$0xff]  ;;  %vm16113_vm2 = vnez %v16112_v55  ;;  %v16115_v25 = vld [vmem:[#allocation142_spill] sm:$0xff]  ;;  %v16118_v9 = vld [vmem:[#allocation455_spill] sm:$0xff]  ;;  %vm16125_vm4 = vnez %v16124_v29 }
 0x314   : > { %16093 = vst [vmem:[#allocation268_spill] sm:$0xff] %v9191_v41  ;;  %v9205_v17 = vadd.f32 128.0, %v16104_v45  ;;  %v16110_v16 = vsel %vm16107_vm1, %v16108_v40, %v16109_v56  ;;  %v16114_v41 = vld [vmem:[#allocation453_spill] sm:$0xff]  ;;  %vm16119_vm3 = vnez %v16118_v9  ;;  %v16121_v13 = vld [vmem:[#allocation143_spill] sm:$0xff]  ;;  %v16127_v40 = vld [vmem:[#allocation144_spill] sm:$0xff] }
 0x315   : > { %16099 = vst [vmem:[#allocation269_spill] sm:$0xff] %v9198_v63  ;;  %v9212_v24 = vadd.f32 128.0, %v16110_v16  ;;  %v16116_v15 = vsel %vm16113_vm2, %v16114_v41, %v16115_v25  ;;  %v16120_v63 = vld [vmem:[#allocation456_spill] sm:$0xff]  ;;  %v16130_v55 = vld [vmem:[#allocation458_spill] sm:$0xff]  ;;  %v16133_v41 = vld [vmem:[#allocation145_spill] sm:$0xff] }
 0x316   : > { %16105 = vst [vmem:[#allocation48_spill] sm:$0xff] %v9205_v17  ;;  %v9219_v37 = vadd.f32 128.0, %v16116_v15  ;;  %v16122_v60 = vsel %vm16119_vm3, %v16120_v63, %v16121_v13  ;;  %v16126_v17 = vld [vmem:[#allocation459_spill] sm:$0xff]  ;;  %vm16131_vm5 = vnez %v16130_v55  ;;  %v16136_v9 = vld [vmem:[#allocation460_spill] sm:$0xff]  ;;  %v16139_v63 = vld [vmem:[#allocation146_spill] sm:$0xff] }
 0x317   : > { %16111 = vst [vmem:[#allocation270_spill] sm:$0xff] %v9212_v24  ;;  %v9226_v45 = vadd.f32 128.0, %v16122_v60  ;;  %v16128_v56 = vsel %vm16125_vm4, %v16126_v17, %v16127_v40  ;;  %v16132_v24 = vld [vmem:[#allocation461_spill] sm:$0xff]  ;;  %vm16137_vm6 = vnez %v16136_v9  ;;  %v16142_v29 = vld [vmem:[#allocation463_spill] sm:$0xff]  ;;  %v16148_v55 = vld [vmem:[#allocation464_spill] sm:$0xff] }
 0x318   : > { %16117 = vst [vmem:[#allocation271_spill] sm:$0xff] %v9219_v37  ;;  %v9233_v16 = vadd.f32 128.0, %v16128_v56  ;;  %v16134_v25 = vsel %vm16131_vm5, %v16132_v24, %v16133_v41  ;;  %v16138_v37 = vld [vmem:[#allocation462_spill] sm:$0xff]  ;;  %vm16143_vm7 = vnez %v16142_v29  ;;  %v16145_v17 = vld [vmem:[#allocation147_spill] sm:$0xff]  ;;  %vm16149_vm8 = vnez %v16148_v55  ;;  %v16151_v24 = vld [vmem:[#allocation148_spill] sm:$0xff] }
 0x319   : > { %16123 = vst [vmem:[#allocation49_spill] sm:$0xff] %v9226_v45  ;;  %v9240_v15 = vadd.f32 128.0, %v16134_v25  ;;  %v16140_v13 = vsel %vm16137_vm6, %v16138_v37, %v16139_v63  ;;  %v16144_v45 = vld [vmem:[#allocation465_spill] sm:$0xff]  ;;  %v16154_v9 = vld [vmem:[#allocation467_spill] sm:$0xff]  ;;  %v16166_v55 = vld [vmem:[#allocation470_spill] sm:$0xff] }
 0x31a   : > { %16129 = vst [vmem:[#allocation272_spill] sm:$0xff] %v9233_v16  ;;  %v9247_v60 = vadd.f32 128.0, %v16140_v13  ;;  %v16146_v40 = vsel %vm16143_vm7, %v16144_v45, %v16145_v17  ;;  %v16150_v16 = vld [vmem:[#allocation466_spill] sm:$0xff]  ;;  %vm16155_vm1 = vnez %v16154_v9  ;;  %v16157_v37 = vld [vmem:[#allocation149_spill] sm:$0xff]  ;;  %vm16167_vm3 = vnez %v16166_v55 }
 0x31b   : > { %16135 = vst [vmem:[#allocation274_spill] sm:$0xff] %v9240_v15  ;;  %v9254_v56 = vadd.f32 128.0, %v16146_v40  ;;  %v16152_v41 = vsel %vm16149_vm8, %v16150_v16, %v16151_v24  ;;  %v16156_v15 = vld [vmem:[#allocation468_spill] sm:$0xff]  ;;  %v16160_v29 = vld [vmem:[#allocation469_spill] sm:$0xff]  ;;  %v16163_v45 = vld [vmem:[#allocation150_spill] sm:$0xff] }
 0x31c   : > { %16141 = vst [vmem:[#allocation50_spill] sm:$0xff] %v9247_v60  ;;  %v9261_v25 = vadd.f32 128.0, %v16152_v41  ;;  %v16158_v63 = vsel %vm16155_vm1, %v16156_v15, %v16157_v37  ;;  %vm16161_vm2 = vnez %v16160_v29  ;;  %v16162_v60 = vld [vmem:[#allocation471_spill] sm:$0xff]  ;;  %v16172_v9 = vld [vmem:[#allocation474_spill] sm:$0xff]  ;;  %v16175_v15 = vld [vmem:[#allocation152_spill] sm:$0xff] }
 0x31d   : > { %16147 = vst [vmem:[#allocation273_spill] sm:$0xff] %v9254_v56  ;;  %v9268_v13 = vadd.f32 128.0, %v16158_v63  ;;  %v16164_v17 = vsel %vm16161_vm2, %v16162_v60, %v16163_v45  ;;  %v16168_v56 = vld [vmem:[#allocation472_spill] sm:$0xff]  ;;  %v16169_v16 = vld [vmem:[#allocation151_spill] sm:$0xff]  ;;  %vm16173_vm4 = vnez %v16172_v9  ;;  %v16181_v60 = vld [vmem:[#allocation153_spill] sm:$0xff] }
 0x31e   : > { %16153 = vst [vmem:[#allocation275_spill] sm:$0xff] %v9261_v25  ;;  %v9275_v40 = vadd.f32 128.0, %v16164_v17  ;;  %v16170_v24 = vsel %vm16167_vm3, %v16168_v56, %v16169_v16  ;;  %v16174_v25 = vld [vmem:[#allocation473_spill] sm:$0xff]  ;;  %v16178_v29 = vld [vmem:[#allocation475_spill] sm:$0xff]  ;;  %v16187_v56 = vld [vmem:[#allocation154_spill] sm:$0xff] }
 0x31f   : > { %16159 = vst [vmem:[#allocation51_spill] sm:$0xff] %v9268_v13  ;;  %v9282_v41 = vadd.f32 128.0, %v16170_v24  ;;  %v16176_v37 = vsel %vm16173_vm4, %v16174_v25, %v16175_v15  ;;  %vm16179_vm5 = vnez %v16178_v29  ;;  %v16180_v13 = vld [vmem:[#allocation476_spill] sm:$0xff]  ;;  %v16184_v55 = vld [vmem:[#allocation477_spill] sm:$0xff]  ;;  %v16190_v9 = vld [vmem:[#allocation478_spill] sm:$0xff] }
 0x320   : > { %16165 = vst [vmem:[#allocation277_spill] sm:$0xff] %v9275_v40  ;;  %v9289_v63 = vadd.f32 128.0, %v16176_v37  ;;  %v16182_v45 = vsel %vm16179_vm5, %v16180_v13, %v16181_v60  ;;  %vm16185_vm6 = vnez %v16184_v55  ;;  %v16186_v40 = vld [vmem:[#allocation479_spill] sm:$0xff]  ;;  %vm16191_vm7 = vnez %v16190_v9  ;;  %v16196_v29 = vld [vmem:[#allocation480_spill] sm:$0xff] }
 0x321   : > { %16171 = vst [vmem:[#allocation276_spill] sm:$0xff] %v9282_v41  ;;  %v9296_v17 = vadd.f32 128.0, %v16182_v45  ;;  %v16188_v16 = vsel %vm16185_vm6, %v16186_v40, %v16187_v56  ;;  %v16192_v41 = vld [vmem:[#allocation481_spill] sm:$0xff]  ;;  %v16193_v25 = vld [vmem:[#allocation155_spill] sm:$0xff]  ;;  %vm16197_vm8 = vnez %v16196_v29  ;;  %v16199_v13 = vld [vmem:[#allocation156_spill] sm:$0xff] }
 0x322   : > { %16177 = vst [vmem:[#allocation52_spill] sm:$0xff] %v9289_v63  ;;  %v9303_v24 = vadd.f32 128.0, %v16188_v16  ;;  %v16194_v15 = vsel %vm16191_vm7, %v16192_v41, %v16193_v25  ;;  %v16198_v63 = vld [vmem:[#allocation482_spill] sm:$0xff]  ;;  %v16202_v55 = vld [vmem:[#allocation483_spill] sm:$0xff]  ;;  %v16205_v40 = vld [vmem:[#allocation157_spill] sm:$0xff] }
 0x323   : > { %16183 = vst [vmem:[#allocation278_spill] sm:$0xff] %v9296_v17  ;;  %v9310_v37 = vadd.f32 128.0, %v16194_v15  ;;  %v16200_v60 = vsel %vm16197_vm8, %v16198_v63, %v16199_v13  ;;  %vm16203_vm1 = vnez %v16202_v55  ;;  %v16204_v17 = vld [vmem:[#allocation485_spill] sm:$0xff]  ;;  %v16208_v9 = vld [vmem:[#allocation484_spill] sm:$0xff]  ;;  %v16211_v41 = vld [vmem:[#allocation158_spill] sm:$0xff] }
 0x324   : > { %16189 = vst [vmem:[#allocation279_spill] sm:$0xff] %v9303_v24  ;;  %v9317_v45 = vadd.f32 128.0, %v16200_v60  ;;  %v16206_v56 = vsel %vm16203_vm1, %v16204_v17, %v16205_v40  ;;  %vm16209_vm2 = vnez %v16208_v9  ;;  %v16210_v24 = vld [vmem:[#allocation486_spill] sm:$0xff]  ;;  %v16214_v29 = vld [vmem:[#allocation487_spill] sm:$0xff]  ;;  %v16220_v55 = vld [vmem:[#allocation489_spill] sm:$0xff] }
 0x325   : > { %16195 = vst [vmem:[#allocation53_spill] sm:$0xff] %v9310_v37  ;;  %v9324_v16 = vadd.f32 128.0, %v16206_v56  ;;  %v16212_v25 = vsel %vm16209_vm2, %v16210_v24, %v16211_v41  ;;  %vm16215_vm3 = vnez %v16214_v29  ;;  %v16216_v37 = vld [vmem:[#allocation488_spill] sm:$0xff]  ;;  %v16217_v63 = vld [vmem:[#allocation159_spill] sm:$0xff]  ;;  %vm16221_vm4 = vnez %v16220_v55  ;;  %v16226_v9 = vld [vmem:[#allocation490_spill] sm:$0xff] }
 0x326   : > { %16201 = vst [vmem:[#allocation280_spill] sm:$0xff] %v9317_v45  ;;  %v9331_v15 = vadd.f32 128.0, %v16212_v25  ;;  %v16218_v13 = vsel %vm16215_vm3, %v16216_v37, %v16217_v63  ;;  %v16222_v45 = vld [vmem:[#allocation492_spill] sm:$0xff]  ;;  %vm16227_vm5 = vnez %v16226_v9  ;;  %v16229_v24 = vld [vmem:[#allocation161_spill] sm:$0xff]  ;;  %v16232_v29 = vld [vmem:[#allocation491_spill] sm:$0xff] }
 0x327   : > { %16207 = vst [vmem:[#allocation282_spill] sm:$0xff] %v9324_v16  ;;  %v9338_v60 = vadd.f32 128.0, %v16218_v13  ;;  %v16223_v17 = vld [vmem:[#allocation160_spill] sm:$0xff]  ;;  %v16228_v16 = vld [vmem:[#allocation493_spill] sm:$0xff]  ;;  %vm16233_vm6 = vnez %v16232_v29  ;;  %v16235_v37 = vld [vmem:[#allocation162_spill] sm:$0xff] }
 0x328   : > { %16213 = vst [vmem:[#allocation54_spill] sm:$0xff] %v9331_v15  ;;  %v16224_v40 = vsel %vm16221_vm4, %v16222_v45, %v16223_v17  ;;  %v16230_v41 = vsel %vm16227_vm5, %v16228_v16, %v16229_v24  ;;  %v16234_v15 = vld [vmem:[#allocation496_spill] sm:$0xff]  ;;  %v16238_v55 = vld [vmem:[#allocation494_spill] sm:$0xff]  ;;  %v16241_v45 = vld [vmem:[#allocation163_spill] sm:$0xff] }
 0x329   : > { %16219 = vst [vmem:[#allocation281_spill] sm:$0xff] %v9338_v60  ;;  %v9345_v56 = vadd.f32 128.0, %v16224_v40  ;;  %v9352_v25 = vadd.f32 128.0, %v16230_v41  ;;  %v16236_v63 = vsel %vm16233_vm6, %v16234_v15, %v16235_v37  ;;  %vm16239_vm7 = vnez %v16238_v55  ;;  %v16240_v60 = vld [vmem:[#allocation497_spill] sm:$0xff]  ;;  %v16244_v9 = vld [vmem:[#allocation495_spill] sm:$0xff]  ;;  %v16247_v16 = vld [vmem:[#allocation164_spill] sm:$0xff] }
 0x32a   : > { %v9359_v13 = vadd.f32 128.0, %v16236_v63  ;;  %v16242_v17 = vsel %vm16239_vm7, %v16240_v60, %v16241_v45  ;;  %vm16245_vm8 = vnez %v16244_v9  ;;  %v16250_v29 = vld [vmem:[#allocation498_spill] sm:$0xff]  ;;  %v16253_v15 = vld [vmem:[#allocation165_spill] sm:$0xff]  ;;  %v16256_v55 = vld [vmem:[#allocation500_spill] sm:$0xff] }
 0x32b   : > { %16225 = vst [vmem:[#allocation284_spill] sm:$0xff] %v9345_v56  ;;  %v9366_v40 = vadd.f32 128.0, %v16242_v17  ;;  %v16246_v56 = vld [vmem:[#allocation499_spill] sm:$0xff]  ;;  %vm16251_vm1 = vnez %v16250_v29  ;;  %vm16257_vm2 = vnez %v16256_v55  ;;  %v16259_v60 = vld [vmem:[#allocation166_spill] sm:$0xff]  ;;  %v16268_v29 = vld [vmem:[#allocation504_spill] sm:$0xff] }
 0x32c   : > { %16231 = vst [vmem:[#allocation55_spill] sm:$0xff] %v9352_v25  ;;  %v16248_v24 = vsel %vm16245_vm8, %v16246_v56, %v16247_v16  ;;  %v16252_v25 = vld [vmem:[#allocation501_spill] sm:$0xff]  ;;  %v16262_v9 = vld [vmem:[#allocation503_spill] sm:$0xff]  ;;  %vm16269_vm4 = vnez %v16268_v29  ;;  %v16286_v29 = vld [vmem:[#allocation510_spill] sm:$0xff] }
 0x32d   : > { %16237 = vst [vmem:[#allocation283_spill] sm:$0xff] %v9359_v13  ;;  %v9373_v41 = vadd.f32 128.0, %v16248_v24  ;;  %v16254_v37 = vsel %vm16251_vm1, %v16252_v25, %v16253_v15  ;;  %v16258_v13 = vld [vmem:[#allocation502_spill] sm:$0xff]  ;;  %vm16263_vm3 = vnez %v16262_v9  ;;  %v16265_v56 = vld [vmem:[#allocation167_spill] sm:$0xff]  ;;  %v16271_v25 = vld [vmem:[#allocation168_spill] sm:$0xff]  ;;  %vm16287_vm7 = vnez %v16286_v29 }
 0x32e   : > { %16243 = vst [vmem:[#allocation285_spill] sm:$0xff] %v9366_v40  ;;  %v9380_v63 = vadd.f32 128.0, %v16254_v37  ;;  %v16260_v45 = vsel %vm16257_vm2, %v16258_v13, %v16259_v60  ;;  %v16264_v40 = vld [vmem:[#allocation505_spill] sm:$0xff]  ;;  %v16274_v55 = vld [vmem:[#allocation507_spill] sm:$0xff]  ;;  %v16304_v29 = vld [vmem:[#allocation516_spill] sm:$0xff] }
 0x32f   : > { %16249 = vst [vmem:[#allocation56_spill] sm:$0xff] %v9373_v41  ;;  %v9387_v17 = vadd.f32 128.0, %v16260_v45  ;;  %v16266_v16 = vsel %vm16263_vm3, %v16264_v40, %v16265_v56  ;;  %v16270_v41 = vld [vmem:[#allocation506_spill] sm:$0xff]  ;;  %vm16275_vm5 = vnez %v16274_v55  ;;  %v16277_v13 = vld [vmem:[#allocation169_spill] sm:$0xff]  ;;  %vm16305_vm2 = vnez %v16304_v29  ;;  %v16322_v29 = vld [vmem:[#allocation523_spill] sm:$0xff] }
 0x330   : > { %16255 = vst [vmem:[#allocation286_spill] sm:$0xff] %v9380_v63  ;;  %v9394_v24 = vadd.f32 128.0, %v16266_v16  ;;  %v16272_v15 = vsel %vm16269_vm4, %v16270_v41, %v16271_v25  ;;  %v16276_v63 = vld [vmem:[#allocation508_spill] sm:$0xff]  ;;  %v16280_v9 = vld [vmem:[#allocation509_spill] sm:$0xff]  ;;  %v16283_v40 = vld [vmem:[#allocation170_spill] sm:$0xff] }
 0x331   : > { %16261 = vst [vmem:[#allocation287_spill] sm:$0xff] %v9387_v17  ;;  %v9401_v37 = vadd.f32 128.0, %v16272_v15  ;;  %v16278_v60 = vsel %vm16275_vm5, %v16276_v63, %v16277_v13  ;;  %vm16281_vm6 = vnez %v16280_v9  ;;  %v16282_v17 = vld [vmem:[#allocation511_spill] sm:$0xff]  ;;  %v16292_v55 = vld [vmem:[#allocation513_spill] sm:$0xff]  ;;  %v16295_v63 = vld [vmem:[#allocation172_spill] sm:$0xff]  ;;  %vm16323_vm5 = vnez %v16322_v29 }
 0x332   : > { %16267 = vst [vmem:[#allocation57_spill] sm:$0xff] %v9394_v24  ;;  %v9408_v45 = vadd.f32 128.0, %v16278_v60  ;;  %v16284_v56 = vsel %vm16281_vm6, %v16282_v17, %v16283_v40  ;;  %v16288_v24 = vld [vmem:[#allocation512_spill] sm:$0xff]  ;;  %v16289_v41 = vld [vmem:[#allocation171_spill] sm:$0xff]  ;;  %vm16293_vm8 = vnez %v16292_v55  ;;  %v16301_v17 = vld [vmem:[#allocation173_spill] sm:$0xff] }
 0x333   : > { %16273 = vst [vmem:[#allocation288_spill] sm:$0xff] %v9401_v37  ;;  %v9415_v16 = vadd.f32 128.0, %v16284_v56  ;;  %v16290_v25 = vsel %vm16287_vm7, %v16288_v24, %v16289_v41  ;;  %v16294_v37 = vld [vmem:[#allocation514_spill] sm:$0xff]  ;;  %v16298_v9 = vld [vmem:[#allocation515_spill] sm:$0xff]  ;;  %v16310_v55 = vld [vmem:[#allocation517_spill] sm:$0xff] }
 0x334   : > { %16279 = vst [vmem:[#allocation289_spill] sm:$0xff] %v9408_v45  ;;  %v9422_v15 = vadd.f32 128.0, %v16290_v25  ;;  %v16296_v13 = vsel %vm16293_vm8, %v16294_v37, %v16295_v63  ;;  %vm16299_vm1 = vnez %v16298_v9  ;;  %v16300_v45 = vld [vmem:[#allocation518_spill] sm:$0xff]  ;;  %vm16311_vm3 = vnez %v16310_v55  ;;  %v16313_v37 = vld [vmem:[#allocation175_spill] sm:$0xff]  ;;  %v16316_v9 = vld [vmem:[#allocation521_spill] sm:$0xff] }
 0x335   : > { %16285 = vst [vmem:[#allocation58_spill] sm:$0xff] %v9415_v16  ;;  %v9429_v60 = vadd.f32 128.0, %v16296_v13  ;;  %v16302_v40 = vsel %vm16299_vm1, %v16300_v45, %v16301_v17  ;;  %v16306_v16 = vld [vmem:[#allocation519_spill] sm:$0xff]  ;;  %v16307_v24 = vld [vmem:[#allocation174_spill] sm:$0xff]  ;;  %vm16317_vm4 = vnez %v16316_v9  ;;  %v16319_v45 = vld [vmem:[#allocation176_spill] sm:$0xff] }
 0x336   : > { %16291 = vst [vmem:[#allocation290_spill] sm:$0xff] %v9422_v15  ;;  %v9436_v56 = vadd.f32 128.0, %v16302_v40  ;;  %v16308_v41 = vsel %vm16305_vm2, %v16306_v16, %v16307_v24  ;;  %v16312_v15 = vld [vmem:[#allocation520_spill] sm:$0xff]  ;;  %v16325_v16 = vld [vmem:[#allocation177_spill] sm:$0xff] }
 0x337   : > { %16297 = vst [vmem:[#allocation291_spill] sm:$0xff] %v9429_v60  ;;  %v9443_v25 = vadd.f32 128.0, %v16308_v41  ;;  %v16314_v63 = vsel %vm16311_vm3, %v16312_v15, %v16313_v37  ;;  %v16318_v60 = vld [vmem:[#allocation522_spill] sm:$0xff]  ;;  %v16328_v55 = vld [vmem:[#allocation524_spill] sm:$0xff]  ;;  %v16334_v9 = vld [vmem:[#allocation525_spill] sm:$0xff] }
 0x338   : > { %16303 = vst [vmem:[#allocation59_spill] sm:$0xff] %v9436_v56  ;;  %v9450_v13 = vadd.f32 128.0, %v16314_v63  ;;  %v16320_v17 = vsel %vm16317_vm4, %v16318_v60, %v16319_v45  ;;  %v16324_v56 = vld [vmem:[#allocation526_spill] sm:$0xff]  ;;  %vm16329_vm6 = vnez %v16328_v55  ;;  %vm16335_vm7 = vnez %v16334_v9  ;;  %v16337_v60 = vld [vmem:[#allocation179_spill] sm:$0xff]  ;;  %v16340_v29 = vld [vmem:[#allocation528_spill] sm:$0xff] }
 0x339   : > { %16309 = vst [vmem:[#allocation292_spill] sm:$0xff] %v9443_v25  ;;  %v9457_v40 = vadd.f32 128.0, %v16320_v17  ;;  %v16326_v24 = vsel %vm16323_vm5, %v16324_v56, %v16325_v16  ;;  %v16330_v25 = vld [vmem:[#allocation527_spill] sm:$0xff]  ;;  %v16331_v15 = vld [vmem:[#allocation178_spill] sm:$0xff]  ;;  %vm16341_vm8 = vnez %v16340_v29  ;;  %v16343_v56 = vld [vmem:[#allocation180_spill] sm:$0xff] }
 0x33a   : > { %16315 = vst [vmem:[#allocation294_spill] sm:$0xff] %v9450_v13  ;;  %v9464_v41 = vadd.f32 128.0, %v16326_v24  ;;  %v16332_v37 = vsel %vm16329_vm6, %v16330_v25, %v16331_v15  ;;  %v16336_v13 = vld [vmem:[#allocation529_spill] sm:$0xff]  ;;  %v16346_v55 = vld [vmem:[#allocation530_spill] sm:$0xff]  ;;  %v16352_v9 = vld [vmem:[#allocation532_spill] sm:$0xff] }
 0x33b   : > { %16321 = vst [vmem:[#allocation60_spill] sm:$0xff] %v9457_v40  ;;  %v9471_v63 = vadd.f32 128.0, %v16332_v37  ;;  %v16338_v45 = vsel %vm16335_vm7, %v16336_v13, %v16337_v60  ;;  %v16342_v40 = vld [vmem:[#allocation531_spill] sm:$0xff]  ;;  %vm16347_vm1 = vnez %v16346_v55  ;;  %v16349_v25 = vld [vmem:[#allocation181_spill] sm:$0xff]  ;;  %vm16353_vm2 = vnez %v16352_v9  ;;  %v16355_v13 = vld [vmem:[#allocation182_spill] sm:$0xff] }
 0x33c   : > { %16327 = vst [vmem:[#allocation293_spill] sm:$0xff] %v9464_v41  ;;  %v9478_v17 = vadd.f32 128.0, %v16338_v45  ;;  %v16344_v16 = vsel %vm16341_vm8, %v16342_v40, %v16343_v56  ;;  %v16348_v41 = vld [vmem:[#allocation533_spill] sm:$0xff]  ;;  %v16358_v29 = vld [vmem:[#allocation187_spill] sm:$0xff]  ;;  %v16368_v9 = vld [vmem:[#allocation536_spill] sm:$0xff]  ;;  %vm16381_vm7 = vnez %v15318_v57  ;;  %vm16383_vm8 = vnez %v15321_v3 }
 0x33d   : > { %16333 = vst [vmem:[#allocation295_spill] sm:$0xff] %v9471_v63  ;;  %v9485_v24 = vadd.f32 128.0, %v16344_v16  ;;  %v16350_v15 = vsel %vm16347_vm1, %v16348_v41, %v16349_v25  ;;  %v16354_v63 = vld [vmem:[#allocation534_spill] sm:$0xff]  ;;  %vm16359_vm3 = vnez %v16358_v29  ;;  %v16361_v40 = vld [vmem:[#allocation183_spill] sm:$0xff]  ;;  %v16366_v41 = vld [vmem:[#allocation184_spill] sm:$0xff]  ;;  %vm16369_vm5 = vnez %v16368_v9 }
 0x33e   : > { %16339 = vst [vmem:[#allocation61_spill] sm:$0xff] %v9478_v17  ;;  %v9492_v37 = vadd.f32 128.0, %v16350_v15  ;;  %v16356_v60 = vsel %vm16353_vm2, %v16354_v63, %v16355_v13  ;;  %v16360_v17 = vld [vmem:[#allocation188_spill] sm:$0xff]  ;;  %v16363_v55 = vld [vmem:[#allocation535_spill] sm:$0xff]  ;;  %v16371_v63 = vld [vmem:[#allocation185_spill] sm:$0xff] }
 0x33f   : > { %16345 = vst [vmem:[#allocation297_spill] sm:$0xff] %v9485_v24  ;;  %v9499_v45 = vadd.f32 128.0, %v16356_v60  ;;  %v16362_v56 = vsel %vm16359_vm3, %v16360_v17, %v16361_v40  ;;  %vm16364_vm4 = vnez %v16363_v55  ;;  %v16365_v24 = vld [vmem:[#allocation537_spill] sm:$0xff]  ;;  %v16373_v29 = vld [vmem:[#allocation538_spill] sm:$0xff]  ;;  %v16541_v50 = vld [vmem:[#allocation59_spill] sm:$0xff] }
 0x340   : > { %16351 = vst [vmem:[#allocation296_spill] sm:$0xff] %v9492_v37  ;;  %v9506_v16 = vadd.f32 128.0, %v16362_v56  ;;  %v16367_v25 = vsel %vm16364_vm4, %v16365_v24, %v16366_v41  ;;  %v16370_v37 = vld [vmem:[#allocation189_spill] sm:$0xff]  ;;  %vm16374_vm6 = vnez %v16373_v29  ;;  %v16376_v17 = vld [vmem:[#allocation186_spill] sm:$0xff]  ;;  %v16378_v24 = vsel %vm8139_vm0, %v8152_v52, %v15289_v0 }
 0x341   : > { %16357 = vst [vmem:[#allocation62_spill] sm:$0xff] %v9499_v45  ;;  %v9513_v15 = vadd.f32 128.0, %v16367_v25  ;;  %v16372_v13 = vsel %vm16369_vm5, %v16370_v37, %v16371_v63  ;;  %v16375_v45 = vld [vmem:[#allocation190_spill] sm:$0xff]  ;;  %v9534_v55 = vadd.f32 128.0, %v16378_v24  ;;  %v16380_v37 = vsel %vm8143_vm11, %v8165_v53, %v15299_v10  ;;  %v16392_v63 = vld [vmem:[#allocation192_spill] sm:$0xff]  ;;  %v16393_v29 = vld [vmem:[#allocation193_spill] sm:$0xff] }
 0x342   : > { %v9520_v60 = vadd.f32 128.0, %v16372_v13  ;;  %v16377_v40 = vsel %vm16374_vm6, %v16375_v45, %v16376_v17  ;;  %v9541_v41 = vadd.f32 128.0, %v16380_v37  ;;  %v16382_v45 = vsel %vm16381_vm7, %v8170_v31, %v15305_v18  ;;  %v16395_v37 = vld [vmem:[#allocation195_spill] sm:$0xff]  ;;  %v16543_v1 = vld [vmem:[#allocation294_spill] sm:$0xff]  ;;  %v16544_v59 = vld [vmem:[#allocation60_spill] sm:$0xff] }
 0x343   : > { %v9527_v56 = vadd.f32 128.0, %v16377_v40  ;;  %16379 = vst [vmem:[#allocation298_spill] sm:$0xff] %v9534_v55  ;;  %v9548_v25 = vadd.f32 128.0, %v16382_v45  ;;  %v16384_v52 = vsel %vm16383_vm8, %v8181_v36, %v15307_v30  ;;  %v16385_v10 = vsel %vm8172_vm15, %v8183_v28, %v15309_v27  ;;  %v16394_v40 = vld [vmem:[#allocation194_spill] sm:$0xff]  ;;  %v16545_v19 = vld [vmem:[#allocation293_spill] sm:$0xff] }
 0x344   : > { %v9555_v33 = vadd.f32 128.0, %v16384_v52  ;;  %v9562_v0 = vadd.f32 128.0, %v16385_v10  ;;  %v16386_v31 = vsel %vm8176_vm13, %v8185_v23, %v15310_v58  ;;  %v16387_v30 = vsel %vm8192_vm10, %v8188_v34, %v15311_v47  ;;  %v16396_v52 = vld [vmem:[#allocation196_spill] sm:$0xff]  ;;  %v16460_v34 = vld [vmem:[#allocation237_spill] sm:$0xff]  ;;  %v16546_v23 = vld [vmem:[#allocation295_spill] sm:$0xff] }
 0x345   : > { %v9569_v18 = vadd.f32 128.0, %v16386_v31  ;;  %v9576_v21 = vadd.f32 128.0, %v16387_v30  ;;  %v16388_v27 = vsel %vm8211_vm9, %v8196_v14, %v15312_v49  ;;  %v16389_v58 = vsel %vm8227_vm14, %v8235_v61, %v15319_v12  ;;  %v16397_v31 = vld [vmem:[#allocation197_spill] sm:$0xff]  ;;  %v16540_v14 = vld [vmem:[#allocation291_spill] sm:$0xff]  ;;  %v16582_v30 = vld [vmem:[#allocation200_spill] sm:$0xff] }
 0x346   : > { %v9583_v57 = vadd.f32 128.0, %v16388_v27  ;;  %v9590_v3 = vadd.f32 128.0, %v16389_v58  ;;  %v16390_v47 = vsel %vm8237_vm12, %v8252_v5, %v15322_v44  ;;  %v16398_v27 = vld [vmem:[#allocation198_spill] sm:$0xff]  ;;  %v16470_v44 = vld [vmem:[#allocation244_spill] sm:$0xff]  ;;  %v16547_v12 = vld [vmem:[#allocation61_spill] sm:$0xff]  ;;  %v16551_v58 = vmax.f32 %v16391_v11, 0.0 }
 0x347   : > { %v9597_v53 = vadd.f32 128.0, %v16390_v47  ;;  %v16399_v47 = vld [vmem:[#allocation8_spill] sm:$0xff]  ;;  %v16548_v28 = vld [vmem:[#allocation297_spill] sm:$0xff]  ;;  %v9797_v61 = vmin.f32 %v16552_v8, 255.0  ;;  %v16553_v13 = vmax.f32 %v8266_v7, 0.0  ;;  %v16554_v24 = vmax.f32 %v8273_v6, 0.0 }
 0x348   : > { %v16542_v5 = vld [vmem:[#allocation292_spill] sm:$0xff]  ;;  %v16550_v49 = vld [vmem:[#allocation62_spill] sm:$0xff]  ;;  %v9793_v55 = vmin.f32 %v16551_v58, 255.0  ;;  %v16555_v10 = vmax.f32 %v8280_v2, 0.0  ;;  %v16556_v11 = vmax.f32 %v8287_v54, 0.0  ;;  %v9817_v8 = vmin.f32 %v16557_v4, 255.0 }
 0x349   : > { %v16549_v36 = vld [vmem:[#allocation296_spill] sm:$0xff]  ;;  %v9801_v9 = vmin.f32 %v16553_v13, 255.0  ;;  %v9805_v17 = vmin.f32 %v16554_v24, 255.0  ;;  %v16558_v7 = vmax.f32 %v8301_v39, 0.0  ;;  %v16559_v6 = vmax.f32 %v8308_v22, 0.0 }
 0x34a   : > { %v9809_v45 = vmin.f32 %v16555_v10, 255.0  ;;  %v9813_v58 = vmin.f32 %v16556_v11, 255.0  ;;  %v16560_v2 = vmax.f32 %v8315_v42, 0.0  ;;  %v16561_v54 = vmax.f32 %v8322_v43, 0.0 }
 0x34b   : > { %v9821_v13 = vmin.f32 %v16558_v7, 255.0  ;;  %v9825_v24 = vmin.f32 %v16559_v6, 255.0  ;;  %v9837_v4 = vmin.f32 %v16562_v62, 255.0  ;;  %v16563_v39 = vmax.f32 %v8340_v51, 0.0 }
 0x34c   : > { %v9829_v10 = vmin.f32 %v16560_v2, 255.0  ;;  %v9833_v11 = vmin.f32 %v16561_v54, 255.0  ;;  %v16564_v22 = vmax.f32 %v8347_v35, 0.0  ;;  %v16565_v42 = vmax.f32 %v8358_v32, 0.0 }
 0x34d   : > { %v9841_v7 = vmin.f32 %v16563_v39, 255.0  ;;  %v16566_v43 = vmax.f32 %v8365_v48, 0.0  ;;  %v16567_v46 = vmax.f32 %v16392_v63, 0.0  ;;  %v16568_v51 = vmax.f32 %v16393_v29, 0.0 }
 0x34e   : > { %v9845_v6 = vmin.f32 %v16564_v22, 255.0  ;;  %v9849_v2 = vmin.f32 %v16565_v42, 255.0  ;;  %v16569_v35 = vmax.f32 %v16394_v40, 0.0  ;;  %v16570_v32 = vmax.f32 %v16395_v37, 0.0 }
 0x34f   : > { %v9853_v54 = vmin.f32 %v16566_v43, 255.0  ;;  %v9857_v62 = vmin.f32 %v16567_v46, 255.0  ;;  %v9861_v39 = vmin.f32 %v16568_v51, 255.0  ;;  %v16571_v48 = vmax.f32 %v16396_v52, 0.0 }
 0x350   : > { %v9865_v22 = vmin.f32 %v16569_v35, 255.0  ;;  %v9869_v42 = vmin.f32 %v16570_v32, 255.0  ;;  %v16572_v63 = vmax.f32 %v16397_v31, 0.0  ;;  %v16574_v29 = vmax.f32 %v16398_v27, 0.0 }
 0x351   : > { %v9873_v43 = vmin.f32 %v16571_v48, 255.0  ;;  %v16576_v40 = vmax.f32 %v16399_v47, 0.0  ;;  %v16578_v37 = vmax.f32 %v16400_v38, 0.0  ;;  %v16580_v52 = vmax.f32 %v16401_v20, 0.0 }
 0x352   : > { %v9877_v46 = vmin.f32 %v16572_v63, 255.0  ;;  %v9881_v51 = vmin.f32 %v16574_v29, 255.0  ;;  %v16583_v31 = vmax.f32 %v16582_v30, 0.0 }
 0x353   : > { %v9885_v35 = vmin.f32 %v16576_v40, 255.0  ;;  %v9889_v32 = vmin.f32 %v16578_v37, 255.0  ;;  %v9893_v48 = vmin.f32 %v16580_v52, 255.0 }
 0x354   : > { %16573 = vst [vmem:[#allocation299_spill] sm:$0xff] %v9877_v46  ;;  %v9897_v63 = vmin.f32 %v16583_v31, 255.0  ;;  %v16585_v46 = vld [vmem:[#allocation10_spill] sm:$0xff] }
 0x355   : > { %16575 = vst [vmem:[#allocation63_spill] sm:$0xff] %v9881_v51  ;;  %v16586_v27 = vmax.f32 %v16585_v46, 0.0  ;;  %v16588_v51 = vld [vmem:[#allocation201_spill] sm:$0xff] }
 0x356   : > { %16577 = vst [vmem:[#allocation300_spill] sm:$0xff] %v9885_v35  ;;  %v16589_v47 = vmax.f32 %v16588_v51, 0.0  ;;  %v16591_v35 = vld [vmem:[#allocation203_spill] sm:$0xff] }
 0x357   : > { %16579 = vst [vmem:[#allocation302_spill] sm:$0xff] %v9889_v32  ;;  %v9901_v29 = vmin.f32 %v16586_v27, 255.0  ;;  %v16592_v38 = vmax.f32 %v16591_v35, 0.0  ;;  %v16594_v32 = vld [vmem:[#allocation11_spill] sm:$0xff] }
 0x358   : > { %16581 = vst [vmem:[#allocation64_spill] sm:$0xff] %v9893_v48  ;;  %v9905_v40 = vmin.f32 %v16589_v47, 255.0  ;;  %v16595_v20 = vmax.f32 %v16594_v32, 0.0  ;;  %v16597_v48 = vld [vmem:[#allocation202_spill] sm:$0xff] }
 0x359   : > { %16584 = vst [vmem:[#allocation301_spill] sm:$0xff] %v9897_v63  ;;  %v9909_v37 = vmin.f32 %v16592_v38, 255.0  ;;  %v16598_v30 = vmax.f32 %v16597_v48, 0.0  ;;  %v16600_v63 = vld [vmem:[#allocation205_spill] sm:$0xff] }
 0x35a   : > { %16587 = vst [vmem:[#allocation304_spill] sm:$0xff] %v9901_v29  ;;  %v9913_v52 = vmin.f32 %v16595_v20, 255.0  ;;  %v16601_v46 = vmax.f32 %v16600_v63, 0.0  ;;  %v16603_v29 = vld [vmem:[#allocation12_spill] sm:$0xff] }
 0x35b   : > { %16590 = vst [vmem:[#allocation65_spill] sm:$0xff] %v9905_v40  ;;  %v9917_v31 = vmin.f32 %v16598_v30, 255.0  ;;  %v16604_v51 = vmax.f32 %v16603_v29, 0.0  ;;  %v16606_v40 = vld [vmem:[#allocation13_spill] sm:$0xff] }
 0x35c   : > { %16593 = vst [vmem:[#allocation303_spill] sm:$0xff] %v9909_v37  ;;  %v9921_v27 = vmin.f32 %v16601_v46, 255.0  ;;  %v16607_v35 = vmax.f32 %v16606_v40, 0.0  ;;  %v16609_v37 = vld [vmem:[#allocation204_spill] sm:$0xff] }
 0x35d   : > { %16596 = vst [vmem:[#allocation305_spill] sm:$0xff] %v9913_v52  ;;  %v9925_v47 = vmin.f32 %v16604_v51, 255.0  ;;  %v16610_v32 = vmax.f32 %v16609_v37, 0.0  ;;  %v16612_v52 = vld [vmem:[#allocation206_spill] sm:$0xff] }
 0x35e   : > { %16599 = vst [vmem:[#allocation66_spill] sm:$0xff] %v9917_v31  ;;  %v9929_v38 = vmin.f32 %v16607_v35, 255.0  ;;  %v16613_v48 = vmax.f32 %v16612_v52, 0.0  ;;  %v16615_v31 = vld [vmem:[#allocation14_spill] sm:$0xff] }
 0x35f   : > { %16602 = vst [vmem:[#allocation306_spill] sm:$0xff] %v9921_v27  ;;  %v9933_v20 = vmin.f32 %v16610_v32, 255.0  ;;  %v16616_v63 = vmax.f32 %v16615_v31, 0.0  ;;  %v16618_v27 = vld [vmem:[#allocation207_spill] sm:$0xff] }
 0x360   : > { %16605 = vst [vmem:[#allocation307_spill] sm:$0xff] %v9925_v47  ;;  %v9937_v30 = vmin.f32 %v16613_v48, 255.0  ;;  %v16619_v29 = vmax.f32 %v16618_v27, 0.0  ;;  %v16621_v47 = vld [vmem:[#allocation208_spill] sm:$0xff] }
 0x361   : > { %16608 = vst [vmem:[#allocation67_spill] sm:$0xff] %v9929_v38  ;;  %v9941_v46 = vmin.f32 %v16616_v63, 255.0  ;;  %v16622_v40 = vmax.f32 %v16621_v47, 0.0  ;;  %v16624_v38 = vld [vmem:[#allocation15_spill] sm:$0xff] }
 0x362   : > { %16611 = vst [vmem:[#allocation308_spill] sm:$0xff] %v9933_v20  ;;  %v9945_v51 = vmin.f32 %v16619_v29, 255.0  ;;  %v16625_v37 = vmax.f32 %v16624_v38, 0.0  ;;  %v16627_v20 = vld [vmem:[#allocation209_spill] sm:$0xff] }
 0x363   : > { %16614 = vst [vmem:[#allocation309_spill] sm:$0xff] %v9937_v30  ;;  %v9949_v35 = vmin.f32 %v16622_v40, 255.0  ;;  %v16628_v52 = vmax.f32 %v16627_v20, 0.0  ;;  %v16630_v30 = vld [vmem:[#allocation16_spill] sm:$0xff] }
 0x364   : > { %16617 = vst [vmem:[#allocation68_spill] sm:$0xff] %v9941_v46  ;;  %v9953_v32 = vmin.f32 %v16625_v37, 255.0  ;;  %v16631_v31 = vmax.f32 %v16630_v30, 0.0  ;;  %v16633_v46 = vld [vmem:[#allocation210_spill] sm:$0xff] }
 0x365   : > { %16620 = vst [vmem:[#allocation310_spill] sm:$0xff] %v9945_v51  ;;  %v9957_v48 = vmin.f32 %v16628_v52, 255.0  ;;  %v16634_v27 = vmax.f32 %v16633_v46, 0.0  ;;  %v16636_v51 = vld [vmem:[#allocation211_spill] sm:$0xff] }
 0x366   : > { %16623 = vst [vmem:[#allocation311_spill] sm:$0xff] %v9949_v35  ;;  %v9961_v63 = vmin.f32 %v16631_v31, 255.0  ;;  %v16637_v47 = vmax.f32 %v16636_v51, 0.0  ;;  %v16639_v35 = vld [vmem:[#allocation17_spill] sm:$0xff] }
 0x367   : > { %16626 = vst [vmem:[#allocation69_spill] sm:$0xff] %v9953_v32  ;;  %v9965_v29 = vmin.f32 %v16634_v27, 255.0  ;;  %v16640_v38 = vmax.f32 %v16639_v35, 0.0  ;;  %v16642_v32 = vld [vmem:[#allocation212_spill] sm:$0xff] }
 0x368   : > { %16629 = vst [vmem:[#allocation312_spill] sm:$0xff] %v9957_v48  ;;  %v9969_v40 = vmin.f32 %v16637_v47, 255.0  ;;  %v16643_v20 = vmax.f32 %v16642_v32, 0.0  ;;  %v16645_v48 = vld [vmem:[#allocation213_spill] sm:$0xff] }
 0x369   : > { %16632 = vst [vmem:[#allocation314_spill] sm:$0xff] %v9961_v63  ;;  %v9973_v37 = vmin.f32 %v16640_v38, 255.0  ;;  %v16646_v30 = vmax.f32 %v16645_v48, 0.0  ;;  %v16648_v63 = vld [vmem:[#allocation18_spill] sm:$0xff] }
 0x36a   : > { %16635 = vst [vmem:[#allocation70_spill] sm:$0xff] %v9965_v29  ;;  %v9977_v52 = vmin.f32 %v16643_v20, 255.0  ;;  %v16649_v46 = vmax.f32 %v16648_v63, 0.0  ;;  %v16651_v29 = vld [vmem:[#allocation214_spill] sm:$0xff] }
 0x36b   : > { %16638 = vst [vmem:[#allocation313_spill] sm:$0xff] %v9969_v40  ;;  %v9981_v31 = vmin.f32 %v16646_v30, 255.0  ;;  %v16652_v51 = vmax.f32 %v16651_v29, 0.0  ;;  %v16654_v40 = vld [vmem:[#allocation215_spill] sm:$0xff] }
 0x36c   : > { %16641 = vst [vmem:[#allocation315_spill] sm:$0xff] %v9973_v37  ;;  %v9985_v27 = vmin.f32 %v16649_v46, 255.0  ;;  %v16655_v35 = vmax.f32 %v16654_v40, 0.0  ;;  %v16657_v37 = vld [vmem:[#allocation19_spill] sm:$0xff] }
 0x36d   : > { %16644 = vst [vmem:[#allocation71_spill] sm:$0xff] %v9977_v52  ;;  %v9989_v47 = vmin.f32 %v16652_v51, 255.0  ;;  %v16658_v32 = vmax.f32 %v16657_v37, 0.0  ;;  %v16660_v52 = vld [vmem:[#allocation20_spill] sm:$0xff] }
 0x36e   : > { %16647 = vst [vmem:[#allocation317_spill] sm:$0xff] %v9981_v31  ;;  %v9993_v38 = vmin.f32 %v16655_v35, 255.0  ;;  %v16661_v48 = vmax.f32 %v16660_v52, 0.0  ;;  %v16663_v31 = vld [vmem:[#allocation216_spill] sm:$0xff] }
 0x36f   : > { %16650 = vst [vmem:[#allocation316_spill] sm:$0xff] %v9985_v27  ;;  %v9997_v20 = vmin.f32 %v16658_v32, 255.0  ;;  %v16664_v63 = vmax.f32 %v16663_v31, 0.0  ;;  %v16666_v27 = vld [vmem:[#allocation21_spill] sm:$0xff] }
 0x370   : > { %16653 = vst [vmem:[#allocation72_spill] sm:$0xff] %v9989_v47  ;;  %v10001_v30 = vmin.f32 %v16661_v48, 255.0  ;;  %v16667_v29 = vmax.f32 %v16666_v27, 0.0  ;;  %v16669_v47 = vld [vmem:[#allocation218_spill] sm:$0xff] }
 0x371   : > { %16656 = vst [vmem:[#allocation318_spill] sm:$0xff] %v9993_v38  ;;  %v10005_v46 = vmin.f32 %v16664_v63, 255.0  ;;  %v16670_v40 = vmax.f32 %v16669_v47, 0.0  ;;  %v16672_v38 = vld [vmem:[#allocation217_spill] sm:$0xff] }
 0x372   : > { %16659 = vst [vmem:[#allocation319_spill] sm:$0xff] %v9997_v20  ;;  %v10009_v51 = vmin.f32 %v16667_v29, 255.0  ;;  %v16673_v37 = vmax.f32 %v16672_v38, 0.0  ;;  %v16675_v20 = vld [vmem:[#allocation22_spill] sm:$0xff] }
 0x373   : > { %16662 = vst [vmem:[#allocation73_spill] sm:$0xff] %v10001_v30  ;;  %v10013_v35 = vmin.f32 %v16670_v40, 255.0  ;;  %v16676_v52 = vmax.f32 %v16675_v20, 0.0  ;;  %v16678_v30 = vld [vmem:[#allocation219_spill] sm:$0xff] }
 0x374   : > { %16665 = vst [vmem:[#allocation320_spill] sm:$0xff] %v10005_v46  ;;  %v10017_v32 = vmin.f32 %v16673_v37, 255.0  ;;  %v16679_v31 = vmax.f32 %v16678_v30, 0.0  ;;  %v16681_v46 = vld [vmem:[#allocation220_spill] sm:$0xff] }
 0x375   : > { %16668 = vst [vmem:[#allocation322_spill] sm:$0xff] %v10009_v51  ;;  %v10021_v48 = vmin.f32 %v16676_v52, 255.0  ;;  %v16682_v27 = vmax.f32 %v16681_v46, 0.0  ;;  %v16684_v51 = vld [vmem:[#allocation23_spill] sm:$0xff] }
 0x376   : > { %16671 = vst [vmem:[#allocation74_spill] sm:$0xff] %v10013_v35  ;;  %v10025_v63 = vmin.f32 %v16679_v31, 255.0  ;;  %v16685_v47 = vmax.f32 %v16684_v51, 0.0  ;;  %v16687_v35 = vld [vmem:[#allocation221_spill] sm:$0xff] }
 0x377   : > { %16674 = vst [vmem:[#allocation321_spill] sm:$0xff] %v10017_v32  ;;  %v10029_v29 = vmin.f32 %v16682_v27, 255.0  ;;  %v16688_v38 = vmax.f32 %v16687_v35, 0.0  ;;  %v16690_v32 = vld [vmem:[#allocation24_spill] sm:$0xff] }
 0x378   : > { %16677 = vst [vmem:[#allocation324_spill] sm:$0xff] %v10021_v48  ;;  %v10033_v40 = vmin.f32 %v16685_v47, 255.0  ;;  %v16691_v20 = vmax.f32 %v16690_v32, 0.0  ;;  %v16693_v48 = vld [vmem:[#allocation222_spill] sm:$0xff] }
 0x379   : > { %16680 = vst [vmem:[#allocation75_spill] sm:$0xff] %v10025_v63  ;;  %v10037_v37 = vmin.f32 %v16688_v38, 255.0  ;;  %v16694_v30 = vmax.f32 %v16693_v48, 0.0  ;;  %v16696_v63 = vld [vmem:[#allocation224_spill] sm:$0xff] }
 0x37a   : > { %16683 = vst [vmem:[#allocation323_spill] sm:$0xff] %v10029_v29  ;;  %v10041_v52 = vmin.f32 %v16691_v20, 255.0  ;;  %v16697_v46 = vmax.f32 %v16696_v63, 0.0  ;;  %v16699_v29 = vld [vmem:[#allocation25_spill] sm:$0xff] }
 0x37b   : > { %16686 = vst [vmem:[#allocation325_spill] sm:$0xff] %v10033_v40  ;;  %v10045_v31 = vmin.f32 %v16694_v30, 255.0  ;;  %v16700_v51 = vmax.f32 %v16699_v29, 0.0  ;;  %v16702_v40 = vld [vmem:[#allocation223_spill] sm:$0xff] }
 0x37c   : > { %16689 = vst [vmem:[#allocation76_spill] sm:$0xff] %v10037_v37  ;;  %v10049_v27 = vmin.f32 %v16697_v46, 255.0  ;;  %v16703_v35 = vmax.f32 %v16702_v40, 0.0  ;;  %v16705_v37 = vld [vmem:[#allocation225_spill] sm:$0xff] }
 0x37d   : > { %16692 = vst [vmem:[#allocation326_spill] sm:$0xff] %v10041_v52  ;;  %v10053_v47 = vmin.f32 %v16700_v51, 255.0  ;;  %v16706_v32 = vmax.f32 %v16705_v37, 0.0  ;;  %v16708_v52 = vld [vmem:[#allocation26_spill] sm:$0xff] }
 0x37e   : > { %16695 = vst [vmem:[#allocation327_spill] sm:$0xff] %v10045_v31  ;;  %v10057_v38 = vmin.f32 %v16703_v35, 255.0  ;;  %v16709_v48 = vmax.f32 %v16708_v52, 0.0  ;;  %v16711_v31 = vld [vmem:[#allocation226_spill] sm:$0xff] }
 0x37f   : > { %16698 = vst [vmem:[#allocation77_spill] sm:$0xff] %v10049_v27  ;;  %v10061_v20 = vmin.f32 %v16706_v32, 255.0  ;;  %v16712_v63 = vmax.f32 %v16711_v31, 0.0  ;;  %v16714_v27 = vld [vmem:[#allocation227_spill] sm:$0xff] }
 0x380   : > { %16701 = vst [vmem:[#allocation328_spill] sm:$0xff] %v10053_v47  ;;  %v10065_v30 = vmin.f32 %v16709_v48, 255.0  ;;  %v16715_v29 = vmax.f32 %v16714_v27, 0.0  ;;  %v16717_v47 = vld [vmem:[#allocation27_spill] sm:$0xff] }
 0x381   : > { %16704 = vst [vmem:[#allocation329_spill] sm:$0xff] %v10057_v38  ;;  %v10069_v46 = vmin.f32 %v16712_v63, 255.0  ;;  %v16718_v40 = vmax.f32 %v16717_v47, 0.0  ;;  %v16720_v38 = vld [vmem:[#allocation228_spill] sm:$0xff] }
 0x382   : > { %16707 = vst [vmem:[#allocation78_spill] sm:$0xff] %v10061_v20  ;;  %v10073_v51 = vmin.f32 %v16715_v29, 255.0  ;;  %v16721_v37 = vmax.f32 %v16720_v38, 0.0  ;;  %v16723_v20 = vld [vmem:[#allocation229_spill] sm:$0xff] }
 0x383   : > { %16710 = vst [vmem:[#allocation330_spill] sm:$0xff] %v10065_v30  ;;  %v10077_v35 = vmin.f32 %v16718_v40, 255.0  ;;  %v16724_v52 = vmax.f32 %v16723_v20, 0.0  ;;  %v16726_v30 = vld [vmem:[#allocation28_spill] sm:$0xff] }
 0x384   : > { %16713 = vst [vmem:[#allocation331_spill] sm:$0xff] %v10069_v46  ;;  %v10081_v32 = vmin.f32 %v16721_v37, 255.0  ;;  %v16727_v31 = vmax.f32 %v16726_v30, 0.0  ;;  %v16729_v46 = vld [vmem:[#allocation230_spill] sm:$0xff] }
 0x385   : > { %16716 = vst [vmem:[#allocation79_spill] sm:$0xff] %v10073_v51  ;;  %v10085_v48 = vmin.f32 %v16724_v52, 255.0  ;;  %v16730_v27 = vmax.f32 %v16729_v46, 0.0  ;;  %v16732_v51 = vld [vmem:[#allocation231_spill] sm:$0xff] }
 0x386   : > { %16719 = vst [vmem:[#allocation332_spill] sm:$0xff] %v10077_v35  ;;  %v10089_v63 = vmin.f32 %v16727_v31, 255.0  ;;  %v16733_v47 = vmax.f32 %v16732_v51, 0.0  ;;  %v16735_v35 = vld [vmem:[#allocation29_spill] sm:$0xff] }
 0x387   : > { %16722 = vst [vmem:[#allocation334_spill] sm:$0xff] %v10081_v32  ;;  %v10093_v29 = vmin.f32 %v16730_v27, 255.0  ;;  %v16736_v38 = vmax.f32 %v16735_v35, 0.0  ;;  %v16738_v32 = vld [vmem:[#allocation232_spill] sm:$0xff] }
 0x388   : > { %16725 = vst [vmem:[#allocation80_spill] sm:$0xff] %v10085_v48  ;;  %v10097_v40 = vmin.f32 %v16733_v47, 255.0  ;;  %v16739_v20 = vmax.f32 %v16738_v32, 0.0  ;;  %v16740_v48 = vld [vmem:[#allocation234_spill] sm:$0xff] }
 0x389   : > { %16728 = vst [vmem:[#allocation333_spill] sm:$0xff] %v10089_v63  ;;  %v10101_v37 = vmin.f32 %v16736_v38, 255.0  ;;  %v16741_v30 = vmax.f32 %v16740_v48, 0.0  ;;  %v16743_v63 = vld [vmem:[#allocation30_spill] sm:$0xff]  ;;  %v16755_v48 = vmax.f32 %v16460_v34, 0.0 }
 0x38a   : > { %16731 = vst [vmem:[#allocation335_spill] sm:$0xff] %v10093_v29  ;;  %v10105_v52 = vmin.f32 %v16739_v20, 255.0  ;;  %v16744_v46 = vmax.f32 %v16743_v63, 0.0  ;;  %v16746_v29 = vld [vmem:[#allocation233_spill] sm:$0xff] }
 0x38b   : > { %16734 = vst [vmem:[#allocation81_spill] sm:$0xff] %v10097_v40  ;;  %v10109_v31 = vmin.f32 %v16741_v30, 255.0  ;;  %v16747_v51 = vmax.f32 %v16746_v29, 0.0  ;;  %v16749_v40 = vld [vmem:[#allocation235_spill] sm:$0xff]  ;;  %v10129_v30 = vmin.f32 %v16755_v48, 255.0 }
 0x38c   : > { %16737 = vst [vmem:[#allocation337_spill] sm:$0xff] %v10101_v37  ;;  %v10113_v27 = vmin.f32 %v16744_v46, 255.0  ;;  %v16750_v35 = vmax.f32 %v16749_v40, 0.0  ;;  %v16752_v37 = vld [vmem:[#allocation31_spill] sm:$0xff] }
 0x38d   : > { %16742 = vst [vmem:[#allocation336_spill] sm:$0xff] %v10109_v31  ;;  %v10117_v47 = vmin.f32 %v16747_v51, 255.0  ;;  %v16753_v32 = vmax.f32 %v16752_v37, 0.0  ;;  %v16757_v31 = vld [vmem:[#allocation236_spill] sm:$0xff] }
 0x38e   : > { %16745 = vst [vmem:[#allocation82_spill] sm:$0xff] %v10113_v27  ;;  %v10121_v38 = vmin.f32 %v16750_v35, 255.0  ;;  %v16758_v63 = vmax.f32 %v16757_v31, 0.0  ;;  %v16760_v27 = vld [vmem:[#allocation32_spill] sm:$0xff] }
 0x38f   : > { %16748 = vst [vmem:[#allocation338_spill] sm:$0xff] %v10117_v47  ;;  %v10125_v20 = vmin.f32 %v16753_v32, 255.0  ;;  %v16761_v29 = vmax.f32 %v16760_v27, 0.0  ;;  %v16763_v47 = vld [vmem:[#allocation238_spill] sm:$0xff] }
 0x390   : > { %16751 = vst [vmem:[#allocation339_spill] sm:$0xff] %v10121_v38  ;;  %v10133_v46 = vmin.f32 %v16758_v63, 255.0  ;;  %v16764_v40 = vmax.f32 %v16763_v47, 0.0  ;;  %v16766_v38 = vld [vmem:[#allocation239_spill] sm:$0xff] }
 0x391   : > { %16754 = vst [vmem:[#allocation83_spill] sm:$0xff] %v10125_v20  ;;  %v10137_v51 = vmin.f32 %v16761_v29, 255.0  ;;  %v16767_v37 = vmax.f32 %v16766_v38, 0.0  ;;  %v16768_v20 = vld [vmem:[#allocation33_spill] sm:$0xff] }
 0x392   : > { %16756 = vst [vmem:[#allocation340_spill] sm:$0xff] %v10129_v30  ;;  %v10141_v35 = vmin.f32 %v16764_v40, 255.0  ;;  %v16769_v34 = vmax.f32 %v16768_v20, 0.0  ;;  %v16770_v30 = vld [vmem:[#allocation240_spill] sm:$0xff]  ;;  %v16782_v20 = vmax.f32 %v16470_v44, 0.0 }
 0x393   : > { %16759 = vst [vmem:[#allocation342_spill] sm:$0xff] %v10133_v46  ;;  %v10145_v32 = vmin.f32 %v16767_v37, 255.0  ;;  %v16771_v31 = vmax.f32 %v16770_v30, 0.0  ;;  %v16773_v46 = vld [vmem:[#allocation242_spill] sm:$0xff]  ;;  %v16784_v30 = vmax.f32 %v8925_v26, 0.0 }
 0x394   : > { %16762 = vst [vmem:[#allocation84_spill] sm:$0xff] %v10137_v51  ;;  %v10149_v48 = vmin.f32 %v16769_v34, 255.0  ;;  %v16774_v27 = vmax.f32 %v16773_v46, 0.0  ;;  %v16776_v51 = vld [vmem:[#allocation34_spill] sm:$0xff]  ;;  %v10169_v34 = vmin.f32 %v16782_v20, 255.0 }
 0x395   : > { %16765 = vst [vmem:[#allocation341_spill] sm:$0xff] %v10141_v35  ;;  %v10153_v63 = vmin.f32 %v16771_v31, 255.0  ;;  %v16777_v47 = vmax.f32 %v16776_v51, 0.0  ;;  %v16779_v35 = vld [vmem:[#allocation241_spill] sm:$0xff]  ;;  %v10173_v31 = vmin.f32 %v16784_v30, 255.0 }
 0x396   : > { %v10157_v29 = vmin.f32 %v16774_v27, 255.0  ;;  %v16780_v38 = vmax.f32 %v16779_v35, 0.0  ;;  %16783 = vst [vmem:[#allocation86_spill] sm:$0xff] %v10169_v34  ;;  %v16798_v34 = vld [vmem:[#allocation246_spill] sm:$0xff] }
 0x397   : > { %16772 = vst [vmem:[#allocation344_spill] sm:$0xff] %v10153_v63  ;;  %v10161_v40 = vmin.f32 %v16777_v47, 255.0  ;;  %v16786_v63 = vld [vmem:[#allocation35_spill] sm:$0xff]  ;;  %v16799_v26 = vmax.f32 %v16798_v34, 0.0 }
 0x398   : > { %16775 = vst [vmem:[#allocation85_spill] sm:$0xff] %v10157_v29  ;;  %v10165_v37 = vmin.f32 %v16780_v38, 255.0  ;;  %v16787_v46 = vmax.f32 %v16786_v63, 0.0  ;;  %v16789_v29 = vld [vmem:[#allocation243_spill] sm:$0xff] }
 0x399   : > { %16778 = vst [vmem:[#allocation343_spill] sm:$0xff] %v10161_v40  ;;  %v16790_v51 = vmax.f32 %v16789_v29, 0.0  ;;  %v16792_v40 = vld [vmem:[#allocation245_spill] sm:$0xff]  ;;  %v10193_v30 = vmin.f32 %v16799_v26, 255.0 }
 0x39a   : > { %16781 = vst [vmem:[#allocation345_spill] sm:$0xff] %v10165_v37  ;;  %v10177_v27 = vmin.f32 %v16787_v46, 255.0  ;;  %v16793_v35 = vmax.f32 %v16792_v40, 0.0  ;;  %v16795_v37 = vld [vmem:[#allocation36_spill] sm:$0xff] }
 0x39b   : > { %16785 = vst [vmem:[#allocation346_spill] sm:$0xff] %v10173_v31  ;;  %v10181_v47 = vmin.f32 %v16790_v51, 255.0  ;;  %v16796_v44 = vmax.f32 %v16795_v37, 0.0  ;;  %v16801_v31 = vld [vmem:[#allocation247_spill] sm:$0xff] }
 0x39c   : > { %16788 = vst [vmem:[#allocation347_spill] sm:$0xff] %v10177_v27  ;;  %v10185_v38 = vmin.f32 %v16793_v35, 255.0  ;;  %v16802_v63 = vmax.f32 %v16801_v31, 0.0  ;;  %v16804_v27 = vld [vmem:[#allocation37_spill] sm:$0xff] }
 0x39d   : > { %16791 = vst [vmem:[#allocation87_spill] sm:$0xff] %v10181_v47  ;;  %v10189_v20 = vmin.f32 %v16796_v44, 255.0  ;;  %v16805_v29 = vmax.f32 %v16804_v27, 0.0  ;;  %v16807_v47 = vld [vmem:[#allocation248_spill] sm:$0xff] }
 0x39e   : > { %16794 = vst [vmem:[#allocation348_spill] sm:$0xff] %v10185_v38  ;;  %v10197_v46 = vmin.f32 %v16802_v63, 255.0  ;;  %v16808_v40 = vmax.f32 %v16807_v47, 0.0  ;;  %v16810_v38 = vld [vmem:[#allocation249_spill] sm:$0xff] }
 0x39f   : > { %16797 = vst [vmem:[#allocation349_spill] sm:$0xff] %v10189_v20  ;;  %v10201_v51 = vmin.f32 %v16805_v29, 255.0  ;;  %v16811_v37 = vmax.f32 %v16810_v38, 0.0  ;;  %v16813_v20 = vld [vmem:[#allocation38_spill] sm:$0xff] }
 0x3a0   : > { %16800 = vst [vmem:[#allocation88_spill] sm:$0xff] %v10193_v30  ;;  %v10205_v35 = vmin.f32 %v16808_v40, 255.0  ;;  %v16814_v34 = vmax.f32 %v16813_v20, 0.0  ;;  %v16816_v30 = vld [vmem:[#allocation250_spill] sm:$0xff] }
 0x3a1   : > { %16803 = vst [vmem:[#allocation350_spill] sm:$0xff] %v10197_v46  ;;  %v10209_v44 = vmin.f32 %v16811_v37, 255.0  ;;  %v16817_v31 = vmax.f32 %v16816_v30, 0.0  ;;  %v16819_v46 = vld [vmem:[#allocation251_spill] sm:$0xff] }
 0x3a2   : > { %16806 = vst [vmem:[#allocation351_spill] sm:$0xff] %v10201_v51  ;;  %v10213_v26 = vmin.f32 %v16814_v34, 255.0  ;;  %v16820_v27 = vmax.f32 %v16819_v46, 0.0  ;;  %v16822_v51 = vld [vmem:[#allocation39_spill] sm:$0xff] }
 0x3a3   : > { %16809 = vst [vmem:[#allocation89_spill] sm:$0xff] %v10205_v35  ;;  %v10217_v63 = vmin.f32 %v16817_v31, 255.0  ;;  %v16823_v47 = vmax.f32 %v16822_v51, 0.0  ;;  %v16825_v35 = vld [vmem:[#allocation252_spill] sm:$0xff] }
 0x3a4   : > { %16812 = vst [vmem:[#allocation352_spill] sm:$0xff] %v10209_v44  ;;  %v10221_v29 = vmin.f32 %v16820_v27, 255.0  ;;  %v16826_v38 = vmax.f32 %v16825_v35, 0.0  ;;  %v16828_v44 = vld [vmem:[#allocation254_spill] sm:$0xff] }
 0x3a5   : > { %16815 = vst [vmem:[#allocation354_spill] sm:$0xff] %v10213_v26  ;;  %v10225_v40 = vmin.f32 %v16823_v47, 255.0  ;;  %v16829_v20 = vmax.f32 %v16828_v44, 0.0  ;;  %v16831_v26 = vld [vmem:[#allocation40_spill] sm:$0xff] }
 0x3a6   : > { %16818 = vst [vmem:[#allocation90_spill] sm:$0xff] %v10217_v63  ;;  %v10229_v37 = vmin.f32 %v16826_v38, 255.0  ;;  %v16832_v30 = vmax.f32 %v16831_v26, 0.0  ;;  %v16834_v63 = vld [vmem:[#allocation253_spill] sm:$0xff] }
 0x3a7   : > { %16821 = vst [vmem:[#allocation353_spill] sm:$0xff] %v10221_v29  ;;  %v10233_v34 = vmin.f32 %v16829_v20, 255.0  ;;  %v16835_v46 = vmax.f32 %v16834_v63, 0.0  ;;  %v16837_v29 = vld [vmem:[#allocation255_spill] sm:$0xff] }
 0x3a8   : > { %16824 = vst [vmem:[#allocation355_spill] sm:$0xff] %v10225_v40  ;;  %v10237_v31 = vmin.f32 %v16832_v30, 255.0  ;;  %v16838_v51 = vmax.f32 %v16837_v29, 0.0  ;;  %v16840_v40 = vld [vmem:[#allocation41_spill] sm:$0xff] }
 0x3a9   : > { %16827 = vst [vmem:[#allocation91_spill] sm:$0xff] %v10229_v37  ;;  %v10241_v27 = vmin.f32 %v16835_v46, 255.0  ;;  %v16841_v35 = vmax.f32 %v16840_v40, 0.0  ;;  %v16843_v37 = vld [vmem:[#allocation257_spill] sm:$0xff] }
 0x3aa   : > { %16830 = vst [vmem:[#allocation357_spill] sm:$0xff] %v10233_v34  ;;  %v10245_v47 = vmin.f32 %v16838_v51, 255.0  ;;  %v16844_v44 = vmax.f32 %v16843_v37, 0.0  ;;  %v16846_v34 = vld [vmem:[#allocation256_spill] sm:$0xff] }
 0x3ab   : > { %16833 = vst [vmem:[#allocation356_spill] sm:$0xff] %v10237_v31  ;;  %v10249_v38 = vmin.f32 %v16841_v35, 255.0  ;;  %v16847_v26 = vmax.f32 %v16846_v34, 0.0  ;;  %v16849_v31 = vld [vmem:[#allocation42_spill] sm:$0xff] }
 0x3ac   : > { %16836 = vst [vmem:[#allocation92_spill] sm:$0xff] %v10241_v27  ;;  %v10253_v20 = vmin.f32 %v16844_v44, 255.0  ;;  %v16850_v63 = vmax.f32 %v16849_v31, 0.0  ;;  %v16852_v27 = vld [vmem:[#allocation258_spill] sm:$0xff] }
 0x3ad   : > { %16839 = vst [vmem:[#allocation358_spill] sm:$0xff] %v10245_v47  ;;  %v10257_v30 = vmin.f32 %v16847_v26, 255.0  ;;  %v16853_v29 = vmax.f32 %v16852_v27, 0.0  ;;  %v16855_v47 = vld [vmem:[#allocation259_spill] sm:$0xff] }
 0x3ae   : > { %16842 = vst [vmem:[#allocation359_spill] sm:$0xff] %v10249_v38  ;;  %v10261_v46 = vmin.f32 %v16850_v63, 255.0  ;;  %v16856_v40 = vmax.f32 %v16855_v47, 0.0  ;;  %v16858_v38 = vld [vmem:[#allocation43_spill] sm:$0xff] }
 0x3af   : > { %16845 = vst [vmem:[#allocation93_spill] sm:$0xff] %v10253_v20  ;;  %v10265_v51 = vmin.f32 %v16853_v29, 255.0  ;;  %v16859_v37 = vmax.f32 %v16858_v38, 0.0  ;;  %v16861_v20 = vld [vmem:[#allocation260_spill] sm:$0xff] }
 0x3b0   : > { %16848 = vst [vmem:[#allocation360_spill] sm:$0xff] %v10257_v30  ;;  %v10269_v35 = vmin.f32 %v16856_v40, 255.0  ;;  %v16862_v34 = vmax.f32 %v16861_v20, 0.0  ;;  %v16864_v30 = vld [vmem:[#allocation262_spill] sm:$0xff] }
 0x3b1   : > { %16851 = vst [vmem:[#allocation362_spill] sm:$0xff] %v10261_v46  ;;  %v10273_v44 = vmin.f32 %v16859_v37, 255.0  ;;  %v16865_v31 = vmax.f32 %v16864_v30, 0.0  ;;  %v16867_v46 = vld [vmem:[#allocation44_spill] sm:$0xff] }
 0x3b2   : > { %16854 = vst [vmem:[#allocation94_spill] sm:$0xff] %v10265_v51  ;;  %v10277_v26 = vmin.f32 %v16862_v34, 255.0  ;;  %v16868_v27 = vmax.f32 %v16867_v46, 0.0  ;;  %v16870_v51 = vld [vmem:[#allocation261_spill] sm:$0xff] }
 0x3b3   : > { %16857 = vst [vmem:[#allocation361_spill] sm:$0xff] %v10269_v35  ;;  %v10281_v63 = vmin.f32 %v16865_v31, 255.0  ;;  %v16871_v47 = vmax.f32 %v16870_v51, 0.0  ;;  %v16873_v35 = vld [vmem:[#allocation264_spill] sm:$0xff] }
 0x3b4   : > { %16860 = vst [vmem:[#allocation364_spill] sm:$0xff] %v10273_v44  ;;  %v10285_v29 = vmin.f32 %v16868_v27, 255.0  ;;  %v16874_v38 = vmax.f32 %v16873_v35, 0.0  ;;  %v16876_v44 = vld [vmem:[#allocation45_spill] sm:$0xff] }
 0x3b5   : > { %16863 = vst [vmem:[#allocation95_spill] sm:$0xff] %v10277_v26  ;;  %v10289_v40 = vmin.f32 %v16871_v47, 255.0  ;;  %v16877_v20 = vmax.f32 %v16876_v44, 0.0  ;;  %v16879_v26 = vld [vmem:[#allocation263_spill] sm:$0xff] }
 0x3b6   : > { %16866 = vst [vmem:[#allocation363_spill] sm:$0xff] %v10281_v63  ;;  %v10293_v37 = vmin.f32 %v16874_v38, 255.0  ;;  %v16880_v30 = vmax.f32 %v16879_v26, 0.0  ;;  %v16882_v63 = vld [vmem:[#allocation265_spill] sm:$0xff] }
 0x3b7   : > { %16869 = vst [vmem:[#allocation365_spill] sm:$0xff] %v10285_v29  ;;  %v10297_v34 = vmin.f32 %v16877_v20, 255.0  ;;  %v16883_v46 = vmax.f32 %v16882_v63, 0.0  ;;  %v16885_v29 = vld [vmem:[#allocation46_spill] sm:$0xff] }
 0x3b8   : > { %16872 = vst [vmem:[#allocation96_spill] sm:$0xff] %v10289_v40  ;;  %v10301_v31 = vmin.f32 %v16880_v30, 255.0  ;;  %v16886_v51 = vmax.f32 %v16885_v29, 0.0  ;;  %v16888_v40 = vld [vmem:[#allocation266_spill] sm:$0xff] }
 0x3b9   : > { %16875 = vst [vmem:[#allocation366_spill] sm:$0xff] %v10293_v37  ;;  %v10305_v27 = vmin.f32 %v16883_v46, 255.0  ;;  %v16889_v35 = vmax.f32 %v16888_v40, 0.0  ;;  %v16891_v37 = vld [vmem:[#allocation267_spill] sm:$0xff] }
 0x3ba   : > { %16878 = vst [vmem:[#allocation367_spill] sm:$0xff] %v10297_v34  ;;  %v10309_v47 = vmin.f32 %v16886_v51, 255.0  ;;  %v16892_v44 = vmax.f32 %v16891_v37, 0.0  ;;  %v16894_v34 = vld [vmem:[#allocation47_spill] sm:$0xff] }
 0x3bb   : > { %16881 = vst [vmem:[#allocation97_spill] sm:$0xff] %v10301_v31  ;;  %v10313_v38 = vmin.f32 %v16889_v35, 255.0  ;;  %v16895_v26 = vmax.f32 %v16894_v34, 0.0  ;;  %v16897_v31 = vld [vmem:[#allocation268_spill] sm:$0xff] }
 0x3bc   : > { %16884 = vst [vmem:[#allocation368_spill] sm:$0xff] %v10305_v27  ;;  %v10317_v20 = vmin.f32 %v16892_v44, 255.0  ;;  %v16898_v63 = vmax.f32 %v16897_v31, 0.0  ;;  %v16900_v27 = vld [vmem:[#allocation269_spill] sm:$0xff] }
 0x3bd   : > { %16887 = vst [vmem:[#allocation369_spill] sm:$0xff] %v10309_v47  ;;  %v10321_v30 = vmin.f32 %v16895_v26, 255.0  ;;  %v16901_v29 = vmax.f32 %v16900_v27, 0.0  ;;  %v16903_v47 = vld [vmem:[#allocation48_spill] sm:$0xff] }
 0x3be   : > { %16890 = vst [vmem:[#allocation98_spill] sm:$0xff] %v10313_v38  ;;  %v10325_v46 = vmin.f32 %v16898_v63, 255.0  ;;  %v16904_v40 = vmax.f32 %v16903_v47, 0.0  ;;  %v16906_v38 = vld [vmem:[#allocation270_spill] sm:$0xff] }
 0x3bf   : > { %16893 = vst [vmem:[#allocation370_spill] sm:$0xff] %v10317_v20  ;;  %v10329_v51 = vmin.f32 %v16901_v29, 255.0  ;;  %v16907_v37 = vmax.f32 %v16906_v38, 0.0  ;;  %v16909_v20 = vld [vmem:[#allocation271_spill] sm:$0xff] }
 0x3c0   : > { %16896 = vst [vmem:[#allocation371_spill] sm:$0xff] %v10321_v30  ;;  %v10333_v35 = vmin.f32 %v16904_v40, 255.0  ;;  %v16910_v34 = vmax.f32 %v16909_v20, 0.0  ;;  %v16912_v30 = vld [vmem:[#allocation49_spill] sm:$0xff] }
 0x3c1   : > { %16899 = vst [vmem:[#allocation99_spill] sm:$0xff] %v10325_v46  ;;  %v10337_v44 = vmin.f32 %v16907_v37, 255.0  ;;  %v16913_v31 = vmax.f32 %v16912_v30, 0.0  ;;  %v16915_v46 = vld [vmem:[#allocation272_spill] sm:$0xff] }
 0x3c2   : > { %16902 = vst [vmem:[#allocation372_spill] sm:$0xff] %v10329_v51  ;;  %v10341_v26 = vmin.f32 %v16910_v34, 255.0  ;;  %v16916_v27 = vmax.f32 %v16915_v46, 0.0  ;;  %v16918_v51 = vld [vmem:[#allocation274_spill] sm:$0xff] }
 0x3c3   : > { %16905 = vst [vmem:[#allocation374_spill] sm:$0xff] %v10333_v35  ;;  %v10345_v63 = vmin.f32 %v16913_v31, 255.0  ;;  %v16919_v47 = vmax.f32 %v16918_v51, 0.0  ;;  %v16921_v35 = vld [vmem:[#allocation50_spill] sm:$0xff] }
 0x3c4   : > { %16908 = vst [vmem:[#allocation100_spill] sm:$0xff] %v10337_v44  ;;  %v10349_v29 = vmin.f32 %v16916_v27, 255.0  ;;  %v16922_v38 = vmax.f32 %v16921_v35, 0.0  ;;  %v16924_v44 = vld [vmem:[#allocation273_spill] sm:$0xff] }
 0x3c5   : > { %16911 = vst [vmem:[#allocation373_spill] sm:$0xff] %v10341_v26  ;;  %v10353_v40 = vmin.f32 %v16919_v47, 255.0  ;;  %v16925_v20 = vmax.f32 %v16924_v44, 0.0  ;;  %v16927_v26 = vld [vmem:[#allocation275_spill] sm:$0xff] }
 0x3c6   : > { %16914 = vst [vmem:[#allocation375_spill] sm:$0xff] %v10345_v63  ;;  %v10357_v37 = vmin.f32 %v16922_v38, 255.0  ;;  %v16928_v30 = vmax.f32 %v16927_v26, 0.0  ;;  %v16930_v63 = vld [vmem:[#allocation51_spill] sm:$0xff] }
 0x3c7   : > { %16917 = vst [vmem:[#allocation101_spill] sm:$0xff] %v10349_v29  ;;  %v10361_v34 = vmin.f32 %v16925_v20, 255.0  ;;  %v16931_v46 = vmax.f32 %v16930_v63, 0.0  ;;  %v16933_v29 = vld [vmem:[#allocation277_spill] sm:$0xff] }
 0x3c8   : > { %16920 = vst [vmem:[#allocation377_spill] sm:$0xff] %v10353_v40  ;;  %v10365_v31 = vmin.f32 %v16928_v30, 255.0  ;;  %v16934_v51 = vmax.f32 %v16933_v29, 0.0  ;;  %v16936_v40 = vld [vmem:[#allocation276_spill] sm:$0xff] }
 0x3c9   : > { %16923 = vst [vmem:[#allocation376_spill] sm:$0xff] %v10357_v37  ;;  %v10369_v27 = vmin.f32 %v16931_v46, 255.0  ;;  %v16937_v35 = vmax.f32 %v16936_v40, 0.0  ;;  %v16939_v37 = vld [vmem:[#allocation52_spill] sm:$0xff] }
 0x3ca   : > { %16926 = vst [vmem:[#allocation102_spill] sm:$0xff] %v10361_v34  ;;  %v10373_v47 = vmin.f32 %v16934_v51, 255.0  ;;  %v16940_v44 = vmax.f32 %v16939_v37, 0.0  ;;  %v16942_v34 = vld [vmem:[#allocation278_spill] sm:$0xff] }
 0x3cb   : > { %16929 = vst [vmem:[#allocation378_spill] sm:$0xff] %v10365_v31  ;;  %v10377_v38 = vmin.f32 %v16937_v35, 255.0  ;;  %v16943_v26 = vmax.f32 %v16942_v34, 0.0  ;;  %v16945_v31 = vld [vmem:[#allocation279_spill] sm:$0xff] }
 0x3cc   : > { %16932 = vst [vmem:[#allocation379_spill] sm:$0xff] %v10369_v27  ;;  %v10381_v20 = vmin.f32 %v16940_v44, 255.0  ;;  %v16946_v63 = vmax.f32 %v16945_v31, 0.0  ;;  %v16948_v27 = vld [vmem:[#allocation53_spill] sm:$0xff] }
 0x3cd   : > { %16935 = vst [vmem:[#allocation103_spill] sm:$0xff] %v10373_v47  ;;  %v10385_v30 = vmin.f32 %v16943_v26, 255.0  ;;  %v16949_v29 = vmax.f32 %v16948_v27, 0.0  ;;  %v16951_v47 = vld [vmem:[#allocation280_spill] sm:$0xff] }
 0x3ce   : > { %16938 = vst [vmem:[#allocation380_spill] sm:$0xff] %v10377_v38  ;;  %v10389_v46 = vmin.f32 %v16946_v63, 255.0  ;;  %v16952_v40 = vmax.f32 %v16951_v47, 0.0  ;;  %v16954_v38 = vld [vmem:[#allocation282_spill] sm:$0xff] }
 0x3cf   : > { %16941 = vst [vmem:[#allocation104_spill] sm:$0xff] %v10381_v20  ;;  %v10393_v51 = vmin.f32 %v16949_v29, 255.0  ;;  %v16955_v37 = vmax.f32 %v16954_v38, 0.0  ;;  %v16957_v20 = vld [vmem:[#allocation54_spill] sm:$0xff] }
 0x3d0   : > { %16944 = vst [vmem:[#allocation381_spill] sm:$0xff] %v10385_v30  ;;  %v10397_v35 = vmin.f32 %v16952_v40, 255.0  ;;  %v16958_v34 = vmax.f32 %v16957_v20, 0.0  ;;  %v16960_v30 = vld [vmem:[#allocation281_spill] sm:$0xff] }
 0x3d1   : > { %16947 = vst [vmem:[#allocation383_spill] sm:$0xff] %v10389_v46  ;;  %v10401_v44 = vmin.f32 %v16955_v37, 255.0  ;;  %v16961_v31 = vmax.f32 %v16960_v30, 0.0  ;;  %v16963_v46 = vld [vmem:[#allocation284_spill] sm:$0xff] }
 0x3d2   : > { %16950 = vst [vmem:[#allocation105_spill] sm:$0xff] %v10393_v51  ;;  %v10405_v26 = vmin.f32 %v16958_v34, 255.0  ;;  %v16964_v27 = vmax.f32 %v16963_v46, 0.0  ;;  %v16966_v51 = vld [vmem:[#allocation55_spill] sm:$0xff] }
 0x3d3   : > { %16953 = vst [vmem:[#allocation382_spill] sm:$0xff] %v10397_v35  ;;  %v10409_v63 = vmin.f32 %v16961_v31, 255.0  ;;  %v16967_v47 = vmax.f32 %v16966_v51, 0.0  ;;  %v16969_v35 = vld [vmem:[#allocation283_spill] sm:$0xff] }
 0x3d4   : > { %16956 = vst [vmem:[#allocation384_spill] sm:$0xff] %v10401_v44  ;;  %v10413_v29 = vmin.f32 %v16964_v27, 255.0  ;;  %v16970_v38 = vmax.f32 %v16969_v35, 0.0  ;;  %v16972_v44 = vld [vmem:[#allocation285_spill] sm:$0xff] }
 0x3d5   : > { %16959 = vst [vmem:[#allocation106_spill] sm:$0xff] %v10405_v26  ;;  %v10417_v40 = vmin.f32 %v16967_v47, 255.0  ;;  %v16973_v20 = vmax.f32 %v16972_v44, 0.0  ;;  %v16975_v26 = vld [vmem:[#allocation56_spill] sm:$0xff] }
 0x3d6   : > { %16962 = vst [vmem:[#allocation385_spill] sm:$0xff] %v10409_v63  ;;  %v10421_v37 = vmin.f32 %v16970_v38, 255.0  ;;  %v16976_v30 = vmax.f32 %v16975_v26, 0.0  ;;  %v16978_v63 = vld [vmem:[#allocation286_spill] sm:$0xff] }
 0x3d7   : > { %16965 = vst [vmem:[#allocation386_spill] sm:$0xff] %v10413_v29  ;;  %v10425_v34 = vmin.f32 %v16973_v20, 255.0  ;;  %v16979_v46 = vmax.f32 %v16978_v63, 0.0  ;;  %v16981_v29 = vld [vmem:[#allocation287_spill] sm:$0xff] }
 0x3d8   : > { %16968 = vst [vmem:[#allocation107_spill] sm:$0xff] %v10417_v40  ;;  %v10429_v31 = vmin.f32 %v16976_v30, 255.0  ;;  %v16982_v51 = vmax.f32 %v16981_v29, 0.0  ;;  %v16983_v40 = vld [vmem:[#allocation57_spill] sm:$0xff] }
 0x3d9   : > { %16971 = vst [vmem:[#allocation387_spill] sm:$0xff] %v10421_v37  ;;  %v10433_v27 = vmin.f32 %v16979_v46, 255.0  ;;  %v16984_v35 = vmax.f32 %v16983_v40, 0.0  ;;  %v16985_v37 = vld [vmem:[#allocation288_spill] sm:$0xff]  ;;  %v16993_v40 = vmax.f32 %v16540_v14, 0.0  ;;  %v16998_v14 = vmax.f32 %v16545_v19, 0.0 }
 0x3da   : > { %16974 = vst [vmem:[#allocation388_spill] sm:$0xff] %v10425_v34  ;;  %v10437_v47 = vmin.f32 %v16982_v51, 255.0  ;;  %v16986_v44 = vmax.f32 %v16985_v37, 0.0  ;;  %v16987_v34 = vld [vmem:[#allocation289_spill] sm:$0xff]  ;;  %v16994_v37 = vmax.f32 %v16541_v50, 0.0  ;;  %v16999_v50 = vmax.f32 %v16546_v23, 0.0 }
 0x3db   : > { %16977 = vst [vmem:[#allocation108_spill] sm:$0xff] %v10429_v31  ;;  %v10441_v38 = vmin.f32 %v16984_v35, 255.0  ;;  %v16988_v26 = vmax.f32 %v16987_v34, 0.0  ;;  %v16989_v31 = vld [vmem:[#allocation58_spill] sm:$0xff]  ;;  %v10461_v35 = vmin.f32 %v16993_v40, 255.0  ;;  %v16995_v34 = vmax.f32 %v16542_v5, 0.0 }
 0x3dc   : > { %16980 = vst [vmem:[#allocation389_spill] sm:$0xff] %v10433_v27  ;;  %v10445_v20 = vmin.f32 %v16986_v44, 255.0  ;;  %v16990_v63 = vmax.f32 %v16989_v31, 0.0  ;;  %v16991_v27 = vld [vmem:[#allocation290_spill] sm:$0xff]  ;;  %v10465_v44 = vmin.f32 %v16994_v37, 255.0  ;;  %v16996_v31 = vmax.f32 %v16543_v1, 0.0 }
 0x3dd   : > { %v10449_v30 = vmin.f32 %v16988_v26, 255.0  ;;  %v16992_v29 = vmax.f32 %v16991_v27, 0.0  ;;  %v10469_v26 = vmin.f32 %v16995_v34, 255.0  ;;  %v16997_v27 = vmax.f32 %v16544_v59, 0.0 }
 0x3de   : > { %v10453_v46 = vmin.f32 %v16990_v63, 255.0  ;;  %v10473_v63 = vmin.f32 %v16996_v31, 255.0  ;;  %v10481_v40 = vmin.f32 %v16998_v14, 255.0  ;;  %v10485_v37 = vmin.f32 %v16999_v50, 255.0 }
 0x3df   : > { %v10457_v51 = vmin.f32 %v16992_v29, 255.0  ;;  %v10477_v29 = vmin.f32 %v16997_v27, 255.0  ;;  %v17000_v5 = vmax.f32 %v16547_v12, 0.0  ;;  %v17001_v1 = vmax.f32 %v16548_v28, 0.0 }
 0x3e0   : > { %v17002_v59 = vmax.f32 %v16549_v36, 0.0  ;;  %v17004_v19 = vmax.f32 %v16550_v49, 0.0  ;;  %v17005_v23 = vmax.f32 %v9506_v16, 0.0  ;;  %v17006_v12 = vmax.f32 %v9513_v15, 0.0 }
 0x3e1   : > { %v10489_v34 = vmin.f32 %v17000_v5, 255.0  ;;  %v10493_v31 = vmin.f32 %v17001_v1, 255.0  ;;  %v17007_v28 = vmax.f32 %v9520_v60, 0.0  ;;  %v17008_v36 = vmax.f32 %v9527_v56, 0.0 }
 0x3e2   : > { %v10497_v27 = vmin.f32 %v17002_v59, 255.0  ;;  %v10501_v14 = vmin.f32 %v17004_v19, 255.0  ;;  %v10505_v50 = vmin.f32 %v17005_v23, 255.0  ;;  %v10509_v5 = vmin.f32 %v17006_v12, 255.0 }
 0x3e3   : > { %v10513_v1 = vmin.f32 %v17007_v28, 255.0  ;;  %v10517_v59 = vmin.f32 %v17008_v36, 255.0  ;;  %v17011_v16 = vmax.f32 %v9541_v41, 0.0  ;;  %v17012_v15 = vmax.f32 %v9548_v25, 0.0 }
 0x3e4   : > { %17003 = vst [vmem:[#allocation390_spill] sm:$0xff] %v10497_v27  ;;  %v17009_v27 = vld [vmem:[#allocation298_spill] sm:$0xff]  ;;  %v17013_v60 = vmax.f32 %v9555_v33, 0.0  ;;  %v17014_v56 = vmax.f32 %v9562_v0, 0.0  ;;  %v17016_v41 = vmax.f32 %v9576_v21, 0.0  ;;  %v17017_v25 = vmax.f32 %v9583_v57, 0.0 }
 0x3e5   : > { %v17010_v49 = vmax.f32 %v17009_v27, 0.0  ;;  %v10525_v23 = vmin.f32 %v17011_v16, 255.0  ;;  %v10529_v12 = vmin.f32 %v17012_v15, 255.0  ;;  %v17015_v27 = vmax.f32 %v9569_v18, 0.0 }
 0x3e6   : > { %v10533_v28 = vmin.f32 %v17013_v60, 255.0  ;;  %v10537_v36 = vmin.f32 %v17014_v56, 255.0  ;;  %v10545_v16 = vmin.f32 %v17016_v41, 255.0  ;;  %v10549_v15 = vmin.f32 %v17017_v25, 255.0 }
 0x3e7   : > { %v10521_v19 = vmin.f32 %v17010_v49, 255.0  ;;  %v10541_v49 = vmin.f32 %v17015_v27, 255.0  ;;  %v17018_v33 = vmax.f32 %v9590_v3, 0.0  ;;  %v17019_v0 = vmax.f32 %v9597_v53, 0.0 }
 0x3e8   : > { %v10560_v18 = vadd.f32 -128.0, %v9793_v55  ;;  %v10563_v27 = vadd.f32 -128.0, %v9797_v61  ;;  %v10566_v21 = vadd.f32 -128.0, %v9801_v9  ;;  %v10569_v57 = vadd.f32 -128.0, %v9805_v17 }
 0x3e9   : > { %v10553_v60 = vmin.f32 %v17018_v33, 255.0  ;;  %v10557_v56 = vmin.f32 %v17019_v0, 255.0  ;;  %v10572_v3 = vadd.f32 -128.0, %v9809_v45  ;;  %v10575_v41 = vadd.f32 -128.0, %v9813_v58 }
 0x3ea   : > { %v10578_v53 = vadd.f32 -128.0, %v9817_v8  ;;  %v10581_v55 = vadd.f32 -128.0, %v9821_v13  ;;  %v10584_v61 = vadd.f32 -128.0, %v9825_v24  ;;  %v10587_v9 = vadd.f32 -128.0, %v9829_v10 }
 0x3eb   : > { %v10590_v17 = vadd.f32 -128.0, %v9833_v11  ;;  %v10593_v45 = vadd.f32 -128.0, %v9837_v4  ;;  %v10596_v58 = vadd.f32 -128.0, %v9841_v7  ;;  %v10599_v8 = vadd.f32 -128.0, %v9845_v6 }
 0x3ec   : > { %v10602_v13 = vadd.f32 -128.0, %v9849_v2  ;;  %v10605_v24 = vadd.f32 -128.0, %v9853_v54  ;;  %v10608_v10 = vadd.f32 -128.0, %v9857_v62  ;;  %v10611_v11 = vadd.f32 -128.0, %v9861_v39  ;;  %v17024_v2 = vld [vmem:[#allocation299_spill] sm:$0xff]  ;;  %v17028_v62 = vld [vmem:[#allocation300_spill] sm:$0xff] }
 0x3ed   : > { %v10614_v4 = vadd.f32 -128.0, %v9865_v22  ;;  %v10617_v7 = vadd.f32 -128.0, %v9869_v42  ;;  %v10620_v6 = vadd.f32 -128.0, %v9873_v43  ;;  %v10623_v25 = vadd.f32 -128.0, %v17024_v2  ;;  %v17026_v54 = vld [vmem:[#allocation63_spill] sm:$0xff]  ;;  %v17030_v39 = vld [vmem:[#allocation302_spill] sm:$0xff] }
 0x3ee   : > { %17020 = vst [vmem:[#allocation109_spill] sm:$0xff] %v10611_v11  ;;  %v10626_v33 = vadd.f32 -128.0, %v17026_v54  ;;  %v10629_v0 = vadd.f32 -128.0, %v17028_v62  ;;  %v10632_v11 = vadd.f32 -128.0, %v17030_v39  ;;  %v17032_v22 = vld [vmem:[#allocation64_spill] sm:$0xff]  ;;  %v17034_v42 = vld [vmem:[#allocation301_spill] sm:$0xff] }
 0x3ef   : > { %17021 = vst [vmem:[#allocation114_spill] sm:$0xff] %v10614_v4  ;;  %v10635_v4 = vadd.f32 -128.0, %v17032_v22  ;;  %v17036_v43 = vld [vmem:[#allocation304_spill] sm:$0xff]  ;;  %v17038_v2 = vld [vmem:[#allocation65_spill] sm:$0xff]  ;;  %v17040_v54 = vld [vmem:[#allocation303_spill] sm:$0xff]  ;;  %vm3746_vm9 = vcmp.lt.s32.totalorder %v10560_v18, 0 }
 0x3f0   : > { %17022 = vst [vmem:[#allocation392_spill] sm:$0xff] %v10617_v7  ;;  %v10638_v7 = vadd.f32 -128.0, %v17034_v42  ;;  %v17042_v62 = vld [vmem:[#allocation305_spill] sm:$0xff]  ;;  %v17044_v39 = vld [vmem:[#allocation66_spill] sm:$0xff]  ;;  %v17048_v42 = vld [vmem:[#allocation307_spill] sm:$0xff]  ;;  %vm3751_vm10 = vcmp.lt.s32.totalorder %v10563_v27, 0 }
 0x3f1   : > { %17023 = vst [vmem:[#allocation110_spill] sm:$0xff] %v10620_v6  ;;  %v10641_v6 = vadd.f32 -128.0, %v17036_v43  ;;  %v17046_v22 = vld [vmem:[#allocation306_spill] sm:$0xff]  ;;  %v17050_v43 = vld [vmem:[#allocation67_spill] sm:$0xff]  ;;  %vm3756_vm11 = vcmp.lt.s32.totalorder %v10566_v21, 0  ;;  %vm3761_vm12 = vcmp.lt.s32.totalorder %v10569_v57, 0 }
 0x3f2   : > { %17025 = vst [vmem:[#allocation391_spill] sm:$0xff] %v10623_v25  ;;  %v10644_v25 = vadd.f32 -128.0, %v17038_v2  ;;  %v17052_v2 = vld [vmem:[#allocation308_spill] sm:$0xff]  ;;  %vm3766_vm13 = vcmp.lt.s32.totalorder %v10572_v3, 0  ;;  %vm3771_vm14 = vcmp.lt.s32.totalorder %v10575_v41, 0  ;;  %vm3776_vm15 = vcmp.lt.s32.totalorder %v10578_v53, 0 }
 0x3f3   : > { %17027 = vst [vmem:[#allocation393_spill] sm:$0xff] %v10626_v33  ;;  %v10647_v33 = vadd.f32 -128.0, %v17040_v54  ;;  %v17054_v54 = vld [vmem:[#allocation309_spill] sm:$0xff]  ;;  %vm3781_vm0 = vcmp.lt.s32.totalorder %v10581_v55, 0  ;;  %vm3786_vm1 = vcmp.lt.s32.totalorder %v10584_v61, 0  ;;  %vm3791_vm2 = vcmp.lt.s32.totalorder %v10587_v9, 0 }
 0x3f4   : > { %17029 = vst [vmem:[#allocation111_spill] sm:$0xff] %v10629_v0  ;;  %v10650_v0 = vadd.f32 -128.0, %v17042_v62  ;;  %v17056_v62 = vld [vmem:[#allocation68_spill] sm:$0xff]  ;;  %vm3796_vm3 = vcmp.lt.s32.totalorder %v10590_v17, 0  ;;  %vm3801_vm4 = vcmp.lt.s32.totalorder %v10593_v45, 0  ;;  %vm3806_vm5 = vcmp.lt.s32.totalorder %v10596_v58, 0 }
 0x3f5   : > { %17031 = vst [vmem:[#allocation395_spill] sm:$0xff] %v10632_v11  ;;  %v10653_v11 = vadd.f32 -128.0, %v17044_v39  ;;  %v17058_v39 = vld [vmem:[#allocation310_spill] sm:$0xff]  ;;  %vm3811_vm6 = vcmp.lt.s32.totalorder %v10599_v8, 0  ;;  %vm3816_vm7 = vcmp.lt.s32.totalorder %v10602_v13, 0  ;;  %vm3821_vm8 = vcmp.lt.s32.totalorder %v10605_v24, 0 }
 0x3f6   : > { %17033 = vst [vmem:[#allocation394_spill] sm:$0xff] %v10635_v4  ;;  %v10656_v4 = vadd.f32 -128.0, %v17046_v22  ;;  %v17060_v22 = vld [vmem:[#allocation311_spill] sm:$0xff] }
 0x3f7   : > { %17035 = vst [vmem:[#allocation112_spill] sm:$0xff] %v10638_v7  ;;  %v10659_v7 = vadd.f32 -128.0, %v17048_v42  ;;  %v17062_v42 = vld [vmem:[#allocation69_spill] sm:$0xff] }
 0x3f8   : > { %17037 = vst [vmem:[#allocation396_spill] sm:$0xff] %v10641_v6  ;;  %v10662_v6 = vadd.f32 -128.0, %v17050_v43  ;;  %v17064_v43 = vld [vmem:[#allocation312_spill] sm:$0xff] }
 0x3f9   : > { %17039 = vst [vmem:[#allocation397_spill] sm:$0xff] %v10644_v25  ;;  %v10665_v25 = vadd.f32 -128.0, %v17052_v2  ;;  %v17066_v2 = vld [vmem:[#allocation314_spill] sm:$0xff] }
 0x3fa   : > { %17041 = vst [vmem:[#allocation113_spill] sm:$0xff] %v10647_v33  ;;  %v10668_v33 = vadd.f32 -128.0, %v17054_v54  ;;  %v17068_v54 = vld [vmem:[#allocation70_spill] sm:$0xff] }
 0x3fb   : > { %17043 = vst [vmem:[#allocation398_spill] sm:$0xff] %v10650_v0  ;;  %v10671_v0 = vadd.f32 -128.0, %v17056_v62  ;;  %v17070_v62 = vld [vmem:[#allocation313_spill] sm:$0xff] }
 0x3fc   : > { %17045 = vst [vmem:[#allocation399_spill] sm:$0xff] %v10653_v11  ;;  %v10674_v11 = vadd.f32 -128.0, %v17058_v39  ;;  %v17072_v39 = vld [vmem:[#allocation315_spill] sm:$0xff] }
 0x3fd   : > { %17047 = vst [vmem:[#allocation401_spill] sm:$0xff] %v10656_v4  ;;  %v10677_v4 = vadd.f32 -128.0, %v17060_v22  ;;  %v17074_v22 = vld [vmem:[#allocation71_spill] sm:$0xff] }
 0x3fe   : > { %17049 = vst [vmem:[#allocation115_spill] sm:$0xff] %v10659_v7  ;;  %v10680_v7 = vadd.f32 -128.0, %v17062_v42  ;;  %v17076_v42 = vld [vmem:[#allocation317_spill] sm:$0xff] }
 0x3ff   : > { %17051 = vst [vmem:[#allocation400_spill] sm:$0xff] %v10662_v6  ;;  %v10683_v6 = vadd.f32 -128.0, %v17064_v43  ;;  %v17078_v43 = vld [vmem:[#allocation316_spill] sm:$0xff] }
 0x400   : > { %17053 = vst [vmem:[#allocation402_spill] sm:$0xff] %v10665_v25  ;;  %v10686_v25 = vadd.f32 -128.0, %v17066_v2  ;;  %v17080_v2 = vld [vmem:[#allocation72_spill] sm:$0xff] }
 0x401   : > { %17055 = vst [vmem:[#allocation116_spill] sm:$0xff] %v10668_v33  ;;  %v10689_v33 = vadd.f32 -128.0, %v17068_v54  ;;  %v17082_v54 = vld [vmem:[#allocation318_spill] sm:$0xff] }
 0x402   : > { %17057 = vst [vmem:[#allocation403_spill] sm:$0xff] %v10671_v0  ;;  %v10692_v0 = vadd.f32 -128.0, %v17070_v62  ;;  %v17084_v62 = vld [vmem:[#allocation319_spill] sm:$0xff] }
 0x403   : > { %17059 = vst [vmem:[#allocation404_spill] sm:$0xff] %v10674_v11  ;;  %v10695_v11 = vadd.f32 -128.0, %v17072_v39  ;;  %v17086_v39 = vld [vmem:[#allocation73_spill] sm:$0xff] }
 0x404   : > { %17061 = vst [vmem:[#allocation117_spill] sm:$0xff] %v10677_v4  ;;  %v10698_v4 = vadd.f32 -128.0, %v17074_v22  ;;  %v17088_v22 = vld [vmem:[#allocation320_spill] sm:$0xff] }
 0x405   : > { %17063 = vst [vmem:[#allocation405_spill] sm:$0xff] %v10680_v7  ;;  %v10701_v7 = vadd.f32 -128.0, %v17076_v42  ;;  %v17090_v42 = vld [vmem:[#allocation322_spill] sm:$0xff] }
 0x406   : > { %17065 = vst [vmem:[#allocation406_spill] sm:$0xff] %v10683_v6  ;;  %v10704_v6 = vadd.f32 -128.0, %v17078_v43  ;;  %v17092_v43 = vld [vmem:[#allocation74_spill] sm:$0xff] }
 0x407   : > { %17067 = vst [vmem:[#allocation118_spill] sm:$0xff] %v10686_v25  ;;  %v10707_v25 = vadd.f32 -128.0, %v17080_v2  ;;  %v17094_v2 = vld [vmem:[#allocation321_spill] sm:$0xff] }
 0x408   : > { %17069 = vst [vmem:[#allocation407_spill] sm:$0xff] %v10689_v33  ;;  %v10710_v33 = vadd.f32 -128.0, %v17082_v54  ;;  %v17096_v54 = vld [vmem:[#allocation324_spill] sm:$0xff] }
 0x409   : > { %17071 = vst [vmem:[#allocation408_spill] sm:$0xff] %v10692_v0  ;;  %v10713_v0 = vadd.f32 -128.0, %v17084_v62  ;;  %v17098_v62 = vld [vmem:[#allocation75_spill] sm:$0xff] }
 0x40a   : > { %17073 = vst [vmem:[#allocation119_spill] sm:$0xff] %v10695_v11  ;;  %v10716_v11 = vadd.f32 -128.0, %v17086_v39  ;;  %v17100_v39 = vld [vmem:[#allocation323_spill] sm:$0xff] }
 0x40b   : > { %17075 = vst [vmem:[#allocation409_spill] sm:$0xff] %v10698_v4  ;;  %v10719_v4 = vadd.f32 -128.0, %v17088_v22  ;;  %v17102_v22 = vld [vmem:[#allocation325_spill] sm:$0xff] }
 0x40c   : > { %17077 = vst [vmem:[#allocation411_spill] sm:$0xff] %v10701_v7  ;;  %v10722_v7 = vadd.f32 -128.0, %v17090_v42  ;;  %v17104_v42 = vld [vmem:[#allocation76_spill] sm:$0xff] }
 0x40d   : > { %17079 = vst [vmem:[#allocation120_spill] sm:$0xff] %v10704_v6  ;;  %v10725_v6 = vadd.f32 -128.0, %v17092_v43  ;;  %v17106_v43 = vld [vmem:[#allocation326_spill] sm:$0xff] }
 0x40e   : > { %17081 = vst [vmem:[#allocation410_spill] sm:$0xff] %v10707_v25  ;;  %v10728_v25 = vadd.f32 -128.0, %v17094_v2  ;;  %v17108_v2 = vld [vmem:[#allocation327_spill] sm:$0xff] }
 0x40f   : > { %17083 = vst [vmem:[#allocation412_spill] sm:$0xff] %v10710_v33  ;;  %v10731_v33 = vadd.f32 -128.0, %v17096_v54  ;;  %v17110_v54 = vld [vmem:[#allocation77_spill] sm:$0xff] }
 0x410   : > { %17085 = vst [vmem:[#allocation121_spill] sm:$0xff] %v10713_v0  ;;  %v10734_v0 = vadd.f32 -128.0, %v17098_v62  ;;  %v17112_v62 = vld [vmem:[#allocation328_spill] sm:$0xff] }
 0x411   : > { %17087 = vst [vmem:[#allocation414_spill] sm:$0xff] %v10716_v11  ;;  %v10737_v11 = vadd.f32 -128.0, %v17100_v39  ;;  %v17114_v39 = vld [vmem:[#allocation329_spill] sm:$0xff] }
 0x412   : > { %17089 = vst [vmem:[#allocation413_spill] sm:$0xff] %v10719_v4  ;;  %v10740_v4 = vadd.f32 -128.0, %v17102_v22  ;;  %v17116_v22 = vld [vmem:[#allocation78_spill] sm:$0xff] }
 0x413   : > { %17091 = vst [vmem:[#allocation122_spill] sm:$0xff] %v10722_v7  ;;  %v10743_v7 = vadd.f32 -128.0, %v17104_v42  ;;  %v17118_v42 = vld [vmem:[#allocation330_spill] sm:$0xff] }
 0x414   : > { %17093 = vst [vmem:[#allocation415_spill] sm:$0xff] %v10725_v6  ;;  %v10746_v6 = vadd.f32 -128.0, %v17106_v43  ;;  %v17120_v43 = vld [vmem:[#allocation331_spill] sm:$0xff] }
 0x415   : > { %17095 = vst [vmem:[#allocation416_spill] sm:$0xff] %v10728_v25  ;;  %v10749_v25 = vadd.f32 -128.0, %v17108_v2  ;;  %v17122_v2 = vld [vmem:[#allocation79_spill] sm:$0xff] }
 0x416   : > { %17097 = vst [vmem:[#allocation123_spill] sm:$0xff] %v10731_v33  ;;  %v10752_v33 = vadd.f32 -128.0, %v17110_v54  ;;  %v17124_v54 = vld [vmem:[#allocation332_spill] sm:$0xff] }
 0x417   : > { %17099 = vst [vmem:[#allocation417_spill] sm:$0xff] %v10734_v0  ;;  %v10755_v0 = vadd.f32 -128.0, %v17112_v62  ;;  %v17125_v62 = vld [vmem:[#allocation334_spill] sm:$0xff] }
 0x418   : > { %17101 = vst [vmem:[#allocation419_spill] sm:$0xff] %v10737_v11  ;;  %v10758_v11 = vadd.f32 -128.0, %v17114_v39  ;;  %v17127_v39 = vld [vmem:[#allocation80_spill] sm:$0xff] }
 0x419   : > { %17103 = vst [vmem:[#allocation124_spill] sm:$0xff] %v10740_v4  ;;  %v10761_v4 = vadd.f32 -128.0, %v17116_v22  ;;  %v17129_v22 = vld [vmem:[#allocation333_spill] sm:$0xff] }
 0x41a   : > { %17105 = vst [vmem:[#allocation418_spill] sm:$0xff] %v10743_v7  ;;  %v10764_v7 = vadd.f32 -128.0, %v17118_v42  ;;  %v17131_v42 = vld [vmem:[#allocation335_spill] sm:$0xff] }
 0x41b   : > { %17107 = vst [vmem:[#allocation421_spill] sm:$0xff] %v10746_v6  ;;  %v10767_v6 = vadd.f32 -128.0, %v17120_v43  ;;  %v17133_v43 = vld [vmem:[#allocation81_spill] sm:$0xff] }
 0x41c   : > { %17109 = vst [vmem:[#allocation125_spill] sm:$0xff] %v10749_v25  ;;  %v10770_v25 = vadd.f32 -128.0, %v17122_v2  ;;  %v17135_v2 = vld [vmem:[#allocation337_spill] sm:$0xff] }
 0x41d   : > { %17111 = vst [vmem:[#allocation420_spill] sm:$0xff] %v10752_v33  ;;  %v10773_v33 = vadd.f32 -128.0, %v17124_v54  ;;  %v10794_v54 = vadd.f32 -128.0, %v10105_v52  ;;  %v17148_v52 = vld [vmem:[#allocation342_spill] sm:$0xff] }
 0x41e   : > { %17113 = vst [vmem:[#allocation422_spill] sm:$0xff] %v10755_v0  ;;  %v10776_v0 = vadd.f32 -128.0, %v17125_v62  ;;  %v17138_v62 = vld [vmem:[#allocation336_spill] sm:$0xff] }
 0x41f   : > { %17115 = vst [vmem:[#allocation126_spill] sm:$0xff] %v10758_v11  ;;  %v10779_v11 = vadd.f32 -128.0, %v17127_v39  ;;  %v17140_v39 = vld [vmem:[#allocation82_spill] sm:$0xff] }
 0x420   : > { %17117 = vst [vmem:[#allocation423_spill] sm:$0xff] %v10761_v4  ;;  %v10782_v4 = vadd.f32 -128.0, %v17129_v22  ;;  %v17142_v22 = vld [vmem:[#allocation338_spill] sm:$0xff] }
 0x421   : > { %17119 = vst [vmem:[#allocation424_spill] sm:$0xff] %v10764_v7  ;;  %v10785_v7 = vadd.f32 -128.0, %v17131_v42  ;;  %v17143_v42 = vld [vmem:[#allocation339_spill] sm:$0xff] }
 0x422   : > { %17121 = vst [vmem:[#allocation127_spill] sm:$0xff] %v10767_v6  ;;  %v10788_v6 = vadd.f32 -128.0, %v17133_v43  ;;  %v17144_v43 = vld [vmem:[#allocation83_spill] sm:$0xff] }
 0x423   : > { %17123 = vst [vmem:[#allocation425_spill] sm:$0xff] %v10770_v25  ;;  %v10791_v25 = vadd.f32 -128.0, %v17135_v2  ;;  %v17146_v2 = vld [vmem:[#allocation340_spill] sm:$0xff] }
 0x424   : > { %17126 = vst [vmem:[#allocation426_spill] sm:$0xff] %v10776_v0  ;;  %v10797_v0 = vadd.f32 -128.0, %v17138_v62  ;;  %v17150_v62 = vld [vmem:[#allocation84_spill] sm:$0xff] }
 0x425   : > { %17128 = vst [vmem:[#allocation128_spill] sm:$0xff] %v10779_v11  ;;  %v10800_v11 = vadd.f32 -128.0, %v17140_v39  ;;  %v17152_v39 = vld [vmem:[#allocation341_spill] sm:$0xff] }
 0x426   : > { %17130 = vst [vmem:[#allocation427_spill] sm:$0xff] %v10782_v4  ;;  %v10803_v4 = vadd.f32 -128.0, %v17142_v22  ;;  %v10824_v22 = vadd.f32 -128.0, %v10145_v32  ;;  %v17166_v32 = vld [vmem:[#allocation346_spill] sm:$0xff] }
 0x427   : > { %17132 = vst [vmem:[#allocation428_spill] sm:$0xff] %v10785_v7  ;;  %v10806_v7 = vadd.f32 -128.0, %v17143_v42  ;;  %v10827_v42 = vadd.f32 -128.0, %v10149_v48  ;;  %v17168_v48 = vld [vmem:[#allocation347_spill] sm:$0xff] }
 0x428   : > { %17134 = vst [vmem:[#allocation129_spill] sm:$0xff] %v10788_v6  ;;  %v10809_v6 = vadd.f32 -128.0, %v17144_v43  ;;  %v17156_v43 = vld [vmem:[#allocation344_spill] sm:$0xff] }
 0x429   : > { %17136 = vst [vmem:[#allocation429_spill] sm:$0xff] %v10791_v25  ;;  %v10812_v25 = vadd.f32 -128.0, %v17146_v2  ;;  %v17158_v2 = vld [vmem:[#allocation85_spill] sm:$0xff] }
 0x42a   : > { %17137 = vst [vmem:[#allocation431_spill] sm:$0xff] %v10794_v54  ;;  %v10815_v54 = vadd.f32 -128.0, %v17148_v52  ;;  %v17160_v52 = vld [vmem:[#allocation343_spill] sm:$0xff] }
 0x42b   : > { %17139 = vst [vmem:[#allocation130_spill] sm:$0xff] %v10797_v0  ;;  %v10818_v0 = vadd.f32 -128.0, %v17150_v62  ;;  %v17162_v62 = vld [vmem:[#allocation345_spill] sm:$0xff] }
 0x42c   : > { %17141 = vst [vmem:[#allocation430_spill] sm:$0xff] %v10800_v11  ;;  %v10821_v11 = vadd.f32 -128.0, %v17152_v39  ;;  %v17164_v39 = vld [vmem:[#allocation86_spill] sm:$0xff] }
 0x42d   : > { %17145 = vst [vmem:[#allocation432_spill] sm:$0xff] %v10809_v6  ;;  %v10830_v6 = vadd.f32 -128.0, %v17156_v43  ;;  %v17170_v43 = vld [vmem:[#allocation87_spill] sm:$0xff] }
 0x42e   : > { %17147 = vst [vmem:[#allocation131_spill] sm:$0xff] %v10812_v25  ;;  %v10833_v25 = vadd.f32 -128.0, %v17158_v2  ;;  %v17172_v2 = vld [vmem:[#allocation348_spill] sm:$0xff] }
 0x42f   : > { %17149 = vst [vmem:[#allocation434_spill] sm:$0xff] %v10815_v54  ;;  %v10836_v54 = vadd.f32 -128.0, %v17160_v52  ;;  %v17174_v52 = vld [vmem:[#allocation349_spill] sm:$0xff] }
 0x430   : > { %17151 = vst [vmem:[#allocation433_spill] sm:$0xff] %v10818_v0  ;;  %v10839_v0 = vadd.f32 -128.0, %v17162_v62  ;;  %v17176_v62 = vld [vmem:[#allocation88_spill] sm:$0xff] }
 0x431   : > { %17153 = vst [vmem:[#allocation132_spill] sm:$0xff] %v10821_v11  ;;  %v10842_v11 = vadd.f32 -128.0, %v17164_v39  ;;  %v17178_v39 = vld [vmem:[#allocation350_spill] sm:$0xff] }
 0x432   : > { %17154 = vst [vmem:[#allocation435_spill] sm:$0xff] %v10824_v22  ;;  %v10845_v22 = vadd.f32 -128.0, %v17166_v32  ;;  %v17180_v32 = vld [vmem:[#allocation351_spill] sm:$0xff] }
 0x433   : > { %17155 = vst [vmem:[#allocation436_spill] sm:$0xff] %v10827_v42  ;;  %v10848_v42 = vadd.f32 -128.0, %v17168_v48  ;;  %v17182_v48 = vld [vmem:[#allocation89_spill] sm:$0xff] }
 0x434   : > { %17157 = vst [vmem:[#allocation133_spill] sm:$0xff] %v10830_v6  ;;  %v10851_v6 = vadd.f32 -128.0, %v17170_v43  ;;  %v17184_v43 = vld [vmem:[#allocation352_spill] sm:$0xff] }
 0x435   : > { %17159 = vst [vmem:[#allocation437_spill] sm:$0xff] %v10833_v25  ;;  %v10854_v25 = vadd.f32 -128.0, %v17172_v2  ;;  %v17186_v2 = vld [vmem:[#allocation354_spill] sm:$0xff] }
 0x436   : > { %17161 = vst [vmem:[#allocation439_spill] sm:$0xff] %v10836_v54  ;;  %v10857_v54 = vadd.f32 -128.0, %v17174_v52  ;;  %v17188_v52 = vld [vmem:[#allocation90_spill] sm:$0xff] }
 0x437   : > { %17163 = vst [vmem:[#allocation134_spill] sm:$0xff] %v10839_v0  ;;  %v10860_v0 = vadd.f32 -128.0, %v17176_v62  ;;  %v17190_v62 = vld [vmem:[#allocation353_spill] sm:$0xff] }
 0x438   : > { %17165 = vst [vmem:[#allocation438_spill] sm:$0xff] %v10842_v11  ;;  %v10863_v11 = vadd.f32 -128.0, %v17178_v39  ;;  %v17192_v39 = vld [vmem:[#allocation355_spill] sm:$0xff] }
 0x439   : > { %17167 = vst [vmem:[#allocation441_spill] sm:$0xff] %v10845_v22  ;;  %v10866_v22 = vadd.f32 -128.0, %v17180_v32  ;;  %v17194_v32 = vld [vmem:[#allocation91_spill] sm:$0xff] }
 0x43a   : > { %17169 = vst [vmem:[#allocation135_spill] sm:$0xff] %v10848_v42  ;;  %v10869_v42 = vadd.f32 -128.0, %v17182_v48  ;;  %v17196_v48 = vld [vmem:[#allocation357_spill] sm:$0xff] }
 0x43b   : > { %17171 = vst [vmem:[#allocation440_spill] sm:$0xff] %v10851_v6  ;;  %v10872_v6 = vadd.f32 -128.0, %v17184_v43  ;;  %v17198_v43 = vld [vmem:[#allocation356_spill] sm:$0xff] }
 0x43c   : > { %17173 = vst [vmem:[#allocation442_spill] sm:$0xff] %v10854_v25  ;;  %v10875_v25 = vadd.f32 -128.0, %v17186_v2  ;;  %v17200_v2 = vld [vmem:[#allocation92_spill] sm:$0xff] }
 0x43d   : > { %17175 = vst [vmem:[#allocation136_spill] sm:$0xff] %v10857_v54  ;;  %v10878_v54 = vadd.f32 -128.0, %v17188_v52  ;;  %v17202_v52 = vld [vmem:[#allocation358_spill] sm:$0xff] }
 0x43e   : > { %17177 = vst [vmem:[#allocation443_spill] sm:$0xff] %v10860_v0  ;;  %v10881_v0 = vadd.f32 -128.0, %v17190_v62  ;;  %v17204_v62 = vld [vmem:[#allocation359_spill] sm:$0xff] }
 0x43f   : > { %17179 = vst [vmem:[#allocation444_spill] sm:$0xff] %v10863_v11  ;;  %v10884_v11 = vadd.f32 -128.0, %v17192_v39  ;;  %v17206_v39 = vld [vmem:[#allocation93_spill] sm:$0xff] }
 0x440   : > { %17181 = vst [vmem:[#allocation137_spill] sm:$0xff] %v10866_v22  ;;  %v10887_v22 = vadd.f32 -128.0, %v17194_v32  ;;  %v17208_v32 = vld [vmem:[#allocation360_spill] sm:$0xff] }
 0x441   : > { %17183 = vst [vmem:[#allocation445_spill] sm:$0xff] %v10869_v42  ;;  %v10890_v42 = vadd.f32 -128.0, %v17196_v48  ;;  %v17210_v48 = vld [vmem:[#allocation362_spill] sm:$0xff] }
 0x442   : > { %17185 = vst [vmem:[#allocation446_spill] sm:$0xff] %v10872_v6  ;;  %v10893_v6 = vadd.f32 -128.0, %v17198_v43  ;;  %v17212_v43 = vld [vmem:[#allocation94_spill] sm:$0xff] }
 0x443   : > { %17187 = vst [vmem:[#allocation138_spill] sm:$0xff] %v10875_v25  ;;  %v10896_v25 = vadd.f32 -128.0, %v17200_v2  ;;  %v17214_v2 = vld [vmem:[#allocation361_spill] sm:$0xff] }
 0x444   : > { %17189 = vst [vmem:[#allocation447_spill] sm:$0xff] %v10878_v54  ;;  %v10899_v54 = vadd.f32 -128.0, %v17202_v52  ;;  %v17216_v52 = vld [vmem:[#allocation364_spill] sm:$0xff] }
 0x445   : > { %17191 = vst [vmem:[#allocation448_spill] sm:$0xff] %v10881_v0  ;;  %v10902_v0 = vadd.f32 -128.0, %v17204_v62  ;;  %v17218_v62 = vld [vmem:[#allocation95_spill] sm:$0xff] }
 0x446   : > { %17193 = vst [vmem:[#allocation139_spill] sm:$0xff] %v10884_v11  ;;  %v10905_v11 = vadd.f32 -128.0, %v17206_v39  ;;  %v17220_v39 = vld [vmem:[#allocation363_spill] sm:$0xff] }
 0x447   : > { %17195 = vst [vmem:[#allocation449_spill] sm:$0xff] %v10887_v22  ;;  %v10908_v22 = vadd.f32 -128.0, %v17208_v32  ;;  %v17222_v32 = vld [vmem:[#allocation365_spill] sm:$0xff] }
 0x448   : > { %17197 = vst [vmem:[#allocation451_spill] sm:$0xff] %v10890_v42  ;;  %v10911_v42 = vadd.f32 -128.0, %v17210_v48  ;;  %v17224_v48 = vld [vmem:[#allocation96_spill] sm:$0xff] }
 0x449   : > { %17199 = vst [vmem:[#allocation140_spill] sm:$0xff] %v10893_v6  ;;  %v10914_v6 = vadd.f32 -128.0, %v17212_v43  ;;  %v17226_v43 = vld [vmem:[#allocation366_spill] sm:$0xff] }
 0x44a   : > { %17201 = vst [vmem:[#allocation450_spill] sm:$0xff] %v10896_v25  ;;  %v10917_v25 = vadd.f32 -128.0, %v17214_v2  ;;  %v17228_v2 = vld [vmem:[#allocation367_spill] sm:$0xff] }
 0x44b   : > { %17203 = vst [vmem:[#allocation452_spill] sm:$0xff] %v10899_v54  ;;  %v10920_v54 = vadd.f32 -128.0, %v17216_v52  ;;  %v17230_v52 = vld [vmem:[#allocation97_spill] sm:$0xff] }
 0x44c   : > { %17205 = vst [vmem:[#allocation141_spill] sm:$0xff] %v10902_v0  ;;  %v10923_v0 = vadd.f32 -128.0, %v17218_v62  ;;  %v17232_v62 = vld [vmem:[#allocation368_spill] sm:$0xff] }
 0x44d   : > { %17207 = vst [vmem:[#allocation454_spill] sm:$0xff] %v10905_v11  ;;  %v10926_v11 = vadd.f32 -128.0, %v17220_v39  ;;  %v17234_v39 = vld [vmem:[#allocation369_spill] sm:$0xff] }
 0x44e   : > { %17209 = vst [vmem:[#allocation453_spill] sm:$0xff] %v10908_v22  ;;  %v10929_v22 = vadd.f32 -128.0, %v17222_v32  ;;  %v17236_v32 = vld [vmem:[#allocation98_spill] sm:$0xff] }
 0x44f   : > { %17211 = vst [vmem:[#allocation142_spill] sm:$0xff] %v10911_v42  ;;  %v10932_v42 = vadd.f32 -128.0, %v17224_v48  ;;  %v17238_v48 = vld [vmem:[#allocation370_spill] sm:$0xff] }
 0x450   : > { %17213 = vst [vmem:[#allocation455_spill] sm:$0xff] %v10914_v6  ;;  %v10935_v6 = vadd.f32 -128.0, %v17226_v43  ;;  %v17240_v43 = vld [vmem:[#allocation371_spill] sm:$0xff] }
 0x451   : > { %17215 = vst [vmem:[#allocation456_spill] sm:$0xff] %v10917_v25  ;;  %v10938_v25 = vadd.f32 -128.0, %v17228_v2  ;;  %v17242_v2 = vld [vmem:[#allocation99_spill] sm:$0xff] }
 0x452   : > { %17217 = vst [vmem:[#allocation143_spill] sm:$0xff] %v10920_v54  ;;  %v10941_v54 = vadd.f32 -128.0, %v17230_v52  ;;  %v17244_v52 = vld [vmem:[#allocation372_spill] sm:$0xff] }
 0x453   : > { %17219 = vst [vmem:[#allocation457_spill] sm:$0xff] %v10923_v0  ;;  %v10944_v0 = vadd.f32 -128.0, %v17232_v62  ;;  %v17246_v62 = vld [vmem:[#allocation374_spill] sm:$0xff] }
 0x454   : > { %17221 = vst [vmem:[#allocation459_spill] sm:$0xff] %v10926_v11  ;;  %v10947_v11 = vadd.f32 -128.0, %v17234_v39  ;;  %v17248_v39 = vld [vmem:[#allocation100_spill] sm:$0xff] }
 0x455   : > { %17223 = vst [vmem:[#allocation144_spill] sm:$0xff] %v10929_v22  ;;  %v10950_v22 = vadd.f32 -128.0, %v17236_v32  ;;  %v17250_v32 = vld [vmem:[#allocation373_spill] sm:$0xff] }
 0x456   : > { %17225 = vst [vmem:[#allocation458_spill] sm:$0xff] %v10932_v42  ;;  %v10953_v42 = vadd.f32 -128.0, %v17238_v48  ;;  %v17252_v48 = vld [vmem:[#allocation375_spill] sm:$0xff] }
 0x457   : > { %17227 = vst [vmem:[#allocation461_spill] sm:$0xff] %v10935_v6  ;;  %v10956_v6 = vadd.f32 -128.0, %v17240_v43  ;;  %v17254_v43 = vld [vmem:[#allocation101_spill] sm:$0xff] }
 0x458   : > { %17229 = vst [vmem:[#allocation145_spill] sm:$0xff] %v10938_v25  ;;  %v10959_v25 = vadd.f32 -128.0, %v17242_v2  ;;  %v17256_v2 = vld [vmem:[#allocation377_spill] sm:$0xff] }
 0x459   : > { %17231 = vst [vmem:[#allocation460_spill] sm:$0xff] %v10941_v54  ;;  %v10962_v54 = vadd.f32 -128.0, %v17244_v52  ;;  %v17258_v52 = vld [vmem:[#allocation376_spill] sm:$0xff] }
 0x45a   : > { %17233 = vst [vmem:[#allocation462_spill] sm:$0xff] %v10944_v0  ;;  %v10965_v0 = vadd.f32 -128.0, %v17246_v62  ;;  %v17260_v62 = vld [vmem:[#allocation102_spill] sm:$0xff] }
 0x45b   : > { %17235 = vst [vmem:[#allocation146_spill] sm:$0xff] %v10947_v11  ;;  %v10968_v11 = vadd.f32 -128.0, %v17248_v39  ;;  %v17262_v39 = vld [vmem:[#allocation378_spill] sm:$0xff] }
 0x45c   : > { %17237 = vst [vmem:[#allocation463_spill] sm:$0xff] %v10950_v22  ;;  %v10971_v22 = vadd.f32 -128.0, %v17250_v32  ;;  %v17264_v32 = vld [vmem:[#allocation379_spill] sm:$0xff] }
 0x45d   : > { %17239 = vst [vmem:[#allocation465_spill] sm:$0xff] %v10953_v42  ;;  %v10974_v42 = vadd.f32 -128.0, %v17252_v48  ;;  %v17266_v48 = vld [vmem:[#allocation103_spill] sm:$0xff] }
 0x45e   : > { %17241 = vst [vmem:[#allocation147_spill] sm:$0xff] %v10956_v6  ;;  %v10977_v6 = vadd.f32 -128.0, %v17254_v43  ;;  %v17268_v43 = vld [vmem:[#allocation380_spill] sm:$0xff] }
 0x45f   : > { %17243 = vst [vmem:[#allocation464_spill] sm:$0xff] %v10959_v25  ;;  %v10980_v25 = vadd.f32 -128.0, %v17256_v2  ;;  %v17270_v2 = vld [vmem:[#allocation104_spill] sm:$0xff] }
 0x460   : > { %17245 = vst [vmem:[#allocation466_spill] sm:$0xff] %v10962_v54  ;;  %v10983_v54 = vadd.f32 -128.0, %v17258_v52  ;;  %v17272_v52 = vld [vmem:[#allocation381_spill] sm:$0xff] }
 0x461   : > { %17247 = vst [vmem:[#allocation148_spill] sm:$0xff] %v10965_v0  ;;  %v10986_v0 = vadd.f32 -128.0, %v17260_v62  ;;  %v17274_v62 = vld [vmem:[#allocation383_spill] sm:$0xff] }
 0x462   : > { %17249 = vst [vmem:[#allocation467_spill] sm:$0xff] %v10968_v11  ;;  %v10989_v11 = vadd.f32 -128.0, %v17262_v39  ;;  %v17276_v39 = vld [vmem:[#allocation105_spill] sm:$0xff] }
 0x463   : > { %17251 = vst [vmem:[#allocation468_spill] sm:$0xff] %v10971_v22  ;;  %v10992_v22 = vadd.f32 -128.0, %v17264_v32  ;;  %v17278_v32 = vld [vmem:[#allocation382_spill] sm:$0xff] }
 0x464   : > { %17253 = vst [vmem:[#allocation149_spill] sm:$0xff] %v10974_v42  ;;  %v10995_v42 = vadd.f32 -128.0, %v17266_v48  ;;  %v17280_v48 = vld [vmem:[#allocation384_spill] sm:$0xff] }
 0x465   : > { %17255 = vst [vmem:[#allocation469_spill] sm:$0xff] %v10977_v6  ;;  %v10998_v6 = vadd.f32 -128.0, %v17268_v43  ;;  %v17282_v43 = vld [vmem:[#allocation106_spill] sm:$0xff] }
 0x466   : > { %17257 = vst [vmem:[#allocation471_spill] sm:$0xff] %v10980_v25  ;;  %v11001_v25 = vadd.f32 -128.0, %v17270_v2  ;;  %v17284_v2 = vld [vmem:[#allocation385_spill] sm:$0xff] }
 0x467   : > { %17259 = vst [vmem:[#allocation150_spill] sm:$0xff] %v10983_v54  ;;  %v11004_v54 = vadd.f32 -128.0, %v17272_v52  ;;  %v17285_v52 = vld [vmem:[#allocation386_spill] sm:$0xff] }
 0x468   : > { %17261 = vst [vmem:[#allocation470_spill] sm:$0xff] %v10986_v0  ;;  %v11007_v0 = vadd.f32 -128.0, %v17274_v62  ;;  %v17286_v62 = vld [vmem:[#allocation107_spill] sm:$0xff] }
 0x469   : > { %17263 = vst [vmem:[#allocation472_spill] sm:$0xff] %v10989_v11  ;;  %v11010_v11 = vadd.f32 -128.0, %v17276_v39  ;;  %v17287_v39 = vld [vmem:[#allocation387_spill] sm:$0xff] }
 0x46a   : > { %17265 = vst [vmem:[#allocation151_spill] sm:$0xff] %v10992_v22  ;;  %v11013_v22 = vadd.f32 -128.0, %v17278_v32  ;;  %v17288_v32 = vld [vmem:[#allocation388_spill] sm:$0xff] }
 0x46b   : > { %17267 = vst [vmem:[#allocation474_spill] sm:$0xff] %v10995_v42  ;;  %v11016_v42 = vadd.f32 -128.0, %v17280_v48  ;;  %v17289_v48 = vld [vmem:[#allocation108_spill] sm:$0xff] }
 0x46c   : > { %17269 = vst [vmem:[#allocation473_spill] sm:$0xff] %v10998_v6  ;;  %v11019_v6 = vadd.f32 -128.0, %v17282_v43  ;;  %v17290_v43 = vld [vmem:[#allocation389_spill] sm:$0xff] }
 0x46d   : > { %17271 = vst [vmem:[#allocation152_spill] sm:$0xff] %v11001_v25  ;;  %v11022_v25 = vadd.f32 -128.0, %v17284_v2  ;;  %v11043_v2 = vadd.f32 -128.0, %v10437_v47  ;;  %v11064_v47 = vadd.f32 -128.0, %v10465_v44  ;;  %v3747_v44 = vceil.f32 %v10560_v18 }
 0x46e   : > { %17273 = vst [vmem:[#allocation475_spill] sm:$0xff] %v11004_v54  ;;  %v11025_v54 = vadd.f32 -128.0, %v17285_v52  ;;  %v11046_v52 = vadd.f32 -128.0, %v10441_v38  ;;  %v11067_v38 = vadd.f32 -128.0, %v10469_v26  ;;  %v3748_v26 = vfloor.f32 %v10560_v18 }
 0x46f   : > { %17275 = vst [vmem:[#allocation476_spill] sm:$0xff] %v11007_v0  ;;  %v11028_v0 = vadd.f32 -128.0, %v17286_v62  ;;  %v11049_v62 = vadd.f32 -128.0, %v10445_v20  ;;  %v11070_v20 = vadd.f32 -128.0, %v10473_v63  ;;  %v3752_v63 = vceil.f32 %v10563_v27 }
 0x470   : > { %17277 = vst [vmem:[#allocation153_spill] sm:$0xff] %v11010_v11  ;;  %v11031_v11 = vadd.f32 -128.0, %v17287_v39  ;;  %v11052_v39 = vadd.f32 -128.0, %v10449_v30  ;;  %v11073_v30 = vadd.f32 -128.0, %v10477_v29  ;;  %v3753_v29 = vfloor.f32 %v10563_v27 }
 0x471   : > { %17279 = vst [vmem:[#allocation477_spill] sm:$0xff] %v11013_v22  ;;  %v11034_v22 = vadd.f32 -128.0, %v17288_v32  ;;  %v11055_v32 = vadd.f32 -128.0, %v10453_v46  ;;  %v11076_v46 = vadd.f32 -128.0, %v10481_v40  ;;  %v17294_v40 = vld [vmem:[#allocation390_spill] sm:$0xff]  ;;  %v11106_v18 = vadd.f32 -128.0, %v10513_v1 }
 0x472   : > { %17281 = vst [vmem:[#allocation479_spill] sm:$0xff] %v11016_v42  ;;  %v11037_v42 = vadd.f32 -128.0, %v17289_v48  ;;  %v11058_v48 = vadd.f32 -128.0, %v10457_v51  ;;  %v11079_v51 = vadd.f32 -128.0, %v10485_v37  ;;  %v11096_v37 = vadd.f32 -128.0, %v10501_v14 }
 0x473   : > { %17283 = vst [vmem:[#allocation154_spill] sm:$0xff] %v11019_v6  ;;  %v11040_v6 = vadd.f32 -128.0, %v17290_v43  ;;  %v11061_v43 = vadd.f32 -128.0, %v10461_v35  ;;  %v11082_v35 = vadd.f32 -128.0, %v10489_v34  ;;  %v11099_v34 = vadd.f32 -128.0, %v10505_v50 }
 0x474   : > { %17291 = vst [vmem:[#allocation478_spill] sm:$0xff] %v11067_v38  ;;  %v11087_v38 = vadd.f32 -128.0, %v10493_v31  ;;  %v11103_v31 = vadd.f32 -128.0, %v10509_v5  ;;  %v11115_v14 = vadd.f32 -128.0, %v10525_v23  ;;  %v11118_v50 = vadd.f32 -128.0, %v10529_v12 }
 0x475   : > { %17292 = vst [vmem:[#allocation481_spill] sm:$0xff] %v11076_v46  ;;  %v11093_v46 = vadd.f32 -128.0, %v17294_v40  ;;  %v11112_v40 = vadd.f32 -128.0, %v10521_v19  ;;  %v3757_v5 = vceil.f32 %v10566_v21  ;;  %v11123_v27 = vsel %vm3751_vm10, %v3752_v63, %v3753_v29 }
 0x476   : > { %17293 = vst [vmem:[#allocation155_spill] sm:$0xff] %v11087_v38  ;;  %v11109_v38 = vadd.f32 -128.0, %v10517_v59  ;;  %v3758_v1 = vfloor.f32 %v10566_v21  ;;  %v3762_v59 = vceil.f32 %v10569_v57  ;;  %v11129_v19 = vadd.f32 -128.0, %v10533_v28 }
 0x477   : > { %17295 = vst [vmem:[#allocation480_spill] sm:$0xff] %v11099_v34  ;;  %v11120_v34 = vsel %vm3746_vm9, %v3747_v44, %v3748_v26  ;;  %v11132_v23 = vadd.f32 -128.0, %v10537_v36  ;;  %v11137_v12 = vadd.f32 -128.0, %v10541_v49  ;;  %v11140_v44 = vadd.f32 -128.0, %v10545_v16 }
 0x478   : > { %17296 = vst [vmem:[#allocation482_spill] sm:$0xff] %v11109_v38  ;;  %v3763_v38 = vfloor.f32 %v10569_v57  ;;  %v11143_v26 = vadd.f32 -128.0, %v10549_v15  ;;  %v11146_v63 = vadd.f32 -128.0, %v10553_v60  ;;  %v11149_v28 = vadd.f32 -128.0, %v10557_v56 }
 0x479   : > { %17297 = vst [vmem:[#allocation156_spill] sm:$0xff] %v11123_v27  ;;  %v11154_v49 = vsel %vm3756_vm11, %v3757_v5, %v3758_v1  ;;  %v3767_v16 = vceil.f32 %v10572_v3  ;;  %v3768_v15 = vfloor.f32 %v10572_v3  ;;  %v3772_v60 = vceil.f32 %v10575_v41 }
 0x47a   : > { %17298 = vst [vmem:[#allocation483_spill] sm:$0xff] %v11132_v23  ;;  %v11156_v57 = vsel %vm3761_vm12, %v3762_v59, %v3763_v38  ;;  %v3773_v56 = vfloor.f32 %v10575_v41  ;;  %v3777_v29 = vceil.f32 %v10578_v53  ;;  %v3778_v21 = vfloor.f32 %v10578_v53 }
 0x47b   : > { %17299 = vst [vmem:[#allocation485_spill] sm:$0xff] %v11137_v12  ;;  %v3782_v5 = vceil.f32 %v10581_v55  ;;  %v3783_v38 = vfloor.f32 %v10581_v55  ;;  %v3787_v1 = vceil.f32 %v10584_v61  ;;  %v3788_v59 = vfloor.f32 %v10584_v61 }
 0x47c   : > { %17300 = vst [vmem:[#allocation157_spill] sm:$0xff] %v11140_v44  ;;  %v3792_v36 = vceil.f32 %v10587_v9  ;;  %v11182_v55 = vsel %vm3766_vm13, %v3767_v16, %v3768_v15  ;;  %v11186_v61 = vsel %vm3771_vm14, %v3772_v60, %v3773_v56  ;;  %v11190_v23 = vsel %vm3776_vm15, %v3777_v29, %v3778_v21  ;;  %v17318_v21 = vld [vmem:[#allocation392_spill] sm:$0xff] }
 0x47d   : > { %17301 = vst [vmem:[#allocation484_spill] sm:$0xff] %v11143_v26  ;;  %v3798_v26 = vfloor.f32 %v10590_v17  ;;  %v11192_v27 = vsel %vm3781_vm0, %v3782_v5, %v3783_v38  ;;  %v11194_v44 = vsel %vm3786_vm1, %v3787_v1, %v3788_v59  ;;  %v3803_v3 = vfloor.f32 %v10593_v45 }
 0x47e   : > { %17302 = vst [vmem:[#allocation486_spill] sm:$0xff] %v11146_v63  ;;  %v3797_v63 = vceil.f32 %v10590_v17  ;;  %v3807_v41 = vceil.f32 %v10596_v58  ;;  %v3808_v53 = vfloor.f32 %v10596_v58  ;;  %v3812_v15 = vceil.f32 %v10599_v8 }
 0x47f   : > { %17303 = vst [vmem:[#allocation158_spill] sm:$0xff] %v11149_v28  ;;  %v3793_v28 = vfloor.f32 %v10587_v9  ;;  %v3802_v9 = vceil.f32 %v10593_v45  ;;  %v3813_v60 = vfloor.f32 %v10599_v8  ;;  %v3817_v38 = vceil.f32 %v10602_v13 }
 0x480   : > { %17304 = vst [vmem:[#allocation487_spill] sm:$0xff] %v11154_v49  ;;  %v11201_v16 = vsel %vm3796_vm3, %v3797_v63, %v3798_v26  ;;  %v11220_v5 = vsel %vm3806_vm5, %v3807_v41, %v3808_v53  ;;  %v3818_v1 = vfloor.f32 %v10602_v13  ;;  %v3822_v8 = vceil.f32 %v10605_v24  ;;  %v17319_v26 = vld [vmem:[#allocation110_spill] sm:$0xff] }
 0x481   : > { %17305 = vst [vmem:[#allocation488_spill] sm:$0xff] %v11156_v57  ;;  %v11199_v17 = vsel %vm3791_vm2, %v3792_v36, %v3793_v28  ;;  %v11218_v58 = vsel %vm3801_vm4, %v3802_v9, %v3803_v3  ;;  %v11225_v59 = vsel %vm3811_vm6, %v3812_v15, %v3813_v60  ;;  %v3823_v56 = vfloor.f32 %v10605_v24  ;;  %v17316_v3 = vld [vmem:[#allocation109_spill] sm:$0xff]  ;;  %v17317_v15 = vld [vmem:[#allocation114_spill] sm:$0xff] }
 0x482   : > { %17306 = vst [vmem:[#allocation159_spill] sm:$0xff] %v11182_v55  ;;  %vm3826_vm9 = vcmp.lt.s32.totalorder %v10608_v10, 0  ;;  %v3827_v45 = vceil.f32 %v10608_v10  ;;  %v3828_v9 = vfloor.f32 %v10608_v10  ;;  %vm3831_vm10 = vcmp.lt.s32.totalorder %v17316_v3, 0  ;;  %v17328_v24 = vld [vmem:[#allocation393_spill] sm:$0xff] }
 0x483   : > { %17307 = vst [vmem:[#allocation489_spill] sm:$0xff] %v11186_v61  ;;  %v3832_v41 = vceil.f32 %v17316_v3  ;;  %v3833_v53 = vfloor.f32 %v17316_v3  ;;  %v3837_v60 = vceil.f32 %v17317_v15  ;;  %v3838_v36 = vfloor.f32 %v17317_v15 }
 0x484   : > { %17308 = vst [vmem:[#allocation492_spill] sm:$0xff] %v11190_v23  ;;  %v3842_v63 = vceil.f32 %v17318_v21  ;;  %v3843_v12 = vfloor.f32 %v17318_v21  ;;  %v3847_v28 = vceil.f32 %v17319_v26  ;;  %v3848_v29 = vfloor.f32 %v17319_v26 }
 0x485   : > { %17309 = vst [vmem:[#allocation160_spill] sm:$0xff] %v11192_v27  ;;  %vm3836_vm11 = vcmp.lt.s32.totalorder %v17317_v15, 0  ;;  %vm3841_vm12 = vcmp.lt.s32.totalorder %v17318_v21, 0  ;;  %vm3846_vm13 = vcmp.lt.s32.totalorder %v17319_v26, 0  ;;  %v11254_v57 = vsel %vm3821_vm8, %v3822_v8, %v3823_v56  ;;  %v17324_v26 = vld [vmem:[#allocation391_spill] sm:$0xff]  ;;  %v17391_v27 = vld [vmem:[#allocation413_spill] sm:$0xff] }
 0x486   : > { %17310 = vst [vmem:[#allocation490_spill] sm:$0xff] %v11194_v44  ;;  %v11258_v61 = vsel %vm3826_vm9, %v3827_v45, %v3828_v9  ;;  %v11262_v21 = vsel %vm3831_vm10, %v3832_v41, %v3833_v53  ;;  %v3852_v15 = vceil.f32 %v17324_v26  ;;  %v3853_v55 = vfloor.f32 %v17324_v26 }
 0x487   : > { %17311 = vst [vmem:[#allocation493_spill] sm:$0xff] %v11199_v17  ;;  %v11250_v17 = vsel %vm3816_vm7, %v3817_v38, %v3818_v1  ;;  %v11268_v13 = vsel %vm3841_vm12, %v3842_v63, %v3843_v12  ;;  %v11270_v38 = vsel %vm3846_vm13, %v3847_v28, %v3848_v29  ;;  %vm3851_vm14 = vcmp.lt.s32.totalorder %v17324_v26, 0  ;;  %v17329_v1 = vld [vmem:[#allocation111_spill] sm:$0xff]  ;;  %v17332_v28 = vld [vmem:[#allocation394_spill] sm:$0xff]  ;;  %v17337_v26 = vld [vmem:[#allocation112_spill] sm:$0xff] }
 0x488   : > { %17312 = vst [vmem:[#allocation161_spill] sm:$0xff] %v11201_v16  ;;  %v11266_v16 = vsel %vm3836_vm11, %v3837_v60, %v3838_v36  ;;  %vm3856_vm15 = vcmp.lt.s32.totalorder %v17328_v24, 0  ;;  %v3857_v10 = vceil.f32 %v17328_v24  ;;  %v3858_v56 = vfloor.f32 %v17328_v24  ;;  %v17330_v36 = vld [vmem:[#allocation395_spill] sm:$0xff] }
 0x489   : > { %17313 = vst [vmem:[#allocation491_spill] sm:$0xff] %v11218_v58  ;;  %vm3861_vm0 = vcmp.lt.s32.totalorder %v17329_v1, 0  ;;  %v3862_v8 = vceil.f32 %v17329_v1  ;;  %v3863_v45 = vfloor.f32 %v17329_v1  ;;  %v3867_v9 = vceil.f32 %v17330_v36 }
 0x48a   : > { %17314 = vst [vmem:[#allocation496_spill] sm:$0xff] %v11220_v5  ;;  %v3868_v12 = vfloor.f32 %v17330_v36  ;;  %v11281_v29 = vsel %vm3851_vm14, %v3852_v15, %v3853_v55  ;;  %vm3866_vm1 = vcmp.lt.s32.totalorder %v17330_v36, 0  ;;  %v3872_v63 = vceil.f32 %v17332_v28  ;;  %v17338_v55 = vld [vmem:[#allocation396_spill] sm:$0xff] }
 0x48b   : > { %17315 = vst [vmem:[#allocation162_spill] sm:$0xff] %v11225_v59  ;;  %v3873_v3 = vfloor.f32 %v17332_v28  ;;  %vm3871_vm2 = vcmp.lt.s32.totalorder %v17332_v28, 0  ;;  %v11297_v44 = vsel %vm3856_vm15, %v3857_v10, %v3858_v56  ;;  %v11301_v53 = vsel %vm3861_vm0, %v3862_v8, %v3863_v45  ;;  %v17339_v10 = vld [vmem:[#allocation397_spill] sm:$0xff] }
 0x48c   : > { %17320 = vst [vmem:[#allocation494_spill] sm:$0xff] %v11250_v17  ;;  %v11303_v60 = vsel %vm3866_vm1, %v3867_v9, %v3868_v12  ;;  %vm3876_vm3 = vcmp.lt.s32.totalorder %v17337_v26, 0  ;;  %v3877_v41 = vceil.f32 %v17337_v26  ;;  %v3878_v15 = vfloor.f32 %v17337_v26  ;;  %v17340_v8 = vld [vmem:[#allocation113_spill] sm:$0xff] }
 0x48d   : > { %17321 = vst [vmem:[#allocation497_spill] sm:$0xff] %v11254_v57  ;;  %v11305_v28 = vsel %vm3871_vm2, %v3872_v63, %v3873_v3  ;;  %v3882_v36 = vceil.f32 %v17338_v55  ;;  %v3883_v24 = vfloor.f32 %v17338_v55  ;;  %v3887_v56 = vceil.f32 %v17339_v10  ;;  %v17345_v63 = vld [vmem:[#allocation399_spill] sm:$0xff] }
 0x48e   : > { %17322 = vst [vmem:[#allocation163_spill] sm:$0xff] %v11258_v61  ;;  %v3888_v1 = vfloor.f32 %v17339_v10  ;;  %vm3881_vm4 = vcmp.lt.s32.totalorder %v17338_v55, 0  ;;  %vm3886_vm5 = vcmp.lt.s32.totalorder %v17339_v10, 0  ;;  %v3892_v45 = vceil.f32 %v17340_v8  ;;  %v17342_v55 = vld [vmem:[#allocation398_spill] sm:$0xff] }
 0x48f   : > { %17323 = vst [vmem:[#allocation495_spill] sm:$0xff] %v11262_v21  ;;  %v3893_v9 = vfloor.f32 %v17340_v8  ;;  %vm3891_vm6 = vcmp.lt.s32.totalorder %v17340_v8, 0  ;;  %v11325_v21 = vsel %vm3876_vm3, %v3877_v41, %v3878_v15  ;;  %v3897_v10 = vceil.f32 %v17342_v55  ;;  %v17347_v41 = vld [vmem:[#allocation401_spill] sm:$0xff] }
 0x490   : > { %17325 = vst [vmem:[#allocation499_spill] sm:$0xff] %v11266_v16  ;;  %v3898_v61 = vfloor.f32 %v17342_v55  ;;  %v11331_v57 = vsel %vm3886_vm5, %v3887_v56, %v3888_v1  ;;  %vm3896_vm7 = vcmp.lt.s32.totalorder %v17342_v55, 0  ;;  %vm3901_vm8 = vcmp.lt.s32.totalorder %v17345_v63, 0 }
 0x491   : > { %17326 = vst [vmem:[#allocation164_spill] sm:$0xff] %v11268_v13  ;;  %v11335_v3 = vsel %vm3891_vm6, %v3892_v45, %v3893_v9  ;;  %v3902_v8 = vceil.f32 %v17345_v63  ;;  %v3903_v26 = vfloor.f32 %v17345_v63  ;;  %vm3906_vm9 = vcmp.lt.s32.totalorder %v17347_v41, 0  ;;  %v17350_v45 = vld [vmem:[#allocation400_spill] sm:$0xff] }
 0x492   : > { %17327 = vst [vmem:[#allocation498_spill] sm:$0xff] %v11270_v38  ;;  %v3907_v15 = vceil.f32 %v17347_v41  ;;  %v3908_v58 = vfloor.f32 %v17347_v41  ;;  %v11344_v1 = vsel %vm3896_vm7, %v3897_v10, %v3898_v61  ;;  %v3917_v9 = vceil.f32 %v17350_v45  ;;  %v17358_v10 = vld [vmem:[#allocation403_spill] sm:$0xff] }
 0x493   : > { %17331 = vst [vmem:[#allocation501_spill] sm:$0xff] %v11281_v29  ;;  %v11329_v29 = vsel %vm3881_vm4, %v3882_v36, %v3883_v24  ;;  %v17348_v36 = vld [vmem:[#allocation115_spill] sm:$0xff]  ;;  %v3918_v55 = vfloor.f32 %v17350_v45  ;;  %vm3916_vm11 = vcmp.lt.s32.totalorder %v17350_v45, 0  ;;  %vm3931_vm14 = vcmp.lt.s32.totalorder %v17358_v10, 0 }
 0x494   : > { %17333 = vst [vmem:[#allocation165_spill] sm:$0xff] %v11297_v44  ;;  %v3912_v24 = vceil.f32 %v17348_v36  ;;  %v3913_v56 = vfloor.f32 %v17348_v36  ;;  %vm3911_vm10 = vcmp.lt.s32.totalorder %v17348_v36, 0  ;;  %v11360_v36 = vsel %vm3901_vm8, %v3902_v8, %v3903_v26  ;;  %v17356_v44 = vld [vmem:[#allocation116_spill] sm:$0xff] }
 0x495   : > { %17334 = vst [vmem:[#allocation500_spill] sm:$0xff] %v11301_v53  ;;  %v11364_v45 = vsel %vm3906_vm9, %v3907_v15, %v3908_v58  ;;  %vm3926_vm13 = vcmp.lt.s32.totalorder %v17356_v44, 0  ;;  %v3927_v61 = vceil.f32 %v17356_v44  ;;  %v3932_v63 = vceil.f32 %v17358_v10  ;;  %v17359_v58 = vld [vmem:[#allocation404_spill] sm:$0xff]  ;;  %v17360_v15 = vld [vmem:[#allocation117_spill] sm:$0xff] }
 0x496   : > { %17335 = vst [vmem:[#allocation502_spill] sm:$0xff] %v11303_v60  ;;  %v11366_v12 = vsel %vm3911_vm10, %v3912_v24, %v3913_v56  ;;  %v3933_v8 = vfloor.f32 %v17358_v10  ;;  %v3937_v26 = vceil.f32 %v17359_v58  ;;  %v3938_v41 = vfloor.f32 %v17359_v58  ;;  %v17369_v10 = vld [vmem:[#allocation407_spill] sm:$0xff] }
 0x497   : > { %17336 = vst [vmem:[#allocation166_spill] sm:$0xff] %v11305_v28  ;;  %v17351_v28 = vld [vmem:[#allocation402_spill] sm:$0xff]  ;;  %v3942_v24 = vceil.f32 %v17360_v15  ;;  %v3943_v56 = vfloor.f32 %v17360_v15  ;;  %vm3936_vm15 = vcmp.lt.s32.totalorder %v17359_v58, 0  ;;  %vm3941_vm0 = vcmp.lt.s32.totalorder %v17360_v15, 0 }
 0x498   : > { %17341 = vst [vmem:[#allocation503_spill] sm:$0xff] %v11325_v21  ;;  %v3922_v60 = vceil.f32 %v17351_v28  ;;  %v3923_v53 = vfloor.f32 %v17351_v28  ;;  %vm3921_vm12 = vcmp.lt.s32.totalorder %v17351_v28, 0  ;;  %v11368_v21 = vsel %vm3916_vm11, %v3917_v9, %v3918_v55 }
 0x499   : > { %17343 = vst [vmem:[#allocation505_spill] sm:$0xff] %v11329_v29  ;;  %v3928_v28 = vfloor.f32 %v17356_v44  ;;  %v11398_v15 = vsel %vm3931_vm14, %v3932_v63, %v3933_v8  ;;  %v11400_v17 = vsel %vm3936_vm15, %v3937_v26, %v3938_v41  ;;  %v11402_v55 = vsel %vm3941_vm0, %v3942_v24, %v3943_v56  ;;  %v17368_v29 = vld [vmem:[#allocation118_spill] sm:$0xff]  ;;  %v17370_v8 = vld [vmem:[#allocation408_spill] sm:$0xff]  ;;  %v17371_v24 = vld [vmem:[#allocation119_spill] sm:$0xff] }
 0x49a   : > { %17344 = vst [vmem:[#allocation167_spill] sm:$0xff] %v11331_v57  ;;  %v11373_v38 = vsel %vm3921_vm12, %v3922_v60, %v3923_v53  ;;  %v17361_v53 = vld [vmem:[#allocation405_spill] sm:$0xff]  ;;  %vm3956_vm3 = vcmp.lt.s32.totalorder %v17368_v29, 0  ;;  %v3957_v44 = vceil.f32 %v17368_v29  ;;  %vm3961_vm4 = vcmp.lt.s32.totalorder %v17369_v10, 0 }
 0x49b   : > { %17346 = vst [vmem:[#allocation504_spill] sm:$0xff] %v11335_v3  ;;  %v3947_v60 = vceil.f32 %v17361_v53  ;;  %v3948_v9 = vfloor.f32 %v17361_v53  ;;  %vm3946_vm1 = vcmp.lt.s32.totalorder %v17361_v53, 0  ;;  %v11394_v58 = vsel %vm3926_vm13, %v3927_v61, %v3928_v28  ;;  %v17366_v3 = vld [vmem:[#allocation406_spill] sm:$0xff] }
 0x49c   : > { %17349 = vst [vmem:[#allocation506_spill] sm:$0xff] %v11344_v1  ;;  %vm3951_vm2 = vcmp.lt.s32.totalorder %v17366_v3, 0  ;;  %v3952_v53 = vceil.f32 %v17366_v3  ;;  %v3953_v1 = vfloor.f32 %v17366_v3  ;;  %v3958_v61 = vfloor.f32 %v17368_v29 }
 0x49d   : > { %17352 = vst [vmem:[#allocation168_spill] sm:$0xff] %v11360_v36  ;;  %v11406_v57 = vsel %vm3946_vm1, %v3947_v60, %v3948_v9  ;;  %v3962_v28 = vceil.f32 %v17369_v10  ;;  %v3963_v63 = vfloor.f32 %v17369_v10  ;;  %v3967_v26 = vceil.f32 %v17370_v8  ;;  %v17372_v9 = vld [vmem:[#allocation409_spill] sm:$0xff] }
 0x49e   : > { %17353 = vst [vmem:[#allocation507_spill] sm:$0xff] %v11364_v45  ;;  %v3968_v41 = vfloor.f32 %v17370_v8  ;;  %v3972_v56 = vceil.f32 %v17371_v24  ;;  %v3973_v60 = vfloor.f32 %v17371_v24  ;;  %vm3966_vm5 = vcmp.lt.s32.totalorder %v17370_v8, 0 }
 0x49f   : > { %17354 = vst [vmem:[#allocation508_spill] sm:$0xff] %v11366_v12  ;;  %vm3971_vm6 = vcmp.lt.s32.totalorder %v17371_v24, 0  ;;  %vm3976_vm7 = vcmp.lt.s32.totalorder %v17372_v9, 0  ;;  %v11431_v8 = vsel %vm3951_vm2, %v3952_v53, %v3953_v1  ;;  %v11435_v24 = vsel %vm3956_vm3, %v3957_v44, %v3958_v61  ;;  %v17380_v53 = vld [vmem:[#allocation120_spill] sm:$0xff]  ;;  %v17381_v61 = vld [vmem:[#allocation410_spill] sm:$0xff] }
 0x4a0   : > { %17355 = vst [vmem:[#allocation169_spill] sm:$0xff] %v11368_v21  ;;  %v3978_v21 = vfloor.f32 %v17372_v9  ;;  %v11439_v12 = vsel %vm3961_vm4, %v3962_v28, %v3963_v63  ;;  %v11441_v45 = vsel %vm3966_vm5, %v3967_v26, %v3968_v41  ;;  %v11443_v36 = vsel %vm3971_vm6, %v3972_v56, %v3973_v60  ;;  %v17382_v63 = vld [vmem:[#allocation412_spill] sm:$0xff]  ;;  %v17383_v26 = vld [vmem:[#allocation121_spill] sm:$0xff]  ;;  %v17384_v60 = vld [vmem:[#allocation414_spill] sm:$0xff] }
 0x4a1   : > { %17357 = vst [vmem:[#allocation509_spill] sm:$0xff] %v11373_v38  ;;  %v3977_v38 = vceil.f32 %v17372_v9  ;;  %v17378_v9 = vld [vmem:[#allocation411_spill] sm:$0xff]  ;;  %vm3986_vm9 = vcmp.lt.s32.totalorder %v17380_v53, 0  ;;  %v3987_v29 = vceil.f32 %v17380_v53  ;;  %v3988_v44 = vfloor.f32 %v17380_v53 }
 0x4a2   : > { %17362 = vst [vmem:[#allocation511_spill] sm:$0xff] %v11394_v58  ;;  %vm3981_vm8 = vcmp.lt.s32.totalorder %v17378_v9, 0  ;;  %v3982_v3 = vceil.f32 %v17378_v9  ;;  %v3983_v1 = vfloor.f32 %v17378_v9  ;;  %vm3991_vm10 = vcmp.lt.s32.totalorder %v17381_v61, 0 }
 0x4a3   : > { %17363 = vst [vmem:[#allocation170_spill] sm:$0xff] %v11398_v15  ;;  %v11446_v49 = vsel %vm3976_vm7, %v3977_v38, %v3978_v21  ;;  %v3992_v10 = vceil.f32 %v17381_v61  ;;  %v3993_v28 = vfloor.f32 %v17381_v61  ;;  %vm3996_vm11 = vcmp.lt.s32.totalorder %v17382_v63, 0  ;;  %v17400_v15 = vld [vmem:[#allocation417_spill] sm:$0xff] }
 0x4a4   : > { %17364 = vst [vmem:[#allocation510_spill] sm:$0xff] %v11400_v17  ;;  %v3997_v21 = vceil.f32 %v17382_v63  ;;  %v3998_v38 = vfloor.f32 %v17382_v63  ;;  %v4002_v41 = vceil.f32 %v17383_v26  ;;  %v4003_v56 = vfloor.f32 %v17383_v26  ;;  %v17402_v17 = vld [vmem:[#allocation419_spill] sm:$0xff] }
 0x4a5   : > { %17365 = vst [vmem:[#allocation512_spill] sm:$0xff] %v11402_v55  ;;  %v4007_v13 = vceil.f32 %v17384_v60  ;;  %vm4001_vm12 = vcmp.lt.s32.totalorder %v17383_v26, 0  ;;  %vm4006_vm13 = vcmp.lt.s32.totalorder %v17384_v60, 0  ;;  %v11473_v16 = vsel %vm3981_vm8, %v3982_v3, %v3983_v1  ;;  %v17392_v1 = vld [vmem:[#allocation122_spill] sm:$0xff] }
 0x4a6   : > { %17367 = vst [vmem:[#allocation171_spill] sm:$0xff] %v11406_v57  ;;  %v4008_v57 = vfloor.f32 %v17384_v60  ;;  %v11477_v55 = vsel %vm3986_vm9, %v3987_v29, %v3988_v44  ;;  %v11481_v26 = vsel %vm3991_vm10, %v3992_v10, %v3993_v28  ;;  %v11485_v60 = vsel %vm3996_vm11, %v3997_v21, %v3998_v38  ;;  %v17393_v44 = vld [vmem:[#allocation415_spill] sm:$0xff]  ;;  %v17394_v28 = vld [vmem:[#allocation416_spill] sm:$0xff] }
 0x4a7   : > { %17373 = vst [vmem:[#allocation513_spill] sm:$0xff] %v11431_v8  ;;  %v11487_v58 = vsel %vm4001_vm12, %v4002_v41, %v4003_v56  ;;  %vm4011_vm14 = vcmp.lt.s32.totalorder %v17391_v27, 0  ;;  %v4012_v9 = vceil.f32 %v17391_v27  ;;  %v4013_v3 = vfloor.f32 %v17391_v27 }
 0x4a8   : > { %17374 = vst [vmem:[#allocation514_spill] sm:$0xff] %v11435_v24  ;;  %v11489_v59 = vsel %vm4006_vm13, %v4007_v13, %v4008_v57  ;;  %vm4016_vm15 = vcmp.lt.s32.totalorder %v17392_v1, 0  ;;  %v4017_v53 = vceil.f32 %v17392_v1  ;;  %v4018_v29 = vfloor.f32 %v17392_v1  ;;  %v17395_v13 = vld [vmem:[#allocation123_spill] sm:$0xff] }
 0x4a9   : > { %17375 = vst [vmem:[#allocation172_spill] sm:$0xff] %v11439_v12  ;;  %v4022_v61 = vceil.f32 %v17393_v44  ;;  %v4023_v10 = vfloor.f32 %v17393_v44  ;;  %v4027_v63 = vceil.f32 %v17394_v28  ;;  %v4028_v57 = vfloor.f32 %v17394_v28 }
 0x4aa   : > { %17376 = vst [vmem:[#allocation515_spill] sm:$0xff] %v11441_v45  ;;  %vm4021_vm0 = vcmp.lt.s32.totalorder %v17393_v44, 0  ;;  %vm4026_vm1 = vcmp.lt.s32.totalorder %v17394_v28, 0  ;;  %v4032_v21 = vceil.f32 %v17395_v13  ;;  %v4033_v38 = vfloor.f32 %v17395_v13 }
 0x4ab   : > { %17377 = vst [vmem:[#allocation518_spill] sm:$0xff] %v11443_v36  ;;  %vm4031_vm2 = vcmp.lt.s32.totalorder %v17395_v13, 0  ;;  %v11514_v28 = vsel %vm4011_vm14, %v4012_v9, %v4013_v3  ;;  %v11520_v41 = vsel %vm4021_vm0, %v4022_v61, %v4023_v10  ;;  %v11522_v56 = vsel %vm4026_vm1, %v4027_v63, %v4028_v57  ;;  %v17403_v3 = vld [vmem:[#allocation124_spill] sm:$0xff]  ;;  %v17405_v63 = vld [vmem:[#allocation421_spill] sm:$0xff] }
 0x4ac   : > { %17379 = vst [vmem:[#allocation173_spill] sm:$0xff] %v11446_v49  ;;  %v11518_v49 = vsel %vm4016_vm15, %v4017_v53, %v4018_v29  ;;  %vm4036_vm3 = vcmp.lt.s32.totalorder %v17400_v15, 0  ;;  %v11525_v13 = vsel %vm4031_vm2, %v4032_v21, %v4033_v38  ;;  %v4037_v8 = vceil.f32 %v17400_v15  ;;  %v17404_v29 = vld [vmem:[#allocation418_spill] sm:$0xff]  ;;  %v17406_v38 = vld [vmem:[#allocation125_spill] sm:$0xff] }
 0x4ad   : > { %17385 = vst [vmem:[#allocation516_spill] sm:$0xff] %v11473_v16  ;;  %v4038_v44 = vfloor.f32 %v17400_v15  ;;  %vm4041_vm4 = vcmp.lt.s32.totalorder %v17402_v17, 0  ;;  %v4042_v27 = vceil.f32 %v17402_v17  ;;  %v4043_v9 = vfloor.f32 %v17402_v17  ;;  %v17415_v15 = vld [vmem:[#allocation422_spill] sm:$0xff] }
 0x4ae   : > { %17386 = vst [vmem:[#allocation519_spill] sm:$0xff] %v11477_v55  ;;  %vm4046_vm5 = vcmp.lt.s32.totalorder %v17403_v3, 0  ;;  %v4047_v1 = vceil.f32 %v17403_v3  ;;  %v4048_v53 = vfloor.f32 %v17403_v3  ;;  %vm4051_vm6 = vcmp.lt.s32.totalorder %v17404_v29, 0  ;;  %v17417_v3 = vld [vmem:[#allocation423_spill] sm:$0xff] }
 0x4af   : > { %17387 = vst [vmem:[#allocation174_spill] sm:$0xff] %v11481_v26  ;;  %v4052_v61 = vceil.f32 %v17404_v29  ;;  %v4053_v10 = vfloor.f32 %v17404_v29  ;;  %v4057_v57 = vceil.f32 %v17405_v63  ;;  %v4058_v21 = vfloor.f32 %v17405_v63  ;;  %v17422_v29 = vld [vmem:[#allocation127_spill] sm:$0xff] }
 0x4b0   : > { %17388 = vst [vmem:[#allocation517_spill] sm:$0xff] %v11485_v60  ;;  %vm4056_vm7 = vcmp.lt.s32.totalorder %v17405_v63, 0  ;;  %vm4061_vm8 = vcmp.lt.s32.totalorder %v17406_v38, 0  ;;  %v17407_v60 = vld [vmem:[#allocation420_spill] sm:$0xff]  ;;  %v11554_v63 = vsel %vm4036_vm3, %v4037_v8, %v4038_v44  ;;  %v11562_v16 = vsel %vm4046_vm5, %v4047_v1, %v4048_v53  ;;  %v17416_v44 = vld [vmem:[#allocation126_spill] sm:$0xff] }
 0x4b1   : > { %17389 = vst [vmem:[#allocation520_spill] sm:$0xff] %v11487_v58  ;;  %v4063_v58 = vfloor.f32 %v17406_v38  ;;  %v4067_v26 = vceil.f32 %v17407_v60  ;;  %v4068_v55 = vfloor.f32 %v17407_v60  ;;  %vm4066_vm9 = vcmp.lt.s32.totalorder %v17407_v60, 0 }
 0x4b2   : > { %17390 = vst [vmem:[#allocation175_spill] sm:$0xff] %v11489_v59  ;;  %v4062_v59 = vceil.f32 %v17406_v38  ;;  %v11558_v38 = vsel %vm4041_vm4, %v4042_v27, %v4043_v9  ;;  %v11566_v45 = vsel %vm4051_vm6, %v4052_v61, %v4053_v10  ;;  %v11568_v60 = vsel %vm4056_vm7, %v4057_v57, %v4058_v21  ;;  %v17424_v10 = vld [vmem:[#allocation425_spill] sm:$0xff]  ;;  %v17427_v21 = vld [vmem:[#allocation427_spill] sm:$0xff] }
 0x4b3   : > { %17396 = vst [vmem:[#allocation521_spill] sm:$0xff] %v11514_v28  ;;  %v11572_v24 = vsel %vm4066_vm9, %v4067_v26, %v4068_v55  ;;  %vm4071_vm10 = vcmp.lt.s32.totalorder %v17415_v15, 0  ;;  %v4072_v17 = vceil.f32 %v17415_v15  ;;  %v4073_v8 = vfloor.f32 %v17415_v15 }
 0x4b4   : > { %17397 = vst [vmem:[#allocation522_spill] sm:$0xff] %v11518_v49  ;;  %v11570_v12 = vsel %vm4061_vm8, %v4062_v59, %v4063_v58  ;;  %v4077_v27 = vceil.f32 %v17416_v44  ;;  %v4078_v9 = vfloor.f32 %v17416_v44  ;;  %v4082_v1 = vceil.f32 %v17417_v3  ;;  %v17418_v59 = vld [vmem:[#allocation424_spill] sm:$0xff] }
 0x4b5   : > { %17398 = vst [vmem:[#allocation176_spill] sm:$0xff] %v11520_v41  ;;  %v4083_v53 = vfloor.f32 %v17417_v3  ;;  %vm4076_vm11 = vcmp.lt.s32.totalorder %v17416_v44, 0  ;;  %vm4081_vm12 = vcmp.lt.s32.totalorder %v17417_v3, 0  ;;  %v4087_v55 = vceil.f32 %v17418_v59 }
 0x4b6   : > { %17399 = vst [vmem:[#allocation523_spill] sm:$0xff] %v11522_v56  ;;  %v4088_v58 = vfloor.f32 %v17418_v59  ;;  %vm4086_vm13 = vcmp.lt.s32.totalorder %v17418_v59, 0  ;;  %v11595_v3 = vsel %vm4071_vm10, %v4072_v17, %v4073_v8  ;;  %v11597_v36 = vsel %vm4076_vm11, %v4077_v27, %v4078_v9  ;;  %v17425_v27 = vld [vmem:[#allocation426_spill] sm:$0xff] }
 0x4b7   : > { %17401 = vst [vmem:[#allocation526_spill] sm:$0xff] %v11525_v13  ;;  %v11599_v26 = vsel %vm4081_vm12, %v4082_v1, %v4083_v53  ;;  %vm4091_vm14 = vcmp.lt.s32.totalorder %v17422_v29, 0  ;;  %v4092_v59 = vceil.f32 %v17422_v29  ;;  %v4093_v57 = vfloor.f32 %v17422_v29  ;;  %v17426_v53 = vld [vmem:[#allocation128_spill] sm:$0xff] }
 0x4b8   : > { %17408 = vst [vmem:[#allocation177_spill] sm:$0xff] %v11554_v63  ;;  %v11602_v61 = vsel %vm4086_vm13, %v4087_v55, %v4088_v58  ;;  %vm4096_vm15 = vcmp.lt.s32.totalorder %v17424_v10, 0  ;;  %v4097_v44 = vceil.f32 %v17424_v10  ;;  %v4098_v15 = vfloor.f32 %v17424_v10 }
 0x4b9   : > { %17409 = vst [vmem:[#allocation524_spill] sm:$0xff] %v11558_v38  ;;  %vm4101_vm0 = vcmp.lt.s32.totalorder %v10773_v33, 0  ;;  %v4102_v17 = vceil.f32 %v10773_v33  ;;  %v4103_v8 = vfloor.f32 %v10773_v33  ;;  %vm4106_vm1 = vcmp.lt.s32.totalorder %v17425_v27, 0 }
 0x4ba   : > { %17410 = vst [vmem:[#allocation527_spill] sm:$0xff] %v11562_v16  ;;  %v4107_v9 = vceil.f32 %v17425_v27  ;;  %v4108_v1 = vfloor.f32 %v17425_v27  ;;  %v4112_v55 = vceil.f32 %v17426_v53  ;;  %v4113_v58 = vfloor.f32 %v17426_v53 }
 0x4bb   : > { %17411 = vst [vmem:[#allocation178_spill] sm:$0xff] %v11566_v45  ;;  %v4117_v38 = vceil.f32 %v17427_v21  ;;  %v4118_v28 = vfloor.f32 %v17427_v21  ;;  %vm4111_vm2 = vcmp.lt.s32.totalorder %v17426_v53, 0  ;;  %vm4116_vm3 = vcmp.lt.s32.totalorder %v17427_v21, 0  ;;  %v17435_v45 = vld [vmem:[#allocation129_spill] sm:$0xff] }
 0x4bc   : > { %17412 = vst [vmem:[#allocation525_spill] sm:$0xff] %v11568_v60  ;;  %v11630_v41 = vsel %vm4091_vm14, %v4092_v59, %v4093_v57  ;;  %v11634_v21 = vsel %vm4096_vm15, %v4097_v44, %v4098_v15  ;;  %v11638_v53 = vsel %vm4101_vm0, %v4102_v17, %v4103_v8  ;;  %v11642_v13 = vsel %vm4106_vm1, %v4107_v9, %v4108_v1  ;;  %v17437_v44 = vld [vmem:[#allocation429_spill] sm:$0xff]  ;;  %v17438_v15 = vld [vmem:[#allocation431_spill] sm:$0xff] }
 0x4bd   : > { %17413 = vst [vmem:[#allocation529_spill] sm:$0xff] %v11570_v12  ;;  %v11644_v56 = vsel %vm4111_vm2, %v4112_v55, %v4113_v58  ;;  %v4127_v29 = vceil.f32 %v17435_v45  ;;  %v4128_v10 = vfloor.f32 %v17435_v45  ;;  %v4132_v59 = vceil.f32 %v17437_v44  ;;  %v17441_v58 = vld [vmem:[#allocation130_spill] sm:$0xff] }
 0x4be   : > { %17414 = vst [vmem:[#allocation179_spill] sm:$0xff] %v11572_v24  ;;  %v17428_v24 = vld [vmem:[#allocation428_spill] sm:$0xff]  ;;  %v4133_v33 = vfloor.f32 %v17437_v44  ;;  %vm4126_vm5 = vcmp.lt.s32.totalorder %v17435_v45, 0  ;;  %vm4131_vm6 = vcmp.lt.s32.totalorder %v17437_v44, 0  ;;  %v4137_v17 = vceil.f32 %v17438_v15 }
 0x4bf   : > { %17419 = vst [vmem:[#allocation528_spill] sm:$0xff] %v11595_v3  ;;  %v4122_v63 = vceil.f32 %v17428_v24  ;;  %v4123_v12 = vfloor.f32 %v17428_v24  ;;  %vm4121_vm4 = vcmp.lt.s32.totalorder %v17428_v24, 0  ;;  %v11646_v24 = vsel %vm4116_vm3, %v4117_v38, %v4118_v28 }
 0x4c0   : > { %17420 = vst [vmem:[#allocation531_spill] sm:$0xff] %v11597_v36  ;;  %v4138_v8 = vfloor.f32 %v17438_v15  ;;  %vm4136_vm7 = vcmp.lt.s32.totalorder %v17438_v15, 0  ;;  %v11666_v1 = vsel %vm4126_vm5, %v4127_v29, %v4128_v10  ;;  %v11668_v55 = vsel %vm4131_vm6, %v4132_v59, %v4133_v33 }
 0x4c1   : > { %17421 = vst [vmem:[#allocation180_spill] sm:$0xff] %v11599_v26  ;;  %v11649_v57 = vsel %vm4121_vm4, %v4122_v63, %v4123_v12  ;;  %vm4141_vm8 = vcmp.lt.s32.totalorder %v17441_v58, 0  ;;  %v4142_v44 = vceil.f32 %v17441_v58  ;;  %v4143_v15 = vfloor.f32 %v17441_v58  ;;  %v17442_v12 = vld [vmem:[#allocation430_spill] sm:$0xff]  ;;  %v17444_v63 = vld [vmem:[#allocation131_spill] sm:$0xff] }
 0x4c2   : > { %17423 = vst [vmem:[#allocation530_spill] sm:$0xff] %v11602_v61  ;;  %v11672_v38 = vsel %vm4136_vm7, %v4137_v17, %v4138_v8  ;;  %vm4146_vm9 = vcmp.lt.s32.totalorder %v17442_v12, 0  ;;  %v4147_v27 = vceil.f32 %v17442_v12  ;;  %v4148_v45 = vfloor.f32 %v17442_v12  ;;  %v17443_v17 = vld [vmem:[#allocation432_spill] sm:$0xff] }
 0x4c3   : > { %17429 = vst [vmem:[#allocation533_spill] sm:$0xff] %v11630_v41  ;;  %vm4151_vm10 = vcmp.lt.s32.totalorder %v10803_v4, 0  ;;  %v4152_v29 = vceil.f32 %v10803_v4  ;;  %v4153_v10 = vfloor.f32 %v10803_v4  ;;  %vm4156_vm11 = vcmp.lt.s32.totalorder %v10806_v7, 0 }
 0x4c4   : > { %17430 = vst [vmem:[#allocation181_spill] sm:$0xff] %v11634_v21  ;;  %v4157_v59 = vceil.f32 %v10806_v7  ;;  %v4158_v33 = vfloor.f32 %v10806_v7  ;;  %vm4161_vm12 = vcmp.lt.s32.totalorder %v17443_v17, 0  ;;  %v4162_v8 = vceil.f32 %v17443_v17  ;;  %v17447_v21 = vld [vmem:[#allocation132_spill] sm:$0xff] }
 0x4c5   : > { %17431 = vst [vmem:[#allocation532_spill] sm:$0xff] %v11638_v53  ;;  %v4163_v9 = vfloor.f32 %v17443_v17  ;;  %vm4166_vm13 = vcmp.lt.s32.totalorder %v17444_v63, 0  ;;  %v4167_v28 = vceil.f32 %v17444_v63  ;;  %v4168_v60 = vfloor.f32 %v17444_v63 }
 0x4c6   : > { %17432 = vst [vmem:[#allocation534_spill] sm:$0xff] %v11642_v13  ;;  %v17446_v13 = vld [vmem:[#allocation433_spill] sm:$0xff]  ;;  %v4182_v41 = vceil.f32 %v17447_v21  ;;  %v4183_v61 = vfloor.f32 %v17447_v21  ;;  %vm4181_vm0 = vcmp.lt.s32.totalorder %v17447_v21, 0  ;;  %v11704_v49 = vsel %vm4141_vm8, %v4142_v44, %v4143_v15 }
 0x4c7   : > { %17433 = vst [vmem:[#allocation182_spill] sm:$0xff] %v11644_v56  ;;  %v4177_v53 = vceil.f32 %v17446_v13  ;;  %v4178_v3 = vfloor.f32 %v17446_v13  ;;  %vm4176_vm15 = vcmp.lt.s32.totalorder %v17446_v13, 0  ;;  %v11708_v5 = vsel %vm4146_vm9, %v4147_v27, %v4148_v45  ;;  %v17456_v45 = vld [vmem:[#allocation435_spill] sm:$0xff] }
 0x4c8   : > { %17434 = vst [vmem:[#allocation187_spill] sm:$0xff] %v11646_v24  ;;  %v11712_v23 = vsel %vm4151_vm10, %v4152_v29, %v4153_v10  ;;  %v11716_v36 = vsel %vm4156_vm11, %v4157_v59, %v4158_v33  ;;  %v11720_v13 = vsel %vm4161_vm12, %v4162_v8, %v4163_v9  ;;  %v11724_v21 = vsel %vm4166_vm13, %v4167_v28, %v4168_v60  ;;  %v17459_v29 = vld [vmem:[#allocation133_spill] sm:$0xff] }
 0x4c9   : > { %17436 = vst [vmem:[#allocation188_spill] sm:$0xff] %v11649_v57  ;;  %v17445_v57 = vld [vmem:[#allocation434_spill] sm:$0xff]  ;;  %v11730_v27 = vsel %vm4176_vm15, %v4177_v53, %v4178_v3  ;;  %v11732_v4 = vsel %vm4181_vm0, %v4182_v41, %v4183_v61  ;;  %v4187_v7 = vceil.f32 %v17456_v45  ;;  %v4188_v58 = vfloor.f32 %v17456_v45  ;;  %v17460_v33 = vld [vmem:[#allocation437_spill] sm:$0xff]  ;;  %v17465_v3 = vld [vmem:[#allocation135_spill] sm:$0xff] }
 0x4ca   : > { %17439 = vst [vmem:[#allocation183_spill] sm:$0xff] %v11666_v1  ;;  %vm4171_vm14 = vcmp.lt.s32.totalorder %v17445_v57, 0  ;;  %v4172_v24 = vceil.f32 %v17445_v57  ;;  %v4173_v56 = vfloor.f32 %v17445_v57  ;;  %vm4186_vm1 = vcmp.lt.s32.totalorder %v17456_v45, 0  ;;  %v17461_v45 = vld [vmem:[#allocation439_spill] sm:$0xff]  ;;  %v17463_v53 = vld [vmem:[#allocation438_spill] sm:$0xff]  ;;  %v17464_v9 = vld [vmem:[#allocation441_spill] sm:$0xff] }
 0x4cb   : > { %17440 = vst [vmem:[#allocation535_spill] sm:$0xff] %v11668_v55  ;;  %v11748_v28 = vsel %vm4186_vm1, %v4187_v7, %v4188_v58  ;;  %vm4196_vm3 = vcmp.lt.s32.totalorder %v17459_v29, 0  ;;  %v4197_v10 = vceil.f32 %v17459_v29  ;;  %v4198_v59 = vfloor.f32 %v17459_v29  ;;  %v17462_v58 = vld [vmem:[#allocation134_spill] sm:$0xff]  ;;  %v17466_v55 = vld [vmem:[#allocation440_spill] sm:$0xff] }
 0x4cc   : > { %17448 = vst [vmem:[#allocation537_spill] sm:$0xff] %v11704_v49  ;;  %v11728_v12 = vsel %vm4171_vm14, %v4172_v24, %v4173_v56  ;;  %v17457_v24 = vld [vmem:[#allocation436_spill] sm:$0xff]  ;;  %vm4201_vm4 = vcmp.lt.s32.totalorder %v17460_v33, 0  ;;  %v4202_v17 = vceil.f32 %v17460_v33  ;;  %v4203_v8 = vfloor.f32 %v17460_v33 }
 0x4cd   : > { %17449 = vst [vmem:[#allocation184_spill] sm:$0xff] %v11708_v5  ;;  %vm4191_vm2 = vcmp.lt.s32.totalorder %v17457_v24, 0  ;;  %v4192_v57 = vceil.f32 %v17457_v24  ;;  %v4193_v15 = vfloor.f32 %v17457_v24  ;;  %vm4206_vm5 = vcmp.lt.s32.totalorder %v17461_v45, 0  ;;  %v17476_v29 = vld [vmem:[#allocation136_spill] sm:$0xff] }
 0x4ce   : > { %17450 = vst [vmem:[#allocation536_spill] sm:$0xff] %v11712_v23  ;;  %v4207_v56 = vceil.f32 %v17461_v45  ;;  %v4208_v7 = vfloor.f32 %v17461_v45  ;;  %vm4211_vm6 = vcmp.lt.s32.totalorder %v17462_v58, 0  ;;  %v4212_v60 = vceil.f32 %v17462_v58 }
 0x4cf   : > { %17451 = vst [vmem:[#allocation189_spill] sm:$0xff] %v11716_v36  ;;  %v4213_v26 = vfloor.f32 %v17462_v58  ;;  %vm4216_vm7 = vcmp.lt.s32.totalorder %v17463_v53, 0  ;;  %v4217_v63 = vceil.f32 %v17463_v53  ;;  %v4218_v61 = vfloor.f32 %v17463_v53 }
 0x4d0   : > { %17452 = vst [vmem:[#allocation185_spill] sm:$0xff] %v11720_v13  ;;  %vm4221_vm8 = vcmp.lt.s32.totalorder %v17464_v9, 0  ;;  %v4222_v41 = vceil.f32 %v17464_v9  ;;  %v4223_v44 = vfloor.f32 %v17464_v9  ;;  %v4227_v16 = vceil.f32 %v17465_v3 }
 0x4d1   : > { %17453 = vst [vmem:[#allocation538_spill] sm:$0xff] %v11728_v12  ;;  %v4228_v13 = vfloor.f32 %v17465_v3  ;;  %v4232_v36 = vceil.f32 %v17466_v55  ;;  %v4233_v1 = vfloor.f32 %v17466_v55  ;;  %vm4226_vm9 = vcmp.lt.s32.totalorder %v17465_v3, 0 }
 0x4d2   : > { %17454 = vst [vmem:[#allocation190_spill] sm:$0xff] %v11730_v27  ;;  %vm4231_vm10 = vcmp.lt.s32.totalorder %v17466_v55, 0  ;;  %v11780_v12 = vsel %vm4191_vm2, %v4192_v57, %v4193_v15  ;;  %v11784_v49 = vsel %vm4196_vm3, %v4197_v10, %v4198_v59  ;;  %v11789_v3 = vsel %vm4201_vm4, %v4202_v17, %v4203_v8  ;;  %v17481_v17 = vld [vmem:[#allocation444_spill] sm:$0xff] }
 0x4d3   : > { %17455 = vst [vmem:[#allocation186_spill] sm:$0xff] %v11732_v4  ;;  %v17467_v4 = vld [vmem:[#allocation442_spill] sm:$0xff]  ;;  %v11793_v55 = vsel %vm4206_vm5, %v4207_v56, %v4208_v7  ;;  %v11797_v5 = vsel %vm4211_vm6, %v4212_v60, %v4213_v26  ;;  %v11801_v24 = vsel %vm4216_vm7, %v4217_v63, %v4218_v61  ;;  %v11805_v57 = vsel %vm4221_vm8, %v4222_v41, %v4223_v44  ;;  %v17478_v26 = vld [vmem:[#allocation443_spill] sm:$0xff]  ;;  %v17482_v7 = vld [vmem:[#allocation137_spill] sm:$0xff] }
 0x4d4   : > { %17458 = vst [vmem:[#allocation191_spill] sm:$0xff] %v11748_v28  ;;  %v4237_v23 = vceil.f32 %v17467_v4  ;;  %v4238_v27 = vfloor.f32 %v17467_v4  ;;  %vm4236_vm11 = vcmp.lt.s32.totalorder %v17467_v4, 0  ;;  %v11807_v4 = vsel %vm4226_vm9, %v4227_v16, %v4228_v13  ;;  %v17485_v44 = vld [vmem:[#allocation138_spill] sm:$0xff]  ;;  %v17486_v63 = vld [vmem:[#allocation447_spill] sm:$0xff] }
 0x4d5   : > { %17468 = vst [vmem:[#allocation192_spill] sm:$0xff] %v11780_v12  ;;  %v11809_v15 = vsel %vm4231_vm10, %v4232_v36, %v4233_v1  ;;  %v4242_v10 = vceil.f32 %v17476_v29  ;;  %v4243_v59 = vfloor.f32 %v17476_v29  ;;  %v4247_v60 = vceil.f32 %v17478_v26  ;;  %v17487_v36 = vld [vmem:[#allocation448_spill] sm:$0xff] }
 0x4d6   : > { %17469 = vst [vmem:[#allocation193_spill] sm:$0xff] %v11789_v3  ;;  %v11812_v56 = vsel %vm4236_vm11, %v4237_v23, %v4238_v27  ;;  %v4248_v53 = vfloor.f32 %v17478_v26  ;;  %vm4241_vm12 = vcmp.lt.s32.totalorder %v17476_v29, 0  ;;  %vm4246_vm13 = vcmp.lt.s32.totalorder %v17478_v26, 0  ;;  %v17483_v26 = vld [vmem:[#allocation445_spill] sm:$0xff] }
 0x4d7   : > { %17470 = vst [vmem:[#allocation194_spill] sm:$0xff] %v11793_v55  ;;  %v11829_v61 = vsel %vm4241_vm12, %v4242_v10, %v4243_v59  ;;  %vm4251_vm14 = vcmp.lt.s32.totalorder %v17481_v17, 0  ;;  %v4252_v8 = vceil.f32 %v17481_v17  ;;  %v4253_v45 = vfloor.f32 %v17481_v17  ;;  %v17484_v59 = vld [vmem:[#allocation446_spill] sm:$0xff] }
 0x4d8   : > { %17471 = vst [vmem:[#allocation195_spill] sm:$0xff] %v11797_v5  ;;  %v11831_v33 = vsel %vm4246_vm13, %v4247_v60, %v4248_v53  ;;  %vm4256_vm15 = vcmp.lt.s32.totalorder %v17482_v7, 0  ;;  %v4257_v58 = vceil.f32 %v17482_v7  ;;  %v4258_v29 = vfloor.f32 %v17482_v7 }
 0x4d9   : > { %17472 = vst [vmem:[#allocation196_spill] sm:$0xff] %v11801_v24  ;;  %vm4261_vm0 = vcmp.lt.s32.totalorder %v17483_v26, 0  ;;  %v4262_v41 = vceil.f32 %v17483_v26  ;;  %v4263_v10 = vfloor.f32 %v17483_v26  ;;  %vm4266_vm1 = vcmp.lt.s32.totalorder %v17484_v59, 0 }
 0x4da   : > { %17473 = vst [vmem:[#allocation197_spill] sm:$0xff] %v11805_v57  ;;  %v4267_v60 = vceil.f32 %v17484_v59  ;;  %v4268_v53 = vfloor.f32 %v17484_v59  ;;  %vm4271_vm2 = vcmp.lt.s32.totalorder %v17485_v44, 0  ;;  %v4272_v27 = vceil.f32 %v17485_v44  ;;  %v17489_v57 = vld [vmem:[#allocation449_spill] sm:$0xff] }
 0x4db   : > { %17474 = vst [vmem:[#allocation198_spill] sm:$0xff] %v11807_v4  ;;  %v4273_v13 = vfloor.f32 %v17485_v44  ;;  %vm4276_vm3 = vcmp.lt.s32.totalorder %v17486_v63, 0  ;;  %v4277_v1 = vceil.f32 %v17486_v63  ;;  %v4278_v23 = vfloor.f32 %v17486_v63 }
 0x4dc   : > { %17475 = vst [vmem:[#allocation8_spill] sm:$0xff] %v11809_v15  ;;  %v4282_v16 = vceil.f32 %v17487_v36  ;;  %v4283_v9 = vfloor.f32 %v17487_v36  ;;  %vm4281_vm4 = vcmp.lt.s32.totalorder %v17487_v36, 0  ;;  %v4292_v12 = vceil.f32 %v17489_v57 }
 0x4dd   : > { %17477 = vst [vmem:[#allocation199_spill] sm:$0xff] %v11812_v56  ;;  %v17488_v56 = vld [vmem:[#allocation139_spill] sm:$0xff]  ;;  %v4293_v24 = vfloor.f32 %v17489_v57  ;;  %v11863_v55 = vsel %vm4251_vm14, %v4252_v8, %v4253_v45  ;;  %vm4291_vm6 = vcmp.lt.s32.totalorder %v17489_v57, 0  ;;  %v11868_v3 = vsel %vm4256_vm15, %v4257_v58, %v4258_v29  ;;  %v17497_v29 = vld [vmem:[#allocation140_spill] sm:$0xff] }
 0x4de   : > { %17479 = vst [vmem:[#allocation9_spill] sm:$0xff] %v11829_v61  ;;  %v4287_v15 = vceil.f32 %v17488_v56  ;;  %v4288_v4 = vfloor.f32 %v17488_v56  ;;  %vm4286_vm5 = vcmp.lt.s32.totalorder %v17488_v56, 0  ;;  %v11872_v56 = vsel %vm4261_vm0, %v4262_v41, %v4263_v10  ;;  %v17495_v45 = vld [vmem:[#allocation451_spill] sm:$0xff] }
 0x4df   : > { %17480 = vst [vmem:[#allocation237_spill] sm:$0xff] %v11831_v33  ;;  %v11876_v36 = vsel %vm4266_vm1, %v4267_v60, %v4268_v53  ;;  %v11880_v5 = vsel %vm4271_vm2, %v4272_v27, %v4273_v13  ;;  %v11884_v17 = vsel %vm4276_vm3, %v4277_v1, %v4278_v23  ;;  %v11886_v57 = vsel %vm4281_vm4, %v4282_v16, %v4283_v9  ;;  %v17498_v1 = vld [vmem:[#allocation450_spill] sm:$0xff]  ;;  %v17501_v53 = vld [vmem:[#allocation452_spill] sm:$0xff]  ;;  %v17502_v9 = vld [vmem:[#allocation141_spill] sm:$0xff] }
 0x4e0   : > { %17490 = vst [vmem:[#allocation244_spill] sm:$0xff] %v11863_v55  ;;  %v11888_v8 = vsel %vm4286_vm5, %v4287_v15, %v4288_v4  ;;  %v4297_v7 = vceil.f32 %v17495_v45  ;;  %v11891_v41 = vsel %vm4291_vm6, %v4292_v12, %v4293_v24  ;;  %v4298_v58 = vfloor.f32 %v17495_v45  ;;  %v17505_v15 = vld [vmem:[#allocation142_spill] sm:$0xff]  ;;  %v17506_v16 = vld [vmem:[#allocation455_spill] sm:$0xff] }
 0x4e1   : > { %17491 = vst [vmem:[#allocation291_spill] sm:$0xff] %v11876_v36  ;;  %v4302_v26 = vceil.f32 %v17497_v29  ;;  %v4303_v44 = vfloor.f32 %v17497_v29  ;;  %vm4296_vm7 = vcmp.lt.s32.totalorder %v17495_v45, 0  ;;  %vm4301_vm8 = vcmp.lt.s32.totalorder %v17497_v29, 0 }
 0x4e2   : > { %17492 = vst [vmem:[#allocation59_spill] sm:$0xff] %v11880_v5  ;;  %vm4306_vm9 = vcmp.lt.s32.totalorder %v17498_v1, 0  ;;  %v11908_v27 = vsel %vm4296_vm7, %v4297_v7, %v4298_v58  ;;  %v4307_v59 = vceil.f32 %v17498_v1  ;;  %v4308_v60 = vfloor.f32 %v17498_v1  ;;  %v17503_v7 = vld [vmem:[#allocation454_spill] sm:$0xff] }
 0x4e3   : > { %17493 = vst [vmem:[#allocation292_spill] sm:$0xff] %v11884_v17  ;;  %v11910_v10 = vsel %vm4301_vm8, %v4302_v26, %v4303_v44  ;;  %vm4311_vm10 = vcmp.lt.s32.totalorder %v17501_v53, 0  ;;  %v4312_v45 = vceil.f32 %v17501_v53  ;;  %v4313_v29 = vfloor.f32 %v17501_v53  ;;  %v17504_v44 = vld [vmem:[#allocation453_spill] sm:$0xff]  ;;  %v17511_v17 = vld [vmem:[#allocation456_spill] sm:$0xff] }
 0x4e4   : > { %17494 = vst [vmem:[#allocation294_spill] sm:$0xff] %v11886_v57  ;;  %vm4316_vm11 = vcmp.lt.s32.totalorder %v17502_v9, 0  ;;  %v4317_v13 = vceil.f32 %v17502_v9  ;;  %v4318_v24 = vfloor.f32 %v17502_v9  ;;  %v4322_v58 = vceil.f32 %v17503_v7 }
 0x4e5   : > { %17496 = vst [vmem:[#allocation60_spill] sm:$0xff] %v11891_v41  ;;  %v4323_v26 = vfloor.f32 %v17503_v7  ;;  %vm4321_vm12 = vcmp.lt.s32.totalorder %v17503_v7, 0  ;;  %vm4326_vm13 = vcmp.lt.s32.totalorder %v17504_v44, 0  ;;  %v4327_v12 = vceil.f32 %v17504_v44 }
 0x4e6   : > { %17499 = vst [vmem:[#allocation293_spill] sm:$0xff] %v11908_v27  ;;  %v4328_v28 = vfloor.f32 %v17504_v44  ;;  %v4332_v23 = vceil.f32 %v17505_v15  ;;  %v4333_v4 = vfloor.f32 %v17505_v15  ;;  %v4337_v63 = vceil.f32 %v17506_v16 }
 0x4e7   : > { %17500 = vst [vmem:[#allocation295_spill] sm:$0xff] %v11910_v10  ;;  %v4338_v57 = vfloor.f32 %v17506_v16  ;;  %vm4331_vm14 = vcmp.lt.s32.totalorder %v17505_v15, 0  ;;  %vm4336_vm15 = vcmp.lt.s32.totalorder %v17506_v16, 0  ;;  %v11936_v7 = vsel %vm4306_vm9, %v4307_v59, %v4308_v60  ;;  %v17514_v60 = vld [vmem:[#allocation143_spill] sm:$0xff] }
 0x4e8   : > { %17507 = vst [vmem:[#allocation61_spill] sm:$0xff] %v11936_v7  ;;  %v11940_v44 = vsel %vm4311_vm10, %v4312_v45, %v4313_v29  ;;  %v11944_v33 = vsel %vm4316_vm11, %v4317_v13, %v4318_v24  ;;  %v11946_v5 = vsel %vm4321_vm12, %v4322_v58, %v4323_v26  ;;  %v11948_v55 = vsel %vm4326_vm13, %v4327_v12, %v4328_v28  ;;  %v17515_v28 = vld [vmem:[#allocation457_spill] sm:$0xff] }
 0x4e9   : > { %17508 = vst [vmem:[#allocation297_spill] sm:$0xff] %v11940_v44  ;;  %vm4341_vm0 = vcmp.lt.s32.totalorder %v17511_v17, 0  ;;  %v4342_v15 = vceil.f32 %v17511_v17  ;;  %v4343_v16 = vfloor.f32 %v17511_v17  ;;  %v11953_v1 = vsel %vm4331_vm14, %v4332_v23, %v4333_v4  ;;  %v17523_v44 = vld [vmem:[#allocation460_spill] sm:$0xff] }
 0x4ea   : > { %17509 = vst [vmem:[#allocation296_spill] sm:$0xff] %v11946_v5  ;;  %v11955_v59 = vsel %vm4336_vm15, %v4337_v63, %v4338_v57  ;;  %v4347_v53 = vceil.f32 %v17514_v60  ;;  %v4348_v9 = vfloor.f32 %v17514_v60  ;;  %vm4346_vm1 = vcmp.lt.s32.totalorder %v17514_v60, 0  ;;  %v17517_v60 = vld [vmem:[#allocation459_spill] sm:$0xff]  ;;  %v17520_v57 = vld [vmem:[#allocation458_spill] sm:$0xff] }
 0x4eb   : > { %17510 = vst [vmem:[#allocation62_spill] sm:$0xff] %v11948_v55  ;;  %v4352_v12 = vceil.f32 %v17515_v28  ;;  %v4353_v24 = vfloor.f32 %v17515_v28  ;;  %vm4351_vm2 = vcmp.lt.s32.totalorder %v17515_v28, 0  ;;  %v11972_v58 = vsel %vm4341_vm0, %v4342_v15, %v4343_v16  ;;  %v17519_v28 = vld [vmem:[#allocation144_spill] sm:$0xff]  ;;  %v17521_v16 = vld [vmem:[#allocation461_spill] sm:$0xff] }
 0x4ec   : > { %17512 = vst [vmem:[#allocation200_spill] sm:$0xff] %v11953_v1  ;;  %v11974_v26 = vsel %vm4346_vm1, %v4347_v53, %v4348_v9  ;;  %vm4356_vm3 = vcmp.lt.s32.totalorder %v17517_v60, 0  ;;  %v4357_v45 = vceil.f32 %v17517_v60  ;;  %v4358_v13 = vfloor.f32 %v17517_v60  ;;  %v17524_v1 = vld [vmem:[#allocation462_spill] sm:$0xff]  ;;  %v17533_v60 = vld [vmem:[#allocation465_spill] sm:$0xff] }
 0x4ed   : > { %17513 = vst [vmem:[#allocation10_spill] sm:$0xff] %v11955_v59  ;;  %v11979_v4 = vsel %vm4351_vm2, %v4352_v12, %v4353_v24  ;;  %vm4361_vm4 = vcmp.lt.s32.totalorder %v17519_v28, 0  ;;  %v4362_v63 = vceil.f32 %v17519_v28  ;;  %v4363_v23 = vfloor.f32 %v17519_v28  ;;  %v17522_v12 = vld [vmem:[#allocation145_spill] sm:$0xff] }
 0x4ee   : > { %17516 = vst [vmem:[#allocation201_spill] sm:$0xff] %v11974_v26  ;;  %vm4366_vm5 = vcmp.lt.s32.totalorder %v17520_v57, 0  ;;  %v4367_v17 = vceil.f32 %v17520_v57  ;;  %v4368_v15 = vfloor.f32 %v17520_v57  ;;  %vm4371_vm6 = vcmp.lt.s32.totalorder %v17521_v16, 0 }
 0x4ef   : > { %17518 = vst [vmem:[#allocation203_spill] sm:$0xff] %v11979_v4  ;;  %v4372_v53 = vceil.f32 %v17521_v16  ;;  %v4373_v9 = vfloor.f32 %v17521_v16  ;;  %v4377_v24 = vceil.f32 %v17522_v12  ;;  %v4378_v29 = vfloor.f32 %v17522_v12 }
 0x4f0   : > { %v4382_v59 = vceil.f32 %v17523_v44  ;;  %v4383_v7 = vfloor.f32 %v17523_v44  ;;  %v4387_v10 = vceil.f32 %v17524_v1  ;;  %v4388_v61 = vfloor.f32 %v17524_v1 }
 0x4f1   : > { %vm4376_vm7 = vcmp.lt.s32.totalorder %v17522_v12, 0  ;;  %vm4381_vm8 = vcmp.lt.s32.totalorder %v17523_v44, 0  ;;  %vm4386_vm9 = vcmp.lt.s32.totalorder %v17524_v1, 0  ;;  %v12004_v5 = vsel %vm4356_vm3, %v4357_v45, %v4358_v13  ;;  %v17529_v1 = vld [vmem:[#allocation146_spill] sm:$0xff] }
 0x4f2   : > { %17525 = vst [vmem:[#allocation11_spill] sm:$0xff] %v12004_v5  ;;  %v12008_v41 = vsel %vm4361_vm4, %v4362_v63, %v4363_v23  ;;  %v12012_v55 = vsel %vm4366_vm5, %v4367_v17, %v4368_v15  ;;  %v12016_v44 = vsel %vm4371_vm6, %v4372_v53, %v4373_v9  ;;  %v4392_v12 = vceil.f32 %v17529_v1  ;;  %v17532_v63 = vld [vmem:[#allocation463_spill] sm:$0xff] }
 0x4f3   : > { %17526 = vst [vmem:[#allocation202_spill] sm:$0xff] %v12008_v41  ;;  %v4393_v36 = vfloor.f32 %v17529_v1  ;;  %v12020_v27 = vsel %vm4376_vm7, %v4377_v24, %v4378_v29  ;;  %v12022_v13 = vsel %vm4381_vm8, %v4382_v59, %v4383_v7  ;;  %v12024_v45 = vsel %vm4386_vm9, %v4387_v10, %v4388_v61  ;;  %v17534_v29 = vld [vmem:[#allocation147_spill] sm:$0xff]  ;;  %v17536_v10 = vld [vmem:[#allocation464_spill] sm:$0xff] }
 0x4f4   : > { %17527 = vst [vmem:[#allocation205_spill] sm:$0xff] %v12012_v55  ;;  %vm4391_vm10 = vcmp.lt.s32.totalorder %v17529_v1, 0  ;;  %vm4396_vm11 = vcmp.lt.s32.totalorder %v17532_v63, 0  ;;  %v4397_v57 = vceil.f32 %v17532_v63  ;;  %v4398_v23 = vfloor.f32 %v17532_v63  ;;  %v17541_v1 = vld [vmem:[#allocation466_spill] sm:$0xff]  ;;  %v17560_v5 = vld [vmem:[#allocation151_spill] sm:$0xff] }
 0x4f5   : > { %17528 = vst [vmem:[#allocation12_spill] sm:$0xff] %v12016_v44  ;;  %vm4401_vm12 = vcmp.lt.s32.totalorder %v17533_v60, 0  ;;  %v4402_v28 = vceil.f32 %v17533_v60  ;;  %v4403_v17 = vfloor.f32 %v17533_v60  ;;  %v4407_v15 = vceil.f32 %v17534_v29 }
 0x4f6   : > { %17530 = vst [vmem:[#allocation13_spill] sm:$0xff] %v12022_v13  ;;  %v4408_v7 = vfloor.f32 %v17534_v29  ;;  %v12035_v61 = vsel %vm4391_vm10, %v4392_v12, %v4393_v36  ;;  %vm4406_vm13 = vcmp.lt.s32.totalorder %v17534_v29, 0  ;;  %v4412_v59 = vceil.f32 %v17536_v10  ;;  %v17542_v36 = vld [vmem:[#allocation148_spill] sm:$0xff] }
 0x4f7   : > { %17531 = vst [vmem:[#allocation204_spill] sm:$0xff] %v12024_v45  ;;  %v4413_v16 = vfloor.f32 %v17536_v10  ;;  %vm4411_vm14 = vcmp.lt.s32.totalorder %v17536_v10, 0  ;;  %v12051_v26 = vsel %vm4396_vm11, %v4397_v57, %v4398_v23  ;;  %v12055_v9 = vsel %vm4401_vm12, %v4402_v28, %v4403_v17  ;;  %v17543_v57 = vld [vmem:[#allocation467_spill] sm:$0xff]  ;;  %v17544_v28 = vld [vmem:[#allocation468_spill] sm:$0xff] }
 0x4f8   : > { %17535 = vst [vmem:[#allocation206_spill] sm:$0xff] %v12035_v61  ;;  %v12057_v24 = vsel %vm4406_vm13, %v4407_v15, %v4408_v7  ;;  %vm4416_vm15 = vcmp.lt.s32.totalorder %v17541_v1, 0  ;;  %v4417_v53 = vceil.f32 %v17541_v1  ;;  %v4418_v12 = vfloor.f32 %v17541_v1 }
 0x4f9   : > { %17537 = vst [vmem:[#allocation14_spill] sm:$0xff] %v12051_v26  ;;  %v12059_v10 = vsel %vm4411_vm14, %v4412_v59, %v4413_v16  ;;  %v4422_v29 = vceil.f32 %v17542_v36  ;;  %v4423_v63 = vfloor.f32 %v17542_v36  ;;  %v4427_v23 = vceil.f32 %v17543_v57  ;;  %v17549_v59 = vld [vmem:[#allocation469_spill] sm:$0xff] }
 0x4fa   : > { %17538 = vst [vmem:[#allocation207_spill] sm:$0xff] %v12055_v9  ;;  %v4428_v60 = vfloor.f32 %v17543_v57  ;;  %vm4421_vm0 = vcmp.lt.s32.totalorder %v17542_v36, 0  ;;  %vm4426_vm1 = vcmp.lt.s32.totalorder %v17543_v57, 0  ;;  %v4432_v17 = vceil.f32 %v17544_v28  ;;  %v17546_v36 = vld [vmem:[#allocation149_spill] sm:$0xff]  ;;  %v17555_v9 = vld [vmem:[#allocation472_spill] sm:$0xff] }
 0x4fb   : > { %17539 = vst [vmem:[#allocation208_spill] sm:$0xff] %v12057_v24  ;;  %v4433_v15 = vfloor.f32 %v17544_v28  ;;  %vm4431_vm2 = vcmp.lt.s32.totalorder %v17544_v28, 0  ;;  %v12079_v44 = vsel %vm4416_vm15, %v4417_v53, %v4418_v12  ;;  %v4437_v57 = vceil.f32 %v17546_v36  ;;  %v17551_v53 = vld [vmem:[#allocation471_spill] sm:$0xff] }
 0x4fc   : > { %17540 = vst [vmem:[#allocation15_spill] sm:$0xff] %v12059_v10  ;;  %v4438_v55 = vfloor.f32 %v17546_v36  ;;  %v12083_v61 = vsel %vm4421_vm0, %v4422_v29, %v4423_v63  ;;  %v12085_v41 = vsel %vm4426_vm1, %v4427_v23, %v4428_v60  ;;  %vm4436_vm3 = vcmp.lt.s32.totalorder %v17546_v36, 0  ;;  %v17552_v29 = vld [vmem:[#allocation150_spill] sm:$0xff] }
 0x4fd   : > { %17545 = vst [vmem:[#allocation209_spill] sm:$0xff] %v12079_v44  ;;  %vm4441_vm4 = vcmp.lt.s32.totalorder %v17549_v59, 0  ;;  %v12089_v7 = vsel %vm4431_vm2, %v4432_v17, %v4433_v15  ;;  %v4442_v28 = vceil.f32 %v17549_v59  ;;  %v4443_v1 = vfloor.f32 %v17549_v59  ;;  %v17554_v17 = vld [vmem:[#allocation470_spill] sm:$0xff] }
 0x4fe   : > { %17547 = vst [vmem:[#allocation16_spill] sm:$0xff] %v12083_v61  ;;  %vm4446_vm5 = vcmp.lt.s32.totalorder %v17551_v53, 0  ;;  %v4447_v12 = vceil.f32 %v17551_v53  ;;  %v4448_v4 = vfloor.f32 %v17551_v53  ;;  %v4452_v63 = vceil.f32 %v17552_v29  ;;  %v17569_v61 = vld [vmem:[#allocation153_spill] sm:$0xff] }
 0x4ff   : > { %17548 = vst [vmem:[#allocation210_spill] sm:$0xff] %v12085_v41  ;;  %v4453_v23 = vfloor.f32 %v17552_v29  ;;  %v12098_v60 = vsel %vm4436_vm3, %v4437_v57, %v4438_v55  ;;  %vm4451_vm6 = vcmp.lt.s32.totalorder %v17552_v29, 0  ;;  %v4457_v15 = vceil.f32 %v17554_v17  ;;  %v17562_v57 = vld [vmem:[#allocation474_spill] sm:$0xff] }
 0x500   : > { %17550 = vst [vmem:[#allocation211_spill] sm:$0xff] %v12089_v7  ;;  %v4458_v36 = vfloor.f32 %v17554_v17  ;;  %vm4456_vm7 = vcmp.lt.s32.totalorder %v17554_v17, 0  ;;  %v4462_v26 = vceil.f32 %v17555_v9  ;;  %v4463_v45 = vfloor.f32 %v17555_v9  ;;  %v17567_v7 = vld [vmem:[#allocation476_spill] sm:$0xff] }
 0x501   : > { %17553 = vst [vmem:[#allocation17_spill] sm:$0xff] %v12098_v60  ;;  %vm4461_vm8 = vcmp.lt.s32.totalorder %v17555_v9, 0  ;;  %v12114_v29 = vsel %vm4441_vm4, %v4442_v28, %v4443_v1  ;;  %v12118_v17 = vsel %vm4446_vm5, %v4447_v12, %v4448_v4  ;;  %v12120_v16 = vsel %vm4451_vm6, %v4452_v63, %v4453_v23  ;;  %v17563_v4 = vld [vmem:[#allocation473_spill] sm:$0xff]  ;;  %v17564_v12 = vld [vmem:[#allocation152_spill] sm:$0xff] }
 0x502   : > { %17556 = vst [vmem:[#allocation212_spill] sm:$0xff] %v12114_v29  ;;  %v12122_v44 = vsel %vm4456_vm7, %v4457_v15, %v4458_v36  ;;  %vm4466_vm9 = vcmp.lt.s32.totalorder %v17560_v5, 0  ;;  %v4467_v55 = vceil.f32 %v17560_v5  ;;  %v4468_v9 = vfloor.f32 %v17560_v5 }
 0x503   : > { %17557 = vst [vmem:[#allocation213_spill] sm:$0xff] %v12118_v17  ;;  %v12127_v10 = vsel %vm4461_vm8, %v4462_v26, %v4463_v45  ;;  %vm4471_vm10 = vcmp.lt.s32.totalorder %v17562_v57, 0  ;;  %v4472_v59 = vceil.f32 %v17562_v57  ;;  %v4473_v28 = vfloor.f32 %v17562_v57  ;;  %v17565_v26 = vld [vmem:[#allocation475_spill] sm:$0xff]  ;;  %v17570_v57 = vld [vmem:[#allocation477_spill] sm:$0xff] }
 0x504   : > { %17558 = vst [vmem:[#allocation18_spill] sm:$0xff] %v12120_v16  ;;  %v4477_v1 = vceil.f32 %v17563_v4  ;;  %v4478_v53 = vfloor.f32 %v17563_v4  ;;  %v4482_v63 = vceil.f32 %v17564_v12  ;;  %v4483_v23 = vfloor.f32 %v17564_v12 }
 0x505   : > { %17559 = vst [vmem:[#allocation214_spill] sm:$0xff] %v12122_v44  ;;  %vm4476_vm11 = vcmp.lt.s32.totalorder %v17563_v4, 0  ;;  %vm4481_vm12 = vcmp.lt.s32.totalorder %v17564_v12, 0  ;;  %v4487_v45 = vceil.f32 %v17565_v26  ;;  %v4488_v15 = vfloor.f32 %v17565_v26 }
 0x506   : > { %17561 = vst [vmem:[#allocation215_spill] sm:$0xff] %v12127_v10  ;;  %vm4486_vm13 = vcmp.lt.s32.totalorder %v17565_v26, 0  ;;  %v12148_v4 = vsel %vm4466_vm9, %v4467_v55, %v4468_v9  ;;  %v12152_v12 = vsel %vm4471_vm10, %v4472_v59, %v4473_v28  ;;  %v12154_v60 = vsel %vm4476_vm11, %v4477_v1, %v4478_v53  ;;  %v17571_v28 = vld [vmem:[#allocation479_spill] sm:$0xff] }
 0x507   : > { %v12156_v36 = vsel %vm4481_vm12, %v4482_v63, %v4483_v23  ;;  %vm4491_vm14 = vcmp.lt.s32.totalorder %v17567_v7, 0  ;;  %v4492_v26 = vceil.f32 %v17567_v7  ;;  %v12160_v41 = vsel %vm4486_vm13, %v4487_v45, %v4488_v15  ;;  %v17572_v63 = vld [vmem:[#allocation154_spill] sm:$0xff] }
 0x508   : > { %17566 = vst [vmem:[#allocation19_spill] sm:$0xff] %v12156_v36  ;;  %v4493_v13 = vfloor.f32 %v17567_v7  ;;  %vm4496_vm15 = vcmp.lt.s32.totalorder %v17569_v61, 0  ;;  %v4497_v5 = vceil.f32 %v17569_v61  ;;  %v4498_v55 = vfloor.f32 %v17569_v61 }
 0x509   : > { %17568 = vst [vmem:[#allocation20_spill] sm:$0xff] %v12160_v41  ;;  %vm4501_vm0 = vcmp.lt.s32.totalorder %v17570_v57, 0  ;;  %v4502_v9 = vceil.f32 %v17570_v57  ;;  %v4503_v59 = vfloor.f32 %v17570_v57  ;;  %v4507_v1 = vceil.f32 %v17571_v28 }
 0x50a   : > { %v4508_v53 = vfloor.f32 %v17571_v28  ;;  %v4512_v23 = vceil.f32 %v17572_v63  ;;  %v4513_v45 = vfloor.f32 %v17572_v63  ;;  %vm4506_vm1 = vcmp.lt.s32.totalorder %v17571_v28, 0 }
 0x50b   : > { %vm4511_vm2 = vcmp.lt.s32.totalorder %v17572_v63, 0  ;;  %v4517_v15 = vceil.f32 %v11022_v25  ;;  %v4518_v10 = vfloor.f32 %v11022_v25  ;;  %vm4516_vm3 = vcmp.lt.s32.totalorder %v11022_v25, 0 }
 0x50c   : > { %v12185_v28 = vsel %vm4491_vm14, %v4492_v26, %v4493_v13  ;;  %v12189_v63 = vsel %vm4496_vm15, %v4497_v5, %v4498_v55  ;;  %v12193_v44 = vsel %vm4501_vm0, %v4502_v9, %v4503_v59  ;;  %v12195_v16 = vsel %vm4506_vm1, %v4507_v1, %v4508_v53 }
 0x50d   : > { %17573 = vst [vmem:[#allocation216_spill] sm:$0xff] %v12185_v28  ;;  %v12197_v17 = vsel %vm4511_vm2, %v4512_v23, %v4513_v45  ;;  %vm4521_vm4 = vcmp.lt.s32.totalorder %v11025_v54, 0  ;;  %v12200_v25 = vsel %vm4516_vm3, %v4517_v15, %v4518_v10  ;;  %v4522_v7 = vceil.f32 %v11025_v54 }
 0x50e   : > { %v4523_v13 = vfloor.f32 %v11025_v54  ;;  %vm4526_vm5 = vcmp.lt.s32.totalorder %v11028_v0, 0  ;;  %v4527_v61 = vceil.f32 %v11028_v0  ;;  %v4528_v26 = vfloor.f32 %v11028_v0 }
 0x50f   : > { %vm4531_vm6 = vcmp.lt.s32.totalorder %v11031_v11, 0  ;;  %v4532_v5 = vceil.f32 %v11031_v11  ;;  %v4533_v55 = vfloor.f32 %v11031_v11  ;;  %vm4536_vm7 = vcmp.lt.s32.totalorder %v11034_v22, 0 }
 0x510   : > { %v4537_v10 = vceil.f32 %v11034_v22  ;;  %v4538_v57 = vfloor.f32 %v11034_v22  ;;  %v4542_v9 = vceil.f32 %v11037_v42  ;;  %v4543_v59 = vfloor.f32 %v11037_v42 }
 0x511   : > { %v4547_v1 = vceil.f32 %v11040_v6  ;;  %v4548_v53 = vfloor.f32 %v11040_v6  ;;  %vm4541_vm8 = vcmp.lt.s32.totalorder %v11037_v42, 0  ;;  %vm4546_vm9 = vcmp.lt.s32.totalorder %v11040_v6, 0 }
 0x512   : > { %v12227_v36 = vsel %vm4521_vm4, %v4522_v7, %v4523_v13  ;;  %v12231_v23 = vsel %vm4526_vm5, %v4527_v61, %v4528_v26  ;;  %v12235_v42 = vsel %vm4531_vm6, %v4532_v5, %v4533_v55  ;;  %v12239_v6 = vsel %vm4536_vm7, %v4537_v10, %v4538_v57 }
 0x513   : > { %17574 = vst [vmem:[#allocation21_spill] sm:$0xff] %v12227_v36  ;;  %v12241_v24 = vsel %vm4541_vm8, %v4542_v9, %v4543_v59  ;;  %v12243_v29 = vsel %vm4546_vm9, %v4547_v1, %v4548_v53  ;;  %vm4551_vm10 = vcmp.lt.s32.totalorder %v11043_v2, 0  ;;  %v4552_v54 = vceil.f32 %v11043_v2 }
 0x514   : > { %v4553_v0 = vfloor.f32 %v11043_v2  ;;  %vm4556_vm11 = vcmp.lt.s32.totalorder %v11046_v52, 0  ;;  %v4557_v11 = vceil.f32 %v11046_v52  ;;  %v4558_v7 = vfloor.f32 %v11046_v52 }
 0x515   : > { %v4562_v22 = vceil.f32 %v11049_v62  ;;  %v4563_v13 = vfloor.f32 %v11049_v62  ;;  %v4567_v61 = vceil.f32 %v11052_v39  ;;  %v4568_v26 = vfloor.f32 %v11052_v39 }
 0x516   : > { %vm4561_vm12 = vcmp.lt.s32.totalorder %v11049_v62, 0  ;;  %vm4566_vm13 = vcmp.lt.s32.totalorder %v11052_v39, 0  ;;  %v4572_v5 = vceil.f32 %v11055_v32  ;;  %v4573_v55 = vfloor.f32 %v11055_v32 }
 0x517   : > { %vm4571_vm14 = vcmp.lt.s32.totalorder %v11055_v32, 0  ;;  %v12268_v39 = vsel %vm4551_vm10, %v4552_v54, %v4553_v0  ;;  %v12272_v53 = vsel %vm4556_vm11, %v4557_v11, %v4558_v7  ;;  %v12274_v10 = vsel %vm4561_vm12, %v4562_v22, %v4563_v13  ;;  %v17575_v11 = vld [vmem:[#allocation478_spill] sm:$0xff] }
 0x518   : > { %v12276_v41 = vsel %vm4566_vm13, %v4567_v61, %v4568_v26  ;;  %vm4576_vm15 = vcmp.lt.s32.totalorder %v11058_v48, 0  ;;  %v12279_v32 = vsel %vm4571_vm14, %v4572_v5, %v4573_v55  ;;  %v4577_v1 = vceil.f32 %v11058_v48  ;;  %v17576_v55 = vld [vmem:[#allocation481_spill] sm:$0xff] }
 0x519   : > { %v4578_v62 = vfloor.f32 %v11058_v48  ;;  %vm4581_vm0 = vcmp.lt.s32.totalorder %v11061_v43, 0  ;;  %v4582_v2 = vceil.f32 %v11061_v43  ;;  %v4583_v52 = vfloor.f32 %v11061_v43 }
 0x51a   : > { %vm4586_vm1 = vcmp.lt.s32.totalorder %v11064_v47, 0  ;;  %v4587_v54 = vceil.f32 %v11064_v47  ;;  %v4588_v0 = vfloor.f32 %v11064_v47  ;;  %vm4591_vm2 = vcmp.lt.s32.totalorder %v17575_v11, 0 }
 0x51b   : > { %v4592_v7 = vceil.f32 %v17575_v11  ;;  %v4593_v22 = vfloor.f32 %v17575_v11  ;;  %v4597_v13 = vceil.f32 %v11070_v20  ;;  %v4598_v61 = vfloor.f32 %v11070_v20 }
 0x51c   : > { %v4602_v26 = vceil.f32 %v11073_v30  ;;  %v4603_v5 = vfloor.f32 %v11073_v30  ;;  %vm4596_vm3 = vcmp.lt.s32.totalorder %v11070_v20, 0  ;;  %vm4601_vm4 = vcmp.lt.s32.totalorder %v11073_v30, 0 }
 0x51d   : > { %v4607_v59 = vceil.f32 %v17576_v55  ;;  %v4608_v9 = vfloor.f32 %v17576_v55  ;;  %vm4606_vm5 = vcmp.lt.s32.totalorder %v17576_v55, 0  ;;  %v12308_v20 = vsel %vm4576_vm15, %v4577_v1, %v4578_v62  ;;  %v17581_v62 = vld [vmem:[#allocation155_spill] sm:$0xff] }
 0x51e   : > { %v12312_v30 = vsel %vm4581_vm0, %v4582_v2, %v4583_v52  ;;  %v12316_v15 = vsel %vm4586_vm1, %v4587_v54, %v4588_v0  ;;  %v12320_v45 = vsel %vm4591_vm2, %v4592_v7, %v4593_v22  ;;  %v12322_v55 = vsel %vm4596_vm3, %v4597_v13, %v4598_v61  ;;  %v17586_v7 = vld [vmem:[#allocation480_spill] sm:$0xff] }
 0x51f   : > { %17577 = vst [vmem:[#allocation218_spill] sm:$0xff] %v12320_v45  ;;  %v12324_v36 = vsel %vm4601_vm4, %v4602_v26, %v4603_v5  ;;  %v12326_v28 = vsel %vm4606_vm5, %v4607_v59, %v4608_v9  ;;  %vm4611_vm6 = vcmp.lt.s32.totalorder %v11079_v51, 0  ;;  %v4612_v48 = vceil.f32 %v11079_v51 }
 0x520   : > { %17578 = vst [vmem:[#allocation217_spill] sm:$0xff] %v12322_v55  ;;  %v4613_v43 = vfloor.f32 %v11079_v51  ;;  %v4617_v47 = vceil.f32 %v11082_v35  ;;  %v4618_v1 = vfloor.f32 %v11082_v35  ;;  %v4622_v2 = vceil.f32 %v17581_v62  ;;  %v17636_v55 = vld [vmem:[#allocation489_spill] sm:$0xff] }
 0x521   : > { %17579 = vst [vmem:[#allocation22_spill] sm:$0xff] %v12324_v36  ;;  %v4623_v52 = vfloor.f32 %v17581_v62  ;;  %vm4616_vm7 = vcmp.lt.s32.totalorder %v11082_v35, 0  ;;  %vm4621_vm8 = vcmp.lt.s32.totalorder %v17581_v62, 0  ;;  %v4627_v9 = vceil.f32 %v11093_v46 }
 0x522   : > { %17580 = vst [vmem:[#allocation219_spill] sm:$0xff] %v12326_v28  ;;  %v4628_v59 = vfloor.f32 %v11093_v46  ;;  %vm4626_vm9 = vcmp.lt.s32.totalorder %v11093_v46, 0  ;;  %v12349_v61 = vsel %vm4611_vm6, %v4612_v48, %v4613_v43  ;;  %v12351_v26 = vsel %vm4616_vm7, %v4617_v47, %v4618_v1 }
 0x523   : > { %17582 = vst [vmem:[#allocation220_spill] sm:$0xff] %v12349_v61  ;;  %v12353_v5 = vsel %vm4621_vm8, %v4622_v2, %v4623_v52  ;;  %vm4631_vm10 = vcmp.lt.s32.totalorder %v11096_v37, 0  ;;  %v4632_v46 = vceil.f32 %v11096_v37  ;;  %v4633_v22 = vfloor.f32 %v11096_v37  ;;  %v17587_v2 = vld [vmem:[#allocation482_spill] sm:$0xff] }
 0x524   : > { %17583 = vst [vmem:[#allocation23_spill] sm:$0xff] %v12351_v26  ;;  %v12356_v62 = vsel %vm4626_vm9, %v4627_v9, %v4628_v59  ;;  %vm4636_vm11 = vcmp.lt.s32.totalorder %v17586_v7, 0  ;;  %v4637_v13 = vceil.f32 %v17586_v7  ;;  %v4638_v51 = vfloor.f32 %v17586_v7  ;;  %v17605_v7 = vld [vmem:[#allocation160_spill] sm:$0xff]  ;;  %v17614_v61 = vld [vmem:[#allocation490_spill] sm:$0xff] }
 0x525   : > { %17584 = vst [vmem:[#allocation221_spill] sm:$0xff] %v12353_v5  ;;  %vm4641_vm12 = vcmp.lt.s32.totalorder %v11103_v31, 0  ;;  %v4642_v48 = vceil.f32 %v11103_v31  ;;  %v4643_v43 = vfloor.f32 %v11103_v31  ;;  %vm4646_vm13 = vcmp.lt.s32.totalorder %v11106_v18, 0  ;;  %v17603_v31 = vld [vmem:[#allocation156_spill] sm:$0xff] }
 0x526   : > { %17585 = vst [vmem:[#allocation24_spill] sm:$0xff] %v12356_v62  ;;  %v4647_v47 = vceil.f32 %v11106_v18  ;;  %v4648_v1 = vfloor.f32 %v11106_v18  ;;  %v4652_v52 = vceil.f32 %v17587_v2  ;;  %v4653_v9 = vfloor.f32 %v17587_v2 }
 0x527   : > { %v4657_v59 = vceil.f32 %v11112_v40  ;;  %v4658_v35 = vfloor.f32 %v11112_v40  ;;  %vm4651_vm14 = vcmp.lt.s32.totalorder %v17587_v2, 0  ;;  %vm4656_vm15 = vcmp.lt.s32.totalorder %v11112_v40, 0 }
 0x528   : > { %v4662_v11 = vceil.f32 %v11115_v14  ;;  %v4663_v0 = vfloor.f32 %v11115_v14  ;;  %v12379_v54 = vsel %vm4631_vm10, %v4632_v46, %v4633_v22  ;;  %vm4661_vm0 = vcmp.lt.s32.totalorder %v11115_v14, 0 }
 0x529   : > { %17588 = vst [vmem:[#allocation222_spill] sm:$0xff] %v12379_v54  ;;  %v4667_v57 = vceil.f32 %v11118_v50  ;;  %v4668_v28 = vfloor.f32 %v11118_v50  ;;  %v12386_v2 = vsel %vm4636_vm11, %v4637_v13, %v4638_v51  ;;  %v12390_v40 = vsel %vm4641_vm12, %v4642_v48, %v4643_v43  ;;  %v17601_v13 = vld [vmem:[#allocation499_spill] sm:$0xff] }
 0x52a   : > { %17589 = vst [vmem:[#allocation224_spill] sm:$0xff] %v12386_v2  ;;  %v12394_v36 = vsel %vm4646_vm13, %v4647_v47, %v4648_v1  ;;  %vm4666_vm1 = vcmp.lt.s32.totalorder %v11118_v50, 0  ;;  %v12399_v22 = vsel %vm4651_vm14, %v4652_v52, %v4653_v9  ;;  %v12401_v46 = vsel %vm4656_vm15, %v4657_v59, %v4658_v35  ;;  %v17597_v9 = vld [vmem:[#allocation492_spill] sm:$0xff]  ;;  %v17628_v54 = vld [vmem:[#allocation159_spill] sm:$0xff] }
 0x52b   : > { %17590 = vst [vmem:[#allocation25_spill] sm:$0xff] %v12390_v40  ;;  %v12407_v18 = vsel %vm4661_vm0, %v4662_v11, %v4663_v0  ;;  %v12412_v43 = vsel %vm4666_vm1, %v4667_v57, %v4668_v28  ;;  %v17596_v52 = vcvt.f32.s32 %v11120_v34  ;;  %v17598_v59 = vcvt.f32.s32 %v17597_v9  ;;  %v17599_v50 = vld [vmem:[#allocation496_spill] sm:$0xff]  ;;  %v17607_v34 = vld [vmem:[#allocation483_spill] sm:$0xff]  ;;  %v17608_v9 = vld [vmem:[#allocation162_spill] sm:$0xff] }
 0x52c   : > { %17591 = vst [vmem:[#allocation223_spill] sm:$0xff] %v12394_v36  ;;  %v17600_v51 = vcvt.f32.s32 %v17599_v50  ;;  %v17602_v28 = vcvt.f32.s32 %v17601_v13  ;;  %v17604_v35 = vcvt.f32.s32 %v17603_v31  ;;  %v17606_v47 = vcvt.f32.s32 %v17605_v7  ;;  %v17612_v40 = vld [vmem:[#allocation487_spill] sm:$0xff]  ;;  %v17630_v7 = vld [vmem:[#allocation161_spill] sm:$0xff] }
 0x52d   : > { %17592 = vst [vmem:[#allocation225_spill] sm:$0xff] %v12399_v22  ;;  %v1703_v0 = vpack.c.b16 %v17598_v59, %v17596_v52  ;;  %v17609_v52 = vcvt.f32.s32 %v17608_v9  ;;  %v17610_v59 = vld [vmem:[#allocation164_spill] sm:$0xff]  ;;  %v17613_v50 = vcvt.f32.s32 %v17612_v40  ;;  %v17615_v13 = vcvt.f32.s32 %v17614_v61  ;;  %v17624_v40 = vld [vmem:[#allocation497_spill] sm:$0xff] }
 0x52e   : > { %17593 = vst [vmem:[#allocation26_spill] sm:$0xff] %v12401_v46  ;;  %v1704_v57 = vpack.c.b16 %v17602_v28, %v17600_v51  ;;  %v1706_v48 = vpack.c.b16 %v17606_v47, %v17604_v35  ;;  %v17611_v11 = vcvt.f32.s32 %v17610_v59  ;;  %vm4671_vm2 = vcmp.lt.s32.totalorder %v11129_v19, 0  ;;  %v17616_v35 = vld [vmem:[#allocation494_spill] sm:$0xff]  ;;  %v17620_v9 = vld [vmem:[#allocation488_spill] sm:$0xff]  ;;  %v17622_v59 = vld [vmem:[#allocation493_spill] sm:$0xff] }
 0x52f   : > { %17594 = vst [vmem:[#allocation226_spill] sm:$0xff] %v12407_v18  ;;  %v1709_v51 = vpack.c.b16 %v17615_v13, %v17613_v50  ;;  %v17617_v47 = vcvt.f32.s32 %v17616_v35  ;;  %v17618_v28 = vld [vmem:[#allocation498_spill] sm:$0xff]  ;;  %v17623_v2 = vcvt.f32.s32 %v17622_v59  ;;  %v17625_v18 = vcvt.f32.s32 %v17624_v40  ;;  %v17626_v61 = vld [vmem:[#allocation501_spill] sm:$0xff]  ;;  %v17632_v35 = vld [vmem:[#allocation163_spill] sm:$0xff] }
 0x530   : > { %17595 = vst [vmem:[#allocation227_spill] sm:$0xff] %v12412_v43  ;;  %v1707_v37 = vpack.c.b16 %v17611_v11, %v17609_v52  ;;  %v1705_v31 = vpack.c.b8 %v1704_v57, %v1703_v0  ;;  %v17619_v14 = vcvt.f32.s32 %v17618_v28  ;;  %v17621_v43 = vcvt.f32.s32 %v17620_v9  ;;  %v17634_v28 = vld [vmem:[#allocation165_spill] sm:$0xff] }
 0x531   : > { %v17627_v50 = vcvt.f32.s32 %v17626_v61  ;;  %v17629_v46 = vcvt.f32.s32 %v17628_v54  ;;  %v17631_v0 = vcvt.f32.s32 %v17630_v7  ;;  %v17633_v62 = vcvt.f32.s32 %v17632_v35  ;;  %v17642_v61 = vld [vmem:[#allocation500_spill] sm:$0xff]  ;;  %v17644_v54 = vld [vmem:[#allocation502_spill] sm:$0xff] }
 0x532   : > { %v1710_v1 = vpack.c.b16 %v17619_v14, %v17617_v47  ;;  %v1712_v11 = vpack.c.b16 %v17623_v2, %v17621_v43  ;;  %v1708_v52 = vpack.c.b8 %v1707_v37, %v1706_v48  ;;  %v17635_v14 = vcvt.f32.s32 %v17634_v28  ;;  %v17638_v2 = vld [vmem:[#allocation491_spill] sm:$0xff]  ;;  %v17646_v7 = vld [vmem:[#allocation506_spill] sm:$0xff]  ;;  %1847 = vst [vmem:[%s12477_s17] sm:$0xff] %v1705_v31 }
 0x533   : > { %v1713_v13 = vpack.c.b16 %v17627_v50, %v17625_v18  ;;  %v1715_v57 = vpack.c.b16 %v17631_v0, %v17629_v46  ;;  %v17637_v59 = vcvt.f32.s32 %v17636_v55  ;;  %v17639_v37 = vcvt.f32.s32 %v17638_v2  ;;  %v17640_v43 = vld [vmem:[#allocation495_spill] sm:$0xff]  ;;  %v17650_v35 = vld [vmem:[#allocation514_spill] sm:$0xff] }
 0x534   : > { %v1716_v47 = vpack.c.b16 %v17635_v14, %v17633_v62  ;;  %v1711_v9 = vpack.c.b8 %v1710_v1, %v1709_v51  ;;  %v17641_v40 = vcvt.f32.s32 %v17640_v43  ;;  %v17643_v18 = vcvt.f32.s32 %v17642_v61  ;;  %v17648_v1 = vld [vmem:[#allocation511_spill] sm:$0xff]  ;;  %1848 = vst [vmem:[%s12477_s17 + $0x8] sm:$0xff] %v1708_v52  ;;  %v17656_v61 = vld [vmem:[#allocation170_spill] sm:$0xff] }
 0x535   : > { %v1718_v48 = vpack.c.b16 %v17639_v37, %v17637_v59  ;;  %v17645_v22 = vcvt.f32.s32 %v17644_v54  ;;  %v17647_v46 = vcvt.f32.s32 %v17646_v7  ;;  %v1714_v55 = vpack.c.b8 %v1713_v13, %v1712_v11  ;;  %v17652_v59 = vld [vmem:[#allocation166_spill] sm:$0xff]  ;;  %v17654_v37 = vld [vmem:[#allocation168_spill] sm:$0xff]  ;;  %v17660_v11 = vld [vmem:[#allocation503_spill] sm:$0xff] }
 0x536   : > { %v1719_v50 = vpack.c.b16 %v17643_v18, %v17641_v40  ;;  %v1717_v62 = vpack.c.b8 %v1716_v47, %v1715_v57  ;;  %v17649_v51 = vcvt.f32.s32 %v17648_v1  ;;  %v17651_v28 = vcvt.f32.s32 %v17650_v35  ;;  %v17658_v54 = vld [vmem:[#allocation172_spill] sm:$0xff]  ;;  %v17662_v57 = vld [vmem:[#allocation507_spill] sm:$0xff]  ;;  %v17664_v1 = vld [vmem:[#allocation510_spill] sm:$0xff]  ;;  %1849 = vst [vmem:[%s12477_s17 + $0x10] sm:$0xff] %v1711_v9 }
 0x537   : > { %v1721_v0 = vpack.c.b16 %v17647_v46, %v17645_v22  ;;  %v17653_v2 = vcvt.f32.s32 %v17652_v59  ;;  %v17655_v43 = vcvt.f32.s32 %v17654_v37  ;;  %v17657_v18 = vcvt.f32.s32 %v17656_v61  ;;  %v17666_v35 = vld [vmem:[#allocation515_spill] sm:$0xff]  ;;  %v17672_v61 = vld [vmem:[#allocation512_spill] sm:$0xff]  ;;  %1850 = vst [vmem:[%s12477_s17 + $0x18] sm:$0xff] %v1714_v55 }
 0x538   : > { %v1722_v14 = vpack.c.b16 %v17651_v28, %v17649_v51  ;;  %v1720_v40 = vpack.c.b8 %v1719_v50, %v1718_v48  ;;  %v17659_v31 = vcvt.f32.s32 %v17658_v54  ;;  %v17661_v13 = vcvt.f32.s32 %v17660_v11  ;;  %v17668_v48 = vld [vmem:[#allocation505_spill] sm:$0xff]  ;;  %v17674_v54 = vld [vmem:[#allocation518_spill] sm:$0xff]  ;;  %1851 = vst [vmem:[%s12477_s17 + $0x20] sm:$0xff] %v1717_v62 }
 0x539   : > { %v1724_v22 = vpack.c.b16 %v17655_v43, %v17653_v2  ;;  %v17663_v47 = vcvt.f32.s32 %v17662_v57  ;;  %v17665_v51 = vcvt.f32.s32 %v17664_v1  ;;  %v17667_v28 = vcvt.f32.s32 %v17666_v35  ;;  %v17670_v2 = vld [vmem:[#allocation508_spill] sm:$0xff]  ;;  %v17700_v62 = vld [vmem:[#allocation174_spill] sm:$0xff] }
 0x53a   : > { %v1725_v7 = vpack.c.b16 %v17659_v31, %v17657_v18  ;;  %vm4676_vm3 = vcmp.lt.s32.totalorder %v17607_v34, 0  ;;  %v1723_v52 = vpack.c.b8 %v1722_v14, %v1721_v0  ;;  %v17669_v50 = vcvt.f32.s32 %v17668_v48  ;;  %v17680_v0 = vld [vmem:[#allocation171_spill] sm:$0xff]  ;;  %1852 = vst [vmem:[%s12477_s17 + $0x28] sm:$0xff] %v1720_v40 }
 0x53b   : > { %v1727_v46 = vpack.c.b16 %v17663_v47, %v17661_v13  ;;  %v1728_v59 = vpack.c.b16 %v17667_v28, %v17665_v51  ;;  %v17671_v37 = vcvt.f32.s32 %v17670_v2  ;;  %v17673_v18 = vcvt.f32.s32 %v17672_v61  ;;  %v17676_v13 = vld [vmem:[#allocation167_spill] sm:$0xff]  ;;  %v17678_v47 = vld [vmem:[#allocation169_spill] sm:$0xff] }
 0x53c   : > { %v17675_v31 = vcvt.f32.s32 %v17674_v54  ;;  %v17677_v57 = vcvt.f32.s32 %v17676_v13  ;;  %v17679_v1 = vcvt.f32.s32 %v17678_v47  ;;  %v1726_v9 = vpack.c.b8 %v1725_v7, %v1724_v22  ;;  %v17682_v28 = vld [vmem:[#allocation173_spill] sm:$0xff]  ;;  %v17692_v22 = vld [vmem:[#allocation519_spill] sm:$0xff]  ;;  %1853 = vst [vmem:[%s12477_s17 + $0x30] sm:$0xff] %v1723_v52 }
 0x53d   : > { %v1730_v43 = vpack.c.b16 %v17671_v37, %v17669_v50  ;;  %v1729_v35 = vpack.c.b8 %v1728_v59, %v1727_v46  ;;  %v17681_v14 = vcvt.f32.s32 %v17680_v0  ;;  %v17683_v48 = vcvt.f32.s32 %v17682_v28  ;;  %v17684_v50 = vld [vmem:[#allocation504_spill] sm:$0xff]  ;;  %v17686_v61 = vld [vmem:[#allocation509_spill] sm:$0xff]  ;;  %v17694_v46 = vld [vmem:[#allocation522_spill] sm:$0xff] }
 0x53e   : > { %v1731_v11 = vpack.c.b16 %v17675_v31, %v17673_v18  ;;  %v1733_v51 = vpack.c.b16 %v17679_v1, %v17677_v57  ;;  %v17685_v37 = vcvt.f32.s32 %v17684_v50  ;;  %v17687_v5 = vcvt.f32.s32 %v17686_v61  ;;  %v17688_v31 = vld [vmem:[#allocation513_spill] sm:$0xff]  ;;  %v17690_v57 = vld [vmem:[#allocation516_spill] sm:$0xff]  ;;  %v17696_v0 = vld [vmem:[#allocation527_spill] sm:$0xff]  ;;  %1854 = vst [vmem:[%s12477_s17 + $0x38] sm:$0xff] %v1726_v9 }
 0x53f   : > { %v1734_v2 = vpack.c.b16 %v17683_v48, %v17681_v14  ;;  %v17689_v13 = vcvt.f32.s32 %v17688_v31  ;;  %v17691_v47 = vcvt.f32.s32 %v17690_v57  ;;  %v17693_v7 = vcvt.f32.s32 %v17692_v22  ;;  %v17698_v28 = vld [vmem:[#allocation531_spill] sm:$0xff]  ;;  %v17704_v31 = vld [vmem:[#allocation178_spill] sm:$0xff]  ;;  %v17706_v57 = vld [vmem:[#allocation180_spill] sm:$0xff]  ;;  %1855 = vst [vmem:[%s12477_s17 + $0x40] sm:$0xff] %v1729_v35 }
 0x540   : > { %v1736_v54 = vpack.c.b16 %v17687_v5, %v17685_v37  ;;  %v1732_v18 = vpack.c.b8 %v1731_v11, %v1730_v43  ;;  %v17695_v59 = vcvt.f32.s32 %v17694_v46  ;;  %v17697_v14 = vcvt.f32.s32 %v17696_v0  ;;  %v17702_v11 = vld [vmem:[#allocation176_spill] sm:$0xff]  ;;  %v17708_v46 = vld [vmem:[#allocation517_spill] sm:$0xff] }
 0x541   : > { %v1737_v55 = vpack.c.b16 %v17691_v47, %v17689_v13  ;;  %v17699_v48 = vcvt.f32.s32 %v17698_v28  ;;  %v1735_v5 = vpack.c.b8 %v1734_v2, %v1733_v51  ;;  %v17701_v43 = vcvt.f32.s32 %v17700_v62  ;;  %v17713_v51 = vld [vmem:[#allocation525_spill] sm:$0xff]  ;;  %v17715_v28 = vld [vmem:[#allocation530_spill] sm:$0xff] }
 0x542   : > { %v1739_v1 = vpack.c.b16 %v17695_v59, %v17693_v7  ;;  %v17703_v37 = vcvt.f32.s32 %v17702_v11  ;;  %v17705_v13 = vcvt.f32.s32 %v17704_v31  ;;  %v17707_v47 = vcvt.f32.s32 %v17706_v57  ;;  %v17710_v59 = vld [vmem:[#allocation523_spill] sm:$0xff]  ;;  %1856 = vst [vmem:[%s12477_s17 + $0x48] sm:$0xff] %v1732_v18 }
 0x543   : > { %v1740_v50 = vpack.c.b16 %v17699_v48, %v17697_v14  ;;  %v17709_v7 = vcvt.f32.s32 %v17708_v46  ;;  %v17711_v0 = vcvt.f32.s32 %v17710_v59  ;;  %v17712_v14 = vld [vmem:[#allocation485_spill] sm:$0xff]  ;;  %v1738_v40 = vpack.c.b8 %v1737_v55, %v1736_v54  ;;  %1857 = vst [vmem:[%s12477_s17 + $0x50] sm:$0xff] %v1735_v5 }
 0x544   : > { %v1742_v61 = vpack.c.b16 %v17703_v37, %v17701_v43  ;;  %v1743_v22 = vpack.c.b16 %v17707_v47, %v17705_v13  ;;  %vm4681_vm4 = vcmp.lt.s32.totalorder %v17712_v14, 0  ;;  %v17714_v2 = vcvt.f32.s32 %v17713_v51  ;;  %v17717_v43 = vld [vmem:[#allocation520_spill] sm:$0xff]  ;;  %v17719_v37 = vld [vmem:[#allocation526_spill] sm:$0xff]  ;;  %v17721_v47 = vld [vmem:[#allocation529_spill] sm:$0xff] }
 0x545   : > { %v1745_v45 = vpack.c.b16 %v17711_v0, %v17709_v7  ;;  %v17716_v48 = vcvt.f32.s32 %v17715_v28  ;;  %v17718_v11 = vcvt.f32.s32 %v17717_v43  ;;  %v17720_v31 = vcvt.f32.s32 %v17719_v37  ;;  %v17723_v7 = vld [vmem:[#allocation533_spill] sm:$0xff]  ;;  %v17725_v0 = vld [vmem:[#allocation175_spill] sm:$0xff]  ;;  %1858 = vst [vmem:[%s12477_s17 + $0x58] sm:$0xff] %v1738_v40 }
 0x546   : > { %v1741_v57 = vpack.c.b8 %v1740_v50, %v1739_v1  ;;  %v17722_v46 = vcvt.f32.s32 %v17721_v47  ;;  %v17724_v52 = vcvt.f32.s32 %v17723_v7  ;;  %v17726_v54 = vcvt.f32.s32 %v17725_v0  ;;  %v17727_v55 = vld [vmem:[#allocation177_spill] sm:$0xff]  ;;  %v17729_v28 = vld [vmem:[#allocation179_spill] sm:$0xff]  ;;  %v17737_v47 = vld [vmem:[#allocation524_spill] sm:$0xff] }
 0x547   : > { %v1746_v62 = vpack.c.b16 %v17716_v48, %v17714_v2  ;;  %v1748_v13 = vpack.c.b16 %v17720_v31, %v17718_v11  ;;  %v17728_v51 = vcvt.f32.s32 %v17727_v55  ;;  %v17730_v2 = vcvt.f32.s32 %v17729_v28  ;;  %v17731_v48 = vld [vmem:[#allocation181_spill] sm:$0xff] }
 0x548   : > { %v1749_v59 = vpack.c.b16 %v17724_v52, %v17722_v46  ;;  %v17732_v43 = vcvt.f32.s32 %v17731_v48  ;;  %v17733_v9 = vfloor.f32 %v11129_v19  ;;  %v17734_v1 = vceil.f32 %v11129_v19  ;;  %v17735_v37 = vld [vmem:[#allocation521_spill] sm:$0xff]  ;;  %v17739_v52 = vld [vmem:[#allocation528_spill] sm:$0xff]  ;;  %1859 = vst [vmem:[%s12477_s17 + $0x60] sm:$0xff] %v1741_v57 }
 0x549   : > { %v1751_v36 = vpack.c.b16 %v17728_v51, %v17726_v54  ;;  %v1744_v11 = vpack.c.b8 %v1743_v22, %v1742_v61  ;;  %v17736_v31 = vcvt.f32.s32 %v17735_v37  ;;  %v17738_v46 = vcvt.f32.s32 %v17737_v47  ;;  %v17741_v54 = vld [vmem:[#allocation532_spill] sm:$0xff]  ;;  %v17750_v47 = vld [vmem:[#allocation537_spill] sm:$0xff] }
 0x54a   : > { %v1752_v26 = vpack.c.b16 %v17732_v43, %v17730_v2  ;;  %v12580_v50 = vsel %vm4671_vm2, %v17734_v1, %v17733_v9  ;;  %v17740_v0 = vcvt.f32.s32 %v17739_v52  ;;  %v17742_v55 = vcvt.f32.s32 %v17741_v54  ;;  %v17743_v2 = vld [vmem:[#allocation534_spill] sm:$0xff] }
 0x54b   : > { %v1754_v7 = vpack.c.b16 %v17738_v46, %v17736_v31  ;;  %v4682_v35 = vceil.f32 %v17712_v14  ;;  %v1747_v28 = vpack.c.b8 %v1746_v62, %v1745_v45  ;;  %v17744_v19 = vcvt.f32.s32 %v17743_v2  ;;  %v17748_v31 = vld [vmem:[#allocation182_spill] sm:$0xff]  ;;  %v17759_v2 = vld [vmem:[#allocation184_spill] sm:$0xff]  ;;  %1860 = vst [vmem:[%s12477_s17 + $0x68] sm:$0xff] %v1744_v11 }
 0x54c   : > { %v1755_v51 = vpack.c.b16 %v17742_v55, %v17740_v0  ;;  %v17745_v48 = vcvt.f32.s32 %v11672_v38  ;;  %v17746_v22 = vcvt.f32.s32 %v11724_v21  ;;  %v17747_v43 = vcvt.f32.s32 %v11784_v49  ;;  %v17752_v62 = vld [vmem:[#allocation538_spill] sm:$0xff]  ;;  %v17754_v0 = vld [vmem:[#allocation193_spill] sm:$0xff]  ;;  %v17757_v55 = vld [vmem:[#allocation187_spill] sm:$0xff] }
 0x54d   : > { %v4683_v1 = vfloor.f32 %v17712_v14  ;;  %v1750_v37 = vpack.c.b8 %v1749_v59, %v1748_v13  ;;  %v17749_v18 = vcvt.f32.s32 %v17748_v31  ;;  %v17751_v46 = vcvt.f32.s32 %v17750_v47  ;;  %v17756_v21 = vld [vmem:[#allocation157_spill] sm:$0xff]  ;;  %v17761_v59 = vld [vmem:[#allocation190_spill] sm:$0xff]  ;;  %1861 = vst [vmem:[%s12477_s17 + $0x70] sm:$0xff] %v1747_v28  ;;  %v17803_v14 = vld [vmem:[#allocation199_spill] sm:$0xff] }
 0x54e   : > { %v1757_v61 = vpack.c.b16 %v17745_v48, %v17744_v19  ;;  %v1758_v9 = vpack.c.b16 %v17747_v43, %v17746_v22  ;;  %v17753_v52 = vcvt.f32.s32 %v17752_v62  ;;  %v17755_v38 = vcvt.f32.s32 %v17754_v0  ;;  %v17763_v22 = vld [vmem:[#allocation194_spill] sm:$0xff]  ;;  %v17767_v62 = vld [vmem:[#allocation536_spill] sm:$0xff] }
 0x54f   : > { %v1760_v45 = vpack.c.b16 %v17751_v46, %v17749_v18  ;;  %vm4686_vm5 = vcmp.lt.s32.totalorder %v17756_v21, 0  ;;  %v1753_v49 = vpack.c.b8 %v1752_v26, %v1751_v36  ;;  %v17758_v5 = vcvt.f32.s32 %v17757_v55  ;;  %v17765_v46 = vld [vmem:[#allocation188_spill] sm:$0xff]  ;;  %v17769_v26 = vld [vmem:[#allocation186_spill] sm:$0xff]  ;;  %1862 = vst [vmem:[%s12477_s17 + $0x78] sm:$0xff] %v1750_v37 }
 0x550   : > { %v1761_v54 = vpack.c.b16 %v17755_v38, %v17753_v52  ;;  %v17760_v19 = vcvt.f32.s32 %v17759_v2  ;;  %v17762_v48 = vcvt.f32.s32 %v17761_v59  ;;  %v17764_v43 = vcvt.f32.s32 %v17763_v22  ;;  %v17771_v38 = vld [vmem:[#allocation195_spill] sm:$0xff] }
 0x551   : > { %v1756_v47 = vpack.c.b8 %v1755_v51, %v1754_v7  ;;  %v17766_v40 = vcvt.f32.s32 %v17765_v46  ;;  %v17768_v52 = vcvt.f32.s32 %v17767_v62  ;;  %v17770_v0 = vcvt.f32.s32 %v17769_v26  ;;  %v17775_v51 = vld [vmem:[#allocation183_spill] sm:$0xff]  ;;  %v17781_v62 = vld [vmem:[#allocation196_spill] sm:$0xff]  ;;  %1863 = vst [vmem:[%s12477_s17 + $0x80] sm:$0xff] %v1753_v49 }
 0x552   : > { %v1763_v13 = vpack.c.b16 %v17760_v19, %v17758_v5  ;;  %v1764_v31 = vpack.c.b16 %v17764_v43, %v17762_v48  ;;  %v17772_v55 = vcvt.f32.s32 %v17771_v38  ;;  %v17773_v2 = vfloor.f32 %v17607_v34  ;;  %v17777_v48 = vld [vmem:[#allocation189_spill] sm:$0xff]  ;;  %v17779_v46 = vld [vmem:[#allocation191_spill] sm:$0xff] }
 0x553   : > { %v1766_v36 = vpack.c.b16 %v17768_v52, %v17766_v40  ;;  %v17774_v19 = vceil.f32 %v17607_v34  ;;  %v1759_v7 = vpack.c.b8 %v1758_v9, %v1757_v61  ;;  %v17776_v59 = vcvt.f32.s32 %v17775_v51  ;;  %v17783_v38 = vld [vmem:[#allocation535_spill] sm:$0xff]  ;;  %v17787_v9 = vld [vmem:[#allocation192_spill] sm:$0xff]  ;;  %v17789_v51 = vld [vmem:[#allocation197_spill] sm:$0xff]  ;;  %1864 = vst [vmem:[%s12477_s17 + $0x88] sm:$0xff] %v1756_v47 }
 0x554   : > { %v1767_v5 = vpack.c.b16 %v17772_v55, %v17770_v0  ;;  %v17778_v22 = vcvt.f32.s32 %v17777_v48  ;;  %v17780_v40 = vcvt.f32.s32 %v17779_v46  ;;  %v17782_v52 = vcvt.f32.s32 %v17781_v62  ;;  %v17785_v55 = vld [vmem:[#allocation185_spill] sm:$0xff] }
 0x555   : > { %v12637_v57 = vsel %vm4676_vm3, %v17774_v19, %v17773_v2  ;;  %v4687_v11 = vceil.f32 %v17756_v21  ;;  %v1762_v0 = vpack.c.b8 %v1761_v54, %v1760_v45  ;;  %v17784_v34 = vcvt.f32.s32 %v17783_v38  ;;  %1865 = vst [vmem:[%s12477_s17 + $0x90] sm:$0xff] %v1759_v7 }
 0x556   : > { %v1769_v43 = vpack.c.b16 %v17778_v22, %v17776_v59  ;;  %v1770_v26 = vpack.c.b16 %v17782_v52, %v17780_v40  ;;  %v17786_v2 = vcvt.f32.s32 %v17785_v55  ;;  %v17788_v19 = vcvt.f32.s32 %v17787_v9  ;;  %v17791_v40 = vld [vmem:[#allocation198_spill] sm:$0xff]  ;;  %v17796_v55 = vld [vmem:[#allocation8_spill] sm:$0xff] }
 0x557   : > { %v17790_v48 = vcvt.f32.s32 %v17789_v51  ;;  %v4688_v22 = vfloor.f32 %v17756_v21  ;;  %v1765_v46 = vpack.c.b8 %v1764_v31, %v1763_v13  ;;  %v17792_v28 = vcvt.f32.s32 %v17791_v40  ;;  %v17799_v9 = vld [vmem:[#allocation60_spill] sm:$0xff]  ;;  %1866 = vst [vmem:[%s12477_s17 + $0x98] sm:$0xff] %v1762_v0 }
 0x558   : > { %v1772_v61 = vpack.c.b16 %v17786_v2, %v17784_v34  ;;  %v17793_v62 = vcvt.f32.s32 %v11868_v3  ;;  %v17794_v54 = vcvt.f32.s32 %v11888_v8  ;;  %v17795_v52 = vcvt.f32.s32 %v11944_v33 }
 0x559   : > { %v1773_v59 = vpack.c.b16 %v17790_v48, %v17788_v19  ;;  %v12670_v34 = vsel %vm4681_vm4, %v4682_v35, %v4683_v1  ;;  %v1768_v37 = vpack.c.b8 %v1767_v5, %v1766_v36  ;;  %v17797_v2 = vcvt.f32.s32 %v17796_v55  ;;  %v17801_v19 = vld [vmem:[#allocation296_spill] sm:$0xff]  ;;  %v17805_v35 = vld [vmem:[#allocation291_spill] sm:$0xff]  ;;  %v17807_v5 = vld [vmem:[#allocation293_spill] sm:$0xff]  ;;  %1867 = vst [vmem:[%s12477_s17 + $0xa0] sm:$0xff] %v1765_v46 }
 0x55a   : > { %v1775_v45 = vpack.c.b16 %v17793_v62, %v17792_v28  ;;  %v1776_v38 = vpack.c.b16 %v17795_v52, %v17794_v54  ;;  %v17798_v13 = vcvt.f32.s32 %v11872_v56  ;;  %v17800_v3 = vcvt.f32.s32 %v17799_v9  ;;  %v17809_v28 = vld [vmem:[#allocation62_spill] sm:$0xff]  ;;  %v17811_v54 = vld [vmem:[#allocation484_spill] sm:$0xff]  ;;  %v17812_v55 = vld [vmem:[#allocation9_spill] sm:$0xff] }
 0x55b   : > { %v17802_v51 = vcvt.f32.s32 %v17801_v19  ;;  %v4680_v33 = vcvt.f32.s32 %v12637_v57  ;;  %v1771_v49 = vpack.c.b8 %v1770_v26, %v1769_v43  ;;  %v17804_v48 = vcvt.f32.s32 %v17803_v14  ;;  %v17814_v43 = vld [vmem:[#allocation59_spill] sm:$0xff]  ;;  %v17818_v19 = vld [vmem:[#allocation200_spill] sm:$0xff]  ;;  %1868 = vst [vmem:[%s12477_s17 + $0xa8] sm:$0xff] %v1768_v37  ;;  %v17923_v57 = vld [vmem:[#allocation217_spill] sm:$0xff] }
 0x55c   : > { %v1778_v31 = vpack.c.b16 %v17798_v13, %v17797_v2  ;;  %v17806_v1 = vcvt.f32.s32 %v17805_v35  ;;  %v17808_v40 = vcvt.f32.s32 %v17807_v5  ;;  %v17810_v56 = vcvt.f32.s32 %v17809_v28  ;;  %v17816_v9 = vld [vmem:[#allocation295_spill] sm:$0xff]  ;;  %v17820_v35 = vld [vmem:[#allocation237_spill] sm:$0xff]  ;;  %v17822_v5 = vld [vmem:[#allocation292_spill] sm:$0xff] }
 0x55d   : > { %v1779_v8 = vpack.c.b16 %v17802_v51, %v17800_v3  ;;  %vm4691_vm6 = vcmp.lt.s32.totalorder %v17811_v54, 0  ;;  %v4692_v47 = vceil.f32 %v17811_v54  ;;  %v1774_v52 = vpack.c.b8 %v1773_v59, %v1772_v61  ;;  %v17824_v59 = vld [vmem:[#allocation61_spill] sm:$0xff]  ;;  %1869 = vst [vmem:[%s12477_s17 + $0xb0] sm:$0xff] %v1771_v49 }
 0x55e   : > { %v1781_v36 = vpack.c.b16 %v17806_v1, %v17804_v48  ;;  %v1782_v62 = vpack.c.b16 %v17810_v56, %v17808_v40  ;;  %v17813_v2 = vcvt.f32.s32 %v17812_v55  ;;  %v17815_v26 = vcvt.f32.s32 %v17814_v43  ;;  %v17826_v56 = vld [vmem:[#allocation10_spill] sm:$0xff] }
 0x55f   : > { %v17817_v3 = vcvt.f32.s32 %v17816_v9  ;;  %v17819_v51 = vcvt.f32.s32 %v17818_v19  ;;  %v4685_v7 = vcvt.f32.s32 %v12670_v34  ;;  %v1777_v48 = vpack.c.b8 %v1776_v38, %v1775_v45  ;;  %v17830_v45 = vld [vmem:[#allocation294_spill] sm:$0xff]  ;;  %v17832_v19 = vld [vmem:[#allocation297_spill] sm:$0xff]  ;;  %1870 = vst [vmem:[%s12477_s17 + $0xb8] sm:$0xff] %v1774_v52 }
 0x560   : > { %v1784_v13 = vpack.c.b16 %v17815_v26, %v17813_v2  ;;  %v17821_v1 = vcvt.f32.s32 %v17820_v35  ;;  %v17823_v40 = vcvt.f32.s32 %v17822_v5  ;;  %v17825_v28 = vcvt.f32.s32 %v17824_v59  ;;  %v17828_v26 = vld [vmem:[#allocation244_spill] sm:$0xff]  ;;  %v17840_v59 = vld [vmem:[#allocation17_spill] sm:$0xff]  ;;  %v17932_v34 = vld [vmem:[#allocation222_spill] sm:$0xff] }
 0x561   : > { %v1785_v14 = vpack.c.b16 %v17819_v51, %v17817_v3  ;;  %v17827_v55 = vcvt.f32.s32 %v17826_v56  ;;  %v12714_v43 = vsel %vm4686_vm5, %v4687_v11, %v4688_v22  ;;  %v1780_v0 = vpack.c.b8 %v1779_v8, %v1778_v31  ;;  %v17838_v31 = vld [vmem:[#allocation208_spill] sm:$0xff]  ;;  %1871 = vst [vmem:[%s12477_s17 + $0xc0] sm:$0xff] %v1777_v48 }
 0x562   : > { %v1787_v61 = vpack.c.b16 %v17823_v40, %v17821_v1  ;;  %v17829_v9 = vcvt.f32.s32 %v17828_v26  ;;  %v17831_v38 = vcvt.f32.s32 %v17830_v45  ;;  %v17833_v51 = vcvt.f32.s32 %v17832_v19  ;;  %v17835_v40 = vld [vmem:[#allocation201_spill] sm:$0xff]  ;;  %v17843_v26 = vld [vmem:[#allocation203_spill] sm:$0xff]  ;;  %v17849_v19 = vld [vmem:[#allocation212_spill] sm:$0xff] }
 0x563   : > { %v1788_v2 = vpack.c.b16 %v17827_v55, %v17825_v28  ;;  %v17834_v35 = vcvt.f32.s32 %v11972_v58  ;;  %v4693_v5 = vfloor.f32 %v17811_v54  ;;  %v1783_v46 = vpack.c.b8 %v1782_v62, %v1781_v36  ;;  %v17842_v55 = vld [vmem:[#allocation486_spill] sm:$0xff]  ;;  %v17847_v62 = vld [vmem:[#allocation15_spill] sm:$0xff]  ;;  %1872 = vst [vmem:[%s12477_s17 + $0xc8] sm:$0xff] %v1780_v0 }
 0x564   : > { %v1790_v3 = vpack.c.b16 %v17831_v38, %v17829_v9  ;;  %v17836_v21 = vcvt.f32.s32 %v17835_v40  ;;  %v17837_v11 = vcvt.f32.s32 %v12020_v27  ;;  %v17839_v8 = vcvt.f32.s32 %v17838_v31  ;;  %v17845_v9 = vld [vmem:[#allocation13_spill] sm:$0xff] }
 0x565   : > { %v1791_v1 = vpack.c.b16 %v17834_v35, %v17833_v51  ;;  %v17841_v28 = vcvt.f32.s32 %v17840_v59  ;;  %vm4696_vm7 = vcmp.lt.s32.totalorder %v17842_v55, 0  ;;  %v1786_v58 = vpack.c.b8 %v1785_v14, %v1784_v13  ;;  %v17855_v14 = vld [vmem:[#allocation209_spill] sm:$0xff]  ;;  %1873 = vst [vmem:[%s12477_s17 + $0xd0] sm:$0xff] %v1783_v46  ;;  %v17882_v35 = vld [vmem:[#allocation215_spill] sm:$0xff] }
 0x566   : > { %v1793_v22 = vpack.c.b16 %v17837_v11, %v17836_v21  ;;  %v17844_v37 = vcvt.f32.s32 %v17843_v26  ;;  %v17846_v45 = vcvt.f32.s32 %v17845_v9  ;;  %v17848_v38 = vcvt.f32.s32 %v17847_v62  ;;  %v17851_v21 = vld [vmem:[#allocation11_spill] sm:$0xff]  ;;  %v17853_v11 = vld [vmem:[#allocation204_spill] sm:$0xff]  ;;  %v17857_v59 = vld [vmem:[#allocation213_spill] sm:$0xff] }
 0x567   : > { %v1794_v56 = vpack.c.b16 %v17841_v28, %v17839_v8  ;;  %v17850_v27 = vcvt.f32.s32 %v17849_v19  ;;  %v1789_v40 = vpack.c.b8 %v1788_v2, %v1787_v61  ;;  %v17852_v49 = vcvt.f32.s32 %v17851_v21  ;;  %v17861_v62 = vld [vmem:[#allocation206_spill] sm:$0xff]  ;;  %v17863_v2 = vld [vmem:[#allocation16_spill] sm:$0xff]  ;;  %1874 = vst [vmem:[%s12477_s17 + $0xd8] sm:$0xff] %v1786_v58 }
 0x568   : > { %v1796_v36 = vpack.c.b16 %v17846_v45, %v17844_v37  ;;  %v17854_v31 = vcvt.f32.s32 %v17853_v11  ;;  %v17856_v8 = vcvt.f32.s32 %v17855_v14  ;;  %v17858_v28 = vcvt.f32.s32 %v17857_v59  ;;  %v17859_v45 = vld [vmem:[#allocation202_spill] sm:$0xff]  ;;  %v17867_v14 = vld [vmem:[#allocation205_spill] sm:$0xff] }
 0x569   : > { %v1797_v51 = vpack.c.b16 %v17850_v27, %v17848_v38  ;;  %v4697_v37 = vceil.f32 %v17842_v55  ;;  %v1792_v9 = vpack.c.b8 %v1791_v1, %v1790_v3  ;;  %v17860_v52 = vcvt.f32.s32 %v17859_v45  ;;  %v17865_v27 = vld [vmem:[#allocation18_spill] sm:$0xff]  ;;  %1875 = vst [vmem:[%s12477_s17 + $0xe0] sm:$0xff] %v1789_v40 }
 0x56a   : > { %v1799_v13 = vpack.c.b16 %v17854_v31, %v17852_v49  ;;  %v1800_v26 = vpack.c.b16 %v17858_v28, %v17856_v8  ;;  %v17862_v38 = vcvt.f32.s32 %v17861_v62  ;;  %v17864_v19 = vcvt.f32.s32 %v17863_v2  ;;  %v17869_v8 = vld [vmem:[#allocation14_spill] sm:$0xff] }
 0x56b   : > { %v17866_v21 = vcvt.f32.s32 %v17865_v27  ;;  %v4698_v11 = vfloor.f32 %v17842_v55  ;;  %v1795_v31 = vpack.c.b8 %v1794_v56, %v1793_v22  ;;  %v17868_v48 = vcvt.f32.s32 %v17867_v14  ;;  %v17871_v1 = vld [vmem:[#allocation210_spill] sm:$0xff]  ;;  %v17876_v27 = vld [vmem:[#allocation12_spill] sm:$0xff]  ;;  %v17880_v56 = vld [vmem:[#allocation211_spill] sm:$0xff]  ;;  %1876 = vst [vmem:[%s12477_s17 + $0xe8] sm:$0xff] %v1792_v9 }
 0x56c   : > { %v1802_v61 = vpack.c.b16 %v17862_v38, %v17860_v52  ;;  %v17870_v59 = vcvt.f32.s32 %v17869_v8  ;;  %v17872_v28 = vcvt.f32.s32 %v17871_v1  ;;  %v17873_v45 = vld [vmem:[#allocation214_spill] sm:$0xff]  ;;  %v17877_v0 = vcvt.f32.s32 %v17876_v27  ;;  %v17896_v9 = vld [vmem:[#allocation19_spill] sm:$0xff] }
 0x56d   : > { %v1803_v49 = vpack.c.b16 %v17866_v21, %v17864_v19  ;;  %v17874_v62 = vcvt.f32.s32 %v17873_v45  ;;  %v17875_v38 = vld [vmem:[#allocation158_spill] sm:$0xff]  ;;  %v1798_v19 = vpack.c.b8 %v1797_v51, %v1796_v36  ;;  %v17878_v21 = vld [vmem:[#allocation207_spill] sm:$0xff]  ;;  %v17881_v14 = vcvt.f32.s32 %v17880_v56  ;;  %1877 = vst [vmem:[%s12477_s17 + $0xf0] sm:$0xff] %v1795_v31  ;;  %v17901_v31 = vld [vmem:[#allocation20_spill] sm:$0xff] }
 0x56e   : > { %v1805_v3 = vpack.c.b16 %v17870_v59, %v17868_v48  ;;  %v4702_v2 = vceil.f32 %v17875_v38  ;;  %v17879_v18 = vcvt.f32.s32 %v17878_v21  ;;  %v17883_v8 = vcvt.f32.s32 %v17882_v35 }
 0x56f   : > { %v1806_v52 = vpack.c.b16 %v17874_v62, %v17872_v28  ;;  %v4703_v59 = vfloor.f32 %v17875_v38  ;;  %v1801_v1 = vpack.c.b8 %v1800_v26, %v1799_v13  ;;  %v17884_v46 = vcvt.f32.s32 %v12148_v4  ;;  %1878 = vst [vmem:[%s12477_s17 + $0xf8] sm:$0xff] %v1798_v19  ;;  %v17908_v19 = vld [vmem:[#allocation21_spill] sm:$0xff] }
 0x570   : > { %v1808_v22 = vpack.c.b16 %v17879_v18, %v17877_v0  ;;  %v1809_v48 = vpack.c.b16 %v17883_v8, %v17881_v14  ;;  %v17885_v28 = vcvt.f32.s32 %v12189_v63  ;;  %v17886_v51 = vcvt.f32.s32 %v12231_v23  ;;  %v17906_v0 = vld [vmem:[#allocation216_spill] sm:$0xff] }
 0x571   : > { %v17887_v45 = vcvt.f32.s32 %v12272_v53  ;;  %vm4701_vm8 = vcmp.lt.s32.totalorder %v17875_v38, 0  ;;  %v1804_v35 = vpack.c.b8 %v1803_v49, %v1802_v61  ;;  %v17888_v58 = vcvt.f32.s32 %v12152_v12  ;;  %1879 = vst [vmem:[%s12477_s17 + $0x100] sm:$0xff] %v1801_v1 }
 0x572   : > { %v1811_v36 = vpack.c.b16 %v17885_v28, %v17884_v46  ;;  %v17889_v62 = vcvt.f32.s32 %v12193_v44  ;;  %v17890_v4 = vcvt.f32.s32 %v12235_v42  ;;  %v17891_v63 = vcvt.f32.s32 %v12274_v10  ;;  %v17915_v46 = vld [vmem:[#allocation223_spill] sm:$0xff] }
 0x573   : > { %v1812_v18 = vpack.c.b16 %v17887_v45, %v17886_v51  ;;  %v4694_v23 = vsel %vm4691_vm6, %v4692_v47, %v4693_v5  ;;  %v1807_v53 = vpack.c.b8 %v1806_v52, %v1805_v3  ;;  %v17892_v40 = vcvt.f32.s32 %v12154_v60  ;;  %1880 = vst [vmem:[%s12477_s17 + $0x108] sm:$0xff] %v1804_v35  ;;  %v17917_v51 = vld [vmem:[#allocation218_spill] sm:$0xff] }
 0x574   : > { %v1814_v13 = vpack.c.b16 %v17889_v62, %v17888_v58  ;;  %v1815_v26 = vpack.c.b16 %v17891_v63, %v17890_v4  ;;  %v17893_v61 = vcvt.f32.s32 %v12195_v16  ;;  %v17894_v12 = vcvt.f32.s32 %v12239_v6 }
 0x575   : > { %v17895_v44 = vcvt.f32.s32 %v12276_v41  ;;  %v4699_v42 = vsel %vm4696_vm7, %v4697_v37, %v4698_v11  ;;  %v1810_v10 = vpack.c.b8 %v1809_v48, %v1808_v22  ;;  %v17897_v54 = vcvt.f32.s32 %v17896_v9  ;;  %v17913_v48 = vld [vmem:[#allocation23_spill] sm:$0xff]  ;;  %1881 = vst [vmem:[%s12477_s17 + $0x110] sm:$0xff] %v1807_v53  ;;  %v17927_v53 = vld [vmem:[#allocation26_spill] sm:$0xff] }
 0x576   : > { %v1817_v49 = vpack.c.b16 %v17893_v61, %v17892_v40  ;;  %v17898_v47 = vcvt.f32.s32 %v12197_v17  ;;  %v17899_v60 = vcvt.f32.s32 %v12241_v24  ;;  %v17900_v16 = vcvt.f32.s32 %v12279_v32 }
 0x577   : > { %v1818_v38 = vpack.c.b16 %v17895_v44, %v17894_v12  ;;  %v4704_v41 = vsel %vm4701_vm8, %v4702_v2, %v4703_v59  ;;  %v1813_v6 = vpack.c.b8 %v1812_v18, %v1811_v36  ;;  %v17902_v52 = vcvt.f32.s32 %v17901_v31  ;;  %v17919_v18 = vld [vmem:[#allocation221_spill] sm:$0xff]  ;;  %1882 = vst [vmem:[%s12477_s17 + $0x118] sm:$0xff] %v1810_v10  ;;  %v17930_v44 = vld [vmem:[#allocation22_spill] sm:$0xff] }
 0x578   : > { %v1820_v5 = vpack.c.b16 %v17898_v47, %v17897_v54  ;;  %v1821_v3 = vpack.c.b16 %v17900_v16, %v17899_v60  ;;  %v17903_v55 = vcvt.f32.s32 %v12200_v25  ;;  %v17904_v11 = vcvt.f32.s32 %v12243_v29  ;;  %v17934_v10 = vld [vmem:[#allocation226_spill] sm:$0xff]  ;;  %v17938_v16 = vld [vmem:[#allocation224_spill] sm:$0xff] }
 0x579   : > { %v17905_v17 = vcvt.f32.s32 %v12308_v20  ;;  %v4695_v24 = vcvt.f32.s32 %v4694_v23  ;;  %v1816_v32 = vpack.c.b8 %v1815_v26, %v1814_v13  ;;  %v17907_v21 = vcvt.f32.s32 %v17906_v0  ;;  %1883 = vst [vmem:[%s12477_s17 + $0x120] sm:$0xff] %v1813_v6 }
 0x57a   : > { %v1823_v37 = vpack.c.b16 %v17903_v55, %v17902_v52  ;;  %v17909_v22 = vcvt.f32.s32 %v17908_v19  ;;  %v17910_v56 = vcvt.f32.s32 %v12268_v39  ;;  %v17911_v14 = vcvt.f32.s32 %v12312_v30  ;;  %v17942_v55 = vld [vmem:[#allocation220_spill] sm:$0xff] }
 0x57b   : > { %v1824_v27 = vpack.c.b16 %v17905_v17, %v17904_v11  ;;  %v4700_v29 = vcvt.f32.s32 %v4699_v42  ;;  %v1819_v8 = vpack.c.b8 %v1818_v38, %v1817_v49  ;;  %v17912_v20 = vcvt.f32.s32 %v12316_v15  ;;  %v17921_v15 = vld [vmem:[#allocation225_spill] sm:$0xff]  ;;  %1884 = vst [vmem:[%s12477_s17 + $0x128] sm:$0xff] %v1816_v32 }
 0x57c   : > { %v1826_v2 = vpack.c.b16 %v17909_v22, %v17907_v21  ;;  %v1827_v25 = vpack.c.b16 %v17911_v14, %v17910_v56  ;;  %v17914_v59 = vcvt.f32.s32 %v17913_v48  ;;  %v17916_v28 = vcvt.f32.s32 %v17915_v46  ;;  %v17944_v11 = vld [vmem:[#allocation25_spill] sm:$0xff] }
 0x57d   : > { %v4705_v39 = vcvt.f32.s32 %v4704_v41  ;;  %v1822_v30 = vpack.c.b8 %v1821_v3, %v1820_v5  ;;  %v17918_v45 = vcvt.f32.s32 %v17917_v51  ;;  %v17920_v35 = vcvt.f32.s32 %v17919_v18  ;;  %v17936_v5 = vld [vmem:[#allocation219_spill] sm:$0xff]  ;;  %1885 = vst [vmem:[%s12477_s17 + $0x130] sm:$0xff] %v1819_v8 }
 0x57e   : > { %v1829_v1 = vpack.c.b16 %v17914_v59, %v17912_v20  ;;  %v1830_v36 = vpack.c.b16 %v4680_v33, %v17916_v28  ;;  %v17922_v62 = vcvt.f32.s32 %v17921_v15  ;;  %v1825_v4 = vpack.c.b8 %v1824_v27, %v1823_v37  ;;  %v17925_v33 = vld [vmem:[#allocation24_spill] sm:$0xff]  ;;  %v17940_v41 = vld [vmem:[#allocation227_spill] sm:$0xff] }
 0x57f   : > { %v1832_v58 = vpack.c.b16 %v17920_v35, %v17918_v45  ;;  %v17924_v63 = vcvt.f32.s32 %v17923_v57  ;;  %v17926_v26 = vcvt.f32.s32 %v17925_v33  ;;  %v17928_v40 = vcvt.f32.s32 %v17927_v53  ;;  %1886 = vst [vmem:[%s12477_s17 + $0x138] sm:$0xff] %v1822_v30 }
 0x580   : > { %v1833_v13 = vpack.c.b16 %v4685_v7, %v17922_v62  ;;  %v17929_v61 = vcvt.f32.s32 %v12714_v43  ;;  %v1828_v12 = vpack.c.b8 %v1827_v25, %v1826_v2  ;;  %v17931_v38 = vcvt.f32.s32 %v17930_v44  ;;  %1887 = vst [vmem:[%s12477_s17 + $0x140] sm:$0xff] %v1825_v4 }
 0x581   : > { %v1835_v23 = vpack.c.b16 %v17926_v26, %v17924_v63  ;;  %v17933_v7 = vcvt.f32.s32 %v17932_v34  ;;  %v17935_v9 = vcvt.f32.s32 %v17934_v10  ;;  %v1831_v47 = vpack.c.b8 %v1830_v36, %v1829_v1 }
 0x582   : > { %v1836_v49 = vpack.c.b16 %v17929_v61, %v17928_v40  ;;  %v17937_v60 = vcvt.f32.s32 %v17936_v5  ;;  %v17939_v43 = vcvt.f32.s32 %v17938_v16  ;;  %v17941_v6 = vcvt.f32.s32 %v17940_v41  ;;  %1888 = vst [vmem:[%s12477_s17 + $0x148] sm:$0xff] %v1828_v12 }
 0x583   : > { %v1838_v42 = vpack.c.b16 %v17933_v7, %v17931_v38  ;;  %v1839_v54 = vpack.c.b16 %v4695_v24, %v17935_v9  ;;  %v1834_v52 = vpack.c.b8 %v1833_v13, %v1832_v58  ;;  %v17943_v37 = vcvt.f32.s32 %v17942_v55  ;;  %1889 = vst [vmem:[%s12477_s17 + $0x150] sm:$0xff] %v1831_v47 }
 0x584   : > { %v1841_v3 = vpack.c.b16 %v17939_v43, %v17937_v60  ;;  %v1842_v31 = vpack.c.b16 %v4700_v29, %v17941_v6  ;;  %v17945_v17 = vcvt.f32.s32 %v17944_v11  ;;  %v17946_v24 = vcvt.f32.s32 %v12580_v50 }
 0x585   : > { %v1837_v0 = vpack.c.b8 %v1836_v49, %v1835_v23  ;;  %v1840_v21 = vpack.c.b8 %v1839_v54, %v1838_v42  ;;  %1890 = vst [vmem:[%s12477_s17 + $0x158] sm:$0xff] %v1834_v52 }
 0x586   : > { %v1844_v27 = vpack.c.b16 %v17945_v17, %v17943_v37  ;;  %v1845_v32 = vpack.c.b16 %v4705_v39, %v17946_v24  ;;  %v1843_v19 = vpack.c.b8 %v1842_v31, %v1841_v3 }
 0x587   : > { %1891 = vst [vmem:[%s12477_s17 + $0x160] sm:$0xff] %v1837_v0 }
 0x588   : > { %v1846_v22 = vpack.c.b8 %v1845_v32, %v1844_v27  ;;  %1892 = vst [vmem:[%s12477_s17 + $0x168] sm:$0xff] %v1840_v21 }
 0x589   : > { %1893 = vst [vmem:[%s12477_s17 + $0x170] sm:$0xff] %v1843_v19 }
 0x58a   : > { %1894 = vst [vmem:[%s12477_s17 + $0x178] sm:$0xff] %v1846_v22 }
 0x58b   : > { %4833 = shalt.err (!%p4830_p13)
}
 0x58c   : > { %s4893_s5 = smov 768   ;;  %s4894_s12 = smov 48  }
 0x58d   : > { %4709 = dma.vmem_to_hbm [thread:$0]  (%p4956_p9), %s1912_s24, 6144, %s1914_s25, %s1896_s26, %s4893_s5, %s4893_s5, %s4894_s12  }
 0x58e PF: > { %s1928_s13 = sand.u32 1, %s4868_s6   ;;  %p4716_p0 = pnand %p2004_p12, %p4963_p11 }
 0x58f   : > { %s1929_s15 = scalar_lea.sflag [#allocation4], %s1928_s13 }
 0x590   : > { %p4717_p1 = pneg %p4716_p0 }
 0x592   : > { %4863 = dma.done.wait (%p4717_p1), %s1929_s15, 6144  }
 0x593   : > { %4865 = vsyncadd (%p4717_p1), %s1929_s15, 4294961152  ;;  %s17_s11 = sadd.s32 1, %s4888_s11   ;;  %s17947_s6 = smov %s4872_s7 }
 0x594   : > { %p14_p2 = scmp.ge.s32.totalorder %s17_s11, 4   ;;  %s17948_s7 = smov %s4876_s8 }
 0x595   : > { %s17949_s8 = smov %s4961_s20  ;;  %s17950_s9 = smov %s4884_s10 }
 0x596   : > { %s17951_s10 = smov %s17953_s14  ;;  %16 = sbr.rel (!%p14_p2) target bundleno = 6 (0x6), region = 69 }
 0x59b   :  { %1935 = vsyncpa [#allocation3], 1 }
 0x59c   :  { %1937 = vsyncpa [#allocation3 + $0x1], 1 }
 0x59d   :  { %1938 = vsyncpa [#allocation4], 1 }
 0x59e   :  { %1940 = vsyncpa [#allocation4 + $0x1], 1 }

</bundles_post_ra>
